<compile_context>
chip_gen: v5e
topology: v5e:2x2
jax: 0.10.0
libtpu: 0.0.40
codegen_flags: <defaults>
</compile_context>

<pallas_src>
import functools

import jax
import jax.numpy as jnp
from jax.experimental import pallas as pl
from jax.experimental.pallas import tpu as pltpu


def _round_up(v, m):
    return ((v + m - 1) // m) * m


# ----------------------------- Pallas kernels ------------------------------

def _instance_norm(y, eps):
    # y: (C, S) f32; per-row (= per (batch-element, channel)) normalization.
    mean = jnp.mean(y, axis=-1, keepdims=True)
    yc = y - mean
    var = jnp.mean(yc * yc, axis=-1, keepdims=True)
    return yc * jax.lax.rsqrt(var + eps)


def _gemm_norm_act_kernel(a_ref, w_ref, o_ref, *, norm, act, eps, slope):
    # a: (1, K, S) bf16, w: (C, K) bf16 -> (1, C, S) f32, lane-dense (S on lanes).
    y = jnp.dot(w_ref[...], a_ref[0], preferred_element_type=jnp.float32)
    if norm:
        y = _instance_norm(y, eps)
    if act:
        y = jnp.where(y >= 0, y, y * slope)
    o_ref[...] = y[None]


def _dual_gemm_norm_add_act_kernel(a1_ref, w1_ref, a2_ref, w2_ref, o_ref, *,
                                   eps, slope):
    # out = LeakyReLU( IN(w1 @ a1) + IN(w2 @ a2) )  -- conv2 + 1x1x1 residual conv
    # of the UnetResBlock fused in one kernel; everything stays in VMEM/vregs.
    y = jnp.dot(w1_ref[...], a1_ref[0], preferred_element_type=jnp.float32)
    r = jnp.dot(w2_ref[...], a2_ref[0], preferred_element_type=jnp.float32)
    y = _instance_norm(y, eps) + _instance_norm(r, eps)
    o_ref[...] = jnp.where(y >= 0, y, y * slope)[None]


# ----------------------------- Pallas wrappers -----------------------------

def fused_gemm(a, w, *, norm, act, eps=1e-5, slope=0.01):
    """out[b] = act(IN(w @ a[b])), a: (B, K, S), w: (R, K) -> (B, R, S) f32."""
    B, K, S = a.shape
    R = w.shape[0]
    Kp, Rp = _round_up(K, 8), _round_up(R, 8)
    a_p = jnp.pad(a.astype(jnp.bfloat16), ((0, 0), (0, Kp - K), (0, 0)))
    w_p = jnp.pad(w.astype(jnp.bfloat16), ((0, Rp - R), (0, Kp - K)))
    kern = functools.partial(_gemm_norm_act_kernel, norm=norm, act=act,
                             eps=eps, slope=slope)
    out = pl.pallas_call(
        kern,
        out_shape=jax.ShapeDtypeStruct((B, Rp, S), jnp.float32),
        grid=(B,),
        in_specs=[pl.BlockSpec((1, Kp, S), lambda b: (b, 0, 0)),
                  pl.BlockSpec((Rp, Kp), lambda b: (0, 0))],
        out_specs=pl.BlockSpec((1, Rp, S), lambda b: (b, 0, 0)),
        compiler_params=pltpu.CompilerParams(
            dimension_semantics=("parallel",)),
    )(a_p, w_p)
    return out[:, :R]


def fused_dual_gemm(a1, w1, a2, w2, *, eps=1e-5, slope=0.01):
    """out[b] = LeakyReLU(IN(w1 @ a1[b]) + IN(w2 @ a2[b])) -> (B, R, S) f32."""
    B, K1, S = a1.shape
    _, K2, _ = a2.shape
    R = w1.shape[0]
    K1p, K2p, Rp = _round_up(K1, 8), _round_up(K2, 8), _round_up(R, 8)
    a1_p = jnp.pad(a1.astype(jnp.bfloat16), ((0, 0), (0, K1p - K1), (0, 0)))
    a2_p = jnp.pad(a2.astype(jnp.bfloat16), ((0, 0), (0, K2p - K2), (0, 0)))
    w1_p = jnp.pad(w1.astype(jnp.bfloat16), ((0, Rp - R), (0, K1p - K1)))
    w2_p = jnp.pad(w2.astype(jnp.bfloat16), ((0, Rp - R), (0, K2p - K2)))
    kern = functools.partial(_dual_gemm_norm_add_act_kernel, eps=eps, slope=slope)
    out = pl.pallas_call(
        kern,
        out_shape=jax.ShapeDtypeStruct((B, Rp, S), jnp.float32),
        grid=(B,),
        in_specs=[pl.BlockSpec((1, K1p, S), lambda b: (b, 0, 0)),
                  pl.BlockSpec((Rp, K1p), lambda b: (0, 0)),
                  pl.BlockSpec((1, K2p, S), lambda b: (b, 0, 0)),
                  pl.BlockSpec((Rp, K2p), lambda b: (0, 0))],
        out_specs=pl.BlockSpec((1, Rp, S), lambda b: (b, 0, 0)),
        compiler_params=pltpu.CompilerParams(
            dimension_semantics=("parallel",)),
    )(a1_p, w1_p, a2_p, w2_p)
    return out[:, :R]


# ----------------------------- conv glue (thin XLA) --------------------------

def _im2col(x, k, pads):
    """x: (N, C, D, H, W) -> ((N, k^3*C, Do*Ho*Wo) bf16, (Do, Ho, Wo)).
    K is ordered (kd, kh, kw, c) to match weight.transpose(0,2,3,4,1)."""
    N, C = x.shape[:2]
    xp = jnp.pad(x.astype(jnp.bfloat16),
                 ((0, 0), (0, 0), pads[0], pads[1], pads[2]))
    Dp, Hp, Wp = xp.shape[2:]
    Do, Ho, Wo = Dp - k + 1, Hp - k + 1, Wp - k + 1
    cols = []
    for a in range(k):
        for b in range(k):
            for c in range(k):
                cols.append(
                    xp[:, :, a:a + Do, b:b + Ho, c:c + Wo].reshape(N, C, Do * Ho * Wo))
    return jnp.concatenate(cols, axis=1), (Do, Ho, Wo)


def _conv_transpose_pixel_expand(x, w, k):
    """ConvTranspose3d with kernel == stride == k (the actual config):
    a pure per-voxel expansion -> one small lane-dense GEMM + depth-to-space."""
    N, Cin, D, H, W = x.shape
    Cout = w.shape[1]
    a = x.transpose(1, 0, 2, 3, 4).reshape(1, Cin, N * D * H * W)
    wm = w.transpose(1, 2, 3, 4, 0).reshape(Cout * k ** 3, Cin)
    out = fused_gemm(a, wm, norm=False, act=False)[0]     # (Cout*k^3, N*D*H*W)
    out = out.reshape(Cout, k, k, k, N, D, H, W)
    out = out.transpose(4, 0, 5, 1, 6, 2, 7, 3)
    return out.reshape(N, Cout, D * k, H * k, W * k)


def _conv_transpose_general(x, w, k, s):
    """General ConvTranspose3d fallback (zero-dilation + flipped-kernel conv),
    MONAI get_conv_layer padding rules.  w: (Cin, Cout, k, k, k)."""
    # TODO(synk): mirrors the original int() truncation for odd (k - s + 1);
    #             MONAI's get_padding would raise on non-integer padding.
    p = (k - s + 1) // 2
    op = 2 * p + s - k
    N, Cin, D, H, W = x.shape
    Cout = w.shape[1]
    Dd, Hd, Wd = (D - 1) * s + 1, (H - 1) * s + 1, (W - 1) * s + 1
    xd = jnp.zeros((N, Cin, Dd, Hd, Wd), x.dtype).at[:, :, ::s, ::s, ::s].set(x)
    lo, hi = k - 1 - p, k - 1 - p + op
    w_eq = jnp.flip(w, axis=(2, 3, 4)).transpose(1, 0, 2, 3, 4)   # (Cout, Cin, k,k,k)
    a, (Do, Ho, Wo) = _im2col(xd, k, [(lo, hi)] * 3)
    wm = w_eq.transpose(0, 2, 3, 4, 1).reshape(Cout, -1)
    out = fused_gemm(a, wm, norm=False, act=False)                # (N, Cout, Do*Ho*Wo)
    return out.reshape(N, Cout, Do, Ho, Wo)


def _conv_transpose3d(x, w, k, s):
    if k == s:
        return _conv_transpose_pixel_expand(x, w, k)
    return _conv_transpose_general(x, w, k, s)


# ----------------------------- decoder blocks ------------------------------

def _init_decoder_block(key, ich, och, skch, cnn_k, tcv_k):
    ks = jax.random.split(key, 4)
    scale = 0.1
    return {
        # torch ConvTranspose3d weight layout: (in, out, k, k, k); bias=False (MONAI)
        "tcv_w": scale * jax.random.normal(
            ks[0], (ich, och, tcv_k, tcv_k, tcv_k), jnp.float32),
        # UnetResBlock convs: bias=False; InstanceNorm3d affine=False (identity)
        "conv1_w": scale * jax.random.normal(
            ks[1], (och, och + skch, cnn_k, cnn_k, cnn_k), jnp.float32),
        "conv2_w": scale * jax.random.normal(
            ks[2], (och, och, cnn_k, cnn_k, cnn_k), jnp.float32),
        "conv3_w": scale * jax.random.normal(
            ks[3], (och, och + skch, 1, 1, 1), jnp.float32),
    }


def _decoder_block_forward(x, skip, p, cfg):
    cnn_k, tcv_k, tcv_s = cfg
    # transposed-conv upsample
    x = _conv_transpose3d(x, p["tcv_w"], tcv_k, tcv_s)
    # concat skip along channel axis (torch.cat((x, skip), dim=1))
    x = jnp.concatenate([x, skip], axis=1)
    N, Ci, D, H, W = x.shape
    och = p["conv1_w"].shape[0]
    k = cnn_k
    pads = [(k // 2, k // 2)] * 3

    # conv1 -> InstanceNorm -> LeakyReLU   (one fused pallas_call)
    a1, (Do, Ho, Wo) = _im2col(x, k, pads)
    w1 = p["conv1_w"].transpose(0, 2, 3, 4, 1).reshape(och, -1)
    h1 = fused_gemm(a1, w1, norm=True, act=True)           # (N, och, Do*Ho*Wo)

    # conv2 -> IN  and  1x1x1 residual conv -> IN, then add -> LeakyReLU
    # (single fused dual-GEMM pallas_call)
    a2, _ = _im2col(h1.reshape(N, och, Do, Ho, Wo), k, pads)
    w2 = p["conv2_w"].transpose(0, 2, 3, 4, 1).reshape(och, -1)
    a3 = x.reshape(N, Ci, D * H * W)
    w3 = p["conv3_w"].reshape(och, Ci)
    out = fused_dual_gemm(a2, w2, a3, w3)                  # (N, och, D*H*W)
    return out.reshape(N, och, D, H, W)


def _decoder_forward(x, skips, params, *, cfgs):
    sk = list(skips)
    for p, cfg in zip(params, cfgs):
        x = _decoder_block_forward(x, sk.pop(), p, cfg)
    return x


class CNNDecoder:
    """Pallas re-implementation of CNNDecoder (UnetResBlock cnn blocks,
    trans_block=None, deform_cnn=False, spatial_dims=3)."""

    def __init__(self, in_channels, features, skip_channels, cnn_kernel_sizes,
                 cnn_dropouts, tcv_kernel_sizes, tcv_strides, key):
        assert isinstance(cnn_kernel_sizes, list)
        assert isinstance(features, list)
        assert isinstance(tcv_strides, list)
        assert len(cnn_kernel_sizes) == len(tcv_strides) == len(features)
        if not isinstance(cnn_dropouts, list):
            cnn_dropouts = [cnn_dropouts for _ in features]
        io = [in_channels] + features
        io = list(zip(io[:-1], io[1:]))
        keys = jax.random.split(key, len(features))
        self.params = []
        cfgs = []
        for k_, (ich, och), skch, cnnks, cnndo, tcvks, tcvst in zip(
                keys, io, skip_channels, cnn_kernel_sizes, cnn_dropouts,
                tcv_kernel_sizes, tcv_strides):
            self.params.append(_init_decoder_block(k_, ich, och, skch, cnnks, tcvks))
            cfgs.append((cnnks, tcvks, tcvst))
        self.cfgs = tuple(cfgs)
        self._fwd = jax.jit(functools.partial(_decoder_forward, cfgs=self.cfgs))

    def __call__(self, x, skips):
        return self._fwd(x, tuple(skips), tuple(self.params))


# --------------------------------- main -------------------------------------

if __name__ == "__main__":
    key = jax.random.PRNGKey(0)
    k_param, k_x, k_s0, k_s1 = jax.random.split(key, 4)

    in_channels = 8
    features = [8, 4]
    skip_channels = [4, 2]
    cnn_kernel_sizes = [3, 3]
    cnn_dropouts = 0.0
    tcv_kernel_sizes = [2, 2]
    tcv_strides = [2, 2]

    dec = CNNDecoder(in_channels, features, skip_channels, cnn_kernel_sizes,
                     cnn_dropouts, tcv_kernel_sizes, tcv_strides, key=k_param)

    N = 2
    x = jax.random.normal(k_x, (N, in_channels, 4, 4, 4), jnp.float32)
    # skips are popped from the end: the LAST list element feeds the FIRST block
    skip_block1 = jax.random.normal(
        k_s1, (N, skip_channels[1], 16, 16, 16), jnp.float32)  # for 2nd block
    skip_block0 = jax.random.normal(
        k_s0, (N, skip_channels[0], 8, 8, 8), jnp.float32)     # for 1st block
    skips = [skip_block1, skip_block0]

    out = dec(x, skips)
    out = jax.block_until_ready(out)
    assert out.shape == (N, features[-1], 16, 16, 16), out.shape
    assert bool(jnp.all(jnp.isfinite(out)))
    print("KERNEL_OK")
</pallas_src>

<mosaic_0001>
module attributes {stable_mosaic.version = 11 : i64} {
  func.func @_gemm_norm_act_kernel(%arg0: i32, %arg1: memref<1x8x128xbf16, #tpu.memory_space<vmem>>, %arg2: memref<64x8xbf16, #tpu.memory_space<vmem>>, %arg3: memref<1x64x128xf32, #tpu.memory_space<vmem>>) attributes {dimension_semantics = [#tpu.dimension_semantics<parallel>], iteration_bounds = array<i64: 1>, scalar_prefetch = 0 : i64, scratch_operands = 0 : i64, tpu.core_type = #tpu.core_type<tc>, window_params = [{transform_indices = @transform_0, window_bounds = array<i64: 1, 8, 128>}, {pipeline_mode = #tpu.pipeline_mode<synchronous>, transform_indices = @transform_1, window_bounds = array<i64: 64, 8>}, {transform_indices = @transform_2, window_bounds = array<i64: 1, 64, 128>}]} {
    %c0 = arith.constant 0 : index
    %c0_0 = arith.constant 0 : index
    %0 = vector.load %arg2[%c0, %c0_0] : memref<64x8xbf16, #tpu.memory_space<vmem>>, vector<64x8xbf16>
    %c0_1 = arith.constant 0 : index
    %c0_2 = arith.constant 0 : index
    %c0_3 = arith.constant 0 : index
    %1 = vector.load %arg1[%c0_1, %c0_2, %c0_3] : memref<1x8x128xbf16, #tpu.memory_space<vmem>>, vector<1x8x128xbf16>
    %2 = vector.shape_cast %1 : vector<1x8x128xbf16> to vector<8x128xbf16>
    %cst = arith.constant dense<0.000000e+00> : vector<64x128xf32>
    %3 = tpu.matmul %0, %2, %cst {dimension_numbers = #tpu.dot_dimension_numbers<[1], [0], [0], [1], [0, 0, 1, 1], [], []>} : vector<64x8xbf16>, vector<8x128xbf16>, vector<64x128xf32> -> vector<64x128xf32>
    %4 = vector.shape_cast %3 : vector<64x128xf32> to vector<1x64x128xf32>
    %c0_4 = arith.constant 0 : index
    %c0_5 = arith.constant 0 : index
    %c0_6 = arith.constant 0 : index
    %5 = vector.load %arg3[%c0_4, %c0_5, %c0_6] : memref<1x64x128xf32, #tpu.memory_space<vmem>>, vector<1x64x128xf32>
    tpu.vector_store %arg3[%c0_4, %c0_5, %c0_6], %4 {strides = array<i32>} : memref<1x64x128xf32, #tpu.memory_space<vmem>>, vector<1x64x128xf32>,
    return
  }
  func.func @transform_0(%arg0: i32) -> (i32, i32, i32) {
    %c0_i32 = arith.constant 0 : i32
    %c0_i32_0 = arith.constant 0 : i32
    %c0_i32_1 = arith.constant 0 : i32
    return %arg0, %c0_i32, %c0_i32_0 : i32, i32, i32
  }
  func.func @transform_1(%arg0: i32) -> (i32, i32) {
    %c0_i32 = arith.constant 0 : i32
    %c0_i32_0 = arith.constant 0 : i32
    %c0_i32_1 = arith.constant 0 : i32
    return %c0_i32, %c0_i32_0 : i32, i32
  }
  func.func @transform_2(%arg0: i32) -> (i32, i32, i32) {
    %c0_i32 = arith.constant 0 : i32
    %c0_i32_0 = arith.constant 0 : i32
    %c0_i32_1 = arith.constant 0 : i32
    return %arg0, %c0_i32, %c0_i32_0 : i32, i32, i32
  }
}

module attributes {stable_mosaic.version = 11 : i64} {
  func.func @_gemm_norm_act_kernel(%arg0: i32, %arg1: memref<1x328x512xbf16, #tpu.memory_space<vmem>>, %arg2: memref<8x328xbf16, #tpu.memory_space<vmem>>, %arg3: memref<1x8x512xf32, #tpu.memory_space<vmem>>) attributes {dimension_semantics = [#tpu.dimension_semantics<parallel>], iteration_bounds = array<i64: 2>, scalar_prefetch = 0 : i64, scratch_operands = 0 : i64, tpu.core_type = #tpu.core_type<tc>, window_params = [{transform_indices = @transform_0, window_bounds = array<i64: 1, 328, 512>}, {pipeline_mode = #tpu.pipeline_mode<synchronous>, transform_indices = @transform_1, window_bounds = array<i64: 8, 328>}, {transform_indices = @transform_2, window_bounds = array<i64: 1, 8, 512>}]} {
    %c0 = arith.constant 0 : index
    %c0_0 = arith.constant 0 : index
    %0 = vector.load %arg2[%c0, %c0_0] : memref<8x328xbf16, #tpu.memory_space<vmem>>, vector<8x328xbf16>
    %c0_1 = arith.constant 0 : index
    %c0_2 = arith.constant 0 : index
    %c0_3 = arith.constant 0 : index
    %1 = vector.load %arg1[%c0_1, %c0_2, %c0_3] : memref<1x328x512xbf16, #tpu.memory_space<vmem>>, vector<1x328x512xbf16>
    %2 = vector.shape_cast %1 : vector<1x328x512xbf16> to vector<328x512xbf16>
    %cst = arith.constant dense<0.000000e+00> : vector<8x512xf32>
    %3 = tpu.matmul %0, %2, %cst {dimension_numbers = #tpu.dot_dimension_numbers<[1], [0], [0], [1], [0, 0, 1, 1], [], []>} : vector<8x328xbf16>, vector<328x512xbf16>, vector<8x512xf32> -> vector<8x512xf32>
    %cst_4 = arith.constant dense<0.000000e+00> : vector<8xf32>
    %4 = vector.multi_reduction <add>, %3, %cst_4 [1] : vector<8x512xf32> to vector<8xf32>
    %5 = vector.shape_cast %4 : vector<8xf32> to vector<8x1xf32>
    %cst_5 = arith.constant 5.120000e+02 : f32
    %6 = vector.broadcast %cst_5 : f32 to vector<8x1xf32>
    %7 = arith.divf %5, %6 : vector<8x1xf32>
    %8 = vector.broadcast %7 : vector<8x1xf32> to vector<8x512xf32>
    %9 = arith.subf %3, %8 : vector<8x512xf32>
    %10 = arith.mulf %9, %9 : vector<8x512xf32>
    %cst_6 = arith.constant dense<0.000000e+00> : vector<8xf32>
    %11 = vector.multi_reduction <add>, %10, %cst_6 [1] : vector<8x512xf32> to vector<8xf32>
    %12 = vector.shape_cast %11 : vector<8xf32> to vector<8x1xf32>
    %cst_7 = arith.constant 5.120000e+02 : f32
    %13 = vector.broadcast %cst_7 : f32 to vector<8x1xf32>
    %14 = arith.divf %12, %13 : vector<8x1xf32>
    %cst_8 = arith.constant 9.99999974E-6 : f32
    %15 = vector.broadcast %cst_8 : f32 to vector<8x1xf32>
    %16 = arith.addf %14, %15 : vector<8x1xf32>
    %17 = math.rsqrt %16 : vector<8x1xf32>
    %18 = vector.broadcast %17 : vector<8x1xf32> to vector<8x512xf32>
    %19 = arith.mulf %9, %18 : vector<8x512xf32>
    %cst_9 = arith.constant 0.000000e+00 : f32
    %20 = vector.broadcast %cst_9 : f32 to vector<8x512xf32>
    %21 = arith.cmpf oge, %19, %20 : vector<8x512xf32>
    %cst_10 = arith.constant 0.00999999977 : f32
    %22 = vector.broadcast %cst_10 : f32 to vector<8x512xf32>
    %23 = arith.mulf %19, %22 : vector<8x512xf32>
    %24 = arith.select %21, %19, %23 : vector<8x512xi1>, vector<8x512xf32>
    %25 = vector.shape_cast %24 : vector<8x512xf32> to vector<1x8x512xf32>
    %c0_11 = arith.constant 0 : index
    %c0_12 = arith.constant 0 : index
    %c0_13 = arith.constant 0 : index
    %26 = vector.load %arg3[%c0_11, %c0_12, %c0_13] : memref<1x8x512xf32, #tpu.memory_space<vmem>>, vector<1x8x512xf32>
    tpu.vector_store %arg3[%c0_11, %c0_12, %c0_13], %25 {strides = array<i32>} : memref<1x8x512xf32, #tpu.memory_space<vmem>>, vector<1x8x512xf32>,
    return
  }
  func.func @transform_0(%arg0: i32) -> (i32, i32, i32) {
    %c0_i32 = arith.constant 0 : i32
    %c0_i32_0 = arith.constant 0 : i32
    %c0_i32_1 = arith.constant 0 : i32
    return %arg0, %c0_i32, %c0_i32_0 : i32, i32, i32
  }
  func.func @transform_1(%arg0: i32) -> (i32, i32) {
    %c0_i32 = arith.constant 0 : i32
    %c0_i32_0 = arith.constant 0 : i32
    %c0_i32_1 = arith.constant 0 : i32
    return %c0_i32, %c0_i32_0 : i32, i32
  }
  func.func @transform_2(%arg0: i32) -> (i32, i32, i32) {
    %c0_i32 = arith.constant 0 : i32
    %c0_i32_0 = arith.constant 0 : i32
    %c0_i32_1 = arith.constant 0 : i32
    return %arg0, %c0_i32, %c0_i32_0 : i32, i32, i32
  }
}

module attributes {stable_mosaic.version = 11 : i64} {
  func.func @_dual_gemm_norm_add_act_kernel(%arg0: i32, %arg1: memref<1x216x512xbf16, #tpu.memory_space<vmem>>, %arg2: memref<8x216xbf16, #tpu.memory_space<vmem>>, %arg3: memref<1x16x512xbf16, #tpu.memory_space<vmem>>, %arg4: memref<8x16xbf16, #tpu.memory_space<vmem>>, %arg5: memref<1x8x512xf32, #tpu.memory_space<vmem>>) attributes {dimension_semantics = [#tpu.dimension_semantics<parallel>], iteration_bounds = array<i64: 2>, scalar_prefetch = 0 : i64, scratch_operands = 0 : i64, tpu.core_type = #tpu.core_type<tc>, window_params = [{transform_indices = @transform_0, window_bounds = array<i64: 1, 216, 512>}, {pipeline_mode = #tpu.pipeline_mode<synchronous>, transform_indices = @transform_1, window_bounds = array<i64: 8, 216>}, {transform_indices = @transform_2, window_bounds = array<i64: 1, 16, 512>}, {pipeline_mode = #tpu.pipeline_mode<synchronous>, transform_indices = @transform_3, window_bounds = array<i64: 8, 16>}, {transform_indices = @transform_4, window_bounds = array<i64: 1, 8, 512>}]} {
    %c0 = arith.constant 0 : index
    %c0_0 = arith.constant 0 : index
    %0 = vector.load %arg2[%c0, %c0_0] : memref<8x216xbf16, #tpu.memory_space<vmem>>, vector<8x216xbf16>
    %c0_1 = arith.constant 0 : index
    %c0_2 = arith.constant 0 : index
    %c0_3 = arith.constant 0 : index
    %1 = vector.load %arg1[%c0_1, %c0_2, %c0_3] : memref<1x216x512xbf16, #tpu.memory_space<vmem>>, vector<1x216x512xbf16>
    %2 = vector.shape_cast %1 : vector<1x216x512xbf16> to vector<216x512xbf16>
    %cst = arith.constant dense<0.000000e+00> : vector<8x512xf32>
    %3 = tpu.matmul %0, %2, %cst {dimension_numbers = #tpu.dot_dimension_numbers<[1], [0], [0], [1], [0, 0, 1, 1], [], []>} : vector<8x216xbf16>, vector<216x512xbf16>, vector<8x512xf32> -> vector<8x512xf32>
    %c0_4 = arith.constant 0 : index
    %c0_5 = arith.constant 0 : index
    %4 = vector.load %arg4[%c0_4, %c0_5] : memref<8x16xbf16, #tpu.memory_space<vmem>>, vector<8x16xbf16>
    %c0_6 = arith.constant 0 : index
    %c0_7 = arith.constant 0 : index
    %c0_8 = arith.constant 0 : index
    %5 = vector.load %arg3[%c0_6, %c0_7, %c0_8] : memref<1x16x512xbf16, #tpu.memory_space<vmem>>, vector<1x16x512xbf16>
    %6 = vector.shape_cast %5 : vector<1x16x512xbf16> to vector<16x512xbf16>
    %cst_9 = arith.constant dense<0.000000e+00> : vector<8x512xf32>
    %7 = tpu.matmul %4, %6, %cst_9 {dimension_numbers = #tpu.dot_dimension_numbers<[1], [0], [0], [1], [0, 0, 1, 1], [], []>} : vector<8x16xbf16>, vector<16x512xbf16>, vector<8x512xf32> -> vector<8x512xf32>
    %cst_10 = arith.constant dense<0.000000e+00> : vector<8xf32>
    %8 = vector.multi_reduction <add>, %3, %cst_10 [1] : vector<8x512xf32> to vector<8xf32>
    %9 = vector.shape_cast %8 : vector<8xf32> to vector<8x1xf32>
    %cst_11 = arith.constant 5.120000e+02 : f32
    %10 = vector.broadcast %cst_11 : f32 to vector<8x1xf32>
    %11 = arith.divf %9, %10 : vector<8x1xf32>
    %12 = vector.broadcast %11 : vector<8x1xf32> to vector<8x512xf32>
    %13 = arith.subf %3, %12 : vector<8x512xf32>
    %14 = arith.mulf %13, %13 : vector<8x512xf32>
    %cst_12 = arith.constant dense<0.000000e+00> : vector<8xf32>
    %15 = vector.multi_reduction <add>, %14, %cst_12 [1] : vector<8x512xf32> to vector<8xf32>
    %16 = vector.shape_cast %15 : vector<8xf32> to vector<8x1xf32>
    %cst_13 = arith.constant 5.120000e+02 : f32
    %17 = vector.broadcast %cst_13 : f32 to vector<8x1xf32>
    %18 = arith.divf %16, %17 : vector<8x1xf32>
    %cst_14 = arith.constant 9.99999974E-6 : f32
    %19 = vector.broadcast %cst_14 : f32 to vector<8x1xf32>
    %20 = arith.addf %18, %19 : vector<8x1xf32>
    %21 = math.rsqrt %20 : vector<8x1xf32>
    %22 = vector.broadcast %21 : vector<8x1xf32> to vector<8x512xf32>
    %23 = arith.mulf %13, %22 : vector<8x512xf32>
    %cst_15 = arith.constant dense<0.000000e+00> : vector<8xf32>
    %24 = vector.multi_reduction <add>, %7, %cst_15 [1] : vector<8x512xf32> to vector<8xf32>
    %25 = vector.shape_cast %24 : vector<8xf32> to vector<8x1xf32>
    %cst_16 = arith.constant 5.120000e+02 : f32
    %26 = vector.broadcast %cst_16 : f32 to vector<8x1xf32>
    %27 = arith.divf %25, %26 : vector<8x1xf32>
    %28 = vector.broadcast %27 : vector<8x1xf32> to vector<8x512xf32>
    %29 = arith.subf %7, %28 : vector<8x512xf32>
    %30 = arith.mulf %29, %29 : vector<8x512xf32>
    %cst_17 = arith.constant dense<0.000000e+00> : vector<8xf32>
    %31 = vector.multi_reduction <add>, %30, %cst_17 [1] : vector<8x512xf32> to vector<8xf32>
    %32 = vector.shape_cast %31 : vector<8xf32> to vector<8x1xf32>
    %cst_18 = arith.constant 5.120000e+02 : f32
    %33 = vector.broadcast %cst_18 : f32 to vector<8x1xf32>
    %34 = arith.divf %32, %33 : vector<8x1xf32>
    %cst_19 = arith.constant 9.99999974E-6 : f32
    %35 = vector.broadcast %cst_19 : f32 to vector<8x1xf32>
    %36 = arith.addf %34, %35 : vector<8x1xf32>
    %37 = math.rsqrt %36 : vector<8x1xf32>
    %38 = vector.broadcast %37 : vector<8x1xf32> to vector<8x512xf32>
    %39 = arith.mulf %29, %38 : vector<8x512xf32>
    %40 = arith.addf %23, %39 : vector<8x512xf32>
    %cst_20 = arith.constant 0.000000e+00 : f32
    %41 = vector.broadcast %cst_20 : f32 to vector<8x512xf32>
    %42 = arith.cmpf oge, %40, %41 : vector<8x512xf32>
    %cst_21 = arith.constant 0.00999999977 : f32
    %43 = vector.broadcast %cst_21 : f32 to vector<8x512xf32>
    %44 = arith.mulf %40, %43 : vector<8x512xf32>
    %45 = arith.select %42, %40, %44 : vector<8x512xi1>, vector<8x512xf32>
    %46 = vector.shape_cast %45 : vector<8x512xf32> to vector<1x8x512xf32>
    %c0_22 = arith.constant 0 : index
    %c0_23 = arith.constant 0 : index
    %c0_24 = arith.constant 0 : index
    %47 = vector.load %arg5[%c0_22, %c0_23, %c0_24] : memref<1x8x512xf32, #tpu.memory_space<vmem>>, vector<1x8x512xf32>
    tpu.vector_store %arg5[%c0_22, %c0_23, %c0_24], %46 {strides = array<i32>} : memref<1x8x512xf32, #tpu.memory_space<vmem>>, vector<1x8x512xf32>,
    return
  }
  func.func @transform_0(%arg0: i32) -> (i32, i32, i32) {
    %c0_i32 = arith.constant 0 : i32
    %c0_i32_0 = arith.constant 0 : i32
    %c0_i32_1 = arith.constant 0 : i32
    return %arg0, %c0_i32, %c0_i32_0 : i32, i32, i32
  }
  func.func @transform_1(%arg0: i32) -> (i32, i32) {
    %c0_i32 = arith.constant 0 : i32
    %c0_i32_0 = arith.constant 0 : i32
    %c0_i32_1 = arith.constant 0 : i32
    return %c0_i32, %c0_i32_0 : i32, i32
  }
  func.func @transform_2(%arg0: i32) -> (i32, i32, i32) {
    %c0_i32 = arith.constant 0 : i32
    %c0_i32_0 = arith.constant 0 : i32
    %c0_i32_1 = arith.constant 0 : i32
    return %arg0, %c0_i32, %c0_i32_0 : i32, i32, i32
  }
  func.func @transform_3(%arg0: i32) -> (i32, i32) {
    %c0_i32 = arith.constant 0 : i32
    %c0_i32_0 = arith.constant 0 : i32
    %c0_i32_1 = arith.constant 0 : i32
    return %c0_i32, %c0_i32_0 : i32, i32
  }
  func.func @transform_4(%arg0: i32) -> (i32, i32, i32) {
    %c0_i32 = arith.constant 0 : i32
    %c0_i32_0 = arith.constant 0 : i32
    %c0_i32_1 = arith.constant 0 : i32
    return %arg0, %c0_i32, %c0_i32_0 : i32, i32, i32
  }
}

module attributes {stable_mosaic.version = 11 : i64} {
  func.func @_gemm_norm_act_kernel(%arg0: i32, %arg1: memref<1x8x1024xbf16, #tpu.memory_space<vmem>>, %arg2: memref<32x8xbf16, #tpu.memory_space<vmem>>, %arg3: memref<1x32x1024xf32, #tpu.memory_space<vmem>>) attributes {dimension_semantics = [#tpu.dimension_semantics<parallel>], iteration_bounds = array<i64: 1>, scalar_prefetch = 0 : i64, scratch_operands = 0 : i64, tpu.core_type = #tpu.core_type<tc>, window_params = [{transform_indices = @transform_0, window_bounds = array<i64: 1, 8, 1024>}, {pipeline_mode = #tpu.pipeline_mode<synchronous>, transform_indices = @transform_1, window_bounds = array<i64: 32, 8>}, {transform_indices = @transform_2, window_bounds = array<i64: 1, 32, 1024>}]} {
    %c0 = arith.constant 0 : index
    %c0_0 = arith.constant 0 : index
    %0 = vector.load %arg2[%c0, %c0_0] : memref<32x8xbf16, #tpu.memory_space<vmem>>, vector<32x8xbf16>
    %c0_1 = arith.constant 0 : index
    %c0_2 = arith.constant 0 : index
    %c0_3 = arith.constant 0 : index
    %1 = vector.load %arg1[%c0_1, %c0_2, %c0_3] : memref<1x8x1024xbf16, #tpu.memory_space<vmem>>, vector<1x8x1024xbf16>
    %2 = vector.shape_cast %1 : vector<1x8x1024xbf16> to vector<8x1024xbf16>
    %cst = arith.constant dense<0.000000e+00> : vector<32x1024xf32>
    %3 = tpu.matmul %0, %2, %cst {dimension_numbers = #tpu.dot_dimension_numbers<[1], [0], [0], [1], [0, 0, 1, 1], [], []>} : vector<32x8xbf16>, vector<8x1024xbf16>, vector<32x1024xf32> -> vector<32x1024xf32>
    %4 = vector.shape_cast %3 : vector<32x1024xf32> to vector<1x32x1024xf32>
    %c0_4 = arith.constant 0 : index
    %c0_5 = arith.constant 0 : index
    %c0_6 = arith.constant 0 : index
    %5 = vector.load %arg3[%c0_4, %c0_5, %c0_6] : memref<1x32x1024xf32, #tpu.memory_space<vmem>>, vector<1x32x1024xf32>
    tpu.vector_store %arg3[%c0_4, %c0_5, %c0_6], %4 {strides = array<i32>} : memref<1x32x1024xf32, #tpu.memory_space<vmem>>, vector<1x32x1024xf32>,
    return
  }
  func.func @transform_0(%arg0: i32) -> (i32, i32, i32) {
    %c0_i32 = arith.constant 0 : i32
    %c0_i32_0 = arith.constant 0 : i32
    %c0_i32_1 = arith.constant 0 : i32
    return %arg0, %c0_i32, %c0_i32_0 : i32, i32, i32
  }
  func.func @transform_1(%arg0: i32) -> (i32, i32) {
    %c0_i32 = arith.constant 0 : i32
    %c0_i32_0 = arith.constant 0 : i32
    %c0_i32_1 = arith.constant 0 : i32
    return %c0_i32, %c0_i32_0 : i32, i32
  }
  func.func @transform_2(%arg0: i32) -> (i32, i32, i32) {
    %c0_i32 = arith.constant 0 : i32
    %c0_i32_0 = arith.constant 0 : i32
    %c0_i32_1 = arith.constant 0 : i32
    return %arg0, %c0_i32, %c0_i32_0 : i32, i32, i32
  }
}

module attributes {stable_mosaic.version = 11 : i64} {
  func.func @_gemm_norm_act_kernel(%arg0: i32, %arg1: memref<1x168x4096xbf16, #tpu.memory_space<vmem>>, %arg2: memref<8x168xbf16, #tpu.memory_space<vmem>>, %arg3: memref<1x8x4096xf32, #tpu.memory_space<vmem>>) attributes {dimension_semantics = [#tpu.dimension_semantics<parallel>], iteration_bounds = array<i64: 2>, scalar_prefetch = 0 : i64, scratch_operands = 0 : i64, tpu.core_type = #tpu.core_type<tc>, window_params = [{transform_indices = @transform_0, window_bounds = array<i64: 1, 168, 4096>}, {pipeline_mode = #tpu.pipeline_mode<synchronous>, transform_indices = @transform_1, window_bounds = array<i64: 8, 168>}, {transform_indices = @transform_2, window_bounds = array<i64: 1, 8, 4096>}]} {
    %c0 = arith.constant 0 : index
    %c0_0 = arith.constant 0 : index
    %0 = vector.load %arg2[%c0, %c0_0] : memref<8x168xbf16, #tpu.memory_space<vmem>>, vector<8x168xbf16>
    %c0_1 = arith.constant 0 : index
    %c0_2 = arith.constant 0 : index
    %c0_3 = arith.constant 0 : index
    %1 = vector.load %arg1[%c0_1, %c0_2, %c0_3] : memref<1x168x4096xbf16, #tpu.memory_space<vmem>>, vector<1x168x4096xbf16>
    %2 = vector.shape_cast %1 : vector<1x168x4096xbf16> to vector<168x4096xbf16>
    %cst = arith.constant dense<0.000000e+00> : vector<8x4096xf32>
    %3 = tpu.matmul %0, %2, %cst {dimension_numbers = #tpu.dot_dimension_numbers<[1], [0], [0], [1], [0, 0, 1, 1], [], []>} : vector<8x168xbf16>, vector<168x4096xbf16>, vector<8x4096xf32> -> vector<8x4096xf32>
    %cst_4 = arith.constant dense<0.000000e+00> : vector<8xf32>
    %4 = vector.multi_reduction <add>, %3, %cst_4 [1] : vector<8x4096xf32> to vector<8xf32>
    %5 = vector.shape_cast %4 : vector<8xf32> to vector<8x1xf32>
    %cst_5 = arith.constant 4.096000e+03 : f32
    %6 = vector.broadcast %cst_5 : f32 to vector<8x1xf32>
    %7 = arith.divf %5, %6 : vector<8x1xf32>
    %8 = vector.broadcast %7 : vector<8x1xf32> to vector<8x4096xf32>
    %9 = arith.subf %3, %8 : vector<8x4096xf32>
    %10 = arith.mulf %9, %9 : vector<8x4096xf32>
    %cst_6 = arith.constant dense<0.000000e+00> : vector<8xf32>
    %11 = vector.multi_reduction <add>, %10, %cst_6 [1] : vector<8x4096xf32> to vector<8xf32>
    %12 = vector.shape_cast %11 : vector<8xf32> to vector<8x1xf32>
    %cst_7 = arith.constant 4.096000e+03 : f32
    %13 = vector.broadcast %cst_7 : f32 to vector<8x1xf32>
    %14 = arith.divf %12, %13 : vector<8x1xf32>
    %cst_8 = arith.constant 9.99999974E-6 : f32
    %15 = vector.broadcast %cst_8 : f32 to vector<8x1xf32>
    %16 = arith.addf %14, %15 : vector<8x1xf32>
    %17 = math.rsqrt %16 : vector<8x1xf32>
    %18 = vector.broadcast %17 : vector<8x1xf32> to vector<8x4096xf32>
    %19 = arith.mulf %9, %18 : vector<8x4096xf32>
    %cst_9 = arith.constant 0.000000e+00 : f32
    %20 = vector.broadcast %cst_9 : f32 to vector<8x4096xf32>
    %21 = arith.cmpf oge, %19, %20 : vector<8x4096xf32>
    %cst_10 = arith.constant 0.00999999977 : f32
    %22 = vector.broadcast %cst_10 : f32 to vector<8x4096xf32>
    %23 = arith.mulf %19, %22 : vector<8x4096xf32>
    %24 = arith.select %21, %19, %23 : vector<8x4096xi1>, vector<8x4096xf32>
    %25 = vector.shape_cast %24 : vector<8x4096xf32> to vector<1x8x4096xf32>
    %c0_11 = arith.constant 0 : index
    %c0_12 = arith.constant 0 : index
    %c0_13 = arith.constant 0 : index
    %26 = vector.load %arg3[%c0_11, %c0_12, %c0_13] : memref<1x8x4096xf32, #tpu.memory_space<vmem>>, vector<1x8x4096xf32>
    tpu.vector_store %arg3[%c0_11, %c0_12, %c0_13], %25 {strides = array<i32>} : memref<1x8x4096xf32, #tpu.memory_space<vmem>>, vector<1x8x4096xf32>,
    return
  }
  func.func @transform_0(%arg0: i32) -> (i32, i32, i32) {
    %c0_i32 = arith.constant 0 : i32
    %c0_i32_0 = arith.constant 0 : i32
    %c0_i32_1 = arith.constant 0 : i32
    return %arg0, %c0_i32, %c0_i32_0 : i32, i32, i32
  }
  func.func @transform_1(%arg0: i32) -> (i32, i32) {
    %c0_i32 = arith.constant 0 : i32
    %c0_i32_0 = arith.constant 0 : i32
    %c0_i32_1 = arith.constant 0 : i32
    return %c0_i32, %c0_i32_0 : i32, i32
  }
  func.func @transform_2(%arg0: i32) -> (i32, i32, i32) {
    %c0_i32 = arith.constant 0 : i32
    %c0_i32_0 = arith.constant 0 : i32
    %c0_i32_1 = arith.constant 0 : i32
    return %arg0, %c0_i32, %c0_i32_0 : i32, i32, i32
  }
}

module attributes {stable_mosaic.version = 11 : i64} {
  func.func @_dual_gemm_norm_add_act_kernel(%arg0: i32, %arg1: memref<1x112x4096xbf16, #tpu.memory_space<vmem>>, %arg2: memref<8x112xbf16, #tpu.memory_space<vmem>>, %arg3: memref<1x8x4096xbf16, #tpu.memory_space<vmem>>, %arg4: memref<8x8xbf16, #tpu.memory_space<vmem>>, %arg5: memref<1x8x4096xf32, #tpu.memory_space<vmem>>) attributes {dimension_semantics = [#tpu.dimension_semantics<parallel>], iteration_bounds = array<i64: 2>, scalar_prefetch = 0 : i64, scratch_operands = 0 : i64, tpu.core_type = #tpu.core_type<tc>, window_params = [{transform_indices = @transform_0, window_bounds = array<i64: 1, 112, 4096>}, {pipeline_mode = #tpu.pipeline_mode<synchronous>, transform_indices = @transform_1, window_bounds = array<i64: 8, 112>}, {transform_indices = @transform_2, window_bounds = array<i64: 1, 8, 4096>}, {pipeline_mode = #tpu.pipeline_mode<synchronous>, transform_indices = @transform_3, window_bounds = array<i64: 8, 8>}, {transform_indices = @transform_4, window_bounds = array<i64: 1, 8, 4096>}]} {
    %c0 = arith.constant 0 : index
    %c0_0 = arith.constant 0 : index
    %0 = vector.load %arg2[%c0, %c0_0] : memref<8x112xbf16, #tpu.memory_space<vmem>>, vector<8x112xbf16>
    %c0_1 = arith.constant 0 : index
    %c0_2 = arith.constant 0 : index
    %c0_3 = arith.constant 0 : index
    %1 = vector.load %arg1[%c0_1, %c0_2, %c0_3] : memref<1x112x4096xbf16, #tpu.memory_space<vmem>>, vector<1x112x4096xbf16>
    %2 = vector.shape_cast %1 : vector<1x112x4096xbf16> to vector<112x4096xbf16>
    %cst = arith.constant dense<0.000000e+00> : vector<8x4096xf32>
    %3 = tpu.matmul %0, %2, %cst {dimension_numbers = #tpu.dot_dimension_numbers<[1], [0], [0], [1], [0, 0, 1, 1], [], []>} : vector<8x112xbf16>, vector<112x4096xbf16>, vector<8x4096xf32> -> vector<8x4096xf32>
    %c0_4 = arith.constant 0 : index
    %c0_5 = arith.constant 0 : index
    %4 = vector.load %arg4[%c0_4, %c0_5] : memref<8x8xbf16, #tpu.memory_space<vmem>>, vector<8x8xbf16>
    %c0_6 = arith.constant 0 : index
    %c0_7 = arith.constant 0 : index
    %c0_8 = arith.constant 0 : index
    %5 = vector.load %arg3[%c0_6, %c0_7, %c0_8] : memref<1x8x4096xbf16, #tpu.memory_space<vmem>>, vector<1x8x4096xbf16>
    %6 = vector.shape_cast %5 : vector<1x8x4096xbf16> to vector<8x4096xbf16>
    %cst_9 = arith.constant dense<0.000000e+00> : vector<8x4096xf32>
    %7 = tpu.matmul %4, %6, %cst_9 {dimension_numbers = #tpu.dot_dimension_numbers<[1], [0], [0], [1], [0, 0, 1, 1], [], []>} : vector<8x8xbf16>, vector<8x4096xbf16>, vector<8x4096xf32> -> vector<8x4096xf32>
    %cst_10 = arith.constant dense<0.000000e+00> : vector<8xf32>
    %8 = vector.multi_reduction <add>, %3, %cst_10 [1] : vector<8x4096xf32> to vector<8xf32>
    %9 = vector.shape_cast %8 : vector<8xf32> to vector<8x1xf32>
    %cst_11 = arith.constant 4.096000e+03 : f32
    %10 = vector.broadcast %cst_11 : f32 to vector<8x1xf32>
    %11 = arith.divf %9, %10 : vector<8x1xf32>
    %12 = vector.broadcast %11 : vector<8x1xf32> to vector<8x4096xf32>
    %13 = arith.subf %3, %12 : vector<8x4096xf32>
    %14 = arith.mulf %13, %13 : vector<8x4096xf32>
    %cst_12 = arith.constant dense<0.000000e+00> : vector<8xf32>
    %15 = vector.multi_reduction <add>, %14, %cst_12 [1] : vector<8x4096xf32> to vector<8xf32>
    %16 = vector.shape_cast %15 : vector<8xf32> to vector<8x1xf32>
    %cst_13 = arith.constant 4.096000e+03 : f32
    %17 = vector.broadcast %cst_13 : f32 to vector<8x1xf32>
    %18 = arith.divf %16, %17 : vector<8x1xf32>
    %cst_14 = arith.constant 9.99999974E-6 : f32
    %19 = vector.broadcast %cst_14 : f32 to vector<8x1xf32>
    %20 = arith.addf %18, %19 : vector<8x1xf32>
    %21 = math.rsqrt %20 : vector<8x1xf32>
    %22 = vector.broadcast %21 : vector<8x1xf32> to vector<8x4096xf32>
    %23 = arith.mulf %13, %22 : vector<8x4096xf32>
    %cst_15 = arith.constant dense<0.000000e+00> : vector<8xf32>
    %24 = vector.multi_reduction <add>, %7, %cst_15 [1] : vector<8x4096xf32> to vector<8xf32>
    %25 = vector.shape_cast %24 : vector<8xf32> to vector<8x1xf32>
    %cst_16 = arith.constant 4.096000e+03 : f32
    %26 = vector.broadcast %cst_16 : f32 to vector<8x1xf32>
    %27 = arith.divf %25, %26 : vector<8x1xf32>
    %28 = vector.broadcast %27 : vector<8x1xf32> to vector<8x4096xf32>
    %29 = arith.subf %7, %28 : vector<8x4096xf32>
    %30 = arith.mulf %29, %29 : vector<8x4096xf32>
    %cst_17 = arith.constant dense<0.000000e+00> : vector<8xf32>
    %31 = vector.multi_reduction <add>, %30, %cst_17 [1] : vector<8x4096xf32> to vector<8xf32>
    %32 = vector.shape_cast %31 : vector<8xf32> to vector<8x1xf32>
    %cst_18 = arith.constant 4.096000e+03 : f32
    %33 = vector.broadcast %cst_18 : f32 to vector<8x1xf32>
    %34 = arith.divf %32, %33 : vector<8x1xf32>
    %cst_19 = arith.constant 9.99999974E-6 : f32
    %35 = vector.broadcast %cst_19 : f32 to vector<8x1xf32>
    %36 = arith.addf %34, %35 : vector<8x1xf32>
    %37 = math.rsqrt %36 : vector<8x1xf32>
    %38 = vector.broadcast %37 : vector<8x1xf32> to vector<8x4096xf32>
    %39 = arith.mulf %29, %38 : vector<8x4096xf32>
    %40 = arith.addf %23, %39 : vector<8x4096xf32>
    %cst_20 = arith.constant 0.000000e+00 : f32
    %41 = vector.broadcast %cst_20 : f32 to vector<8x4096xf32>
    %42 = arith.cmpf oge, %40, %41 : vector<8x4096xf32>
    %cst_21 = arith.constant 0.00999999977 : f32
    %43 = vector.broadcast %cst_21 : f32 to vector<8x4096xf32>
    %44 = arith.mulf %40, %43 : vector<8x4096xf32>
    %45 = arith.select %42, %40, %44 : vector<8x4096xi1>, vector<8x4096xf32>
    %46 = vector.shape_cast %45 : vector<8x4096xf32> to vector<1x8x4096xf32>
    %c0_22 = arith.constant 0 : index
    %c0_23 = arith.constant 0 : index
    %c0_24 = arith.constant 0 : index
    %47 = vector.load %arg5[%c0_22, %c0_23, %c0_24] : memref<1x8x4096xf32, #tpu.memory_space<vmem>>, vector<1x8x4096xf32>
    tpu.vector_store %arg5[%c0_22, %c0_23, %c0_24], %46 {strides = array<i32>} : memref<1x8x4096xf32, #tpu.memory_space<vmem>>, vector<1x8x4096xf32>,
    return
  }
  func.func @transform_0(%arg0: i32) -> (i32, i32, i32) {
    %c0_i32 = arith.constant 0 : i32
    %c0_i32_0 = arith.constant 0 : i32
    %c0_i32_1 = arith.constant 0 : i32
    return %arg0, %c0_i32, %c0_i32_0 : i32, i32, i32
  }
  func.func @transform_1(%arg0: i32) -> (i32, i32) {
    %c0_i32 = arith.constant 0 : i32
    %c0_i32_0 = arith.constant 0 : i32
    %c0_i32_1 = arith.constant 0 : i32
    return %c0_i32, %c0_i32_0 : i32, i32
  }
  func.func @transform_2(%arg0: i32) -> (i32, i32, i32) {
    %c0_i32 = arith.constant 0 : i32
    %c0_i32_0 = arith.constant 0 : i32
    %c0_i32_1 = arith.constant 0 : i32
    return %arg0, %c0_i32, %c0_i32_0 : i32, i32, i32
  }
  func.func @transform_3(%arg0: i32) -> (i32, i32) {
    %c0_i32 = arith.constant 0 : i32
    %c0_i32_0 = arith.constant 0 : i32
    %c0_i32_1 = arith.constant 0 : i32
    return %c0_i32, %c0_i32_0 : i32, i32
  }
  func.func @transform_4(%arg0: i32) -> (i32, i32, i32) {
    %c0_i32 = arith.constant 0 : i32
    %c0_i32_0 = arith.constant 0 : i32
    %c0_i32_1 = arith.constant 0 : i32
    return %arg0, %c0_i32, %c0_i32_0 : i32, i32, i32
  }
}

</mosaic_0001>

<bundles_post_ra>
// kernel: _decoder_forward.6
= control target key start
LH: loop header
LB: loop body
LE: loop exit
PB: predicated region body
PF: predicated region fallthrough
CT: control target
= control target key end

     0   :  { %vm54_vm0 = vcmask 1043456   ;;  %vm41_vm1 = vcmask 64512   ;;  %s180_s0 = inlined_call_operand.vmem [shape: bf16[1,8,128], index: 0, kind: input, shape index: {}]   ;;  %s181_s1 = inlined_call_operand.vmem [shape: bf16[64,8], index: 1, kind: input, shape index: {}]   ;;  %s182_s2 = inlined_call_operand.vmem [shape: f32[1,64,128], index: 2, kind: output, shape index: {}]  }
   0x1   :  { %v20_v0 = vld [vmem:[%s180_s0] sm:$0xf]  ;;  %v120_v3 = vld [vmem:[%s181_s1 + $0x8] sm:$0xff]  ;;  %v121_v4 = vld [vmem:[%s181_s1 + $0x10] sm:$0xff] }
   0x2   :  { %v56_v1 = vsel %vm54_vm0, %v20_v0, 0  ;;  %v119_v2 = vld [vmem:[%s181_s1] sm:$0xff]  ;;  %v122_v5 = vld [vmem:[%s181_s1 + $0x18] sm:$0xff] }
   0x3   :  { %65 = vmatpush.bf16.msra.mxu0 %v56_v1  ;;  %123 = vmatpush.bf16.msra.mxu1 %v56_v1 }
   0x4   :  { %124 = vmatpush.bf16.msra.mxu2 %v56_v1  ;;  %125 = vmatpush.bf16.msra.mxu3 %v56_v1 }
   0x6   :  { %115 = vmatmul.msk.bf16.vlgmr.msra.gmra.mxu0 %vm41_vm1, %v119_v2  ;;  %116 = vmatmul.msk.bf16.vlgmr.msra.gmra.mxu1 %vm41_vm1, %v120_v3 }
   0x7   :  { %117 = vmatmul.msk.bf16.vlgmr.msra.gmra.mxu2 %vm41_vm1, %v121_v4  ;;  %118 = vmatmul.msk.bf16.vlgmr.msra.gmra.mxu3 %vm41_vm1, %v122_v5 }
  0x83   :  { %v67_v6 = vpop.f32.mrf.mxu0  ;;  %v72_v7 = vpop.f32.mrf.mxu1 }
  0x84   :  { %87 = vst [vmem:[%s182_s2] sm:$0xff] %v67_v6 }
  0x85   :  { %89 = vst [vmem:[%s182_s2 + $0x10] sm:$0xff] %v72_v7 }
  0x8a   :  { %v77_v8 = vpop.f32.mrf.mxu2  ;;  %v82_v9 = vpop.f32.mrf.mxu3 }
  0x8b   :  { %91 = vst [vmem:[%s182_s2 + $0x20] sm:$0xff] %v77_v8  ;;  %v69_v10 = vpop.f32.mrf.mxu0  ;;  %v74_v11 = vpop.f32.mrf.mxu1 }
  0x8c   :  { %93 = vst [vmem:[%s182_s2 + $0x30] sm:$0xff] %v82_v9 }
  0x8d   :  { %88 = vst [vmem:[%s182_s2 + $0x8] sm:$0xff] %v69_v10 }
  0x8e   :  { %90 = vst [vmem:[%s182_s2 + $0x18] sm:$0xff] %v74_v11 }
  0x92   :  { %v79_v12 = vpop.f32.mrf.mxu2  ;;  %v84_v13 = vpop.f32.mrf.mxu3 }
  0x93   :  { %92 = vst [vmem:[%s182_s2 + $0x28] sm:$0xff] %v79_v12 }
  0x94   :  { %94 = vst [vmem:[%s182_s2 + $0x38] sm:$0xff] %v84_v13 }

// kernel: _decoder_forward.7
= control target key start
LH: loop header
LB: loop body
LE: loop exit
PB: predicated region body
PF: predicated region fallthrough
CT: control target
= control target key end

     0   :  { %s1388_s9 = smov 0   ;;  %s1613_s0 = inlined_call_operand.vmem [shape: bf16[2,328,512], index: 0, kind: input, shape index: {}]   ;;  %s1614_s1 = inlined_call_operand.vmem [shape: bf16[8,328], index: 1, kind: input, shape index: {}]   ;;  %s1615_s2 = inlined_call_operand.vmem [shape: f32[2,8,512], index: 2, kind: output, shape index: {}]  }
   0x1 LB: > { %s935_s10 = sadd.s32 4294967295, %s1370_s9   ;;  %p939_p0 = scmp.ge.s32.totalorder %s1370_s9, 1  ;;  %s1370_s9 = sphi %s1388_s9, %s12_s9  }
   0x2   : > { %p112_p1 = scmp.lt.s32.totalorder %s1370_s9, 3 }
   0x4   : > { %p113_p2 = pnand %p939_p0, %p112_p1 }
   0x5   : > { %p134_p3 = scmp.lt.s32.totalorder (!%p113_p2), %s935_s10, 1 }
   0x6   : > { %116 = sbr.rel (%p113_p2) target bundleno = 521 (0x209), region = 28 }
   0xb   : > { %s1617_s10 = smov (!%p134_p3, %s935_s10), 1  ;;  %vm653_vm0 = vcmask 1043456   ;;  %vm649_vm1 = vcmask 588800  }
   0xc   : > { %s1350_s11 = smul.u32 656, %s1617_s10  ;;  %s1269_s19 = sshll.u32 %s1617_s10, 5 }
   0xd   : > { %s143_s22 = scalar_lea.vmem %s1615_s2, %s1269_s19 }
   0xe   : > { %s1402_s14 = scalar_lea.vmem %s1613_s0, %s1350_s11 }
   0xf   : > { %v1185_v0 = vld [vmem:[%s1402_s14 + $0x1e0] sm:$0xf]  ;;  %v1332_v1 = vld [vmem:[%s1402_s14 + $0x1ec] sm:$0xf0]  ;;  %v1298_v2 = vld [vmem:[%s1402_s14 + $0xe4] sm:$0xf] }
  0x10   : > { %v1186_v3 = vor.u32 %v1332_v1, %v1185_v0  ;;  %v1059_v4 = vld [vmem:[%s1402_s14 + $0xf0] sm:$0xf0]  ;;  %v1057_v5 = vld [vmem:[%s1402_s14 + $0xe0] sm:$0xf]  ;;  %v1300_v6 = vld [vmem:[%s1402_s14 + $0xec] sm:$0xf0] }
  0x11   : > { %v1062_v7 = vor.u32 %v1298_v2, %v1059_v4  ;;  %v1058_v8 = vor.u32 %v1300_v6, %v1057_v5  ;;  %v1411_v9 = vld [vmem:[%s1402_s14 + $0x280] sm:$0xff]  ;;  %v1328_v11 = vld [vmem:[%s1402_s14 + $0x1cc] sm:$0xf0]  ;;  %v1043_v15 = vld [vmem:[%s1402_s14 + $0xd0] sm:$0xf0] }
  0x12   : > { %v1169_v10 = vld [vmem:[%s1402_s14 + $0x1c0] sm:$0xf]  ;;  %679 = vmatpush.bf16.msra.mxu1 %v1186_v3  ;;  %v481_v12 = vunpack.c.l.b16 %v1411_v9  ;;  %v1294_v14 = vld [vmem:[%s1402_s14 + $0xc4] sm:$0xf]  ;;  %v1296_v18 = vld [vmem:[%s1402_s14 + $0xcc] sm:$0xf0] }
  0x13   : > { %v1170_v13 = vor.u32 %v1328_v11, %v1169_v10  ;;  %v1041_v16 = vld [vmem:[%s1402_s14 + $0xc0] sm:$0xf]  ;;  %705 = vmatpush.bf16.msra.mxu3 %v1062_v7  ;;  %666 = vmatpush.bf16.msra.mxu0 %v1058_v8  ;;  %v1046_v17 = vor.u32 %v1294_v14, %v1043_v15  ;;  %v1348_v20 = vld [vmem:[%s1402_s14 + $0x26c] sm:$0xf0]  ;;  %v1290_v25 = vld [vmem:[%s1402_s14 + $0xa4] sm:$0xf] }
  0x14   : > { %v1249_v19 = vld [vmem:[%s1402_s14 + $0x260] sm:$0xf]  ;;  %v565_v21 = vpack.c.b16 %v481_v12, %v481_v12  ;;  %v1042_v22 = vor.u32 %v1296_v18, %v1041_v16  ;;  %v1324_v24 = vld [vmem:[%s1402_s14 + $0x1ac] sm:$0xf0]  ;;  %v1027_v26 = vld [vmem:[%s1402_s14 + $0xb0] sm:$0xf0] }
  0x15   : > { %v1153_v23 = vld [vmem:[%s1402_s14 + $0x1a0] sm:$0xf]  ;;  %v1292_v28 = vld [vmem:[%s1402_s14 + $0xac] sm:$0xf0]  ;;  %v1250_v31 = vor.u32 %v1348_v20, %v1249_v19  ;;  %v1030_v32 = vor.u32 %v1290_v25, %v1027_v26  ;;  %v1286_v38 = vld [vmem:[%s1402_s14 + $0x84] sm:$0xf]  ;;  %v482_v25 = vunpack.c.h.b16 %v1411_v9 }
  0x16   : > { %v1025_v27 = vld [vmem:[%s1402_s14 + $0xa0] sm:$0xf]  ;;  %v655_v29 = vsel %vm653_vm0, %v565_v21, 0  ;;  %680 = vmatpush.bf16.msra.mxu1 %v1170_v13  ;;  %v1154_v30 = vor.u32 %v1324_v24, %v1153_v23  ;;  %v1320_v35 = vld [vmem:[%s1402_s14 + $0x18c] sm:$0xf0] }
  0x17   : > { %695 = vmatpush.bf16.msra.mxu2 %v655_v29  ;;  %706 = vmatpush.bf16.msra.mxu3 %v1046_v17  ;;  %v1233_v33 = vld [vmem:[%s1402_s14 + $0x240] sm:$0xf]  ;;  %v1026_v36 = vor.u32 %v1292_v28, %v1025_v27  ;;  %v1344_v37 = vld [vmem:[%s1402_s14 + $0x24c] sm:$0xf0]  ;;  %v1011_v39 = vld [vmem:[%s1402_s14 + $0x90] sm:$0xf0] }
  0x18   : > { %v1137_v34 = vld [vmem:[%s1402_s14 + $0x180] sm:$0xf]  ;;  %667 = vmatpush.bf16.msra.mxu0 %v1042_v22  ;;  %v1288_v41 = vld [vmem:[%s1402_s14 + $0x8c] sm:$0xf0]  ;;  %v1234_v43 = vor.u32 %v1344_v37, %v1233_v33  ;;  %v1014_v44 = vor.u32 %v1286_v38, %v1011_v39  ;;  %v1282_v50 = vld [vmem:[%s1402_s14 + $0x64] sm:$0xf] }
  0x19   : > { %v1009_v40 = vld [vmem:[%s1402_s14 + $0x80] sm:$0xf]  ;;  %v1138_v42 = vor.u32 %v1320_v35, %v1137_v34  ;;  %v1316_v47 = vld [vmem:[%s1402_s14 + $0x16c] sm:$0xf0]  ;;  %v995_v51 = vld [vmem:[%s1402_s14 + $0x70] sm:$0xf0] }
  0x1a   : > { %681 = vmatpush.bf16.msra.mxu1 %v1154_v30  ;;  %v1217_v45 = vld [vmem:[%s1402_s14 + $0x220] sm:$0xf]  ;;  %v1010_v48 = vor.u32 %v1288_v41, %v1009_v40  ;;  %v1340_v49 = vld [vmem:[%s1402_s14 + $0x22c] sm:$0xf0]  ;;  %v998_v57 = vor.u32 %v1282_v50, %v995_v51  ;;  %v1278_v62 = vld [vmem:[%s1402_s14 + $0x44] sm:$0xf] }
  0x1b   : > { %696 = vmatpush.bf16.msra.mxu2 %v1250_v31  ;;  %707 = vmatpush.bf16.msra.mxu3 %v1030_v32  ;;  %v1121_v46 = vld [vmem:[%s1402_s14 + $0x160] sm:$0xf]  ;;  %v1284_v53 = vld [vmem:[%s1402_s14 + $0x6c] sm:$0xf0]  ;;  %v1218_v56 = vor.u32 %v1340_v49, %v1217_v45  ;;  %v979_v63 = vld [vmem:[%s1402_s14 + $0x50] sm:$0xf0] }
  0x1c   : > { %668 = vmatpush.bf16.msra.mxu0 %v1026_v36  ;;  %v993_v52 = vld [vmem:[%s1402_s14 + $0x60] sm:$0xf]  ;;  %v1122_v54 = vor.u32 %v1316_v47, %v1121_v46  ;;  %v1336_v58 = vld [vmem:[%s1402_s14 + $0x20c] sm:$0xf0]  ;;  %v1330_v0 = vld [vmem:[%s1402_s14 + $0x1e4] sm:$0xf]  ;;  %v982_v6 = vor.u32 %v1278_v62, %v979_v63 }
  0x1d   : > { %v1201_v55 = vld [vmem:[%s1402_s14 + $0x200] sm:$0xf]  ;;  %v1312_v60 = vld [vmem:[%s1402_s14 + $0x14c] sm:$0xf0]  ;;  %v994_v61 = vor.u32 %v1284_v53, %v993_v52  ;;  %v1187_v1 = vld [vmem:[%s1402_s14 + $0x1f0] sm:$0xf0] }
  0x1e   : > { %682 = vmatpush.bf16.msra.mxu1 %v1138_v42  ;;  %v1105_v59 = vld [vmem:[%s1402_s14 + $0x140] sm:$0xf]  ;;  %v1280_v3 = vld [vmem:[%s1402_s14 + $0x4c] sm:$0xf0]  ;;  %v1202_v5 = vor.u32 %v1336_v58, %v1201_v55  ;;  %v1190_v10 = vor.u32 %v1330_v0, %v1187_v1  ;;  %v1274_v12 = vld [vmem:[%s1402_s14 + $0x24] sm:$0xf]  ;;  %v566_v42 = vpack.c.b16 %v482_v25, %v482_v25 }
  0x1f   : > { %697 = vmatpush.bf16.msra.mxu2 %v1234_v43  ;;  %708 = vmatpush.bf16.msra.mxu3 %v1014_v44  ;;  %v977_v2 = vld [vmem:[%s1402_s14 + $0x40] sm:$0xf]  ;;  %v1106_v4 = vor.u32 %v1312_v60, %v1105_v59  ;;  %v1308_v8 = vld [vmem:[%s1402_s14 + $0x12c] sm:$0xf0]  ;;  %v963_v13 = vld [vmem:[%s1402_s14 + $0x30] sm:$0xf0] }
  0x20   : > { %669 = vmatpush.bf16.msra.mxu0 %v1010_v48  ;;  %v1089_v7 = vld [vmem:[%s1402_s14 + $0x120] sm:$0xf]  ;;  %v978_v11 = vor.u32 %v1280_v3, %v977_v2  ;;  %v1326_v14 = vld [vmem:[%s1402_s14 + $0x1c4] sm:$0xf]  ;;  %v1171_v15 = vld [vmem:[%s1402_s14 + $0x1d0] sm:$0xf0]  ;;  %v966_v22 = vor.u32 %v1274_v12, %v963_v13 }
  0x21   : > { %v961_v16 = vld [vmem:[%s1402_s14 + $0x20] sm:$0xf]  ;;  %v1276_v17 = vld [vmem:[%s1402_s14 + $0x2c] sm:$0xf0]  ;;  %v1090_v18 = vor.u32 %v1308_v8, %v1089_v7  ;;  %v1270_v21 = vld [vmem:[%s1402_s14 + $0x4] sm:$0xf]  ;;  %v1174_v27 = vor.u32 %v1326_v14, %v1171_v15 }
  0x22   : > { %683 = vmatpush.bf16.msra.mxu1 %v1122_v54  ;;  %v1073_v19 = vld [vmem:[%s1402_s14 + $0x100] sm:$0xf]  ;;  %v1304_v20 = vld [vmem:[%s1402_s14 + $0x10c] sm:$0xf0]  ;;  %v947_v23 = vld [vmem:[%s1402_s14 + $0x10] sm:$0xf0]  ;;  %v962_v28 = vor.u32 %v1276_v17, %v961_v16 }
  0x23   : > { %698 = vmatpush.bf16.msra.mxu2 %v1218_v56  ;;  %709 = vmatpush.bf16.msra.mxu3 %v998_v57  ;;  %v1322_v24 = vld [vmem:[%s1402_s14 + $0x1a4] sm:$0xf]  ;;  %v146_v26 = vld [vmem:[%s1614_s1 + $0x8] sm:$0xf]  ;;  %v1301_v30 = vld [vmem:[%s1402_s14 + $0xf4] sm:$0xf0]  ;;  %v1074_v36 = vor.u32 %v1304_v20, %v1073_v19  ;;  %v950_v40 = vor.u32 %v1270_v21, %v947_v23 }
  0x24   : > { %670 = vmatpush.bf16.msra.mxu0 %v994_v61  ;;  %v1065_v29 = vld [vmem:[%s1402_s14 + $0xe8] sm:$0xf]  ;;  %v233_v31 = vunpack.c.l.b16 %v146_v26  ;;  %v145_v32 = vld [vmem:[%s1614_s1] sm:$0xff]  ;;  %v1155_v33 = vld [vmem:[%s1402_s14 + $0x1b0] sm:$0xf0]  ;;  %v658_v54 = vsel %vm653_vm0, %v566_v42, 0 }
  0x25   : > { %v1193_v34 = vld [vmem:[%s1402_s14 + $0x1e8] sm:$0xf]  ;;  %v1333_v9 = vld [vmem:[%s1402_s14 + $0x1f4] sm:$0xf0]  ;;  %v232_v35 = vunpack.c.h.b16 %v145_v32  ;;  %v945_v37 = vld [vmem:[%s1402_s14] sm:$0xf]  ;;  %v1066_v41 = vor.u32 %v1301_v30, %v1065_v29  ;;  %v1158_v43 = vor.u32 %v1322_v24, %v1155_v33  ;;  %v231_v48 = vunpack.c.l.b16 %v145_v32 }
  0x26   : > { %684 = vmatpush.bf16.msra.mxu1 %v1106_v4  ;;  %v1272_v38 = vld [vmem:[%s1402_s14 + $0xc] sm:$0xf0]  ;;  %v1482_v39 = vpack.c.b16 %v233_v31, %v233_v31  ;;  %v1194_v44 = vor.u32 %v1333_v9, %v1193_v34  ;;  %v1318_v45 = vld [vmem:[%s1402_s14 + $0x184] sm:$0xf]  ;;  %v1049_v46 = vld [vmem:[%s1402_s14 + $0xc8] sm:$0xf] }
  0x27   : > { %699 = vmatpush.bf16.msra.mxu2 %v1202_v5  ;;  %710 = vmatpush.bf16.msra.mxu3 %v982_v6  ;;  %v1297_v47 = vld [vmem:[%s1402_s14 + $0xd4] sm:$0xf0]  ;;  %v946_v49 = vor.u32 %v1272_v38, %v945_v37  ;;  %v1139_v50 = vld [vmem:[%s1402_s14 + $0x190] sm:$0xf0]  ;;  %v1177_v51 = vld [vmem:[%s1402_s14 + $0x1c8] sm:$0xf]  ;;  %v1492_v53 = vpack.c.b16 %v232_v35, %v232_v35  ;;  %v1497_v60 = vpack.c.b16 %v231_v48, %v231_v48 }
  0x28   : > { %671 = vmatpush.bf16.msra.mxu0 %v978_v11  ;;  %v1329_v52 = vld [vmem:[%s1402_s14 + $0x1d4] sm:$0xf0]  ;;  %v1050_v55 = vor.u32 %v1297_v47, %v1049_v46  ;;  %v1346_v56 = vld [vmem:[%s1402_s14 + $0x264] sm:$0xf]  ;;  %v1251_v57 = vld [vmem:[%s1402_s14 + $0x270] sm:$0xf0]  ;;  %v1142_v58 = vor.u32 %v1318_v45, %v1139_v50 }
  0x29   : > { %v1178_v59 = vor.u32 %v1329_v52, %v1177_v51  ;;  %v1314_v61 = vld [vmem:[%s1402_s14 + $0x164] sm:$0xf]  ;;  %v1033_v62 = vld [vmem:[%s1402_s14 + $0xa8] sm:$0xf]  ;;  %v1293_v63 = vld [vmem:[%s1402_s14 + $0xb4] sm:$0xf0]  ;;  %v1254_v3 = vor.u32 %v1346_v56, %v1251_v57 }
  0x2a   : > { %685 = vmatpush.bf16.msra.mxu1 %v1090_v18  ;;  %1263 = vmatmul.msk.bf16.vlgmr.msra.gmra.mxu2 %vm649_vm1, %v1482_v39  ;;  %v1123_v0 = vld [vmem:[%s1402_s14 + $0x170] sm:$0xf0]  ;;  %v1161_v1 = vld [vmem:[%s1402_s14 + $0x1a8] sm:$0xf]  ;;  %v1325_v2 = vld [vmem:[%s1402_s14 + $0x1b4] sm:$0xf0]  ;;  %v1034_v4 = vor.u32 %v1293_v63, %v1033_v62 }
  0x2b   : > { %718 = vmatpush.bf16.msrb.mxu2 %v1190_v10  ;;  %711 = vmatpush.bf16.msra.mxu3 %v966_v22  ;;  %v1310_v5 = vld [vmem:[%s1402_s14 + $0x144] sm:$0xf]  ;;  %v1235_v7 = vld [vmem:[%s1402_s14 + $0x250] sm:$0xf0]  ;;  %v1126_v8 = vor.u32 %v1314_v61, %v1123_v0  ;;  %v1162_v10 = vor.u32 %v1325_v2, %v1161_v1  ;;  %v1017_v12 = vld [vmem:[%s1402_s14 + $0x88] sm:$0xf] }
  0x2c   : > { %672 = vmatpush.bf16.msra.mxu0 %v962_v28  ;;  %v1342_v6 = vld [vmem:[%s1402_s14 + $0x244] sm:$0xf]  ;;  %v1107_v11 = vld [vmem:[%s1402_s14 + $0x150] sm:$0xf0]  ;;  %v1289_v13 = vld [vmem:[%s1402_s14 + $0x94] sm:$0xf0] }
  0x2d   : > { %v1145_v14 = vld [vmem:[%s1402_s14 + $0x188] sm:$0xf]  ;;  %v1321_v15 = vld [vmem:[%s1402_s14 + $0x194] sm:$0xf0]  ;;  %v1238_v17 = vor.u32 %v1342_v6, %v1235_v7  ;;  %v1018_v18 = vor.u32 %v1289_v13, %v1017_v12  ;;  %v1338_v19 = vld [vmem:[%s1402_s14 + $0x224] sm:$0xf]  ;;  %v1110_v21 = vor.u32 %v1310_v5, %v1107_v11 }
  0x2e   : > { %686 = vmatpush.bf16.msra.mxu1 %v1074_v36  ;;  %v1517_v16 = vld [vmem:[%s1402_s14 + $0x288] sm:$0xff]  ;;  %v1219_v20 = vld [vmem:[%s1402_s14 + $0x230] sm:$0xf0]  ;;  %v1146_v22 = vor.u32 %v1321_v15, %v1145_v14  ;;  %v1306_v23 = vld [vmem:[%s1402_s14 + $0x124] sm:$0xf] }
  0x2f   : > { %719 = vmatpush.bf16.msrb.mxu2 %v1174_v27  ;;  %712 = vmatpush.bf16.msra.mxu3 %v950_v40  ;;  %v1001_v24 = vld [vmem:[%s1402_s14 + $0x68] sm:$0xf]  ;;  %v1285_v25 = vld [vmem:[%s1402_s14 + $0x74] sm:$0xf0]  ;;  %v483_v26 = vunpack.c.l.b16 %v1517_v16  ;;  %v1091_v27 = vld [vmem:[%s1402_s14 + $0x130] sm:$0xf0]  ;;  %v1222_v30 = vor.u32 %v1338_v19, %v1219_v20  ;;  %v484_v63 = vunpack.c.h.b16 %v1517_v16 }
  0x30   : > { %673 = vmatpush.bf16.msra.mxu0 %v946_v49  ;;  %v1129_v28 = vld [vmem:[%s1402_s14 + $0x168] sm:$0xf]  ;;  %v1317_v29 = vld [vmem:[%s1402_s14 + $0x174] sm:$0xf0]  ;;  %v1002_v31 = vor.u32 %v1285_v25, %v1001_v24  ;;  %v1334_v32 = vld [vmem:[%s1402_s14 + $0x204] sm:$0xf]  ;;  %v1094_v34 = vor.u32 %v1306_v23, %v1091_v27 }
  0x31   : > { %687 = vmatmul.bf16.vlgmr.msra.gmra.mxu1 %v1492_v53  ;;  %v1203_v33 = vld [vmem:[%s1402_s14 + $0x210] sm:$0xf0]  ;;  %v1130_v9 = vor.u32 %v1317_v29, %v1129_v28  ;;  %v1302_v35 = vld [vmem:[%s1402_s14 + $0x104] sm:$0xf]  ;;  %v985_v36 = vld [vmem:[%s1402_s14 + $0x48] sm:$0xf]  ;;  %v567_v38 = vpack.c.b16 %v483_v26, %v483_v26  ;;  %v568_v14 = vpack.c.b16 %v484_v63, %v484_v63 }
  0x32   : > { %744 = vmatpush.bf16.msrb.mxu1 %v1066_v41  ;;  %713 = vmatmul.bf16.vlgmr.msra.gmra.mxu3 %v1497_v60  ;;  %v1281_v37 = vld [vmem:[%s1402_s14 + $0x54] sm:$0xf0]  ;;  %v1075_v40 = vld [vmem:[%s1402_s14 + $0x110] sm:$0xf0]  ;;  %v1113_v41 = vld [vmem:[%s1402_s14 + $0x148] sm:$0xf] }
  0x33   : > { %720 = vmatpush.bf16.msrb.mxu2 %v1158_v43  ;;  %757 = vmatpush.bf16.msrb.mxu3 %v1194_v44  ;;  %v1313_v42 = vld [vmem:[%s1402_s14 + $0x154] sm:$0xf0]  ;;  %v1206_v43 = vor.u32 %v1334_v32, %v1203_v33  ;;  %v1299_v44 = vld [vmem:[%s1402_s14 + $0xec] sm:$0xf]  ;;  %v1067_v45 = vld [vmem:[%s1402_s14 + $0xf8] sm:$0xf0]  ;;  %v986_v46 = vor.u32 %v1281_v37, %v985_v36  ;;  %v1078_v48 = vor.u32 %v1302_v35, %v1075_v40 }
  0x34   : > { %734 = vmatpush.bf16.msrb.mxu0 %v658_v54  ;;  %v969_v47 = vld [vmem:[%s1402_s14 + $0x28] sm:$0xf]  ;;  %v1114_v49 = vor.u32 %v1313_v42, %v1113_v41  ;;  %v661_v50 = vsel %vm653_vm0, %v567_v38, 0  ;;  %v1277_v51 = vld [vmem:[%s1402_s14 + $0x34] sm:$0xf0]  ;;  %v1070_v54 = vor.u32 %v1299_v44, %v1067_v45  ;;  %v664_v25 = vsel %vm653_vm0, %v568_v14, 0 }
  0x35   : > { %674 = vmatmul.bf16.vlgmr.msra.gmra.mxu0 %v1497_v60  ;;  %v1097_v52 = vld [vmem:[%s1402_s14 + $0x128] sm:$0xf]  ;;  %v1349_v57 = vld [vmem:[%s1402_s14 + $0x274] sm:$0xf0]  ;;  %v970_v61 = vor.u32 %v1277_v51, %v969_v47  ;;  %v1331_v11 = vld [vmem:[%s1402_s14 + $0x1ec] sm:$0xf] }
  0x36   : > { %745 = vmatpush.bf16.msrb.mxu1 %v1050_v55  ;;  %v1309_v55 = vld [vmem:[%s1402_s14 + $0x134] sm:$0xf0]  ;;  %v1257_v56 = vld [vmem:[%s1402_s14 + $0x268] sm:$0xf]  ;;  %v1195_v12 = vld [vmem:[%s1402_s14 + $0x1f8] sm:$0xf0] }
  0x37   : > { %721 = vmatpush.bf16.msrb.mxu2 %v1142_v58  ;;  %758 = vmatpush.bf16.msrb.mxu3 %v1178_v59  ;;  %v1295_v58 = vld [vmem:[%s1402_s14 + $0xcc] sm:$0xf]  ;;  %v1051_v59 = vld [vmem:[%s1402_s14 + $0xd8] sm:$0xf0]  ;;  %v953_v62 = vld [vmem:[%s1402_s14 + $0x8] sm:$0xf]  ;;  %v1098_v0 = vor.u32 %v1309_v55, %v1097_v52  ;;  %v1258_v1 = vor.u32 %v1349_v57, %v1257_v56 }
  0x38   : > { %735 = vmatpush.bf16.msrb.mxu0 %v1254_v3  ;;  %v1273_v2 = vld [vmem:[%s1402_s14 + $0x14] sm:$0xf0]  ;;  %v1081_v3 = vld [vmem:[%s1402_s14 + $0x108] sm:$0xf]  ;;  %v1054_v5 = vor.u32 %v1295_v58, %v1051_v59  ;;  %v1327_v23 = vld [vmem:[%s1402_s14 + $0x1cc] sm:$0xf] }
  0x39   : > { %v1241_v6 = vld [vmem:[%s1402_s14 + $0x248] sm:$0xf]  ;;  %v1345_v7 = vld [vmem:[%s1402_s14 + $0x254] sm:$0xf0]  ;;  %v954_v13 = vor.u32 %v1273_v2, %v953_v62  ;;  %v1179_v24 = vld [vmem:[%s1402_s14 + $0x1d8] sm:$0xf0] }
  0x3a   : > { %746 = vmatpush.bf16.msrb.mxu1 %v1034_v4  ;;  %v1305_v4 = vld [vmem:[%s1402_s14 + $0x114] sm:$0xf0]  ;;  %v1242_v16 = vor.u32 %v1345_v7, %v1241_v6  ;;  %v1225_v19 = vld [vmem:[%s1402_s14 + $0x228] sm:$0xf]  ;;  %v1347_v26 = vld [vmem:[%s1402_s14 + $0x26c] sm:$0xf] }
  0x3b   : > { %722 = vmatpush.bf16.msrb.mxu2 %v1126_v8  ;;  %759 = vmatpush.bf16.msrb.mxu3 %v1162_v10  ;;  %v1291_v8 = vld [vmem:[%s1402_s14 + $0xac] sm:$0xf]  ;;  %v1035_v10 = vld [vmem:[%s1402_s14 + $0xb8] sm:$0xf0]  ;;  %v1082_v15 = vor.u32 %v1305_v4, %v1081_v3  ;;  %v1341_v20 = vld [vmem:[%s1402_s14 + $0x234] sm:$0xf0] }
  0x3c   : > { %736 = vmatpush.bf16.msrb.mxu0 %v1238_v17  ;;  %v1038_v17 = vor.u32 %v1291_v8, %v1035_v10  ;;  %v1259_v27 = vld [vmem:[%s1402_s14 + $0x278] sm:$0xf0]  ;;  %v1226_v28 = vor.u32 %v1341_v20, %v1225_v19  ;;  %v1337_v32 = vld [vmem:[%s1402_s14 + $0x214] sm:$0xf0]  ;;  %v1283_v33 = vld [vmem:[%s1402_s14 + $0x6c] sm:$0xf] }
  0x3d   : > { %v1323_v35 = vld [vmem:[%s1402_s14 + $0x1ac] sm:$0xf]  ;;  %v1163_v36 = vld [vmem:[%s1402_s14 + $0x1b8] sm:$0xf0] }
  0x3e   : > { %747 = vmatpush.bf16.msrb.mxu1 %v1018_v18  ;;  %v1198_v18 = vor.u32 %v1331_v11, %v1195_v12  ;;  %v1343_v37 = vld [vmem:[%s1402_s14 + $0x24c] sm:$0xf]  ;;  %v1243_v38 = vld [vmem:[%s1402_s14 + $0x258] sm:$0xf0]  ;;  %v1166_v42 = vor.u32 %v1323_v35, %v1163_v36 }
  0x3f   : > { %723 = vmatpush.bf16.msrb.mxu2 %v1110_v21  ;;  %760 = vmatpush.bf16.msrb.mxu3 %v1146_v22  ;;  %v1287_v21 = vld [vmem:[%s1402_s14 + $0x8c] sm:$0xf]  ;;  %v1019_v22 = vld [vmem:[%s1402_s14 + $0x98] sm:$0xf0]  ;;  %v1246_v44 = vor.u32 %v1343_v37, %v1243_v38 }
  0x40   : > { %737 = vmatpush.bf16.msrb.mxu0 %v1222_v30  ;;  %v1022_v29 = vor.u32 %v1287_v21, %v1019_v22  ;;  %v1182_v30 = vor.u32 %v1327_v23, %v1179_v24  ;;  %v987_v45 = vld [vmem:[%s1402_s14 + $0x58] sm:$0xf0]  ;;  %v1275_v52 = vld [vmem:[%s1402_s14 + $0x2c] sm:$0xf] }
  0x41   : > { %v1147_v47 = vld [vmem:[%s1402_s14 + $0x198] sm:$0xf0]  ;;  %v1315_v56 = vld [vmem:[%s1402_s14 + $0x16c] sm:$0xf] }
  0x42   : > { %748 = vmatpush.bf16.msrb.mxu1 %v1002_v31  ;;  %v1209_v31 = vld [vmem:[%s1402_s14 + $0x208] sm:$0xf]  ;;  %v971_v55 = vld [vmem:[%s1402_s14 + $0x38] sm:$0xf0]  ;;  %v1335_v58 = vld [vmem:[%s1402_s14 + $0x20c] sm:$0xf] }
  0x43   : > { %724 = vmatpush.bf16.msrb.mxu2 %v1094_v34  ;;  %761 = vmatpush.bf16.msrb.mxu3 %v1130_v9  ;;  %v1262_v34 = vor.u32 %v1347_v26, %v1259_v27  ;;  %v1003_v9 = vld [vmem:[%s1402_s14 + $0x78] sm:$0xf0]  ;;  %v1210_v40 = vor.u32 %v1337_v32, %v1209_v31  ;;  %v1311_v2 = vld [vmem:[%s1402_s14 + $0x14c] sm:$0xf] }
  0x44   : > { %738 = vmatpush.bf16.msrb.mxu0 %v1206_v43  ;;  %v1006_v41 = vor.u32 %v1283_v33, %v1003_v9  ;;  %v1279_v43 = vld [vmem:[%s1402_s14 + $0x4c] sm:$0xf]  ;;  %v1131_v57 = vld [vmem:[%s1402_s14 + $0x178] sm:$0xf0] }
  0x45   : > { %v1211_v59 = vld [vmem:[%s1402_s14 + $0x218] sm:$0xf0]  ;;  %v1134_v62 = vor.u32 %v1315_v56, %v1131_v57  ;;  %v1307_v6 = vld [vmem:[%s1402_s14 + $0x12c] sm:$0xf] }
  0x46   : > { %749 = vmatpush.bf16.msrb.mxu1 %v986_v46  ;;  %v1319_v46 = vld [vmem:[%s1402_s14 + $0x18c] sm:$0xf]  ;;  %v1214_v63 = vor.u32 %v1335_v58, %v1211_v59  ;;  %v1115_v3 = vld [vmem:[%s1402_s14 + $0x158] sm:$0xf0] }
  0x47   : > { %725 = vmatpush.bf16.msrb.mxu2 %v1078_v48  ;;  %762 = vmatpush.bf16.msrb.mxu3 %v1114_v49  ;;  %v1339_v48 = vld [vmem:[%s1402_s14 + $0x22c] sm:$0xf]  ;;  %v1227_v49 = vld [vmem:[%s1402_s14 + $0x238] sm:$0xf0]  ;;  %v1150_v51 = vor.u32 %v1319_v46, %v1147_v47 }
  0x48   : > { %773 = vmatpush.bf16.msra.mxu0 %v661_v50  ;;  %v990_v50 = vor.u32 %v1279_v43, %v987_v45  ;;  %v1099_v7 = vld [vmem:[%s1402_s14 + $0x138] sm:$0xf0]  ;;  %v1303_v10 = vld [vmem:[%s1402_s14 + $0x10c] sm:$0xf]  ;;  %v1372_v45 = vmov 512.0  }
  0x49   : > { %1264 = vmatmul.msk.bf16.vlgmr.msrb.gmra.mxu0 %vm649_vm1, %v1482_v39  ;;  %v1102_v8 = vor.u32 %v1307_v6, %v1099_v7  ;;  %v1083_v11 = vld [vmem:[%s1402_s14 + $0x118] sm:$0xf0]  ;;  %1360 = vrcp.f32 %v1372_v45 }
  0x4a   : > { %726 = vmatmul.bf16.vlgmr.msrb.gmra.mxu2 %v1492_v53  ;;  %750 = vmatpush.bf16.msrb.mxu1 %v970_v61  ;;  %v974_v61 = vor.u32 %v1275_v52, %v971_v55  ;;  %v1086_v12 = vor.u32 %v1303_v10, %v1083_v11 }
  0x4b   : > { %783 = vmatpush.bf16.msra.mxu2 %v1070_v54  ;;  %763 = vmatpush.bf16.msrb.mxu3 %v1098_v0  ;;  %v1230_v54 = vor.u32 %v1339_v48, %v1227_v49  ;;  %v1271_v0 = vld [vmem:[%s1402_s14 + $0xc] sm:$0xf] }
  0x4c   : > { %774 = vmatpush.bf16.msra.mxu0 %v1258_v1  ;;  %v955_v1 = vld [vmem:[%s1402_s14 + $0x18] sm:$0xf0] }
  0x4d   : > { %v958_v4 = vor.u32 %v1271_v0, %v955_v1 }
  0x4e   : > { %751 = vmatpush.bf16.msrb.mxu1 %v954_v13 }
  0x4f   : > { %784 = vmatpush.bf16.msra.mxu2 %v1054_v5  ;;  %764 = vmatpush.bf16.msrb.mxu3 %v1082_v15  ;;  %v1118_v5 = vor.u32 %v1311_v2, %v1115_v3  ;;  %v1361_v46 = vpop.eup %1360 }
  0x50   : > { %775 = vmatpush.bf16.msra.mxu0 %v1242_v16  ;;  %v828_v47 = vmul.f32 512.0, %v1361_v46  ;;  %vm832_vm2 = vweird.f32 %v1361_v46 }
  0x51   : > { %752 = vmatmul.bf16.vlgmr.msrb.gmra.mxu1 %v1497_v60 }
  0x52   : > { %796 = vmatpush.bf16.msra.mxu1 %v1198_v18  ;;  %765 = vmatmul.bf16.vlgmr.msrb.gmra.mxu3 %v1492_v53  ;;  %v829_v48 = vsub.f32 1.0, %v828_v47 }
  0x53   : > { %785 = vmatpush.bf16.msra.mxu2 %v1038_v17  ;;  %812 = vmatpush.bf16.msra.mxu3 %v664_v25 }
  0x54   : > { %776 = vmatpush.bf16.msra.mxu0 %v1226_v28  ;;  %v830_v49 = vmul.f32 %v1361_v46, %v829_v48 }
  0x56   : > { %797 = vmatpush.bf16.msra.mxu1 %v1182_v30 }
  0x57   : > { %786 = vmatpush.bf16.msra.mxu2 %v1022_v29  ;;  %813 = vmatpush.bf16.msra.mxu3 %v1262_v34 }
  0x58   : > { %777 = vmatpush.bf16.msra.mxu0 %v1210_v40 }
  0x5a   : > { %798 = vmatpush.bf16.msra.mxu1 %v1166_v42 }
  0x5b   : > { %787 = vmatpush.bf16.msra.mxu2 %v1006_v41  ;;  %814 = vmatpush.bf16.msra.mxu3 %v1246_v44 }
  0x5c   : > { %1265 = vmatmul.msk.bf16.vlgmr.msra.gmra.mxu0 %vm649_vm1, %v1482_v39 }
  0x5e   : > { %799 = vmatpush.bf16.msra.mxu1 %v1150_v51 }
  0x5f   : > { %788 = vmatpush.bf16.msra.mxu2 %v990_v50  ;;  %815 = vmatpush.bf16.msra.mxu3 %v1230_v54  ;;  %v831_v50 = vadd.f32 %v1361_v46, %v830_v49 }
  0x61   : > { %v833_v51 = vsel %vm832_vm2, %v1361_v46, %v831_v50 }
  0x62   : > { %800 = vmatpush.bf16.msra.mxu1 %v1134_v62 }
  0x63   : > { %789 = vmatpush.bf16.msra.mxu2 %v974_v61  ;;  %816 = vmatpush.bf16.msra.mxu3 %v1214_v63 }
  0x66   : > { %1266 = vmatmul.msk.bf16.vlgmr.msra.gmra.mxu3 %vm649_vm1, %v1482_v39  ;;  %801 = vmatpush.bf16.msra.mxu1 %v1118_v5 }
  0x67   : > { %790 = vmatpush.bf16.msra.mxu2 %v958_v4 }
  0x6a   : > { %791 = vmatmul.bf16.vlgmr.msra.gmra.mxu2 %v1497_v60  ;;  %802 = vmatpush.bf16.msra.mxu1 %v1102_v8 }
  0x6e   : > { %803 = vmatpush.bf16.msra.mxu1 %v1086_v12 }
  0x71   : > { %804 = vmatmul.bf16.vlgmr.msra.gmra.mxu1 %v1492_v53 }
  0xad   : > { %v701_v14 = vpop.f32.mrf.mxu2 }
  0xae   : > { %v688_v13 = vpop.f32.mrf.mxu1 }
  0xb2   : > { %v675_v15 = vpop.f32.mrf.mxu0 }
  0xb3   : > { %v689_v30 = vadd.f32 %v688_v13, %v675_v15 }
  0xb5   : > { %v714_v16 = vpop.f32.mrf.mxu3  ;;  %v703_v18 = vpop.f32.mrf.mxu2  ;;  %v702_v34 = vadd.f32 %v701_v14, %v689_v30 }
  0xb6   : > { %v690_v17 = vpop.f32.mrf.mxu1 }
  0xba   : > { %v677_v19 = vpop.f32.mrf.mxu0 }
  0xbd   : > { %v716_v20 = vpop.f32.mrf.mxu3 }
  0xc6   : > { %v740_v39 = vpop.f32.mrf.mxu0 }
  0xcd   : > { %v727_v21 = vpop.f32.mrf.mxu2 }
  0xce   : > { %v742_v22 = vpop.f32.mrf.mxu0  ;;  %v753_v23 = vpop.f32.mrf.mxu1  ;;  %v728_v29 = vadd.f32 %v727_v21, %v714_v16 }
  0xd0   : > { %v741_v32 = vadd.f32 %v740_v39, %v728_v29 }
  0xd2   : > { %v822_v37 = vadd.f32 %v741_v32, %v702_v34 }
  0xd5   : > { %v766_v24 = vpop.f32.mrf.mxu3  ;;  %v729_v25 = vpop.f32.mrf.mxu2 }
  0xd6   : > { %v755_v60 = vpop.f32.mrf.mxu1  ;;  %v767_v31 = vadd.f32 %v766_v24, %v753_v23 }
  0xd9   : > { %v779_v26 = vpop.f32.mrf.mxu0 }
  0xda   : > { %v780_v9 = vadd.f32 %v779_v26, %v767_v31 }
  0xdc   : > { %v823_v41 = vadd.f32 %v822_v37, %v780_v9 }
  0xdd   : > { %v768_v27 = vpop.f32.mrf.mxu3 }
  0xe1   : > { %v781_v28 = vpop.f32.mrf.mxu0 }
  0xe9   : > { %v818_v53 = vpop.f32.mrf.mxu3 }
  0xed   : > { %v792_v33 = vpop.f32.mrf.mxu2 }
  0xee   : > { %v805_v35 = vpop.f32.mrf.mxu1 }
  0xef   : > { %v806_v36 = vadd.f32 %v805_v35, %v792_v33 }
  0xf1   : > { %v820_v38 = vpop.f32.mrf.mxu3  ;;  %v819_v40 = vadd.f32 %v818_v53, %v806_v36 }
  0xf3   : > { %v824_v43 = vadd.f32 %v823_v41, %v819_v40 }
  0xf5   : > { %v794_v42 = vpop.f32.mrf.mxu2  ;;  %825 = vadd.xlane.f32.xlu0 %v824_v43 }
  0xf6   : > { %v807_v44 = vpop.f32.mrf.mxu1 }
 0x168   : > { %v826_v52 = vpop.xlane.xlu0 %825 }
 0x169   : > { %v834_v54 = vmul.f32 %v833_v51, %v826_v52 }
 0x16b   : > { %v835_v55 = vsub.f32 %v702_v34, %v834_v54  ;;  %v836_v56 = vsub.f32 %v741_v32, %v834_v54  ;;  %v837_v57 = vsub.f32 %v780_v9, %v834_v54  ;;  %v838_v58 = vsub.f32 %v819_v40, %v834_v54 }
 0x16d   : > { %v839_v59 = vmul.f32 %v835_v55, %v835_v55  ;;  %v840_v61 = vmul.f32 %v836_v56, %v836_v56  ;;  %v841_v62 = vmul.f32 %v837_v57, %v837_v57  ;;  %v842_v0 = vmul.f32 %v838_v58, %v838_v58 }
 0x16f   : > { %v843_v63 = vadd.f32 %v840_v61, %v839_v59 }
 0x171   : > { %v844_v1 = vadd.f32 %v843_v63, %v841_v62 }
 0x173   : > { %v845_v2 = vadd.f32 %v844_v1, %v842_v0 }
 0x175   : > { %846 = vadd.xlane.f32.xlu0 %v845_v2 }
 0x1e8   : > { %v847_v3 = vpop.xlane.xlu0 %846 }
 0x1e9   : > { %v848_v4 = vmul.f32 %v847_v3, %v833_v51 }
 0x1eb   : > { %v849_v5 = vadd.f32 1e-05, %v848_v4 }
 0x1ed   : > { %1362 = vrsqrt.f32 %v849_v5  ;;  %vm856_vm4 = vweird.f32 %v849_v5 }
 0x1f3   : > { %v1363_v6 = vpop.eup %1362 }
 0x1f4   : > { %v851_v7 = vmul.f32 %v1363_v6, %v849_v5  ;;  %vm857_vm3 = vweird.f32 %v1363_v6 }
 0x1f5   : > { %vm858_vm5 = vmor %vm856_vm4, %vm857_vm3 }
 0x1f6   : > { %v852_v8 = vmul.f32 %v1363_v6, %v851_v7 }
 0x1f8   : > { %v853_v10 = vmul.f32 0.5, %v852_v8 }
 0x1fa   : > { %v854_v11 = vsub.f32 1.5, %v853_v10 }
 0x1fc   : > { %v855_v12 = vmul.f32 %v1363_v6, %v854_v11 }
 0x1fe   : > { %v859_v13 = vsel %vm858_vm5, %v1363_v6, %v855_v12 }
 0x1ff   : > { %v860_v14 = vmul.f32 %v859_v13, %v835_v55  ;;  %v861_v15 = vmul.f32 %v859_v13, %v836_v56  ;;  %v862_v16 = vmul.f32 %v859_v13, %v837_v57  ;;  %v863_v17 = vmul.f32 %v859_v13, %v838_v58 }
 0x201   : > { %vm864_vm6 = vcmp.ge.f32.partialorder %v860_v14, 0.0  ;;  %vm865_vm7 = vcmp.ge.f32.partialorder %v861_v15, 0.0  ;;  %vm866_vm8 = vcmp.ge.f32.partialorder %v862_v16, 0.0  ;;  %vm867_vm9 = vcmp.ge.f32.partialorder %v863_v17, 0.0 }
 0x202   : > { %v868_v18 = vmul.f32 0.01, %v860_v14  ;;  %v869_v19 = vmul.f32 0.01, %v861_v15  ;;  %v870_v20 = vmul.f32 0.01, %v862_v16 }
 0x203   : > { %v871_v39 = vmul.f32 0.01, %v863_v17 }
 0x204   : > { %v872_v21 = vsel %vm864_vm6, %v860_v14, %v868_v18  ;;  %v873_v22 = vsel %vm865_vm7, %v861_v15, %v869_v19  ;;  %v874_v23 = vsel %vm866_vm8, %v862_v16, %v870_v20 }
 0x205   : > { %v875_v24 = vsel %vm867_vm9, %v863_v17, %v871_v39  ;;  %876 = vst [vmem:[%s143_s22] sm:$0xff] %v872_v21 }
 0x206   : > { %877 = vst [vmem:[%s143_s22 + $0x8] sm:$0xff] %v873_v22 }
 0x207   : > { %878 = vst [vmem:[%s143_s22 + $0x10] sm:$0xff] %v874_v23 }
 0x208   : > { %879 = vst [vmem:[%s143_s22 + $0x18] sm:$0xff] %v875_v24 }
 0x209 PF: > { %s12_s9 = sadd.s32 1, %s1370_s9  }
 0x20a   : > { %p9_p4 = scmp.ge.s32.totalorder %s12_s9, 4  }
 0x20c   :  { %11 = sbr.rel (!%p9_p4) target bundleno = 1 (0x1), region = 58 }

// kernel: _decoder_forward.8
= control target key start
LH: loop header
LB: loop body
LE: loop exit
PB: predicated region body
PF: predicated region fallthrough
CT: control target
= control target key end

     0   :  { %s1268_s15 = smov 0   ;;  %s1440_s0 = inlined_call_operand.vmem [shape: bf16[2,216,512], index: 0, kind: input, shape index: {}]   ;;  %s1441_s1 = inlined_call_operand.vmem [shape: bf16[8,216], index: 1, kind: input, shape index: {}]   ;;  %s1442_s2 = inlined_call_operand.vmem [shape: bf16[2,16,512], index: 2, kind: input, shape index: {}]   ;;  %s1443_s3 = inlined_call_operand.vmem [shape: bf16[8,16], index: 3, kind: input, shape index: {}]   ;;  %s1444_s4 = inlined_call_operand.vmem [shape: f32[2,8,512], index: 4, kind: output, shape index: {}]  }
   0x1 LB: > { %s916_s16 = sadd.s32 4294967295, %s1240_s15   ;;  %p920_p0 = scmp.ge.s32.totalorder %s1240_s15, 1  ;;  %s1240_s15 = sphi %s1268_s15, %s14_s15  }
   0x2   : > { %p172_p1 = scmp.lt.s32.totalorder %s1240_s15, 3 }
   0x4   : > { %p173_p2 = pnand %p920_p0, %p172_p1 }
   0x5   : > { %p203_p3 = scmp.lt.s32.totalorder (!%p173_p2), %s916_s16, 1 }
   0x6   : > { %176 = sbr.rel (%p173_p2) target bundleno = 504 (0x1f8), region = 36 }
   0xb   : > { %s1446_s16 = smov (!%p203_p3, %s916_s16), 1  ;;  %vm554_vm0 = vcmask 1043456   ;;  %vm550_vm1 = vcmask 719872   ;;  %vm696_vm2 = vcmask 130048  }
   0xc   : > { %s1218_s17 = smul.u32 432, %s1446_s16  ;;  %s1160_s23 = sshll.u32 %s1446_s16, 5 }
   0xd   : > { %s1395_s26 = scalar_lea.vmem %s1442_s2, %s1160_s23  ;;  %s217_s5 = scalar_lea.vmem %s1444_s4, %s1160_s23 }
   0xe   : > { %s1282_s20 = scalar_lea.vmem %s1440_s0, %s1218_s17 }
   0xf   : > { %v1040_v0 = vld [vmem:[%s1282_s20 + $0xe0] sm:$0xf]  ;;  %v1192_v1 = vld [vmem:[%s1282_s20 + $0xec] sm:$0xf0]  ;;  %v1190_v2 = vld [vmem:[%s1282_s20 + $0xe4] sm:$0xf] }
  0x10   : > { %v1041_v3 = vor.u32 %v1192_v1, %v1040_v0  ;;  %v1042_v4 = vld [vmem:[%s1282_s20 + $0xf0] sm:$0xf0]  ;;  %v272_v5 = vld [vmem:[%s1282_s20 + $0x1a0] sm:$0xff]  ;;  %v1188_v10 = vld [vmem:[%s1282_s20 + $0xcc] sm:$0xf0] }
  0x11   : > { %v1024_v6 = vld [vmem:[%s1282_s20 + $0xc0] sm:$0xf]  ;;  %v1045_v7 = vor.u32 %v1190_v2, %v1042_v4  ;;  %v438_v8 = vunpack.c.l.b16 %v272_v5  ;;  %v439_v9 = vunpack.c.h.b16 %v272_v5  ;;  %v1186_v11 = vld [vmem:[%s1282_s20 + $0xc4] sm:$0xf]  ;;  %v1026_v12 = vld [vmem:[%s1282_s20 + $0xd0] sm:$0xf0] }
  0x12   : > { %567 = vmatpush.bf16.msra.mxu0 %v1041_v3  ;;  %v1120_v13 = vld [vmem:[%s1282_s20 + $0x180] sm:$0xf]  ;;  %v1212_v14 = vld [vmem:[%s1282_s20 + $0x18c] sm:$0xf0]  ;;  %v1025_v17 = vor.u32 %v1188_v10, %v1024_v6  ;;  %v1029_v18 = vor.u32 %v1186_v11, %v1026_v12  ;;  %v1210_v19 = vld [vmem:[%s1282_s20 + $0x184] sm:$0xf] }
  0x13   : > { %593 = vmatpush.bf16.msra.mxu2 %v1045_v7  ;;  %v494_v15 = vpack.c.b16 %v438_v8, %v438_v8  ;;  %v495_v16 = vpack.c.b16 %v439_v9, %v439_v9  ;;  %v1122_v20 = vld [vmem:[%s1282_s20 + $0x190] sm:$0xf0]  ;;  %v1008_v21 = vld [vmem:[%s1282_s20 + $0xa0] sm:$0xf]  ;;  %v1184_v22 = vld [vmem:[%s1282_s20 + $0xac] sm:$0xf0]  ;;  %v1121_v27 = vor.u32 %v1212_v14, %v1120_v13 }
  0x14   : > { %v1182_v23 = vld [vmem:[%s1282_s20 + $0xa4] sm:$0xf]  ;;  %v1010_v24 = vld [vmem:[%s1282_s20 + $0xb0] sm:$0xf0]  ;;  %v1125_v28 = vor.u32 %v1210_v19, %v1122_v20  ;;  %v1104_v29 = vld [vmem:[%s1282_s20 + $0x160] sm:$0xf]  ;;  %v1009_v31 = vor.u32 %v1184_v22, %v1008_v21 }
  0x15   : > { %v556_v25 = vsel %vm554_vm0, %v494_v15, 0  ;;  %v559_v26 = vsel %vm554_vm0, %v495_v16, 0  ;;  %v1208_v30 = vld [vmem:[%s1282_s20 + $0x16c] sm:$0xf0]  ;;  %v1013_v32 = vor.u32 %v1182_v23, %v1010_v24  ;;  %v1206_v33 = vld [vmem:[%s1282_s20 + $0x164] sm:$0xf] }
  0x16   : > { %582 = vmatpush.bf16.msra.mxu1 %v556_v25  ;;  %608 = vmatpush.bf16.msra.mxu3 %v559_v26  ;;  %v1106_v34 = vld [vmem:[%s1282_s20 + $0x170] sm:$0xf0]  ;;  %v992_v35 = vld [vmem:[%s1282_s20 + $0x80] sm:$0xf]  ;;  %v1180_v36 = vld [vmem:[%s1282_s20 + $0x8c] sm:$0xf0]  ;;  %v1105_v39 = vor.u32 %v1208_v30, %v1104_v29 }
  0x17   : > { %568 = vmatpush.bf16.msra.mxu0 %v1025_v17  ;;  %594 = vmatpush.bf16.msra.mxu2 %v1029_v18  ;;  %v1178_v37 = vld [vmem:[%s1282_s20 + $0x84] sm:$0xf]  ;;  %v994_v38 = vld [vmem:[%s1282_s20 + $0x90] sm:$0xf0]  ;;  %v1109_v40 = vor.u32 %v1206_v33, %v1106_v34  ;;  %v1088_v41 = vld [vmem:[%s1282_s20 + $0x140] sm:$0xf]  ;;  %v993_v43 = vor.u32 %v1180_v36, %v992_v35 }
  0x18   : > { %v1204_v42 = vld [vmem:[%s1282_s20 + $0x14c] sm:$0xf0]  ;;  %v997_v44 = vor.u32 %v1178_v37, %v994_v38  ;;  %v1202_v45 = vld [vmem:[%s1282_s20 + $0x144] sm:$0xf]  ;;  %v1090_v46 = vld [vmem:[%s1282_s20 + $0x150] sm:$0xf0] }
  0x19   : > { %v976_v47 = vld [vmem:[%s1282_s20 + $0x60] sm:$0xf]  ;;  %v1176_v48 = vld [vmem:[%s1282_s20 + $0x6c] sm:$0xf0]  ;;  %v1174_v49 = vld [vmem:[%s1282_s20 + $0x64] sm:$0xf]  ;;  %v1089_v51 = vor.u32 %v1204_v42, %v1088_v41  ;;  %v1093_v52 = vor.u32 %v1202_v45, %v1090_v46 }
  0x1a   : > { %583 = vmatpush.bf16.msra.mxu1 %v1121_v27  ;;  %609 = vmatpush.bf16.msra.mxu3 %v1125_v28  ;;  %v978_v50 = vld [vmem:[%s1282_s20 + $0x70] sm:$0xf0]  ;;  %v1072_v53 = vld [vmem:[%s1282_s20 + $0x120] sm:$0xf]  ;;  %v1200_v54 = vld [vmem:[%s1282_s20 + $0x12c] sm:$0xf0]  ;;  %v977_v56 = vor.u32 %v1176_v48, %v976_v47 }
  0x1b   : > { %569 = vmatpush.bf16.msra.mxu0 %v1009_v31  ;;  %595 = vmatpush.bf16.msra.mxu2 %v1013_v32  ;;  %v1198_v55 = vld [vmem:[%s1282_s20 + $0x124] sm:$0xf]  ;;  %v981_v57 = vor.u32 %v1174_v49, %v978_v50  ;;  %v1074_v58 = vld [vmem:[%s1282_s20 + $0x130] sm:$0xf0]  ;;  %v960_v59 = vld [vmem:[%s1282_s20 + $0x40] sm:$0xf]  ;;  %v1073_v1 = vor.u32 %v1200_v54, %v1072_v53 }
  0x1c   : > { %v1172_v60 = vld [vmem:[%s1282_s20 + $0x4c] sm:$0xf0]  ;;  %v1170_v61 = vld [vmem:[%s1282_s20 + $0x44] sm:$0xf]  ;;  %v962_v62 = vld [vmem:[%s1282_s20 + $0x50] sm:$0xf0]  ;;  %v1077_v2 = vor.u32 %v1198_v55, %v1074_v58 }
  0x1d   : > { %v273_v63 = vld [vmem:[%s1282_s20 + $0x1a8] sm:$0xff]  ;;  %v1056_v3 = vld [vmem:[%s1282_s20 + $0x100] sm:$0xf]  ;;  %v1196_v4 = vld [vmem:[%s1282_s20 + $0x10c] sm:$0xf0]  ;;  %v961_v6 = vor.u32 %v1172_v60, %v960_v59  ;;  %v965_v7 = vor.u32 %v1170_v61, %v962_v62 }
  0x1e   : > { %584 = vmatpush.bf16.msra.mxu1 %v1105_v39  ;;  %610 = vmatpush.bf16.msra.mxu3 %v1109_v40  ;;  %v440_v0 = vunpack.c.l.b16 %v273_v63  ;;  %v219_v5 = vld [vmem:[%s1441_s1] sm:$0xff]  ;;  %v1058_v9 = vld [vmem:[%s1282_s20 + $0x110] sm:$0xf0]  ;;  %v1168_v11 = vld [vmem:[%s1282_s20 + $0x2c] sm:$0xf0]  ;;  %v441_v18 = vunpack.c.h.b16 %v273_v63  ;;  %v1057_v19 = vor.u32 %v1196_v4, %v1056_v3 }
  0x1f   : > { %570 = vmatpush.bf16.msra.mxu0 %v993_v43  ;;  %596 = vmatpush.bf16.msra.mxu2 %v997_v44  ;;  %v1194_v8 = vld [vmem:[%s1282_s20 + $0x104] sm:$0xf]  ;;  %v944_v10 = vld [vmem:[%s1282_s20 + $0x20] sm:$0xf]  ;;  %v946_v13 = vld [vmem:[%s1282_s20 + $0x30] sm:$0xf0]  ;;  %v276_v17 = vunpack.c.h.b16 %v219_v5  ;;  %v275_v37 = vunpack.c.l.b16 %v219_v5 }
  0x20   : > { %v1166_v12 = vld [vmem:[%s1282_s20 + $0x24] sm:$0xf]  ;;  %v1048_v14 = vld [vmem:[%s1282_s20 + $0xe8] sm:$0xf]  ;;  %v1193_v15 = vld [vmem:[%s1282_s20 + $0xf4] sm:$0xf0]  ;;  %v496_v16 = vpack.c.b16 %v440_v0, %v440_v0  ;;  %v1061_v20 = vor.u32 %v1194_v8, %v1058_v9  ;;  %v945_v21 = vor.u32 %v1168_v11, %v944_v10  ;;  %v497_v34 = vpack.c.b16 %v441_v18, %v441_v18 }
  0x21   : > { %v949_v22 = vor.u32 %v1166_v12, %v946_v13  ;;  %v928_v23 = vld [vmem:[%s1282_s20] sm:$0xf]  ;;  %v1164_v24 = vld [vmem:[%s1282_s20 + $0xc] sm:$0xf0]  ;;  %v1162_v25 = vld [vmem:[%s1282_s20 + $0x4] sm:$0xf]  ;;  %v1049_v26 = vor.u32 %v1193_v15, %v1048_v14  ;;  %v1348_v31 = vpack.c.b16 %v276_v17, %v276_v17  ;;  %v1364_v49 = vpack.c.b16 %v275_v37, %v275_v37 }
  0x22   : > { %585 = vmatpush.bf16.msra.mxu1 %v1089_v51  ;;  %611 = vmatpush.bf16.msra.mxu3 %v1093_v52  ;;  %v930_v27 = vld [vmem:[%s1282_s20 + $0x10] sm:$0xf0]  ;;  %v1032_v28 = vld [vmem:[%s1282_s20 + $0xc8] sm:$0xf]  ;;  %v1189_v29 = vld [vmem:[%s1282_s20 + $0xd4] sm:$0xf0]  ;;  %v929_v38 = vor.u32 %v1164_v24, %v928_v23 }
  0x23   : > { %571 = vmatpush.bf16.msra.mxu0 %v977_v56  ;;  %597 = vmatpush.bf16.msra.mxu2 %v981_v57  ;;  %v562_v30 = vsel %vm554_vm0, %v496_v16, 0  ;;  %v1128_v32 = vld [vmem:[%s1282_s20 + $0x188] sm:$0xf]  ;;  %v1213_v33 = vld [vmem:[%s1282_s20 + $0x194] sm:$0xf0]  ;;  %v933_v39 = vor.u32 %v1162_v25, %v930_v27  ;;  %v1033_v40 = vor.u32 %v1189_v29, %v1032_v28  ;;  %v565_v46 = vsel %vm554_vm0, %v497_v34, 0 }
  0x24   : > { %v1191_v35 = vld [vmem:[%s1282_s20 + $0xec] sm:$0xf]  ;;  %v1050_v36 = vld [vmem:[%s1282_s20 + $0xf8] sm:$0xf0]  ;;  %v1129_v41 = vor.u32 %v1213_v33, %v1128_v32  ;;  %v1016_v42 = vld [vmem:[%s1282_s20 + $0xa8] sm:$0xf] }
  0x25   : > { %v1185_v43 = vld [vmem:[%s1282_s20 + $0xb4] sm:$0xf0]  ;;  %v1112_v44 = vld [vmem:[%s1282_s20 + $0x168] sm:$0xf]  ;;  %v1053_v45 = vor.u32 %v1191_v35, %v1050_v36  ;;  %v1187_v48 = vld [vmem:[%s1282_s20 + $0xcc] sm:$0xf] }
  0x26   : > { %586 = vmatpush.bf16.msra.mxu1 %v1073_v1  ;;  %612 = vmatpush.bf16.msra.mxu3 %v1077_v2  ;;  %v1209_v47 = vld [vmem:[%s1282_s20 + $0x174] sm:$0xf0]  ;;  %v1034_v50 = vld [vmem:[%s1282_s20 + $0xd8] sm:$0xf0]  ;;  %v1211_v51 = vld [vmem:[%s1282_s20 + $0x18c] sm:$0xf]  ;;  %v1017_v53 = vor.u32 %v1185_v43, %v1016_v42 }
  0x27   : > { %572 = vmatpush.bf16.msra.mxu0 %v961_v6  ;;  %598 = vmatpush.bf16.msra.mxu2 %v965_v7  ;;  %v1130_v52 = vld [vmem:[%s1282_s20 + $0x198] sm:$0xf0]  ;;  %v1113_v54 = vor.u32 %v1209_v47, %v1112_v44  ;;  %v1000_v55 = vld [vmem:[%s1282_s20 + $0x88] sm:$0xf]  ;;  %v1181_v56 = vld [vmem:[%s1282_s20 + $0x94] sm:$0xf0]  ;;  %v1037_v57 = vor.u32 %v1187_v48, %v1034_v50 }
  0x28   : > { %v1133_v58 = vor.u32 %v1211_v51, %v1130_v52  ;;  %v1096_v59 = vld [vmem:[%s1282_s20 + $0x148] sm:$0xf]  ;;  %v1205_v60 = vld [vmem:[%s1282_s20 + $0x154] sm:$0xf0]  ;;  %v1183_v61 = vld [vmem:[%s1282_s20 + $0xac] sm:$0xf]  ;;  %v1001_v1 = vor.u32 %v1181_v56, %v1000_v55 }
  0x29   : > { %v1018_v62 = vld [vmem:[%s1282_s20 + $0xb8] sm:$0xf0]  ;;  %v1207_v63 = vld [vmem:[%s1282_s20 + $0x16c] sm:$0xf]  ;;  %v1097_v2 = vor.u32 %v1205_v60, %v1096_v59  ;;  %v984_v3 = vld [vmem:[%s1282_s20 + $0x68] sm:$0xf] }
  0x2a   : > { %587 = vmatpush.bf16.msra.mxu1 %v1057_v19  ;;  %613 = vmatpush.bf16.msra.mxu3 %v1061_v20  ;;  %v1114_v0 = vld [vmem:[%s1282_s20 + $0x178] sm:$0xf0]  ;;  %v1177_v4 = vld [vmem:[%s1282_s20 + $0x74] sm:$0xf0]  ;;  %v1021_v5 = vor.u32 %v1183_v61, %v1018_v62  ;;  %v1080_v7 = vld [vmem:[%s1282_s20 + $0x128] sm:$0xf] }
  0x2b   : > { %573 = vmatpush.bf16.msra.mxu0 %v945_v21  ;;  %599 = vmatpush.bf16.msra.mxu2 %v949_v22  ;;  %v1117_v6 = vor.u32 %v1207_v63, %v1114_v0  ;;  %v1201_v8 = vld [vmem:[%s1282_s20 + $0x134] sm:$0xf0]  ;;  %v1179_v9 = vld [vmem:[%s1282_s20 + $0x8c] sm:$0xf]  ;;  %v1002_v10 = vld [vmem:[%s1282_s20 + $0x98] sm:$0xf0]  ;;  %v985_v13 = vor.u32 %v1177_v4, %v984_v3 }
  0x2c   : > { %v1203_v11 = vld [vmem:[%s1282_s20 + $0x14c] sm:$0xf]  ;;  %v1098_v12 = vld [vmem:[%s1282_s20 + $0x158] sm:$0xf0]  ;;  %v1081_v14 = vor.u32 %v1201_v8, %v1080_v7  ;;  %v968_v15 = vld [vmem:[%s1282_s20 + $0x48] sm:$0xf]  ;;  %v1005_v17 = vor.u32 %v1179_v9, %v1002_v10 }
  0x2d   : > { %1135 = vmatmul.msk.bf16.vlgmr.msra.gmra.mxu3 %vm550_vm1, %v1348_v31  ;;  %1134 = vmatmul.msk.bf16.vlgmr.msra.gmra.mxu1 %vm550_vm1, %v1348_v31  ;;  %v1173_v16 = vld [vmem:[%s1282_s20 + $0x54] sm:$0xf0]  ;;  %v1101_v18 = vor.u32 %v1203_v11, %v1098_v12  ;;  %v1064_v19 = vld [vmem:[%s1282_s20 + $0x108] sm:$0xf]  ;;  %v1175_v21 = vld [vmem:[%s1282_s20 + $0x6c] sm:$0xf] }
  0x2e   : > { %619 = vmatpush.bf16.msrb.mxu1 %v1049_v26  ;;  %634 = vmatpush.bf16.msrb.mxu3 %v562_v30  ;;  %v1197_v20 = vld [vmem:[%s1282_s20 + $0x114] sm:$0xf0]  ;;  %v986_v22 = vld [vmem:[%s1282_s20 + $0x78] sm:$0xf0]  ;;  %v1199_v23 = vld [vmem:[%s1282_s20 + $0x12c] sm:$0xf]  ;;  %v969_v27 = vor.u32 %v1173_v16, %v968_v15 }
  0x2f   : > { %574 = vmatpush.bf16.msra.mxu0 %v929_v38  ;;  %600 = vmatpush.bf16.msra.mxu2 %v933_v39  ;;  %v1082_v24 = vld [vmem:[%s1282_s20 + $0x138] sm:$0xf0]  ;;  %v1140_v25 = vld [vmem:[%s1395_s26] sm:$0xf]  ;;  %v1216_v26 = vld [vmem:[%s1395_s26 + $0xc] sm:$0xf0]  ;;  %v1065_v28 = vor.u32 %v1197_v20, %v1064_v19  ;;  %v989_v29 = vor.u32 %v1175_v21, %v986_v22 }
  0x30   : > { %v1085_v30 = vor.u32 %v1199_v23, %v1082_v24  ;;  %v952_v32 = vld [vmem:[%s1282_s20 + $0x28] sm:$0xf]  ;;  %v1169_v33 = vld [vmem:[%s1282_s20 + $0x34] sm:$0xf0]  ;;  %v1171_v34 = vld [vmem:[%s1282_s20 + $0x4c] sm:$0xf]  ;;  %v1141_v38 = vor.u32 %v1216_v26, %v1140_v25 }
  0x31   : > { %v970_v35 = vld [vmem:[%s1282_s20 + $0x58] sm:$0xf0]  ;;  %v1195_v36 = vld [vmem:[%s1282_s20 + $0x10c] sm:$0xf]  ;;  %v1148_v39 = vld [vmem:[%s1395_s26 + $0x8] sm:$0xf] }
  0x32   : > { %620 = vmatpush.bf16.msrb.mxu1 %v1033_v40  ;;  %635 = vmatpush.bf16.msrb.mxu3 %v1129_v41  ;;  %v1066_v37 = vld [vmem:[%s1282_s20 + $0x118] sm:$0xf0]  ;;  %v1217_v40 = vld [vmem:[%s1395_s26 + $0x14] sm:$0xf0]  ;;  %v953_v41 = vor.u32 %v1169_v33, %v952_v32  ;;  %v973_v42 = vor.u32 %v1171_v34, %v970_v35  ;;  %v936_v44 = vld [vmem:[%s1282_s20 + $0x8] sm:$0xf] }
  0x33   : > { %645 = vmatpush.bf16.msrb.mxu0 %v1053_v45  ;;  %660 = vmatpush.bf16.msrb.mxu2 %v565_v46  ;;  %v1069_v43 = vor.u32 %v1195_v36, %v1066_v37  ;;  %v1165_v45 = vld [vmem:[%s1282_s20 + $0x14] sm:$0xf0]  ;;  %v1167_v46 = vld [vmem:[%s1282_s20 + $0x2c] sm:$0xf]  ;;  %v1149_v47 = vor.u32 %v1217_v40, %v1148_v39  ;;  %v954_v48 = vld [vmem:[%s1282_s20 + $0x38] sm:$0xf0] }
  0x34   : > { %601 = vmatmul.bf16.vlgmr.msra.gmra.mxu2 %v1364_v49  ;;  %575 = vmatmul.bf16.vlgmr.msra.gmra.mxu0 %v1364_v49  ;;  %v1214_v50 = vld [vmem:[%s1395_s26 + $0x4] sm:$0xf]  ;;  %v1142_v51 = vld [vmem:[%s1395_s26 + $0x10] sm:$0xf0]  ;;  %v937_v52 = vor.u32 %v1165_v45, %v936_v44  ;;  %v1163_v55 = vld [vmem:[%s1282_s20 + $0xc] sm:$0xf] }
  0x35   : > { %v938_v56 = vld [vmem:[%s1282_s20 + $0x18] sm:$0xf0]  ;;  %v671_v61 = vld [vmem:[%s1443_s3] sm:$0xf] }
  0x36   : > { %621 = vmatpush.bf16.msrb.mxu1 %v1017_v53  ;;  %636 = vmatpush.bf16.msrb.mxu3 %v1113_v54  ;;  %v957_v53 = vor.u32 %v1167_v46, %v954_v48  ;;  %v1145_v54 = vor.u32 %v1214_v50, %v1142_v51  ;;  %v941_v59 = vor.u32 %v1163_v55, %v938_v56 }
  0x37   : > { %646 = vmatpush.bf16.msrb.mxu0 %v1037_v57  ;;  %661 = vmatpush.bf16.msrb.mxu2 %v1133_v58  ;;  %v1215_v57 = vld [vmem:[%s1395_s26 + $0xc] sm:$0xf]  ;;  %v1150_v58 = vld [vmem:[%s1395_s26 + $0x18] sm:$0xf0] }
  0x38   : > { %v1153_v60 = vor.u32 %v1215_v57, %v1150_v58 }
  0x3a   : > { %622 = vmatpush.bf16.msrb.mxu1 %v1001_v1  ;;  %637 = vmatpush.bf16.msrb.mxu3 %v1097_v2 }
  0x3b   : > { %647 = vmatpush.bf16.msrb.mxu0 %v1021_v5  ;;  %662 = vmatpush.bf16.msrb.mxu2 %v1117_v6 }
  0x3e   : > { %623 = vmatpush.bf16.msrb.mxu1 %v985_v13  ;;  %638 = vmatpush.bf16.msrb.mxu3 %v1081_v14 }
  0x3f   : > { %648 = vmatpush.bf16.msrb.mxu0 %v1005_v17  ;;  %663 = vmatpush.bf16.msrb.mxu2 %v1101_v18 }
  0x42   : > { %624 = vmatpush.bf16.msrb.mxu1 %v969_v27  ;;  %639 = vmatpush.bf16.msrb.mxu3 %v1065_v28 }
  0x43   : > { %649 = vmatpush.bf16.msrb.mxu0 %v989_v29  ;;  %664 = vmatpush.bf16.msrb.mxu2 %v1085_v30  ;;  %v1242_v30 = vmov 512.0  }
  0x44   : > { %1228 = vrcp.f32 %v1242_v30 }
  0x45   : > { %1136 = vmatmul.msk.bf16.vlgmr.msrb.gmra.mxu3 %vm550_vm1, %v1348_v31 }
  0x46   : > { %707 = vmatpush.bf16.msra.mxu3 %v1141_v38  ;;  %625 = vmatpush.bf16.msrb.mxu1 %v953_v41 }
  0x47   : > { %650 = vmatpush.bf16.msrb.mxu0 %v973_v42  ;;  %665 = vmatpush.bf16.msrb.mxu2 %v1069_v43 }
  0x4a   : > { %626 = vmatpush.bf16.msrb.mxu1 %v937_v52  ;;  %1137 = vmatmul.msk.bf16.vlgmr.msrb.gmra.mxu2 %vm550_vm1, %v1348_v31  ;;  %v1229_v32 = vpop.eup %1228 }
  0x4b   : > { %733 = vmatpush.bf16.msra.mxu2 %v1149_v47  ;;  %651 = vmatpush.bf16.msrb.mxu0 %v957_v53  ;;  %v758_v33 = vmul.f32 512.0, %v1229_v32  ;;  %vm762_vm3 = vweird.f32 %v1229_v32 }
  0x4d   : > { %627 = vmatmul.bf16.vlgmr.msrb.gmra.mxu1 %v1364_v49  ;;  %v759_v34 = vsub.f32 1.0, %v758_v33 }
  0x4e   : > { %720 = vmatpush.bf16.msra.mxu1 %v1145_v54 }
  0x4f   : > { %652 = vmatpush.bf16.msrb.mxu0 %v941_v59  ;;  %v760_v35 = vmul.f32 %v1229_v32, %v759_v34 }
  0x51   : > { %v761_v36 = vadd.f32 %v1229_v32, %v760_v35 }
  0x52   : > { %653 = vmatmul.bf16.vlgmr.msrb.gmra.mxu0 %v1364_v49 }
  0x53   : > { %746 = vmatpush.bf16.msra.mxu0 %v1153_v60  ;;  %v763_v37 = vsel %vm762_vm3, %v1229_v32, %v761_v36 }
  0x55   : > { %1154 = vmatmul.msk.bf16.vlgmr.msra.gmra.mxu3 %vm696_vm2, %v671_v61 }
  0x5a   : > { %1156 = vmatmul.msk.bf16.vlgmr.msra.gmra.mxu2 %vm696_vm2, %v671_v61 }
  0x5d   : > { %1155 = vmatmul.msk.bf16.vlgmr.msra.gmra.mxu1 %vm696_vm2, %v671_v61 }
  0x62   : > { %1157 = vmatmul.msk.bf16.vlgmr.msra.gmra.mxu0 %vm696_vm2, %v671_v61 }
  0xaa   : > { %v589_v31 = vpop.f32.mrf.mxu1 }
  0xb0   : > { %v615_v63 = vpop.f32.mrf.mxu3 }
  0xb1   : > { %v576_v62 = vpop.f32.mrf.mxu0 }
  0xb2   : > { %v591_v0 = vpop.f32.mrf.mxu1  ;;  %v590_v6 = vadd.f32 %v589_v31, %v576_v62 }
  0xb7   : > { %v602_v1 = vpop.f32.mrf.mxu2 }
  0xb8   : > { %v617_v3 = vpop.f32.mrf.mxu3  ;;  %v616_v49 = vadd.f32 %v615_v63, %v602_v1 }
  0xb9   : > { %v578_v2 = vpop.f32.mrf.mxu0 }
  0xba   : > { %v752_v10 = vadd.f32 %v616_v49, %v590_v6 }
  0xbf   : > { %v604_v4 = vpop.f32.mrf.mxu2 }
  0xc8   : > { %v641_v5 = vpop.f32.mrf.mxu3 }
  0xca   : > { %v628_v7 = vpop.f32.mrf.mxu1 }
  0xcb   : > { %v642_v8 = vadd.f32 %v641_v5, %v628_v7 }
  0xcd   : > { %v667_v9 = vpop.f32.mrf.mxu2  ;;  %v753_v14 = vadd.f32 %v752_v10, %v642_v8 }
  0xcf   : > { %v654_v11 = vpop.f32.mrf.mxu0 }
  0xd0   : > { %v668_v12 = vadd.f32 %v667_v9, %v654_v11  ;;  %v643_v13 = vpop.f32.mrf.mxu3 }
  0xd2   : > { %v630_v15 = vpop.f32.mrf.mxu1  ;;  %v754_v16 = vadd.f32 %v753_v14, %v668_v12 }
  0xd4   : > { %755 = vadd.xlane.f32.xlu0 %v754_v16 }
  0xd5   : > { %v669_v17 = vpop.f32.mrf.mxu2 }
  0xd7   : > { %v656_v18 = vpop.f32.mrf.mxu0 }
  0xd8   : > { %v709_v19 = vpop.f32.mrf.mxu3 }
  0xda   : > { %v722_v20 = vpop.f32.mrf.mxu1 }
  0xdb   : > { %v794_v21 = vadd.f32 %v722_v20, %v709_v19 }
  0xdd   : > { %v735_v22 = vpop.f32.mrf.mxu2 }
  0xde   : > { %v795_v23 = vadd.f32 %v794_v21, %v735_v22 }
  0xdf   : > { %v748_v24 = vpop.f32.mrf.mxu0 }
  0xe0   : > { %v711_v25 = vpop.f32.mrf.mxu3  ;;  %v796_v26 = vadd.f32 %v795_v23, %v748_v24 }
  0xe2   : > { %v724_v27 = vpop.f32.mrf.mxu1  ;;  %797 = vadd.xlane.f32.xlu0 %v796_v26 }
  0xe5   : > { %v737_v28 = vpop.f32.mrf.mxu2 }
  0xe7   : > { %v750_v29 = vpop.f32.mrf.mxu0 }
 0x147   : > { %v756_v38 = vpop.xlane.xlu0 %755 }
 0x148   : > { %v764_v39 = vmul.f32 %v763_v37, %v756_v38 }
 0x14a   : > { %v765_v40 = vsub.f32 %v590_v6, %v764_v39  ;;  %v766_v41 = vsub.f32 %v616_v49, %v764_v39  ;;  %v767_v42 = vsub.f32 %v642_v8, %v764_v39  ;;  %v768_v43 = vsub.f32 %v668_v12, %v764_v39 }
 0x14c   : > { %v769_v44 = vmul.f32 %v765_v40, %v765_v40  ;;  %v770_v45 = vmul.f32 %v766_v41, %v766_v41  ;;  %v771_v46 = vmul.f32 %v767_v42, %v767_v42  ;;  %v772_v48 = vmul.f32 %v768_v43, %v768_v43 }
 0x14e   : > { %v773_v47 = vadd.f32 %v770_v45, %v769_v44 }
 0x150   : > { %v774_v50 = vadd.f32 %v773_v47, %v771_v46 }
 0x152   : > { %v775_v51 = vadd.f32 %v774_v50, %v772_v48 }
 0x154   : > { %776 = vadd.xlane.f32.xlu1 %v775_v51 }
 0x155   : > { %v798_v52 = vpop.xlane.xlu0 %797 }
 0x156   : > { %v799_v53 = vmul.f32 %v798_v52, %v763_v37 }
 0x158   : > { %v800_v54 = vsub.f32 %v709_v19, %v799_v53  ;;  %v801_v55 = vsub.f32 %v722_v20, %v799_v53  ;;  %v802_v56 = vsub.f32 %v735_v22, %v799_v53  ;;  %v803_v57 = vsub.f32 %v748_v24, %v799_v53 }
 0x15a   : > { %v804_v58 = vmul.f32 %v800_v54, %v800_v54  ;;  %v805_v59 = vmul.f32 %v801_v55, %v801_v55  ;;  %v806_v60 = vmul.f32 %v802_v56, %v802_v56  ;;  %v807_v31 = vmul.f32 %v803_v57, %v803_v57 }
 0x15c   : > { %v808_v61 = vadd.f32 %v805_v59, %v804_v58 }
 0x15e   : > { %v809_v62 = vadd.f32 %v808_v61, %v806_v60 }
 0x160   : > { %v810_v63 = vadd.f32 %v809_v62, %v807_v31 }
 0x162   : > { %811 = vadd.xlane.f32.xlu1 %v810_v63 }
 0x1c7   : > { %v777_v0 = vpop.xlane.xlu1 %776 }
 0x1c8   : > { %v778_v1 = vmul.f32 %v777_v0, %v763_v37 }
 0x1ca   : > { %v779_v2 = vadd.f32 1e-05, %v778_v1 }
 0x1cc   : > { %1230 = vrsqrt.f32 %v779_v2  ;;  %vm786_vm5 = vweird.f32 %v779_v2 }
 0x1d2   : > { %v1231_v3 = vpop.eup %1230 }
 0x1d3   : > { %v781_v4 = vmul.f32 %v1231_v3, %v779_v2  ;;  %vm787_vm4 = vweird.f32 %v1231_v3 }
 0x1d4   : > { %vm788_vm6 = vmor %vm786_vm5, %vm787_vm4 }
 0x1d5   : > { %v812_v5 = vpop.xlane.xlu1 %811  ;;  %v782_v49 = vmul.f32 %v1231_v3, %v781_v4 }
 0x1d6   : > { %v813_v6 = vmul.f32 %v812_v5, %v763_v37 }
 0x1d7   : > { %v783_v8 = vmul.f32 0.5, %v782_v49 }
 0x1d8   : > { %v814_v7 = vadd.f32 1e-05, %v813_v6 }
 0x1d9   : > { %v784_v9 = vsub.f32 1.5, %v783_v8 }
 0x1da   : > { %1232 = vrsqrt.f32 %v814_v7  ;;  %vm821_vm8 = vweird.f32 %v814_v7 }
 0x1db   : > { %v785_v12 = vmul.f32 %v1231_v3, %v784_v9 }
 0x1dd   : > { %v789_v15 = vsel %vm788_vm6, %v1231_v3, %v785_v12 }
 0x1de   : > { %v790_v18 = vmul.f32 %v789_v15, %v765_v40  ;;  %v791_v19 = vmul.f32 %v789_v15, %v766_v41  ;;  %v792_v20 = vmul.f32 %v789_v15, %v767_v42  ;;  %v793_v21 = vmul.f32 %v789_v15, %v768_v43 }
 0x1e0   : > { %v1233_v10 = vpop.eup %1232 }
 0x1e1   : > { %v816_v11 = vmul.f32 %v1233_v10, %v814_v7  ;;  %vm822_vm7 = vweird.f32 %v1233_v10 }
 0x1e2   : > { %vm823_vm9 = vmor %vm821_vm8, %vm822_vm7 }
 0x1e3   : > { %v817_v13 = vmul.f32 %v1233_v10, %v816_v11 }
 0x1e5   : > { %v818_v14 = vmul.f32 0.5, %v817_v13 }
 0x1e7   : > { %v819_v16 = vsub.f32 1.5, %v818_v14 }
 0x1e9   : > { %v820_v17 = vmul.f32 %v1233_v10, %v819_v16 }
 0x1eb   : > { %v824_v22 = vsel %vm823_vm9, %v1233_v10, %v820_v17 }
 0x1ec   : > { %v825_v23 = vmul.f32 %v824_v22, %v800_v54  ;;  %v826_v24 = vmul.f32 %v824_v22, %v801_v55  ;;  %v827_v25 = vmul.f32 %v824_v22, %v802_v56  ;;  %v828_v26 = vmul.f32 %v824_v22, %v803_v57 }
 0x1ee   : > { %v829_v27 = vadd.f32 %v825_v23, %v790_v18  ;;  %v830_v28 = vadd.f32 %v826_v24, %v791_v19  ;;  %v831_v29 = vadd.f32 %v827_v25, %v792_v20  ;;  %v832_v30 = vadd.f32 %v828_v26, %v793_v21 }
 0x1f0   : > { %vm833_vm10 = vcmp.ge.f32.partialorder %v829_v27, 0.0  ;;  %vm834_vm11 = vcmp.ge.f32.partialorder %v830_v28, 0.0  ;;  %vm835_vm12 = vcmp.ge.f32.partialorder %v831_v29, 0.0  ;;  %vm836_vm13 = vcmp.ge.f32.partialorder %v832_v30, 0.0 }
 0x1f1   : > { %v837_v32 = vmul.f32 0.01, %v829_v27  ;;  %v838_v33 = vmul.f32 0.01, %v830_v28  ;;  %v839_v34 = vmul.f32 0.01, %v831_v29 }
 0x1f2   : > { %v840_v35 = vmul.f32 0.01, %v832_v30 }
 0x1f3   : > { %v841_v36 = vsel %vm833_vm10, %v829_v27, %v837_v32  ;;  %v842_v37 = vsel %vm834_vm11, %v830_v28, %v838_v33  ;;  %v843_v38 = vsel %vm835_vm12, %v831_v29, %v839_v34 }
 0x1f4   : > { %v844_v39 = vsel %vm836_vm13, %v832_v30, %v840_v35  ;;  %845 = vst [vmem:[%s217_s5] sm:$0xff] %v841_v36 }
 0x1f5   : > { %846 = vst [vmem:[%s217_s5 + $0x8] sm:$0xff] %v842_v37 }
 0x1f6   : > { %847 = vst [vmem:[%s217_s5 + $0x10] sm:$0xff] %v843_v38 }
 0x1f7   : > { %848 = vst [vmem:[%s217_s5 + $0x18] sm:$0xff] %v844_v39 }
 0x1f8 PF: > { %s14_s15 = sadd.s32 1, %s1240_s15  }
 0x1f9   : > { %p11_p4 = scmp.ge.s32.totalorder %s14_s15, 4  }
 0x1fb   :  { %13 = sbr.rel (!%p11_p4) target bundleno = 1 (0x1), region = 69 }

// kernel: _decoder_forward.9
= control target key start
LH: loop header
LB: loop body
LE: loop exit
PB: predicated region body
PF: predicated region fallthrough
CT: control target
= control target key end

     0   :  { %vm57_vm0 = vcmask 1043456   ;;  %vm50_vm1 = vcmask 64512   ;;  %s449_s0 = inlined_call_operand.vmem [shape: bf16[1,8,1024], index: 0, kind: input, shape index: {}]   ;;  %s450_s1 = inlined_call_operand.vmem [shape: bf16[32,8], index: 1, kind: input, shape index: {}]   ;;  %s451_s2 = inlined_call_operand.vmem [shape: f32[1,32,1024], index: 2, kind: output, shape index: {}]  }
   0x1   :  { %v16_v0 = vld [vmem:[%s449_s0] sm:$0xff]  ;;  %v17_v1 = vld [vmem:[%s449_s0 + $0x8] sm:$0xff]  ;;  %v19_v6 = vld [vmem:[%s449_s0 + $0x18] sm:$0xff] }
   0x2   :  { %v34_v2 = vunpack.c.l.b16 %v16_v0  ;;  %v35_v3 = vunpack.c.h.b16 %v16_v0  ;;  %v36_v4 = vunpack.c.l.b16 %v17_v1  ;;  %v37_v5 = vunpack.c.h.b16 %v17_v1  ;;  %v18_v7 = vld [vmem:[%s449_s0 + $0x10] sm:$0xff]  ;;  %v294_v24 = vld [vmem:[%s450_s1] sm:$0xff]  ;;  %v295_v29 = vld [vmem:[%s450_s1 + $0x8] sm:$0xff] }
   0x3   :  { %v40_v8 = vunpack.c.l.b16 %v19_v6  ;;  %v41_v9 = vunpack.c.h.b16 %v19_v6  ;;  %v38_v10 = vunpack.c.l.b16 %v18_v7  ;;  %v39_v11 = vunpack.c.h.b16 %v18_v7 }
   0x4   :  { %v42_v12 = vpack.c.b16 %v34_v2, %v34_v2  ;;  %v43_v13 = vpack.c.b16 %v35_v3, %v35_v3  ;;  %v44_v14 = vpack.c.b16 %v36_v4, %v36_v4  ;;  %v45_v15 = vpack.c.b16 %v37_v5, %v37_v5 }
   0x5   :  { %v48_v16 = vpack.c.b16 %v40_v8, %v40_v8  ;;  %v49_v17 = vpack.c.b16 %v41_v9, %v41_v9  ;;  %v46_v18 = vpack.c.b16 %v38_v10, %v38_v10  ;;  %v47_v19 = vpack.c.b16 %v39_v11, %v39_v11 }
   0x6   :  { %v59_v20 = vsel %vm57_vm0, %v42_v12, 0  ;;  %v62_v21 = vsel %vm57_vm0, %v43_v13, 0  ;;  %v65_v22 = vsel %vm57_vm0, %v44_v14, 0  ;;  %v68_v23 = vsel %vm57_vm0, %v45_v15, 0 }
   0x7   :  { %89 = vmatpush.bf16.msra.mxu0 %v59_v20  ;;  %108 = vmatpush.bf16.msra.mxu1 %v62_v21  ;;  %v77_v25 = vsel %vm57_vm0, %v48_v16, 0  ;;  %v80_v26 = vsel %vm57_vm0, %v49_v17, 0  ;;  %v71_v27 = vsel %vm57_vm0, %v46_v18, 0  ;;  %v74_v28 = vsel %vm57_vm0, %v47_v19, 0 }
   0x8   :  { %127 = vmatpush.bf16.msra.mxu2 %v65_v22  ;;  %146 = vmatpush.bf16.msra.mxu3 %v68_v23 }
   0xa   :  { %278 = vmatmul.msk.bf16.vlgmr.msra.gmra.mxu0 %vm50_vm1, %v294_v24  ;;  %280 = vmatmul.msk.bf16.vlgmr.msra.gmra.mxu1 %vm50_vm1, %v294_v24 }
   0xb   :  { %282 = vmatmul.msk.bf16.vlgmr.msra.gmra.mxu2 %vm50_vm1, %v294_v24  ;;  %284 = vmatmul.msk.bf16.vlgmr.msra.gmra.mxu3 %vm50_vm1, %v294_v24 }
   0xc   :  { %203 = vmatpush.bf16.msrb.mxu2 %v77_v25  ;;  %222 = vmatpush.bf16.msrb.mxu3 %v80_v26 }
   0xd   :  { %165 = vmatpush.bf16.msrb.mxu0 %v71_v27  ;;  %184 = vmatpush.bf16.msrb.mxu1 %v74_v28 }
  0x1a   :  { %279 = vmatmul.msk.bf16.gmra.mxu0 %vm50_vm1, %v295_v29  ;;  %281 = vmatmul.msk.bf16.gmra.mxu1 %vm50_vm1, %v295_v29 }
  0x1b   :  { %283 = vmatmul.msk.bf16.gmra.mxu2 %vm50_vm1, %v295_v29  ;;  %285 = vmatmul.msk.bf16.gmra.mxu3 %vm50_vm1, %v295_v29 }
  0x2a   :  { %286 = vmatmul.msk.bf16.vlgmr.msrb.gmra.mxu0 %vm50_vm1, %v294_v24  ;;  %288 = vmatmul.msk.bf16.vlgmr.msrb.gmra.mxu1 %vm50_vm1, %v294_v24 }
  0x2b   :  { %290 = vmatmul.msk.bf16.vlgmr.msrb.gmra.mxu2 %vm50_vm1, %v294_v24  ;;  %292 = vmatmul.msk.bf16.vlgmr.msrb.gmra.mxu3 %vm50_vm1, %v294_v24 }
  0x3a   :  { %287 = vmatmul.msk.bf16.gmra.mxu0 %vm50_vm1, %v295_v29  ;;  %289 = vmatmul.msk.bf16.gmra.mxu1 %vm50_vm1, %v295_v29 }
  0x3b   :  { %291 = vmatmul.msk.bf16.gmra.mxu2 %vm50_vm1, %v295_v29  ;;  %293 = vmatmul.msk.bf16.gmra.mxu3 %vm50_vm1, %v295_v29 }
  0x87   :  { %v91_v30 = vpop.f32.mrf.mxu0  ;;  %v110_v31 = vpop.f32.mrf.mxu1 }
  0x88   :  { %234 = vst [vmem:[%s451_s2] sm:$0xff] %v91_v30 }
  0x89   :  { %235 = vst [vmem:[%s451_s2 + $0x8] sm:$0xff] %v110_v31 }
  0x8e   :  { %v129_v32 = vpop.f32.mrf.mxu2  ;;  %v148_v33 = vpop.f32.mrf.mxu3 }
  0x8f   :  { %236 = vst [vmem:[%s451_s2 + $0x10] sm:$0xff] %v129_v32  ;;  %v93_v34 = vpop.f32.mrf.mxu0  ;;  %v112_v35 = vpop.f32.mrf.mxu1 }
  0x90   :  { %237 = vst [vmem:[%s451_s2 + $0x18] sm:$0xff] %v148_v33 }
  0x91   :  { %242 = vst [vmem:[%s451_s2 + $0x40] sm:$0xff] %v93_v34 }
  0x92   :  { %243 = vst [vmem:[%s451_s2 + $0x48] sm:$0xff] %v112_v35 }
  0x96   :  { %v131_v36 = vpop.f32.mrf.mxu2  ;;  %v150_v37 = vpop.f32.mrf.mxu3 }
  0x97   :  { %244 = vst [vmem:[%s451_s2 + $0x50] sm:$0xff] %v131_v36  ;;  %v96_v38 = vpop.f32.mrf.mxu0  ;;  %v115_v39 = vpop.f32.mrf.mxu1 }
  0x98   :  { %245 = vst [vmem:[%s451_s2 + $0x58] sm:$0xff] %v150_v37 }
  0x99   :  { %250 = vst [vmem:[%s451_s2 + $0x80] sm:$0xff] %v96_v38 }
  0x9a   :  { %251 = vst [vmem:[%s451_s2 + $0x88] sm:$0xff] %v115_v39 }
  0x9e   :  { %v134_v40 = vpop.f32.mrf.mxu2  ;;  %v153_v41 = vpop.f32.mrf.mxu3 }
  0x9f   :  { %252 = vst [vmem:[%s451_s2 + $0x90] sm:$0xff] %v134_v40  ;;  %v98_v42 = vpop.f32.mrf.mxu0  ;;  %v117_v43 = vpop.f32.mrf.mxu1 }
  0xa0   :  { %253 = vst [vmem:[%s451_s2 + $0x98] sm:$0xff] %v153_v41 }
  0xa1   :  { %258 = vst [vmem:[%s451_s2 + $0xc0] sm:$0xff] %v98_v42 }
  0xa2   :  { %259 = vst [vmem:[%s451_s2 + $0xc8] sm:$0xff] %v117_v43 }
  0xa6   :  { %v136_v44 = vpop.f32.mrf.mxu2  ;;  %v155_v45 = vpop.f32.mrf.mxu3 }
  0xa7   :  { %260 = vst [vmem:[%s451_s2 + $0xd0] sm:$0xff] %v136_v44  ;;  %v167_v46 = vpop.f32.mrf.mxu0  ;;  %v186_v47 = vpop.f32.mrf.mxu1 }
  0xa8   :  { %261 = vst [vmem:[%s451_s2 + $0xd8] sm:$0xff] %v155_v45 }
  0xa9   :  { %238 = vst [vmem:[%s451_s2 + $0x20] sm:$0xff] %v167_v46 }
  0xaa   :  { %239 = vst [vmem:[%s451_s2 + $0x28] sm:$0xff] %v186_v47 }
  0xae   :  { %v205_v48 = vpop.f32.mrf.mxu2  ;;  %v224_v49 = vpop.f32.mrf.mxu3 }
  0xaf   :  { %240 = vst [vmem:[%s451_s2 + $0x30] sm:$0xff] %v205_v48  ;;  %v169_v50 = vpop.f32.mrf.mxu0  ;;  %v188_v51 = vpop.f32.mrf.mxu1 }
  0xb0   :  { %241 = vst [vmem:[%s451_s2 + $0x38] sm:$0xff] %v224_v49 }
  0xb1   :  { %246 = vst [vmem:[%s451_s2 + $0x60] sm:$0xff] %v169_v50 }
  0xb2   :  { %247 = vst [vmem:[%s451_s2 + $0x68] sm:$0xff] %v188_v51 }
  0xb6   :  { %v207_v52 = vpop.f32.mrf.mxu2  ;;  %v226_v53 = vpop.f32.mrf.mxu3 }
  0xb7   :  { %248 = vst [vmem:[%s451_s2 + $0x70] sm:$0xff] %v207_v52  ;;  %v172_v54 = vpop.f32.mrf.mxu0  ;;  %v191_v55 = vpop.f32.mrf.mxu1 }
  0xb8   :  { %249 = vst [vmem:[%s451_s2 + $0x78] sm:$0xff] %v226_v53 }
  0xb9   :  { %254 = vst [vmem:[%s451_s2 + $0xa0] sm:$0xff] %v172_v54 }
  0xba   :  { %255 = vst [vmem:[%s451_s2 + $0xa8] sm:$0xff] %v191_v55 }
  0xbe   :  { %v210_v56 = vpop.f32.mrf.mxu2  ;;  %v229_v57 = vpop.f32.mrf.mxu3 }
  0xbf   :  { %256 = vst [vmem:[%s451_s2 + $0xb0] sm:$0xff] %v210_v56  ;;  %v174_v58 = vpop.f32.mrf.mxu0  ;;  %v193_v59 = vpop.f32.mrf.mxu1 }
  0xc0   :  { %257 = vst [vmem:[%s451_s2 + $0xb8] sm:$0xff] %v229_v57 }
  0xc1   :  { %262 = vst [vmem:[%s451_s2 + $0xe0] sm:$0xff] %v174_v58 }
  0xc2   :  { %263 = vst [vmem:[%s451_s2 + $0xe8] sm:$0xff] %v193_v59 }
  0xc6   :  { %v212_v60 = vpop.f32.mrf.mxu2  ;;  %v231_v61 = vpop.f32.mrf.mxu3 }
  0xc7   :  { %264 = vst [vmem:[%s451_s2 + $0xf0] sm:$0xff] %v212_v60 }
  0xc8   :  { %265 = vst [vmem:[%s451_s2 + $0xf8] sm:$0xff] %v231_v61 }

// kernel: _decoder_forward.10
= control target key start
LH: loop header
LB: loop body
LE: loop exit
PB: predicated region body
PF: predicated region fallthrough
CT: control target
= control target key end

     0   :  { %s5147_s9 = smov 0   ;;  %s6421_s0 = inlined_call_operand.vmem [shape: bf16[2,168,4096], index: 0, kind: input, shape index: {}]   ;;  %s6422_s1 = inlined_call_operand.vmem [shape: bf16[8,168], index: 1, kind: input, shape index: {}]   ;;  %s6423_s2 = inlined_call_operand.vmem [shape: f32[2,8,4096], index: 2, kind: output, shape index: {}]  }
   0x1 LB: > { %s3466_s10 = sadd.s32 4294967295, %s5129_s9   ;;  %p3470_p0 = scmp.ge.s32.totalorder %s5129_s9, 1  ;;  %s5129_s9 = sphi %s5147_s9, %s12_s9  }
   0x2   : > { %p112_p1 = scmp.lt.s32.totalorder %s5129_s9, 3 }
   0x4   : > { %p113_p2 = pnand %p3470_p0, %p112_p1 }
   0x5   : > { %p134_p3 = scmp.lt.s32.totalorder (!%p113_p2), %s3466_s10, 1 }
   0x6   : > { %116 = sbr.rel (%p113_p2) target bundleno = 875 (0x36b), region = 28 }
   0xb   : > { %s6425_s10 = smov (!%p134_p3, %s3466_s10), 1  ;;  %vm2172_vm0 = vcmask 1043456   ;;  %v5182_v23 = vld [vmem:[%s6422_s1] sm:$0xff]  ;;  %vm2168_vm1 = vcmask 326656  }
   0xc   : > { %s5109_s11 = smul.u32 2688, %s6425_s10  ;;  %v484_v41 = vunpack.c.h.b16 %v5182_v23  ;;  %s4788_s17 = sshll.u32 %s6425_s10, 8 }
   0xd   : > { %s6305_s20 = scalar_lea.vmem %s6423_s2, %s4788_s17 }
   0xe   : > { %s5161_s14 = scalar_lea.vmem %s6421_s0, %s5109_s11  ;;  %v5207_v55 = vpack.c.b16 %v484_v41, %v484_v41 }
   0xf   : > { %v4372_v0 = vld [vmem:[%s5161_s14 + $0x700] sm:$0xf]  ;;  %v5077_v10 = vld [vmem:[%s5161_s14 + $0x904] sm:$0xf]  ;;  %v4380_v15 = vld [vmem:[%s5161_s14 + $0x708] sm:$0xf] }
  0x10   : > { %v5029_v1 = vld [vmem:[%s5161_s14 + $0x77c] sm:$0xf0]  ;;  %v4630_v14 = vld [vmem:[%s5161_s14 + $0x980] sm:$0xf0]  ;;  %v5030_v16 = vld [vmem:[%s5161_s14 + $0x784] sm:$0xf0] }
  0x11   : > { %v466_v2 = vld [vmem:[%s5161_s14 + $0xa00] sm:$0xff]  ;;  %v4373_v3 = vor.u32 %v5029_v1, %v4372_v0  ;;  %v4381_v17 = vor.u32 %v5030_v16, %v4380_v15  ;;  %v4633_v25 = vor.u32 %v5077_v10, %v4630_v14  ;;  %v5187_v28 = vld [vmem:[%s5161_s14 + $0xa08] sm:$0xff] }
  0x12   : > { %v1464_v4 = vunpack.c.l.b16 %v466_v2  ;;  %v1465_v5 = vunpack.c.h.b16 %v466_v2  ;;  %v4244_v6 = vld [vmem:[%s5161_s14 + $0x600] sm:$0xf]  ;;  %v5045_v27 = vld [vmem:[%s5161_s14 + $0x804] sm:$0xf]  ;;  %v1466_v31 = vunpack.c.l.b16 %v5187_v28  ;;  %v4252_v32 = vld [vmem:[%s5161_s14 + $0x608] sm:$0xf]  ;;  %v1467_v15 = vunpack.c.h.b16 %v5187_v28 }
  0x13   : > { %v4997_v7 = vld [vmem:[%s5161_s14 + $0x67c] sm:$0xf0]  ;;  %2269 = vmatpush.bf16.msra.mxu0 %v4373_v3  ;;  %2321 = vmatpush.bf16.msra.mxu1 %v4381_v17  ;;  %v4502_v30 = vld [vmem:[%s5161_s14 + $0x880] sm:$0xf0]  ;;  %v4998_v33 = vld [vmem:[%s5161_s14 + $0x684] sm:$0xf0] }
  0x14   : > { %v4628_v8 = vld [vmem:[%s5161_s14 + $0x900] sm:$0xf]  ;;  %v1816_v11 = vpack.c.b16 %v1464_v4, %v1464_v4  ;;  %v1817_v12 = vpack.c.b16 %v1465_v5, %v1465_v5  ;;  %v4245_v13 = vor.u32 %v4997_v7, %v4244_v6  ;;  %v5013_v34 = vld [vmem:[%s5161_s14 + $0x704] sm:$0xf]  ;;  %v4253_v36 = vor.u32 %v4998_v33, %v4252_v32  ;;  %v4124_v40 = vld [vmem:[%s5161_s14 + $0x508] sm:$0xf] }
  0x15   : > { %v5093_v9 = vld [vmem:[%s5161_s14 + $0x97c] sm:$0xf0]  ;;  %v4374_v35 = vld [vmem:[%s5161_s14 + $0x780] sm:$0xf0]  ;;  %v1818_v37 = vpack.c.b16 %v1466_v31, %v1466_v31  ;;  %v4505_v43 = vor.u32 %v5045_v27, %v4502_v30  ;;  %v4966_v44 = vld [vmem:[%s5161_s14 + $0x584] sm:$0xf0] }
  0x16   : > { %v4116_v18 = vld [vmem:[%s5161_s14 + $0x500] sm:$0xf]  ;;  %v2174_v20 = vsel %vm2172_vm0, %v1816_v11, 0  ;;  %v2177_v21 = vsel %vm2172_vm0, %v1817_v12, 0  ;;  %v4629_v24 = vor.u32 %v5093_v9, %v4628_v8  ;;  %v4377_v45 = vor.u32 %v5013_v34, %v4374_v35  ;;  %v4981_v46 = vld [vmem:[%s5161_s14 + $0x604] sm:$0xf] }
  0x17   : > { %v4965_v19 = vld [vmem:[%s5161_s14 + $0x57c] sm:$0xf0]  ;;  %2287 = vmatpush.bf16.msra.mxu2 %v2174_v20  ;;  %2313 = vmatpush.bf16.msra.mxu3 %v2177_v21  ;;  %v4246_v47 = vld [vmem:[%s5161_s14 + $0x680] sm:$0xf0]  ;;  %v4636_v48 = vld [vmem:[%s5161_s14 + $0x908] sm:$0xf]  ;;  %v4125_v52 = vor.u32 %v4966_v44, %v4124_v40 }
  0x18   : > { %v4500_v22 = vld [vmem:[%s5161_s14 + $0x800] sm:$0xf]  ;;  %2270 = vmatpush.bf16.msra.mxu0 %v4245_v13  ;;  %v4117_v29 = vor.u32 %v4965_v19, %v4116_v18  ;;  %2322 = vmatpush.bf16.msra.mxu1 %v4253_v36  ;;  %v2180_v49 = vsel %vm2172_vm0, %v1818_v37, 0  ;;  %v5094_v51 = vld [vmem:[%s5161_s14 + $0x984] sm:$0xf0]  ;;  %v4249_v58 = vor.u32 %v4981_v46, %v4246_v47  ;;  %v5238_v30 = vld [vmem:[%s5161_s14 + $0xa10] sm:$0xff] }
  0x19   : > { %v5061_v26 = vld [vmem:[%s5161_s14 + $0x87c] sm:$0xf0]  ;;  %v3996_v56 = vld [vmem:[%s5161_s14 + $0x408] sm:$0xf]  ;;  %v4637_v59 = vor.u32 %v5094_v51, %v4636_v48  ;;  %v4949_v60 = vld [vmem:[%s5161_s14 + $0x504] sm:$0xf] }
  0x1a   : > { %v3988_v38 = vld [vmem:[%s5161_s14 + $0x400] sm:$0xf]  ;;  %v4501_v42 = vor.u32 %v5061_v26, %v4500_v22  ;;  %v4934_v57 = vld [vmem:[%s5161_s14 + $0x484] sm:$0xf0]  ;;  %v4118_v61 = vld [vmem:[%s5161_s14 + $0x580] sm:$0xf0] }
  0x1b   : > { %v4933_v39 = vld [vmem:[%s5161_s14 + $0x47c] sm:$0xf0]  ;;  %2288 = vmatpush.bf16.msra.mxu2 %v4629_v24  ;;  %2314 = vmatpush.bf16.msra.mxu3 %v4633_v25  ;;  %v4508_v63 = vld [vmem:[%s5161_s14 + $0x808] sm:$0xf]  ;;  %v5014_v1 = vld [vmem:[%s5161_s14 + $0x70c] sm:$0xf]  ;;  %v3997_v2 = vor.u32 %v4934_v57, %v3996_v56  ;;  %v4121_v8 = vor.u32 %v4949_v60, %v4118_v61 }
  0x1c   : > { %2271 = vmatpush.bf16.msra.mxu0 %v4117_v29  ;;  %v3989_v50 = vor.u32 %v4933_v39, %v3988_v38  ;;  %v3860_v53 = vld [vmem:[%s5161_s14 + $0x300] sm:$0xf]  ;;  %2323 = vmatpush.bf16.msra.mxu1 %v4125_v52  ;;  %v5062_v0 = vld [vmem:[%s5161_s14 + $0x884] sm:$0xf0]  ;;  %v4382_v3 = vld [vmem:[%s5161_s14 + $0x788] sm:$0xf0]  ;;  %v1819_v29 = vpack.c.b16 %v1467_v15, %v1467_v15  ;;  %v1468_v38 = vunpack.c.l.b16 %v5238_v30  ;;  %v483_v39 = vunpack.c.l.b16 %v5182_v23 }
  0x1d   : > { %v4901_v54 = vld [vmem:[%s5161_s14 + $0x37c] sm:$0xf0]  ;;  %v3868_v6 = vld [vmem:[%s5161_s14 + $0x308] sm:$0xf]  ;;  %v4509_v9 = vor.u32 %v5062_v0, %v4508_v63  ;;  %v4385_v10 = vor.u32 %v5014_v1, %v4382_v3  ;;  %v4917_v12 = vld [vmem:[%s5161_s14 + $0x404] sm:$0xf] }
  0x1e   : > { %v3861_v62 = vor.u32 %v4901_v54, %v3860_v53  ;;  %v3732_v4 = vld [vmem:[%s5161_s14 + $0x200] sm:$0xf]  ;;  %v4902_v7 = vld [vmem:[%s5161_s14 + $0x384] sm:$0xf0]  ;;  %v3990_v13 = vld [vmem:[%s5161_s14 + $0x480] sm:$0xf0]  ;;  %v1820_v52 = vpack.c.b16 %v1468_v38, %v1468_v38  ;;  %v5256_v53 = vpack.c.b16 %v483_v39, %v483_v39 }
  0x1f   : > { %2289 = vmatpush.bf16.msra.mxu2 %v4501_v42  ;;  %2315 = vmatpush.bf16.msra.mxu3 %v4505_v43  ;;  %v4869_v5 = vld [vmem:[%s5161_s14 + $0x27c] sm:$0xf0]  ;;  %v4982_v14 = vld [vmem:[%s5161_s14 + $0x60c] sm:$0xf]  ;;  %v3869_v17 = vor.u32 %v4902_v7, %v3868_v6  ;;  %v3740_v20 = vld [vmem:[%s5161_s14 + $0x208] sm:$0xf]  ;;  %v3993_v22 = vor.u32 %v4917_v12, %v3990_v13  ;;  %v1469_v7 = vunpack.c.h.b16 %v5238_v30 }
  0x20   : > { %2272 = vmatpush.bf16.msra.mxu0 %v3989_v50  ;;  %2324 = vmatpush.bf16.msra.mxu1 %v3997_v2  ;;  %v3733_v11 = vor.u32 %v4869_v5, %v3732_v4  ;;  %v4254_v16 = vld [vmem:[%s5161_s14 + $0x688] sm:$0xf0]  ;;  %v3604_v18 = vld [vmem:[%s5161_s14 + $0x100] sm:$0xf]  ;;  %v4870_v21 = vld [vmem:[%s5161_s14 + $0x284] sm:$0xf0] }
  0x21   : > { %v4837_v19 = vld [vmem:[%s5161_s14 + $0x17c] sm:$0xf0]  ;;  %v4885_v24 = vld [vmem:[%s5161_s14 + $0x304] sm:$0xf]  ;;  %v4257_v25 = vor.u32 %v4982_v14, %v4254_v16  ;;  %v4950_v28 = vld [vmem:[%s5161_s14 + $0x50c] sm:$0xf]  ;;  %v3741_v32 = vor.u32 %v4870_v21, %v3740_v20 }
  0x22   : > { %4755 = vmatmul.msk.bf16.vlgmr.msra.gmra.mxu3 %vm2168_vm1, %v5207_v55  ;;  %4754 = vmatmul.msk.bf16.vlgmr.msra.gmra.mxu2 %vm2168_vm1, %v5207_v55  ;;  %v3605_v26 = vor.u32 %v4837_v19, %v3604_v18  ;;  %v3862_v27 = vld [vmem:[%s5161_s14 + $0x380] sm:$0xf0]  ;;  %v4126_v31 = vld [vmem:[%s5161_s14 + $0x588] sm:$0xf0]  ;;  %v3476_v33 = vld [vmem:[%s5161_s14] sm:$0xf] }
  0x23   : > { %2295 = vmatpush.bf16.msrb.mxu2 %v4377_v45  ;;  %2339 = vmatpush.bf16.msrb.mxu3 %v2180_v49  ;;  %v4805_v34 = vld [vmem:[%s5161_s14 + $0x7c] sm:$0xf0]  ;;  %v3612_v35 = vld [vmem:[%s5161_s14 + $0x108] sm:$0xf]  ;;  %v3865_v37 = vor.u32 %v4885_v24, %v3862_v27  ;;  %v4129_v40 = vor.u32 %v4950_v28, %v4126_v31  ;;  %v4853_v42 = vld [vmem:[%s5161_s14 + $0x204] sm:$0xf] }
  0x24   : > { %2273 = vmatpush.bf16.msra.mxu0 %v3861_v62  ;;  %2325 = vmatpush.bf16.msra.mxu1 %v3869_v17  ;;  %v4838_v36 = vld [vmem:[%s5161_s14 + $0x184] sm:$0xf0]  ;;  %v3477_v41 = vor.u32 %v4805_v34, %v3476_v33  ;;  %v3734_v43 = vld [vmem:[%s5161_s14 + $0x280] sm:$0xf0]  ;;  %v2183_v44 = vsel %vm2172_vm0, %v1819_v29, 0  ;;  %v2186_v3 = vsel %vm2172_vm0, %v1820_v52, 0 }
  0x25   : > { %v4918_v45 = vld [vmem:[%s5161_s14 + $0x40c] sm:$0xf]  ;;  %v3613_v47 = vor.u32 %v4838_v36, %v3612_v35  ;;  %v3484_v50 = vld [vmem:[%s5161_s14 + $0x8] sm:$0xf]  ;;  %v3737_v51 = vor.u32 %v4853_v42, %v3734_v43  ;;  %v4821_v56 = vld [vmem:[%s5161_s14 + $0x104] sm:$0xf] }
  0x26   : > { %v3998_v46 = vld [vmem:[%s5161_s14 + $0x488] sm:$0xf0]  ;;  %v4806_v23 = vld [vmem:[%s5161_s14 + $0x84] sm:$0xf0]  ;;  %v3606_v57 = vld [vmem:[%s5161_s14 + $0x180] sm:$0xf0] }
  0x27   : > { %2296 = vmatpush.bf16.msrb.mxu2 %v4249_v58  ;;  %2340 = vmatpush.bf16.msrb.mxu3 %v4637_v59  ;;  %v5078_v48 = vld [vmem:[%s5161_s14 + $0x90c] sm:$0xf]  ;;  %v4001_v54 = vor.u32 %v4918_v45, %v3998_v46  ;;  %v3485_v61 = vor.u32 %v4806_v23, %v3484_v50  ;;  %v5015_v0 = vld [vmem:[%s5161_s14 + $0x714] sm:$0xf]  ;;  %v3609_v2 = vor.u32 %v4821_v56, %v3606_v57  ;;  %v4644_v4 = vld [vmem:[%s5161_s14 + $0x910] sm:$0xf] }
  0x28   : > { %2274 = vmatpush.bf16.msra.mxu0 %v3733_v11  ;;  %2326 = vmatpush.bf16.msra.mxu1 %v3741_v32  ;;  %v4638_v49 = vld [vmem:[%s5161_s14 + $0x988] sm:$0xf0]  ;;  %v4390_v1 = vld [vmem:[%s5161_s14 + $0x790] sm:$0xf0]  ;;  %v5095_v5 = vld [vmem:[%s5161_s14 + $0x98c] sm:$0xf0] }
  0x29   : > { %v4641_v58 = vor.u32 %v5078_v48, %v4638_v49  ;;  %v4886_v59 = vld [vmem:[%s5161_s14 + $0x30c] sm:$0xf]  ;;  %v4388_v13 = vld [vmem:[%s5161_s14 + $0x710] sm:$0xf]  ;;  %v4393_v15 = vor.u32 %v5015_v0, %v4390_v1  ;;  %v4645_v16 = vor.u32 %v5095_v5, %v4644_v4  ;;  %v4983_v18 = vld [vmem:[%s5161_s14 + $0x614] sm:$0xf] }
  0x2a   : > { %v3870_v60 = vld [vmem:[%s5161_s14 + $0x388] sm:$0xf0]  ;;  %v5031_v14 = vld [vmem:[%s5161_s14 + $0x78c] sm:$0xf0]  ;;  %v4262_v19 = vld [vmem:[%s5161_s14 + $0x690] sm:$0xf0] }
  0x2b   : > { %2297 = vmatpush.bf16.msrb.mxu2 %v4121_v8  ;;  %2341 = vmatpush.bf16.msrb.mxu3 %v4509_v9  ;;  %v5046_v62 = vld [vmem:[%s5161_s14 + $0x80c] sm:$0xf]  ;;  %v3873_v6 = vor.u32 %v4886_v59, %v3870_v60  ;;  %v4789_v8 = vld [vmem:[%s5161_s14 + $0x4] sm:$0xf]  ;;  %v4389_v21 = vor.u32 %v5031_v14, %v4388_v13  ;;  %v4516_v24 = vld [vmem:[%s5161_s14 + $0x810] sm:$0xf]  ;;  %v4265_v30 = vor.u32 %v4983_v18, %v4262_v19 }
  0x2c   : > { %2275 = vmatpush.bf16.msra.mxu0 %v3605_v26  ;;  %2327 = vmatpush.bf16.msra.mxu1 %v3613_v47  ;;  %v4510_v63 = vld [vmem:[%s5161_s14 + $0x888] sm:$0xf0]  ;;  %v3478_v9 = vld [vmem:[%s5161_s14 + $0x80] sm:$0xf0]  ;;  %v1821_v26 = vpack.c.b16 %v1469_v7, %v1469_v7  ;;  %v4260_v28 = vld [vmem:[%s5161_s14 + $0x610] sm:$0xf] }
  0x2d   : > { %v4513_v11 = vor.u32 %v5046_v62, %v4510_v63  ;;  %v3742_v12 = vld [vmem:[%s5161_s14 + $0x288] sm:$0xf0]  ;;  %v3481_v17 = vor.u32 %v4789_v8, %v3478_v9  ;;  %v4999_v29 = vld [vmem:[%s5161_s14 + $0x68c] sm:$0xf0]  ;;  %v4951_v32 = vld [vmem:[%s5161_s14 + $0x514] sm:$0xf] }
  0x2e   : > { %v3614_v27 = vld [vmem:[%s5161_s14 + $0x188] sm:$0xf0]  ;;  %v4134_v33 = vld [vmem:[%s5161_s14 + $0x590] sm:$0xf0]  ;;  %v4261_v35 = vor.u32 %v4999_v29, %v4260_v28  ;;  %v2189_v36 = vsel %vm2172_vm0, %v1821_v26, 0 }
  0x2f   : > { %2347 = vmatpush.bf16.msra.mxu3 %v4385_v10  ;;  %2298 = vmatpush.bf16.msrb.mxu2 %v3993_v22  ;;  %v4854_v10 = vld [vmem:[%s5161_s14 + $0x20c] sm:$0xf]  ;;  %v4132_v39 = vld [vmem:[%s5161_s14 + $0x510] sm:$0xf]  ;;  %v4137_v42 = vor.u32 %v4951_v32, %v4134_v33  ;;  %v5032_v43 = vld [vmem:[%s5161_s14 + $0x794] sm:$0xf0] }
  0x30   : > { %2276 = vmatpush.bf16.msra.mxu0 %v3477_v41  ;;  %2328 = vmatpush.bf16.msra.mxu1 %v3485_v61  ;;  %v3745_v20 = vor.u32 %v4854_v10, %v3742_v12  ;;  %v4822_v22 = vld [vmem:[%s5161_s14 + $0x10c] sm:$0xf]  ;;  %v4396_v41 = vld [vmem:[%s5161_s14 + $0x718] sm:$0xf]  ;;  %v4646_v45 = vld [vmem:[%s5161_s14 + $0x990] sm:$0xf0] }
  0x31   : > { %v3617_v34 = vor.u32 %v4822_v22, %v3614_v27  ;;  %v3486_v38 = vld [vmem:[%s5161_s14 + $0x88] sm:$0xf0]  ;;  %v4919_v46 = vld [vmem:[%s5161_s14 + $0x414] sm:$0xf]  ;;  %v4004_v50 = vld [vmem:[%s5161_s14 + $0x410] sm:$0xf]  ;;  %v4397_v23 = vor.u32 %v5032_v43, %v4396_v41 }
  0x32   : > { %4756 = vmatmul.msk.bf16.vlgmr.msrb.gmra.mxu3 %vm2168_vm1, %v5207_v55  ;;  %v4006_v47 = vld [vmem:[%s5161_s14 + $0x490] sm:$0xf0]  ;;  %v4935_v52 = vld [vmem:[%s5161_s14 + $0x48c] sm:$0xf0]  ;;  %v5000_v56 = vld [vmem:[%s5161_s14 + $0x694] sm:$0xf0] }
  0x33   : > { %2348 = vmatpush.bf16.msra.mxu3 %v4257_v25  ;;  %2299 = vmatpush.bf16.msrb.mxu2 %v3865_v37  ;;  %v5063_v25 = vld [vmem:[%s5161_s14 + $0x88c] sm:$0xf0]  ;;  %v4790_v37 = vld [vmem:[%s5161_s14 + $0xc] sm:$0xf]  ;;  %v4009_v57 = vor.u32 %v4919_v46, %v4006_v47  ;;  %v4518_v59 = vld [vmem:[%s5161_s14 + $0x890] sm:$0xf0]  ;;  %v4005_v0 = vor.u32 %v4935_v52, %v4004_v50 }
  0x34   : > { %2365 = vmatpush.bf16.msrb.mxu0 %v2183_v44  ;;  %2391 = vmatpush.bf16.msrb.mxu1 %v2186_v3  ;;  %v4517_v31 = vor.u32 %v5063_v25, %v4516_v24  ;;  %v5079_v44 = vld [vmem:[%s5161_s14 + $0x914] sm:$0xf]  ;;  %v3489_v48 = vor.u32 %v4790_v37, %v3486_v38  ;;  %v5016_v62 = vld [vmem:[%s5161_s14 + $0x71c] sm:$0xf]  ;;  %v3876_v3 = vld [vmem:[%s5161_s14 + $0x310] sm:$0xf] }
  0x35   : > { %2277 = vmatmul.bf16.vlgmr.msra.gmra.mxu0 %v5256_v53  ;;  %2329 = vmatmul.bf16.vlgmr.msra.gmra.mxu1 %v5256_v53  ;;  %v4887_v60 = vld [vmem:[%s5161_s14 + $0x314] sm:$0xf]  ;;  %v4398_v63 = vld [vmem:[%s5161_s14 + $0x798] sm:$0xf0]  ;;  %v4903_v4 = vld [vmem:[%s5161_s14 + $0x38c] sm:$0xf0] }
  0x36   : > { %v3878_v61 = vld [vmem:[%s5161_s14 + $0x390] sm:$0xf0]  ;;  %v4140_v7 = vld [vmem:[%s5161_s14 + $0x518] sm:$0xf]  ;;  %v4270_v12 = vld [vmem:[%s5161_s14 + $0x698] sm:$0xf0]  ;;  %v3877_v13 = vor.u32 %v4903_v4, %v3876_v3 }
  0x37   : > { %2349 = vmatpush.bf16.msra.mxu3 %v4129_v40  ;;  %2300 = vmatpush.bf16.msrb.mxu2 %v3737_v51  ;;  %v4967_v40 = vld [vmem:[%s5161_s14 + $0x58c] sm:$0xf0]  ;;  %v4649_v51 = vor.u32 %v5079_v44, %v4646_v45  ;;  %v3881_v5 = vor.u32 %v4887_v60, %v3878_v61  ;;  %v4968_v8 = vld [vmem:[%s5161_s14 + $0x594] sm:$0xf0]  ;;  %v4855_v9 = vld [vmem:[%s5161_s14 + $0x214] sm:$0xf] }
  0x38   : > { %2366 = vmatpush.bf16.msrb.mxu0 %v4641_v58  ;;  %2392 = vmatpush.bf16.msrb.mxu1 %v4645_v16  ;;  %v4133_v49 = vor.u32 %v4967_v40, %v4132_v39  ;;  %v5047_v58 = vld [vmem:[%s5161_s14 + $0x814] sm:$0xf]  ;;  %v4141_v14 = vor.u32 %v4968_v8, %v4140_v7  ;;  %v4871_v16 = vld [vmem:[%s5161_s14 + $0x28c] sm:$0xf0]  ;;  %v4952_v25 = vld [vmem:[%s5161_s14 + $0x51c] sm:$0xf] }
  0x39   : > { %v3750_v10 = vld [vmem:[%s5161_s14 + $0x290] sm:$0xf0]  ;;  %v4142_v26 = vld [vmem:[%s5161_s14 + $0x598] sm:$0xf0]  ;;  %v3492_v44 = vld [vmem:[%s5161_s14 + $0x10] sm:$0xf] }
  0x3a   : > { %v3753_v18 = vor.u32 %v4855_v9, %v3750_v10  ;;  %v4823_v22 = vld [vmem:[%s5161_s14 + $0x114] sm:$0xf]  ;;  %v4145_v33 = vor.u32 %v4952_v25, %v4142_v26  ;;  %v4920_v39 = vld [vmem:[%s5161_s14 + $0x41c] sm:$0xf]  ;;  %v4807_v45 = vld [vmem:[%s5161_s14 + $0x8c] sm:$0xf0] }
  0x3b   : > { %2350 = vmatpush.bf16.msra.mxu3 %v4001_v54  ;;  %2301 = vmatpush.bf16.msrb.mxu2 %v3609_v2  ;;  %v4268_v54 = vld [vmem:[%s5161_s14 + $0x618] sm:$0xf]  ;;  %v4521_v2 = vor.u32 %v5047_v58, %v4518_v59  ;;  %v3622_v24 = vld [vmem:[%s5161_s14 + $0x190] sm:$0xf0]  ;;  %v4014_v40 = vld [vmem:[%s5161_s14 + $0x498] sm:$0xf0]  ;;  %v3493_v52 = vor.u32 %v4807_v45, %v3492_v44 }
  0x3c   : > { %2367 = vmatpush.bf16.msrb.mxu0 %v4513_v11  ;;  %2393 = vmatpush.bf16.msrb.mxu1 %v4517_v31  ;;  %v4269_v1 = vor.u32 %v5000_v56, %v4268_v54  ;;  %v4984_v11 = vld [vmem:[%s5161_s14 + $0x61c] sm:$0xf]  ;;  %v4839_v31 = vld [vmem:[%s5161_s14 + $0x18c] sm:$0xf0]  ;;  %v3625_v32 = vor.u32 %v4823_v22, %v3622_v24  ;;  %v3494_v38 = vld [vmem:[%s5161_s14 + $0x90] sm:$0xf0]  ;;  %v4017_v47 = vor.u32 %v4920_v39, %v4014_v40 }
  0x3d   : > { %v4273_v19 = vor.u32 %v4984_v11, %v4270_v12  ;;  %v5080_v56 = vld [vmem:[%s5161_s14 + $0x91c] sm:$0xf]  ;;  %v470_v58 = vld [vmem:[%s5161_s14 + $0xa20] sm:$0xff]  ;;  %v3628_v60 = vld [vmem:[%s5161_s14 + $0x118] sm:$0xf] }
  0x3e   : > { %v4840_v61 = vld [vmem:[%s5161_s14 + $0x194] sm:$0xf0]  ;;  %v4856_v3 = vld [vmem:[%s5161_s14 + $0x21c] sm:$0xf]  ;;  %v5017_v11 = vld [vmem:[%s5161_s14 + $0x724] sm:$0xf] }
  0x3f   : > { %2351 = vmatpush.bf16.msra.mxu3 %v3873_v6  ;;  %2302 = vmatpush.bf16.msrb.mxu2 %v3481_v17  ;;  %v4401_v6 = vor.u32 %v5016_v62, %v4398_v63  ;;  %v469_v17 = vld [vmem:[%s5161_s14 + $0xa18] sm:$0xff]  ;;  %v3629_v8 = vor.u32 %v4840_v61, %v3628_v60  ;;  %v4406_v12 = vld [vmem:[%s5161_s14 + $0x7a0] sm:$0xf0] }
  0x40   : > { %2399 = vmatpush.bf16.msra.mxu0 %v4393_v15  ;;  %2417 = vmatpush.bf16.msra.mxu1 %v2189_v36  ;;  %v3748_v15 = vld [vmem:[%s5161_s14 + $0x210] sm:$0xf]  ;;  %v1471_v28 = vunpack.c.h.b16 %v469_v17  ;;  %v4791_v36 = vld [vmem:[%s5161_s14 + $0x14] sm:$0xf]  ;;  %v1470_v37 = vunpack.c.l.b16 %v469_v17  ;;  %v3758_v4 = vld [vmem:[%s5161_s14 + $0x298] sm:$0xf0]  ;;  %v1473_v17 = vunpack.c.h.b16 %v470_v58  ;;  %v4409_v22 = vor.u32 %v5017_v11, %v4406_v12 }
  0x41   : > { %v3749_v27 = vor.u32 %v4871_v16, %v3748_v15  ;;  %v3497_v46 = vor.u32 %v4791_v36, %v3494_v38  ;;  %v4526_v7 = vld [vmem:[%s5161_s14 + $0x898] sm:$0xf0]  ;;  %v3500_v10 = vld [vmem:[%s5161_s14 + $0x18] sm:$0xf]  ;;  %v4660_v36 = vld [vmem:[%s5161_s14 + $0x920] sm:$0xf] }
  0x42   : > { %2303 = vmatmul.bf16.vlgmr.msrb.gmra.mxu2 %v5256_v53  ;;  %v1822_v50 = vpack.c.b16 %v1470_v37, %v1470_v37  ;;  %v4524_v15 = vld [vmem:[%s5161_s14 + $0x818] sm:$0xf]  ;;  %v4824_v24 = vld [vmem:[%s5161_s14 + $0x11c] sm:$0xf]  ;;  %v5097_v37 = vld [vmem:[%s5161_s14 + $0x99c] sm:$0xf0] }
  0x43   : > { %2352 = vmatpush.bf16.msra.mxu3 %v3745_v20  ;;  %2373 = vmatpush.bf16.msra.mxu2 %v4389_v21  ;;  %v4012_v20 = vld [vmem:[%s5161_s14 + $0x418] sm:$0xf]  ;;  %v3630_v25 = vld [vmem:[%s5161_s14 + $0x198] sm:$0xf0]  ;;  %v4661_v44 = vor.u32 %v5097_v37, %v4660_v36  ;;  %v3892_v12 = vld [vmem:[%s5161_s14 + $0x320] sm:$0xf] }
  0x44   : > { %2400 = vmatpush.bf16.msra.mxu0 %v4265_v30  ;;  %2418 = vmatpush.bf16.msra.mxu1 %v4649_v51  ;;  %v4936_v21 = vld [vmem:[%s5161_s14 + $0x494] sm:$0xf0]  ;;  %v3620_v30 = vld [vmem:[%s5161_s14 + $0x110] sm:$0xf]  ;;  %v3886_v51 = vld [vmem:[%s5161_s14 + $0x398] sm:$0xf0] }
  0x45   : > { %4757 = vmatmul.msk.bf16.vlgmr.msrb.gmra.mxu0 %vm2168_vm1, %v5207_v55  ;;  %4758 = vmatmul.msk.bf16.vlgmr.msrb.gmra.mxu1 %vm2168_vm1, %v5207_v55  ;;  %v4013_v29 = vor.u32 %v4936_v21, %v4012_v20  ;;  %v3621_v41 = vor.u32 %v4839_v31, %v3620_v30  ;;  %v2192_v62 = vsel %vm2172_vm0, %v1822_v50, 0  ;;  %v5064_v16 = vld [vmem:[%s5161_s14 + $0x894] sm:$0xf0]  ;;  %v5033_v20 = vld [vmem:[%s5161_s14 + $0x79c] sm:$0xf0] }
  0x46   : > { %v4276_v31 = vld [vmem:[%s5161_s14 + $0x620] sm:$0xf]  ;;  %v4792_v39 = vld [vmem:[%s5161_s14 + $0x1c] sm:$0xf]  ;;  %v4954_v36 = vld [vmem:[%s5161_s14 + $0x52c] sm:$0xf] }
  0x47   : > { %2353 = vmatpush.bf16.msra.mxu3 %v3617_v34  ;;  %2374 = vmatpush.bf16.msra.mxu2 %v4261_v35  ;;  %v3884_v34 = vld [vmem:[%s5161_s14 + $0x318] sm:$0xf]  ;;  %v3502_v40 = vld [vmem:[%s5161_s14 + $0x98] sm:$0xf0]  ;;  %v5065_v50 = vld [vmem:[%s5161_s14 + $0x89c] sm:$0xf0] }
  0x48   : > { %2401 = vmatpush.bf16.msra.mxu0 %v4137_v42  ;;  %2419 = vmatpush.bf16.msra.mxu1 %v4521_v2  ;;  %v4904_v35 = vld [vmem:[%s5161_s14 + $0x394] sm:$0xf0]  ;;  %v1823_v42 = vpack.c.b16 %v1471_v28, %v1471_v28  ;;  %v4985_v28 = vld [vmem:[%s5161_s14 + $0x624] sm:$0xf]  ;;  %v4158_v37 = vld [vmem:[%s5161_s14 + $0x5a8] sm:$0xf0] }
  0x49   : > { %v3885_v43 = vor.u32 %v4904_v35, %v3884_v34  ;;  %v3633_v35 = vor.u32 %v4824_v24, %v3630_v25  ;;  %v4286_v24 = vld [vmem:[%s5161_s14 + $0x6a8] sm:$0xf0] }
  0x4a   : > { %v2195_v54 = vsel %vm2172_vm0, %v1823_v42, 0  ;;  %v4150_v42 = vld [vmem:[%s5161_s14 + $0x5a0] sm:$0xf0] }
  0x4b   : > { %2354 = vmatpush.bf16.msra.mxu3 %v3489_v48  ;;  %2375 = vmatpush.bf16.msra.mxu2 %v4133_v49  ;;  %v3756_v48 = vld [vmem:[%s5161_s14 + $0x218] sm:$0xf] }
  0x4c   : > { %2402 = vmatpush.bf16.msra.mxu0 %v4009_v57  ;;  %2451 = vmatpush.bf16.msrb.mxu1 %v4401_v6  ;;  %v4872_v49 = vld [vmem:[%s5161_s14 + $0x294] sm:$0xf0]  ;;  %v4654_v57 = vld [vmem:[%s5161_s14 + $0x998] sm:$0xf0] }
  0x4d   : > { %v3757_v59 = vor.u32 %v4872_v49, %v3756_v48  ;;  %v4657_v2 = vor.u32 %v5080_v56, %v4654_v57  ;;  %v5048_v6 = vld [vmem:[%s5161_s14 + $0x81c] sm:$0xf]  ;;  %v4969_v48 = vld [vmem:[%s5161_s14 + $0x59c] sm:$0xf0]  ;;  %v4662_v56 = vld [vmem:[%s5161_s14 + $0x9a0] sm:$0xf0] }
  0x4e   : > { %2355 = vmatmul.bf16.vlgmr.msra.gmra.mxu3 %v5256_v53  ;;  %v4532_v49 = vld [vmem:[%s5161_s14 + $0x820] sm:$0xf]  ;;  %v4921_v57 = vld [vmem:[%s5161_s14 + $0x424] sm:$0xf] }
  0x4f   : > { %2425 = vmatpush.bf16.msrb.mxu3 %v4397_v23  ;;  %2376 = vmatpush.bf16.msra.mxu2 %v4005_v0  ;;  %v4888_v23 = vld [vmem:[%s5161_s14 + $0x31c] sm:$0xf]  ;;  %v4652_v0 = vld [vmem:[%s5161_s14 + $0x918] sm:$0xf]  ;;  %v4533_v60 = vor.u32 %v5065_v50, %v4532_v49  ;;  %v4922_v50 = vld [vmem:[%s5161_s14 + $0x42c] sm:$0xf] }
  0x50   : > { %2403 = vmatpush.bf16.msra.mxu0 %v3881_v5  ;;  %2452 = vmatpush.bf16.msrb.mxu1 %v4273_v19  ;;  %v3889_v63 = vor.u32 %v4888_v23, %v3886_v51  ;;  %v1472_v5 = vunpack.c.l.b16 %v470_v58  ;;  %v4404_v19 = vld [vmem:[%s5161_s14 + $0x720] sm:$0xf]  ;;  %v4412_v51 = vld [vmem:[%s5161_s14 + $0x728] sm:$0xf]  ;;  %v4022_v58 = vld [vmem:[%s5161_s14 + $0x4a0] sm:$0xf0] }
  0x51   : > { %v4405_v30 = vor.u32 %v5033_v20, %v4404_v19  ;;  %v4857_v19 = vld [vmem:[%s5161_s14 + $0x224] sm:$0xf] }
  0x52   : > { %v1824_v21 = vpack.c.b16 %v1472_v5, %v1472_v5  ;;  %v4534_v5 = vld [vmem:[%s5161_s14 + $0x8a0] sm:$0xf0] }
  0x53   : > { %2426 = vmatpush.bf16.msrb.mxu3 %v4269_v1  ;;  %2377 = vmatpush.bf16.msra.mxu2 %v3877_v13  ;;  %v5096_v1 = vld [vmem:[%s5161_s14 + $0x994] sm:$0xf0]  ;;  %v3761_v13 = vor.u32 %v4856_v3, %v3758_v4  ;;  %v5002_v3 = vld [vmem:[%s5161_s14 + $0x6a4] sm:$0xf0]  ;;  %v5049_v4 = vld [vmem:[%s5161_s14 + $0x824] sm:$0xf] }
  0x54   : > { %2404 = vmatpush.bf16.msra.mxu0 %v3753_v18  ;;  %2453 = vmatpush.bf16.msrb.mxu1 %v4145_v33  ;;  %v4653_v9 = vor.u32 %v5096_v1, %v4652_v0  ;;  %v4529_v18 = vor.u32 %v5048_v6, %v4526_v7  ;;  %v1825_v33 = vpack.c.b16 %v1473_v17, %v1473_v17  ;;  %v2198_v34 = vsel %vm2172_vm0, %v1824_v21, 0  ;;  %v4889_v6 = vld [vmem:[%s5161_s14 + $0x324] sm:$0xf]  ;;  %v4970_v17 = vld [vmem:[%s5161_s14 + $0x5a4] sm:$0xf0] }
  0x55   : > { %4759 = vmatmul.msk.bf16.vlgmr.msra.gmra.mxu1 %vm2168_vm1, %v5207_v55  ;;  %v4025_v1 = vor.u32 %v4921_v57, %v4022_v58  ;;  %v3894_v7 = vld [vmem:[%s5161_s14 + $0x3a0] sm:$0xf0]  ;;  %v4809_v57 = vld [vmem:[%s5161_s14 + $0x9c] sm:$0xf0] }
  0x56   : > { %v2201_v45 = vsel %vm2172_vm0, %v1825_v33, 0  ;;  %v3766_v20 = vld [vmem:[%s5161_s14 + $0x2a0] sm:$0xf0] }
  0x57   : > { %2427 = vmatpush.bf16.msrb.mxu3 %v4141_v14  ;;  %2378 = vmatpush.bf16.msra.mxu2 %v3749_v27  ;;  %v4808_v14 = vld [vmem:[%s5161_s14 + $0x94] sm:$0xf0]  ;;  %v4525_v27 = vor.u32 %v5064_v16, %v4524_v15  ;;  %v3897_v15 = vor.u32 %v4889_v6, %v3894_v7  ;;  %v4156_v16 = vld [vmem:[%s5161_s14 + $0x528] sm:$0xf]  ;;  %v4825_v33 = vld [vmem:[%s5161_s14 + $0x124] sm:$0xf] }
  0x58   : > { %2405 = vmatpush.bf16.msra.mxu0 %v3625_v32  ;;  %2454 = vmatpush.bf16.msrb.mxu1 %v4017_v47  ;;  %v3501_v26 = vor.u32 %v4808_v14, %v3500_v10  ;;  %v5001_v32 = vld [vmem:[%s5161_s14 + $0x69c] sm:$0xf0]  ;;  %v3505_v47 = vor.u32 %v4792_v39, %v3502_v40  ;;  %v4414_v10 = vld [vmem:[%s5161_s14 + $0x7a8] sm:$0xf0]  ;;  %v4537_v14 = vor.u32 %v5049_v4, %v4534_v5  ;;  %v3644_v5 = vld [vmem:[%s5161_s14 + $0x128] sm:$0xf] }
  0x59   : > { %v4157_v25 = vor.u32 %v4970_v17, %v4156_v16  ;;  %v5082_v6 = vld [vmem:[%s5161_s14 + $0x92c] sm:$0xf] }
  0x5a   : > { %v4670_v7 = vld [vmem:[%s5161_s14 + $0x9a8] sm:$0xf0] }
  0x5b   : > { %2428 = vmatpush.bf16.msrb.mxu3 %v4013_v29  ;;  %2379 = vmatpush.bf16.msra.mxu2 %v3621_v41  ;;  %v4278_v29 = vld [vmem:[%s5161_s14 + $0x6a0] sm:$0xf0] }
  0x5c   : > { %2406 = vmatpush.bf16.msra.mxu0 %v3497_v46  ;;  %2455 = vmatpush.bf16.msrb.mxu1 %v3889_v63  ;;  %v4281_v38 = vor.u32 %v4985_v28, %v4278_v29  ;;  %v4953_v41 = vld [vmem:[%s5161_s14 + $0x524] sm:$0xf]  ;;  %v4148_v46 = vld [vmem:[%s5161_s14 + $0x520] sm:$0xf]  ;;  %v471_v28 = vld [vmem:[%s5161_s14 + $0xa28] sm:$0xff]  ;;  %v3769_v29 = vor.u32 %v4857_v19, %v3766_v20 }
  0x5d   : > { %v4153_v23 = vor.u32 %v4953_v41, %v4150_v42  ;;  %v4937_v63 = vld [vmem:[%s5161_s14 + $0x49c] sm:$0xf0]  ;;  %v1475_v39 = vunpack.c.h.b16 %v471_v28  ;;  %v5050_v19 = vld [vmem:[%s5161_s14 + $0x82c] sm:$0xf] }
  0x5e   : > { %v3636_v41 = vld [vmem:[%s5161_s14 + $0x120] sm:$0xf]  ;;  %v4542_v20 = vld [vmem:[%s5161_s14 + $0x8a8] sm:$0xf0] }
  0x5f   : > { %2429 = vmatpush.bf16.msrb.mxu3 %v3885_v43  ;;  %2380 = vmatpush.bf16.msra.mxu2 %v3493_v52  ;;  %v4277_v43 = vor.u32 %v5001_v32, %v4276_v31  ;;  %v5034_v52 = vld [vmem:[%s5161_s14 + $0x7a4] sm:$0xf0]  ;;  %v4841_v42 = vld [vmem:[%s5161_s14 + $0x19c] sm:$0xf0] }
  0x60   : > { %2469 = vmatpush.bf16.msrb.mxu0 %v2195_v54  ;;  %2456 = vmatpush.bf16.msrb.mxu1 %v3761_v13  ;;  %v5081_v54 = vld [vmem:[%s5161_s14 + $0x924] sm:$0xf]  ;;  %v4413_v61 = vor.u32 %v5034_v52, %v4412_v51  ;;  %v4905_v13 = vld [vmem:[%s5161_s14 + $0x39c] sm:$0xf0]  ;;  %v4938_v31 = vld [vmem:[%s5161_s14 + $0x4a4] sm:$0xf0]  ;;  %v3637_v49 = vor.u32 %v4841_v42, %v3636_v41  ;;  %v1827_v52 = vpack.c.b16 %v1475_v39, %v1475_v39 }
  0x61   : > { %2407 = vmatmul.bf16.vlgmr.msra.gmra.mxu0 %v5256_v53  ;;  %v4665_v0 = vor.u32 %v5081_v54, %v4662_v56  ;;  %v3893_v21 = vor.u32 %v4905_v13, %v3892_v12  ;;  %v3508_v56 = vld [vmem:[%s5161_s14 + $0x20] sm:$0xf]  ;;  %v4673_v13 = vor.u32 %v5082_v6, %v4670_v7  ;;  %v4292_v39 = vld [vmem:[%s5161_s14 + $0x630] sm:$0xf] }
  0x62   : > { %2381 = vmatmul.bf16.vlgmr.msra.gmra.mxu2 %v5256_v53  ;;  %v4939_v6 = vld [vmem:[%s5161_s14 + $0x4ac] sm:$0xf0] }
  0x63   : > { %2430 = vmatpush.bf16.msrb.mxu3 %v3757_v59  ;;  %2443 = vmatpush.bf16.msrb.mxu2 %v2192_v62  ;;  %v4149_v59 = vor.u32 %v4969_v48, %v4148_v46  ;;  %v4020_v62 = vld [vmem:[%s5161_s14 + $0x420] sm:$0xf]  ;;  %v4161_v46 = vor.u32 %v4954_v36, %v4158_v37  ;;  %v3510_v48 = vld [vmem:[%s5161_s14 + $0xa0] sm:$0xf0] }
  0x64   : > { %2470 = vmatpush.bf16.msrb.mxu0 %v4657_v2  ;;  %2457 = vmatpush.bf16.msrb.mxu1 %v3633_v35  ;;  %v4284_v2 = vld [vmem:[%s5161_s14 + $0x628] sm:$0xf] }
  0x65   : > { %v4285_v11 = vor.u32 %v5002_v3, %v4284_v2  ;;  %v4890_v2 = vld [vmem:[%s5161_s14 + $0x32c] sm:$0xf] }
  0x66   : > { %v3902_v3 = vld [vmem:[%s5161_s14 + $0x3a8] sm:$0xf0] }
  0x67   : > { %2431 = vmatpush.bf16.msrb.mxu3 %v3629_v8  ;;  %2444 = vmatpush.bf16.msrb.mxu2 %v4653_v9  ;;  %v4021_v8 = vor.u32 %v4937_v63, %v4020_v62  ;;  %v5018_v9 = vld [vmem:[%s5161_s14 + $0x72c] sm:$0xf]  ;;  %v5445_v62 = vld [vmem:[%s5161_s14 + $0xa30] sm:$0xff]  ;;  %v3509_v63 = vor.u32 %v4809_v57, %v3508_v56  ;;  %v3905_v12 = vor.u32 %v4890_v2, %v3902_v3 }
  0x68   : > { %2471 = vmatpush.bf16.msrb.mxu0 %v4529_v18  ;;  %2458 = vmatpush.bf16.msrb.mxu1 %v3505_v47  ;;  %v4417_v18 = vor.u32 %v5018_v9, %v4414_v10  ;;  %v4793_v47 = vld [vmem:[%s5161_s14 + $0x24] sm:$0xf]  ;;  %v4668_v9 = vld [vmem:[%s5161_s14 + $0x928] sm:$0xf] }
  0x69   : > { %v3513_v58 = vor.u32 %v4793_v47, %v3510_v48  ;;  %v5098_v10 = vld [vmem:[%s5161_s14 + $0x9a4] sm:$0xf0]  ;;  %v4294_v47 = vld [vmem:[%s5161_s14 + $0x6b0] sm:$0xf0]  ;;  %v4794_v48 = vld [vmem:[%s5161_s14 + $0x2c] sm:$0xf] }
  0x6a   : > { %v4669_v17 = vor.u32 %v5098_v10, %v4668_v9  ;;  %v4923_v9 = vld [vmem:[%s5161_s14 + $0x434] sm:$0xf] }
  0x6b   : > { %2432 = vmatpush.bf16.msrb.mxu3 %v3501_v26  ;;  %2445 = vmatpush.bf16.msrb.mxu2 %v4525_v27  ;;  %v3764_v26 = vld [vmem:[%s5161_s14 + $0x220] sm:$0xf]  ;;  %v4038_v10 = vld [vmem:[%s5161_s14 + $0x4b0] sm:$0xf0] }
  0x6c   : > { %2503 = vmatpush.bf16.msra.mxu0 %v4409_v22  ;;  %2521 = vmatpush.bf16.msra.mxu1 %v2201_v45  ;;  %v4986_v22 = vld [vmem:[%s5161_s14 + $0x62c] sm:$0xf]  ;;  %v4873_v27 = vld [vmem:[%s5161_s14 + $0x29c] sm:$0xf0]  ;;  %v4906_v45 = vld [vmem:[%s5161_s14 + $0x3a4] sm:$0xf0] }
  0x6d   : > { %2459 = vmatmul.bf16.vlgmr.msrb.gmra.mxu1 %v5256_v53  ;;  %v4289_v32 = vor.u32 %v4986_v22, %v4286_v24  ;;  %v3765_v35 = vor.u32 %v4873_v27, %v3764_v26  ;;  %v4540_v22 = vld [vmem:[%s5161_s14 + $0x828] sm:$0xf]  ;;  %v4420_v27 = vld [vmem:[%s5161_s14 + $0x730] sm:$0xf] }
  0x6e   : > { %2433 = vmatmul.bf16.vlgmr.msrb.gmra.mxu3 %v5256_v53  ;;  %v5066_v24 = vld [vmem:[%s5161_s14 + $0x8a4] sm:$0xf0] }
  0x6f   : > { %2477 = vmatpush.bf16.msra.mxu2 %v4405_v30  ;;  %2495 = vmatpush.bf16.msra.mxu3 %v2198_v34  ;;  %v4028_v30 = vld [vmem:[%s5161_s14 + $0x428] sm:$0xf]  ;;  %v3638_v34 = vld [vmem:[%s5161_s14 + $0x1a0] sm:$0xf0]  ;;  %v4541_v36 = vor.u32 %v5066_v24, %v4540_v22  ;;  %v4891_v24 = vld [vmem:[%s5161_s14 + $0x334] sm:$0xf] }
  0x70   : > { %2504 = vmatpush.bf16.msra.mxu0 %v4281_v38  ;;  %2522 = vmatpush.bf16.msra.mxu1 %v4665_v0  ;;  %v1474_v38 = vunpack.c.l.b16 %v471_v28  ;;  %v4029_v40 = vor.u32 %v4938_v31, %v4028_v30  ;;  %v5035_v28 = vld [vmem:[%s5161_s14 + $0x7ac] sm:$0xf0]  ;;  %v1477_v30 = vunpack.c.h.b16 %v5445_v62  ;;  %v4545_v31 = vor.u32 %v5050_v19, %v4542_v20 }
  0x71   : > { %4761 = vmatmul.msk.bf16.vlgmr.msrb.gmra.mxu0 %vm2168_vm1, %v5207_v55  ;;  %v4421_v37 = vor.u32 %v5035_v28, %v4420_v27  ;;  %v3908_v19 = vld [vmem:[%s5161_s14 + $0x330] sm:$0xf]  ;;  %v4172_v27 = vld [vmem:[%s5161_s14 + $0x538] sm:$0xf] }
  0x72   : > { %4760 = vmatmul.msk.bf16.vlgmr.msrb.gmra.mxu2 %vm2168_vm1, %v5207_v55  ;;  %v1826_v51 = vpack.c.b16 %v1474_v38, %v1474_v38  ;;  %v4907_v20 = vld [vmem:[%s5161_s14 + $0x3ac] sm:$0xf0]  ;;  %v4972_v28 = vld [vmem:[%s5161_s14 + $0x5b4] sm:$0xf0] }
  0x73   : > { %2478 = vmatpush.bf16.msra.mxu2 %v4277_v43  ;;  %2496 = vmatpush.bf16.msra.mxu3 %v4661_v44  ;;  %v3641_v43 = vor.u32 %v4825_v33, %v3638_v34  ;;  %v3900_v44 = vld [vmem:[%s5161_s14 + $0x328] sm:$0xf]  ;;  %v4826_v33 = vld [vmem:[%s5161_s14 + $0x12c] sm:$0xf] }
  0x74   : > { %2505 = vmatpush.bf16.msra.mxu0 %v4153_v23  ;;  %2523 = vmatpush.bf16.msra.mxu1 %v4537_v14  ;;  %v4030_v23 = vld [vmem:[%s5161_s14 + $0x4a8] sm:$0xf0]  ;;  %v3901_v54 = vor.u32 %v4906_v45, %v3900_v44  ;;  %v2204_v0 = vsel %vm2172_vm0, %v1826_v51, 0  ;;  %v5099_v44 = vld [vmem:[%s5161_s14 + $0x9ac] sm:$0xf0] }
  0x75   : > { %v4858_v14 = vld [vmem:[%s5161_s14 + $0x22c] sm:$0xf]  ;;  %v4987_v45 = vld [vmem:[%s5161_s14 + $0x634] sm:$0xf]  ;;  %v4164_v51 = vld [vmem:[%s5161_s14 + $0x530] sm:$0xf] }
  0x76   : > { %v3646_v34 = vld [vmem:[%s5161_s14 + $0x1a8] sm:$0xf0] }
  0x77   : > { %2479 = vmatpush.bf16.msra.mxu2 %v4149_v59  ;;  %2497 = vmatpush.bf16.msra.mxu3 %v4533_v60  ;;  %v3772_v59 = vld [vmem:[%s5161_s14 + $0x228] sm:$0xf]  ;;  %v3649_v42 = vor.u32 %v4826_v33, %v3646_v34  ;;  %v3780_v33 = vld [vmem:[%s5161_s14 + $0x230] sm:$0xf] }
  0x78   : > { %2506 = vmatpush.bf16.msra.mxu0 %v4025_v1  ;;  %2555 = vmatpush.bf16.msrb.mxu1 %v4417_v18  ;;  %v4874_v60 = vld [vmem:[%s5161_s14 + $0x2a4] sm:$0xf0]  ;;  %v2207_v1 = vsel %vm2172_vm0, %v1827_v52, 0  ;;  %v4971_v52 = vld [vmem:[%s5161_s14 + $0x5ac] sm:$0xf0] }
  0x79   : > { %v3773_v4 = vor.u32 %v4874_v60, %v3772_v59  ;;  %v3516_v18 = vld [vmem:[%s5161_s14 + $0x28] sm:$0xf]  ;;  %v5067_v59 = vld [vmem:[%s5161_s14 + $0x8ac] sm:$0xf0]  ;;  %v4955_v60 = vld [vmem:[%s5161_s14 + $0x534] sm:$0xf]  ;;  %v4165_v2 = vor.u32 %v4971_v52, %v4164_v51 }
  0x7a   : > { %v4875_v34 = vld [vmem:[%s5161_s14 + $0x2ac] sm:$0xf0]  ;;  %v3654_v51 = vld [vmem:[%s5161_s14 + $0x1b0] sm:$0xf0] }
  0x7b   : > { %2529 = vmatpush.bf16.msrb.mxu3 %v4413_v61  ;;  %2480 = vmatpush.bf16.msra.mxu2 %v4021_v8  ;;  %v4033_v61 = vor.u32 %v4922_v50, %v4030_v23  ;;  %v4842_v8 = vld [vmem:[%s5161_s14 + $0x1a4] sm:$0xf0] }
  0x7c   : > { %2507 = vmatpush.bf16.msra.mxu0 %v3897_v15  ;;  %2556 = vmatpush.bf16.msrb.mxu1 %v4289_v32  ;;  %v3774_v15 = vld [vmem:[%s5161_s14 + $0x2a8] sm:$0xf0]  ;;  %v3645_v16 = vor.u32 %v4842_v8, %v3644_v5  ;;  %v4422_v32 = vld [vmem:[%s5161_s14 + $0x7b0] sm:$0xf0]  ;;  %v4036_v5 = vld [vmem:[%s5161_s14 + $0x430] sm:$0xf] }
  0x7d   : > { %4763 = vmatmul.msk.bf16.vlgmr.msra.gmra.mxu1 %vm2168_vm1, %v5207_v55  ;;  %v3777_v26 = vor.u32 %v4858_v14, %v3774_v15  ;;  %v4550_v14 = vld [vmem:[%s5161_s14 + $0x8b0] sm:$0xf0]  ;;  %v4037_v15 = vor.u32 %v4939_v6, %v4036_v5  ;;  %v3788_v5 = vld [vmem:[%s5161_s14 + $0x238] sm:$0xf] }
  0x7e   : > { %4762 = vmatmul.msk.bf16.vlgmr.msra.gmra.mxu3 %vm2168_vm1, %v5207_v55  ;;  %v4876_v6 = vld [vmem:[%s5161_s14 + $0x2b4] sm:$0xf0] }
  0x7f   : > { %2530 = vmatpush.bf16.msrb.mxu3 %v4285_v11  ;;  %2481 = vmatpush.bf16.msra.mxu2 %v3893_v21  ;;  %v1476_v11 = vunpack.c.l.b16 %v5445_v62  ;;  %v4810_v21 = vld [vmem:[%s5161_s14 + $0xa4] sm:$0xf0]  ;;  %v4428_v62 = vld [vmem:[%s5161_s14 + $0x738] sm:$0xf] }
  0x80   : > { %2508 = vmatpush.bf16.msra.mxu0 %v3769_v29  ;;  %2557 = vmatpush.bf16.msrb.mxu1 %v4161_v46  ;;  %v5019_v29 = vld [vmem:[%s5161_s14 + $0x734] sm:$0xf]  ;;  %v1829_v46 = vpack.c.b16 %v1477_v30, %v1477_v30  ;;  %v4988_v30 = vld [vmem:[%s5161_s14 + $0x63c] sm:$0xf] }
  0x81   : > { %v4425_v41 = vor.u32 %v5019_v29, %v4422_v32  ;;  %v3909_v29 = vor.u32 %v4907_v20, %v3908_v19  ;;  %v4844_v19 = vld [vmem:[%s5161_s14 + $0x1b4] sm:$0xf0]  ;;  %v5084_v20 = vld [vmem:[%s5161_s14 + $0x93c] sm:$0xf] }
  0x82   : > { %v2213_v57 = vsel %vm2172_vm0, %v1829_v46, 0  ;;  %v3652_v46 = vld [vmem:[%s5161_s14 + $0x130] sm:$0xf] }
  0x83   : > { %2531 = vmatpush.bf16.msrb.mxu3 %v4157_v25  ;;  %2482 = vmatpush.bf16.msra.mxu2 %v3765_v35  ;;  %v1828_v25 = vpack.c.b16 %v1476_v11, %v1476_v11  ;;  %v3517_v35 = vor.u32 %v4810_v21, %v3516_v18  ;;  %v4300_v11 = vld [vmem:[%s5161_s14 + $0x638] sm:$0xf]  ;;  %v4041_v18 = vor.u32 %v4923_v9, %v4038_v10  ;;  %v3918_v9 = vld [vmem:[%s5161_s14 + $0x3b8] sm:$0xf0]  ;;  %v5549_v10 = vld [vmem:[%s5161_s14 + $0xa40] sm:$0xff] }
  0x84   : > { %2509 = vmatpush.bf16.msra.mxu0 %v3641_v43  ;;  %2558 = vmatpush.bf16.msrb.mxu1 %v4033_v61  ;;  %v4676_v43 = vld [vmem:[%s5161_s14 + $0x930] sm:$0xf]  ;;  %v4166_v61 = vld [vmem:[%s5161_s14 + $0x5b0] sm:$0xf0] }
  0x85   : > { %v2210_v38 = vsel %vm2172_vm0, %v1828_v25, 0  ;;  %v4677_v23 = vor.u32 %v5099_v44, %v4676_v43  ;;  %v3910_v25 = vld [vmem:[%s5161_s14 + $0x3b0] sm:$0xf0]  ;;  %v4956_v43 = vld [vmem:[%s5161_s14 + $0x53c] sm:$0xf] }
  0x86   : > { %v3913_v32 = vor.u32 %v4891_v24, %v3910_v25  ;;  %v4174_v44 = vld [vmem:[%s5161_s14 + $0x5b8] sm:$0xf0] }
  0x87   : > { %2532 = vmatpush.bf16.msrb.mxu3 %v4029_v40  ;;  %2483 = vmatpush.bf16.msra.mxu2 %v3637_v49  ;;  %v5003_v40 = vld [vmem:[%s5161_s14 + $0x6ac] sm:$0xf0]  ;;  %v3518_v49 = vld [vmem:[%s5161_s14 + $0xa8] sm:$0xf0]  ;;  %v4177_v52 = vor.u32 %v4956_v43, %v4174_v44  ;;  %v4860_v25 = vld [vmem:[%s5161_s14 + $0x23c] sm:$0xf] }
  0x88   : > { %2510 = vmatpush.bf16.msra.mxu0 %v3513_v58  ;;  %2559 = vmatpush.bf16.msrb.mxu1 %v3905_v12  ;;  %v4293_v50 = vor.u32 %v5003_v40, %v4292_v39  ;;  %v3521_v56 = vor.u32 %v4794_v48, %v3518_v49  ;;  %v4548_v58 = vld [vmem:[%s5161_s14 + $0x830] sm:$0xf]  ;;  %v5004_v12 = vld [vmem:[%s5161_s14 + $0x6b4] sm:$0xf0]  ;;  %v4438_v44 = vld [vmem:[%s5161_s14 + $0x7c0] sm:$0xf0] }
  0x89   : > { %v4549_v3 = vor.u32 %v5067_v59, %v4548_v58  ;;  %v4301_v21 = vor.u32 %v5004_v12, %v4300_v11  ;;  %v4044_v40 = vld [vmem:[%s5161_s14 + $0x438] sm:$0xf]  ;;  %v4924_v58 = vld [vmem:[%s5161_s14 + $0x43c] sm:$0xf] }
  0x8a   : > { %v4046_v59 = vld [vmem:[%s5161_s14 + $0x4b8] sm:$0xf0] }
  0x8b   : > { %2533 = vmatpush.bf16.msrb.mxu3 %v3901_v54  ;;  %2484 = vmatpush.bf16.msra.mxu2 %v3509_v63  ;;  %v4297_v54 = vor.u32 %v4987_v45, %v4294_v47  ;;  %v5036_v63 = vld [vmem:[%s5161_s14 + $0x7b4] sm:$0xf0]  ;;  %v4843_v47 = vld [vmem:[%s5161_s14 + $0x1ac] sm:$0xf0] }
  0x8c   : > { %2573 = vmatpush.bf16.msrb.mxu0 %v2207_v1  ;;  %2560 = vmatpush.bf16.msrb.mxu1 %v3777_v26  ;;  %v4678_v1 = vld [vmem:[%s5161_s14 + $0x9b0] sm:$0xf0]  ;;  %v4429_v7 = vor.u32 %v5036_v63, %v4428_v62  ;;  %v4811_v62 = vld [vmem:[%s5161_s14 + $0xac] sm:$0xf0] }
  0x8d   : > { %2511 = vmatmul.bf16.vlgmr.msra.gmra.mxu0 %v5256_v53 }
  0x8e   : > { %2485 = vmatmul.bf16.vlgmr.msra.gmra.mxu2 %v5256_v53 }
  0x8f   : > { %2534 = vmatpush.bf16.msrb.mxu3 %v3773_v4  ;;  %2547 = vmatpush.bf16.msrb.mxu2 %v2204_v0  ;;  %v5083_v0 = vld [vmem:[%s5161_s14 + $0x934] sm:$0xf]  ;;  %v4169_v4 = vor.u32 %v4955_v60, %v4166_v61  ;;  %v3524_v61 = vld [vmem:[%s5161_s14 + $0x30] sm:$0xf] }
  0x90   : > { %2574 = vmatpush.bf16.msrb.mxu0 %v4673_v13  ;;  %2561 = vmatpush.bf16.msrb.mxu1 %v3649_v42  ;;  %v4681_v8 = vor.u32 %v5083_v0, %v4678_v1  ;;  %v5051_v13 = vld [vmem:[%s5161_s14 + $0x834] sm:$0xf]  ;;  %v3781_v42 = vor.u32 %v4875_v34, %v3780_v33  ;;  %v5068_v33 = vld [vmem:[%s5161_s14 + $0x8b4] sm:$0xf0] }
  0x91   : > { %v4553_v22 = vor.u32 %v5051_v13, %v4550_v14  ;;  %v3789_v14 = vor.u32 %v4876_v6, %v3788_v5 }
  0x93   : > { %2535 = vmatpush.bf16.msrb.mxu3 %v3645_v16  ;;  %2548 = vmatpush.bf16.msrb.mxu2 %v4669_v17  ;;  %v5020_v16 = vld [vmem:[%s5161_s14 + $0x73c] sm:$0xf] }
  0x94   : > { %2575 = vmatpush.bf16.msrb.mxu0 %v4545_v31  ;;  %2562 = vmatpush.bf16.msrb.mxu1 %v3521_v56  ;;  %v4430_v17 = vld [vmem:[%s5161_s14 + $0x7b8] sm:$0xf0]  ;;  %v4908_v56 = vld [vmem:[%s5161_s14 + $0x3b4] sm:$0xf0] }
  0x95   : > { %v4433_v26 = vor.u32 %v5020_v16, %v4430_v17  ;;  %v4302_v31 = vld [vmem:[%s5161_s14 + $0x6b8] sm:$0xf0]  ;;  %v4684_v16 = vld [vmem:[%s5161_s14 + $0x938] sm:$0xf] }
  0x96   : > { %v4305_v39 = vor.u32 %v4988_v30, %v4302_v31  ;;  %v5100_v17 = vld [vmem:[%s5161_s14 + $0x9b4] sm:$0xf0] }
  0x97   : > { %2536 = vmatpush.bf16.msrb.mxu3 %v3517_v35  ;;  %2549 = vmatpush.bf16.msrb.mxu2 %v4541_v36  ;;  %v4173_v35 = vor.u32 %v4972_v28, %v4172_v27  ;;  %v4859_v36 = vld [vmem:[%s5161_s14 + $0x234] sm:$0xf]  ;;  %v4685_v28 = vor.u32 %v5100_v17, %v4684_v16  ;;  %v3532_v31 = vld [vmem:[%s5161_s14 + $0x38] sm:$0xf]  ;;  %v5085_v16 = vld [vmem:[%s5161_s14 + $0x944] sm:$0xf] }
  0x98   : > { %2607 = vmatpush.bf16.msra.mxu0 %v4425_v41  ;;  %2625 = vmatpush.bf16.msra.mxu1 %v2213_v57  ;;  %v4940_v41 = vld [vmem:[%s5161_s14 + $0x4b4] sm:$0xf0]  ;;  %v3653_v57 = vor.u32 %v4843_v47, %v3652_v46  ;;  %v3662_v46 = vld [vmem:[%s5161_s14 + $0x1b8] sm:$0xf0]  ;;  %v4694_v17 = vld [vmem:[%s5161_s14 + $0x9c0] sm:$0xf0] }
  0x99   : > { %2563 = vmatmul.bf16.vlgmr.msrb.gmra.mxu1 %v5256_v53 }
  0x9a   : > { %2537 = vmatmul.bf16.vlgmr.msrb.gmra.mxu3 %v5256_v53 }
  0x9b   : > { %2581 = vmatpush.bf16.msra.mxu2 %v4421_v37  ;;  %2599 = vmatpush.bf16.msra.mxu3 %v2210_v38  ;;  %v3782_v37 = vld [vmem:[%s5161_s14 + $0x2b0] sm:$0xf0]  ;;  %v473_v38 = vld [vmem:[%s5161_s14 + $0xa38] sm:$0xff] }
  0x9c   : > { %2608 = vmatpush.bf16.msra.mxu0 %v4297_v54  ;;  %2626 = vmatpush.bf16.msra.mxu1 %v4681_v8  ;;  %v3785_v45 = vor.u32 %v4859_v36, %v3782_v37  ;;  %v1478_v48 = vunpack.c.l.b16 %v473_v38  ;;  %v1479_v49 = vunpack.c.h.b16 %v473_v38  ;;  %v3916_v54 = vld [vmem:[%s5161_s14 + $0x338] sm:$0xf]  ;;  %v4892_v8 = vld [vmem:[%s5161_s14 + $0x33c] sm:$0xf] }
  0x9d   : > { %4765 = vmatmul.msk.bf16.vlgmr.msrb.gmra.mxu0 %vm2168_vm1, %v5207_v55  ;;  %v3917_v1 = vor.u32 %v4908_v56, %v3916_v54  ;;  %v5052_v36 = vld [vmem:[%s5161_s14 + $0x83c] sm:$0xf] }
  0x9e   : > { %4764 = vmatmul.msk.bf16.vlgmr.msrb.gmra.mxu2 %vm2168_vm1, %v5207_v55  ;;  %v1830_v63 = vpack.c.b16 %v1478_v48, %v1478_v48  ;;  %v1831_v0 = vpack.c.b16 %v1479_v49, %v1479_v49  ;;  %v4558_v37 = vld [vmem:[%s5161_s14 + $0x8b8] sm:$0xf0] }
  0x9f   : > { %2582 = vmatpush.bf16.msra.mxu2 %v4293_v50  ;;  %2600 = vmatpush.bf16.msra.mxu3 %v4677_v23  ;;  %v4045_v50 = vor.u32 %v4940_v41, %v4044_v40  ;;  %v4827_v23 = vld [vmem:[%s5161_s14 + $0x134] sm:$0xf]  ;;  %v5037_v40 = vld [vmem:[%s5161_s14 + $0x7bc] sm:$0xf0]  ;;  %v5021_v41 = vld [vmem:[%s5161_s14 + $0x744] sm:$0xf]  ;;  %v4561_v48 = vor.u32 %v5052_v36, %v4558_v37 }
  0xa0   : > { %2609 = vmatpush.bf16.msra.mxu0 %v4169_v4  ;;  %2627 = vmatpush.bf16.msra.mxu1 %v4553_v22  ;;  %v3657_v60 = vor.u32 %v4827_v23, %v3654_v51  ;;  %v4049_v4 = vor.u32 %v4924_v58, %v4046_v59  ;;  %v2216_v12 = vsel %vm2172_vm0, %v1830_v63, 0  ;;  %v2219_v13 = vsel %vm2172_vm0, %v1831_v0, 0  ;;  %v4308_v23 = vld [vmem:[%s5161_s14 + $0x640] sm:$0xf]  ;;  %v4989_v59 = vld [vmem:[%s5161_s14 + $0x644] sm:$0xf] }
  0xa1   : > { %v1480_v22 = vunpack.c.l.b16 %v5549_v10  ;;  %v5005_v51 = vld [vmem:[%s5161_s14 + $0x6bc] sm:$0xf0]  ;;  %v4796_v63 = vld [vmem:[%s5161_s14 + $0x3c] sm:$0xf]  ;;  %v5022_v37 = vld [vmem:[%s5161_s14 + $0x74c] sm:$0xf] }
  0xa2   : > { %v5101_v58 = vld [vmem:[%s5161_s14 + $0x9bc] sm:$0xf0]  ;;  %v3534_v0 = vld [vmem:[%s5161_s14 + $0xb8] sm:$0xf0] }
  0xa3   : > { %2583 = vmatpush.bf16.msra.mxu2 %v4165_v2  ;;  %2601 = vmatpush.bf16.msra.mxu3 %v4549_v3  ;;  %v4795_v2 = vld [vmem:[%s5161_s14 + $0x34] sm:$0xf]  ;;  %v1832_v38 = vpack.c.b16 %v1480_v22, %v1480_v22  ;;  %v3537_v6 = vor.u32 %v4796_v63, %v3534_v0  ;;  %v4941_v22 = vld [vmem:[%s5161_s14 + $0x4bc] sm:$0xf0]  ;;  %v4060_v0 = vld [vmem:[%s5161_s14 + $0x448] sm:$0xf] }
  0xa4   : > { %2610 = vmatpush.bf16.msra.mxu0 %v4041_v18  ;;  %2659 = vmatpush.bf16.msrb.mxu1 %v4433_v26  ;;  %v3526_v3 = vld [vmem:[%s5161_s14 + $0xb0] sm:$0xf0]  ;;  %v3921_v18 = vor.u32 %v4892_v8, %v3918_v9  ;;  %v3790_v26 = vld [vmem:[%s5161_s14 + $0x2b8] sm:$0xf0]  ;;  %v4564_v8 = vld [vmem:[%s5161_s14 + $0x840] sm:$0xf] }
  0xa5   : > { %v3529_v11 = vor.u32 %v4795_v2, %v3526_v3  ;;  %v5560_v24 = vpop.f32.mrf.mxu3  ;;  %v5566_v27 = vpop.f32.mrf.mxu2  ;;  %v3793_v34 = vor.u32 %v4860_v25, %v3790_v26  ;;  %v4180_v3 = vld [vmem:[%s5161_s14 + $0x540] sm:$0xf] }
  0xa6   : > { %v5069_v9 = vld [vmem:[%s5161_s14 + $0x8bc] sm:$0xf0] }
  0xa7   : > { %2633 = vmatpush.bf16.msrb.mxu3 %v4429_v7  ;;  %2584 = vmatpush.bf16.msra.mxu2 %v4037_v15  ;;  %v3525_v7 = vor.u32 %v4811_v62, %v3524_v61  ;;  %v3660_v15 = vld [vmem:[%s5161_s14 + $0x138] sm:$0xf]  ;;  %v4310_v62 = vld [vmem:[%s5161_s14 + $0x6c0] sm:$0xf0] }
  0xa8   : > { %2611 = vmatpush.bf16.msra.mxu0 %v3913_v32  ;;  %2660 = vmatpush.bf16.msrb.mxu1 %v4305_v39  ;;  %v4556_v32 = vld [vmem:[%s5161_s14 + $0x838] sm:$0xf]  ;;  %v4436_v39 = vld [vmem:[%s5161_s14 + $0x740] sm:$0xf]  ;;  %v4313_v5 = vor.u32 %v4989_v59, %v4310_v62  ;;  %v475_v62 = vld [vmem:[%s5161_s14 + $0xa48] sm:$0xff] }
  0xa9   : > { %4767 = vmatmul.msk.bf16.vlgmr.msra.gmra.mxu1 %vm2168_vm1, %v5207_v55  ;;  %v4557_v43 = vor.u32 %v5068_v33, %v4556_v32  ;;  %v4437_v49 = vor.u32 %v5037_v40, %v4436_v39  ;;  %v5006_v33 = vld [vmem:[%s5161_s14 + $0x6c4] sm:$0xf0]  ;;  %v3924_v40 = vld [vmem:[%s5161_s14 + $0x340] sm:$0xf] }
  0xaa   : > { %4766 = vmatmul.msk.bf16.vlgmr.msra.gmra.mxu3 %vm2168_vm1, %v5207_v55 }
  0xab   : > { %2634 = vmatpush.bf16.msrb.mxu3 %v4301_v21  ;;  %2585 = vmatpush.bf16.msra.mxu2 %v3909_v29  ;;  %v4686_v21 = vld [vmem:[%s5161_s14 + $0x9b8] sm:$0xf0]  ;;  %v3661_v29 = vor.u32 %v4844_v19, %v3660_v15  ;;  %v5038_v15 = vld [vmem:[%s5161_s14 + $0x7c4] sm:$0xf0]  ;;  %v4565_v19 = vor.u32 %v5069_v9, %v4564_v8  ;;  %v1482_v9 = vunpack.c.l.b16 %v475_v62 }
  0xac   : > { %2612 = vmatpush.bf16.msra.mxu0 %v3785_v45  ;;  %2661 = vmatpush.bf16.msrb.mxu1 %v4177_v52  ;;  %v4689_v30 = vor.u32 %v5084_v20, %v4686_v21  ;;  %v4828_v45 = vld [vmem:[%s5161_s14 + $0x13c] sm:$0xf]  ;;  %v4441_v52 = vor.u32 %v5021_v41, %v4438_v44  ;;  %v4052_v21 = vld [vmem:[%s5161_s14 + $0x440] sm:$0xf] }
  0xad   : > { %v3665_v54 = vor.u32 %v4828_v45, %v3662_v46  ;;  %v2319_v56 = vpop.f32.mrf.mxu3  ;;  %v2293_v61 = vpop.f32.mrf.mxu2  ;;  %v4053_v36 = vor.u32 %v4941_v22, %v4052_v21  ;;  %v4909_v41 = vld [vmem:[%s5161_s14 + $0x3bc] sm:$0xf0]  ;;  %v4893_v45 = vld [vmem:[%s5161_s14 + $0x344] sm:$0xf]  ;;  %v4926_v21 = vld [vmem:[%s5161_s14 + $0x44c] sm:$0xf] }
  0xae   : > { %v3926_v46 = vld [vmem:[%s5161_s14 + $0x3c0] sm:$0xf0]  ;;  %v4877_v56 = vld [vmem:[%s5161_s14 + $0x2bc] sm:$0xf0]  ;;  %v4062_v22 = vld [vmem:[%s5161_s14 + $0x4c8] sm:$0xf0] }
  0xaf   : > { %2635 = vmatpush.bf16.msrb.mxu3 %v4173_v35  ;;  %2586 = vmatpush.bf16.msra.mxu2 %v3781_v42  ;;  %v4812_v35 = vld [vmem:[%s5161_s14 + $0xb4] sm:$0xf0]  ;;  %v1481_v42 = vunpack.c.h.b16 %v5549_v10  ;;  %v3798_v61 = vld [vmem:[%s5161_s14 + $0x2c0] sm:$0xf0] }
  0xb0   : > { %2613 = vmatpush.bf16.msra.mxu0 %v3657_v60  ;;  %2662 = vmatpush.bf16.msrb.mxu1 %v4049_v4  ;;  %v3533_v47 = vor.u32 %v4812_v35, %v3532_v31  ;;  %v4973_v4 = vld [vmem:[%s5161_s14 + $0x5bc] sm:$0xf0]  ;;  %v4316_v31 = vld [vmem:[%s5161_s14 + $0x648] sm:$0xf]  ;;  %v4566_v35 = vld [vmem:[%s5161_s14 + $0x8c0] sm:$0xf0] }
  0xb1   : > { %v1833_v60 = vpack.c.b16 %v1481_v42, %v1481_v42 }
  0xb2   : > { %v2278_v10 = vpop.f32.mrf.mxu0  ;;  %v2330_v26 = vpop.f32.mrf.mxu1 }
  0xb3   : > { %2636 = vmatpush.bf16.msrb.mxu3 %v4045_v50  ;;  %2587 = vmatpush.bf16.msra.mxu2 %v3653_v57  ;;  %v2222_v50 = vsel %vm2172_vm0, %v1832_v38, 0  ;;  %v4692_v57 = vld [vmem:[%s5161_s14 + $0x940] sm:$0xf]  ;;  %v4446_v38 = vld [vmem:[%s5161_s14 + $0x7c8] sm:$0xf0] }
  0xb4   : > { %2614 = vmatpush.bf16.msra.mxu0 %v3529_v11  ;;  %2663 = vmatpush.bf16.msrb.mxu1 %v3921_v18  ;;  %v4693_v2 = vor.u32 %v5101_v58, %v4692_v57  ;;  %v4957_v11 = vld [vmem:[%s5161_s14 + $0x544] sm:$0xf]  ;;  %v4181_v18 = vor.u32 %v4973_v4, %v4180_v3  ;;  %v4958_v3 = vld [vmem:[%s5161_s14 + $0x54c] sm:$0xf] }
  0xb5   : > { %v4190_v4 = vld [vmem:[%s5161_s14 + $0x5c8] sm:$0xf0] }
  0xb7   : > { %2637 = vmatpush.bf16.msrb.mxu3 %v3917_v1  ;;  %2588 = vmatpush.bf16.msra.mxu2 %v3525_v7  ;;  %v4309_v1 = vor.u32 %v5005_v51, %v4308_v23  ;;  %v2225_v7 = vsel %vm2172_vm0, %v1833_v60, 0  ;;  %v4990_v23 = vld [vmem:[%s5161_s14 + $0x64c] sm:$0xf]  ;;  %v4861_v60 = vld [vmem:[%s5161_s14 + $0x244] sm:$0xf] }
  0xb8   : > { %2677 = vmatpush.bf16.msrb.mxu0 %v2219_v13  ;;  %2664 = vmatpush.bf16.msrb.mxu1 %v3793_v34  ;;  %v4444_v13 = vld [vmem:[%s5161_s14 + $0x748] sm:$0xf]  ;;  %v5053_v34 = vld [vmem:[%s5161_s14 + $0x844] sm:$0xf]  ;;  %v4318_v51 = vld [vmem:[%s5161_s14 + $0x6c8] sm:$0xf0] }
  0xb9   : > { %2615 = vmatmul.bf16.vlgmr.msra.gmra.mxu0 %v5256_v53  ;;  %v4445_v25 = vor.u32 %v5038_v15, %v4444_v13  ;;  %v4569_v44 = vor.u32 %v5053_v34, %v4566_v35  ;;  %v4321_v63 = vor.u32 %v4990_v23, %v4318_v51  ;;  %v4829_v13 = vld [vmem:[%s5161_s14 + $0x144] sm:$0xf]  ;;  %v4065_v34 = vor.u32 %v4926_v21, %v4062_v22  ;;  %v3804_v35 = vld [vmem:[%s5161_s14 + $0x248] sm:$0xf]  ;;  %v4324_v22 = vld [vmem:[%s5161_s14 + $0x650] sm:$0xf] }
  0xba   : > { %2589 = vmatmul.bf16.vlgmr.msra.gmra.mxu2 %v5256_v53  ;;  %v2280_v42 = vpop.f32.mrf.mxu0  ;;  %v2332_v58 = vpop.f32.mrf.mxu1  ;;  %v3670_v15 = vld [vmem:[%s5161_s14 + $0x1c0] sm:$0xf0]  ;;  %v4846_v51 = vld [vmem:[%s5161_s14 + $0x1c4] sm:$0xf0] }
  0xbb   : > { %2651 = vmatpush.bf16.msrb.mxu2 %v2216_v12  ;;  %2638 = vmatpush.bf16.msrb.mxu3 %v3789_v14  ;;  %v4182_v12 = vld [vmem:[%s5161_s14 + $0x5c0] sm:$0xf0]  ;;  %v5602_v14 = vadd.f32 %v5566_v27, %v2278_v10  ;;  %v4697_v27 = vor.u32 %v5085_v16, %v4694_v17  ;;  %v1483_v10 = vunpack.c.h.b16 %v475_v62  ;;  %v4193_v17 = vor.u32 %v4958_v3, %v4190_v4  ;;  %v4862_v58 = vld [vmem:[%s5161_s14 + $0x24c] sm:$0xf]  ;;  %v4814_v4 = vld [vmem:[%s5161_s14 + $0xc4] sm:$0xf0] }
  0xbc   : > { %2678 = vmatpush.bf16.msrb.mxu0 %v4689_v30  ;;  %2665 = vmatpush.bf16.msrb.mxu1 %v3665_v54  ;;  %v4185_v20 = vor.u32 %v4957_v11, %v4182_v12  ;;  %v4054_v30 = vld [vmem:[%s5161_s14 + $0x4c0] sm:$0xf0]  ;;  %v3796_v54 = vld [vmem:[%s5161_s14 + $0x240] sm:$0xf] }
  0xbf   : > { %2652 = vmatpush.bf16.msrb.mxu2 %v4685_v28  ;;  %2639 = vmatpush.bf16.msrb.mxu3 %v3661_v29  ;;  %v2343_v28 = vpop.f32.mrf.mxu3  ;;  %v4925_v29 = vld [vmem:[%s5161_s14 + $0x444] sm:$0xf] }
  0xc0   : > { %2679 = vmatpush.bf16.msrb.mxu0 %v4561_v48  ;;  %2666 = vmatpush.bf16.msrb.mxu1 %v3537_v6  ;;  %v5612_v32 = vadd.f32 %v2343_v28, %v2330_v26  ;;  %v4057_v39 = vor.u32 %v4925_v29, %v4054_v30  ;;  %v4188_v48 = vld [vmem:[%s5161_s14 + $0x548] sm:$0xf]  ;;  %v3668_v6 = vld [vmem:[%s5161_s14 + $0x140] sm:$0xf]  ;;  %v1835_v28 = vpack.c.b16 %v1483_v10, %v1483_v10  ;;  %v5023_v10 = vld [vmem:[%s5161_s14 + $0x754] sm:$0xf] }
  0xc1   : > { %v4813_v26 = vld [vmem:[%s5161_s14 + $0xbc] sm:$0xf0] }
  0xc2   : > { %v2369_v8 = vpop.f32.mrf.mxu0  ;;  %v5656_v30 = vpop.f32.mrf.mxu1 }
  0xc3   : > { %2653 = vmatpush.bf16.msrb.mxu2 %v4557_v43  ;;  %2640 = vmatpush.bf16.msrb.mxu3 %v3533_v47  ;;  %v4317_v43 = vor.u32 %v5006_v33, %v4316_v31  ;;  %v4449_v47 = vor.u32 %v5022_v37, %v4446_v38  ;;  %v4797_v31 = vld [vmem:[%s5161_s14 + $0x44] sm:$0xf]  ;;  %v4894_v38 = vld [vmem:[%s5161_s14 + $0x34c] sm:$0xf] }
  0xc4   : > { %2711 = vmatpush.bf16.msra.mxu0 %v4441_v52  ;;  %2729 = vmatpush.bf16.msra.mxu1 %v2225_v7  ;;  %v3929_v52 = vor.u32 %v4893_v45, %v3926_v46  ;;  %v4845_v7 = vld [vmem:[%s5161_s14 + $0x1bc] sm:$0xf0]  ;;  %v3542_v33 = vld [vmem:[%s5161_s14 + $0xc0] sm:$0xf0]  ;;  %v3676_v46 = vld [vmem:[%s5161_s14 + $0x148] sm:$0xf] }
  0xc5   : > { %2667 = vmatmul.bf16.vlgmr.msrb.gmra.mxu1 %v5256_v53  ;;  %v2304_v11 = vpop.f32.mrf.mxu2 }
  0xc6   : > { %2641 = vmatmul.bf16.vlgmr.msrb.gmra.mxu3 %v5256_v53  ;;  %v5646_v16 = vadd.f32 %v5560_v24, %v2304_v11  ;;  %v3540_v24 = vld [vmem:[%s5161_s14 + $0x40] sm:$0xf] }
  0xc7   : > { %2685 = vmatpush.bf16.msra.mxu2 %v4437_v49  ;;  %2703 = vmatpush.bf16.msra.mxu3 %v2222_v50  ;;  %v4974_v49 = vld [vmem:[%s5161_s14 + $0x5c4] sm:$0xf0]  ;;  %v3925_v50 = vor.u32 %v4909_v41, %v3924_v40  ;;  %v2345_v59 = vpop.f32.mrf.mxu3  ;;  %v3541_v37 = vor.u32 %v4813_v26, %v3540_v24  ;;  %v5665_v40 = vld [vmem:[%s5161_s14 + $0xa50] sm:$0xff]  ;;  %v3545_v41 = vor.u32 %v4797_v31, %v3542_v33 }
  0xc8   : > { %2712 = vmatpush.bf16.msra.mxu0 %v4313_v5  ;;  %2730 = vmatpush.bf16.msra.mxu1 %v4697_v27  ;;  %v4189_v57 = vor.u32 %v4974_v49, %v4188_v48  ;;  %v3801_v5 = vor.u32 %v4861_v60, %v3798_v61  ;;  %v1834_v27 = vpack.c.b16 %v1482_v9, %v1482_v9  ;;  %v5102_v48 = vld [vmem:[%s5161_s14 + $0x9c4] sm:$0xf0]  ;;  %v3806_v59 = vld [vmem:[%s5161_s14 + $0x2c8] sm:$0xf0]  ;;  %v5039_v9 = vld [vmem:[%s5161_s14 + $0x7cc] sm:$0xf0]  ;;  %v1485_v11 = vunpack.c.h.b16 %v5665_v40 }
  0xc9   : > { %4769 = vmatmul.msk.bf16.vlgmr.msrb.gmra.mxu0 %vm2168_vm1, %v5207_v55  ;;  %v3677_v61 = vor.u32 %v4846_v51, %v3676_v46  ;;  %v3809_v3 = vor.u32 %v4862_v58, %v3806_v59  ;;  %v4991_v31 = vld [vmem:[%s5161_s14 + $0x654] sm:$0xf]  ;;  %v5071_v46 = vld [vmem:[%s5161_s14 + $0x8cc] sm:$0xf0]  ;;  %v5040_v51 = vld [vmem:[%s5161_s14 + $0x7d4] sm:$0xf0] }
  0xca   : > { %4768 = vmatmul.msk.bf16.vlgmr.msrb.gmra.mxu2 %vm2168_vm1, %v5207_v55  ;;  %v2228_v42 = vsel %vm2172_vm0, %v1834_v27, 0  ;;  %v1837_v33 = vpack.c.b16 %v1485_v11, %v1485_v11 }
  0xcb   : > { %2686 = vmatpush.bf16.msra.mxu2 %v4309_v1  ;;  %2704 = vmatpush.bf16.msra.mxu3 %v4693_v2  ;;  %v4942_v1 = vld [vmem:[%s5161_s14 + $0x4c4] sm:$0xf0]  ;;  %v3797_v2 = vor.u32 %v4877_v56, %v3796_v54  ;;  %v4702_v54 = vld [vmem:[%s5161_s14 + $0x9c8] sm:$0xf0]  ;;  %v1484_v56 = vunpack.c.l.b16 %v5665_v40  ;;  %v4196_v40 = vld [vmem:[%s5161_s14 + $0x550] sm:$0xf] }
  0xcc   : > { %2713 = vmatpush.bf16.msra.mxu0 %v4185_v20  ;;  %2731 = vmatpush.bf16.msra.mxu1 %v4569_v44  ;;  %v4061_v12 = vor.u32 %v4942_v1, %v4060_v0  ;;  %v3669_v20 = vor.u32 %v4845_v7, %v3668_v6  ;;  %v2371_v44 = vpop.f32.mrf.mxu0  ;;  %v3548_v0 = vld [vmem:[%s5161_s14 + $0x48] sm:$0xf]  ;;  %v4574_v6 = vld [vmem:[%s5161_s14 + $0x8c8] sm:$0xf0] }
  0xcd   : > { %v2306_v49 = vpop.f32.mrf.mxu2  ;;  %v4572_v1 = vld [vmem:[%s5161_s14 + $0x848] sm:$0xf]  ;;  %v1836_v7 = vpack.c.b16 %v1484_v56, %v1484_v56  ;;  %v2237_v44 = vsel %vm2172_vm0, %v1837_v33, 0 }
  0xce   : > { %v4198_v49 = vld [vmem:[%s5161_s14 + $0x5d0] sm:$0xf0] }
  0xcf   : > { %2687 = vmatpush.bf16.msra.mxu2 %v4181_v18  ;;  %2705 = vmatpush.bf16.msra.mxu3 %v4565_v19  ;;  %v3932_v18 = vld [vmem:[%s5161_s14 + $0x348] sm:$0xf]  ;;  %v2234_v21 = vsel %vm2172_vm0, %v1836_v7, 0 }
  0xd0   : > { %2714 = vmatpush.bf16.msra.mxu0 %v4057_v39  ;;  %2763 = vmatpush.bf16.msrb.mxu1 %v4449_v47  ;;  %v4910_v19 = vld [vmem:[%s5161_s14 + $0x3c4] sm:$0xf0]  ;;  %v3934_v39 = vld [vmem:[%s5161_s14 + $0x3c8] sm:$0xf0] }
  0xd1   : > { %v3933_v29 = vor.u32 %v4910_v19, %v3932_v18  ;;  %v4700_v47 = vld [vmem:[%s5161_s14 + $0x948] sm:$0xf]  ;;  %v3937_v23 = vor.u32 %v4894_v38, %v3934_v39  ;;  %v3549_v18 = vor.u32 %v4814_v4, %v3548_v0  ;;  %v4927_v0 = vld [vmem:[%s5161_s14 + $0x454] sm:$0xf] }
  0xd2   : > { %v4701_v60 = vor.u32 %v5102_v48, %v4700_v47  ;;  %v4959_v48 = vld [vmem:[%s5161_s14 + $0x554] sm:$0xf] }
  0xd3   : > { %2737 = vmatpush.bf16.msrb.mxu3 %v4445_v25  ;;  %2688 = vmatpush.bf16.msra.mxu2 %v4053_v36  ;;  %v3673_v25 = vor.u32 %v4829_v13, %v3670_v15  ;;  %v4878_v36 = vld [vmem:[%s5161_s14 + $0x2c4] sm:$0xf0]  ;;  %v4454_v13 = vld [vmem:[%s5161_s14 + $0x7d0] sm:$0xf0]  ;;  %v4830_v15 = vld [vmem:[%s5161_s14 + $0x14c] sm:$0xf]  ;;  %v4201_v59 = vor.u32 %v4959_v48, %v4198_v49 }
  0xd4   : > { %2715 = vmatpush.bf16.msra.mxu0 %v3929_v52  ;;  %2764 = vmatpush.bf16.msrb.mxu1 %v4321_v63  ;;  %v3805_v45 = vor.u32 %v4878_v36, %v3804_v35  ;;  %v5086_v52 = vld [vmem:[%s5161_s14 + $0x94c] sm:$0xf]  ;;  %v2397_v63 = vpop.f32.mrf.mxu1  ;;  %v4457_v26 = vor.u32 %v5023_v10, %v4454_v13  ;;  %v5055_v4 = vld [vmem:[%s5161_s14 + $0x854] sm:$0xf]  ;;  %v4462_v10 = vld [vmem:[%s5161_s14 + $0x7d8] sm:$0xf0] }
  0xd5   : > { %4771 = vmatmul.msk.bf16.vlgmr.msra.gmra.mxu1 %vm2168_vm1, %v5207_v55  ;;  %v4705_v62 = vor.u32 %v5086_v52, %v4702_v54  ;;  %v4798_v35 = vld [vmem:[%s5161_s14 + $0x4c] sm:$0xf]  ;;  %v5087_v52 = vld [vmem:[%s5161_s14 + $0x954] sm:$0xf]  ;;  %v3940_v13 = vld [vmem:[%s5161_s14 + $0x350] sm:$0xf] }
  0xd6   : > { %4770 = vmatmul.msk.bf16.vlgmr.msra.gmra.mxu3 %vm2168_vm1, %v5207_v55  ;;  %v3550_v36 = vld [vmem:[%s5161_s14 + $0xc8] sm:$0xf0]  ;;  %v4710_v54 = vld [vmem:[%s5161_s14 + $0x9d0] sm:$0xf0] }
  0xd7   : > { %2738 = vmatpush.bf16.msrb.mxu3 %v4317_v43  ;;  %2689 = vmatpush.bf16.msra.mxu2 %v3925_v50  ;;  %v2231_v43 = vsel %vm2172_vm0, %v1835_v28, 0  ;;  %v2356_v50 = vpop.f32.mrf.mxu3  ;;  %v4708_v28 = vld [vmem:[%s5161_s14 + $0x950] sm:$0xf]  ;;  %v4713_v63 = vor.u32 %v5087_v52, %v4710_v54  ;;  %v3686_v52 = vld [vmem:[%s5161_s14 + $0x1d0] sm:$0xf0] }
  0xd8   : > { %2716 = vmatpush.bf16.msra.mxu0 %v3801_v5  ;;  %2765 = vmatpush.bf16.msrb.mxu1 %v4193_v17  ;;  %v5054_v5 = vld [vmem:[%s5161_s14 + $0x84c] sm:$0xf] }
  0xd9   : > { %v3678_v17 = vld [vmem:[%s5161_s14 + $0x1c8] sm:$0xf0]  ;;  %v4577_v19 = vor.u32 %v5054_v5, %v4574_v6  ;;  %v4582_v5 = vld [vmem:[%s5161_s14 + $0x8d0] sm:$0xf0] }
  0xda   : > { %v3681_v27 = vor.u32 %v4830_v15, %v3678_v17  ;;  %v4911_v15 = vld [vmem:[%s5161_s14 + $0x3cc] sm:$0xf0] }
  0xdb   : > { %2739 = vmatpush.bf16.msrb.mxu3 %v4189_v57  ;;  %2690 = vmatpush.bf16.msra.mxu2 %v3797_v2  ;;  %v5676_v57 = vadd.f32 %v2369_v8, %v2356_v50  ;;  %v5070_v2 = vld [vmem:[%s5161_s14 + $0x8c4] sm:$0xf0]  ;;  %v4452_v8 = vld [vmem:[%s5161_s14 + $0x750] sm:$0xf]  ;;  %v4460_v50 = vld [vmem:[%s5161_s14 + $0x758] sm:$0xf] }
  0xdc   : > { %2717 = vmatpush.bf16.msra.mxu0 %v3673_v25  ;;  %2766 = vmatpush.bf16.msrb.mxu1 %v4065_v34  ;;  %v5007_v25 = vld [vmem:[%s5161_s14 + $0x6cc] sm:$0xf0]  ;;  %v4326_v34 = vld [vmem:[%s5161_s14 + $0x6d0] sm:$0xf0] }
  0xdd   : > { %v4325_v38 = vor.u32 %v5007_v25, %v4324_v22  ;;  %v4976_v25 = vld [vmem:[%s5161_s14 + $0x5d4] sm:$0xf0] }
  0xde   : > { %v2408_v47 = vpop.f32.mrf.mxu0 }
  0xdf   : > { %2740 = vmatpush.bf16.msrb.mxu3 %v4061_v12  ;;  %2691 = vmatpush.bf16.msra.mxu2 %v3669_v20  ;;  %v4573_v12 = vor.u32 %v5070_v2, %v4572_v1  ;;  %v4453_v20 = vor.u32 %v5039_v9, %v4452_v8  ;;  %v2358_v24 = vpop.f32.mrf.mxu3  ;;  %v4070_v1 = vld [vmem:[%s5161_s14 + $0x4d0] sm:$0xf0]  ;;  %v4332_v2 = vld [vmem:[%s5161_s14 + $0x658] sm:$0xf]  ;;  %v5024_v9 = vld [vmem:[%s5161_s14 + $0x75c] sm:$0xf] }
  0xe0   : > { %2718 = vmatpush.bf16.msra.mxu0 %v3545_v41  ;;  %2767 = vmatpush.bf16.msrb.mxu1 %v3937_v23  ;;  %v4975_v41 = vld [vmem:[%s5161_s14 + $0x5cc] sm:$0xf0]  ;;  %v4465_v22 = vor.u32 %v5024_v9, %v4462_v10  ;;  %v3941_v24 = vor.u32 %v4911_v15, %v3940_v13  ;;  %v3820_v10 = vld [vmem:[%s5161_s14 + $0x258] sm:$0xf] }
  0xe1   : > { %v4197_v56 = vor.u32 %v4975_v41, %v4196_v40 }
  0xe3   : > { %2741 = vmatpush.bf16.msrb.mxu3 %v3933_v29  ;;  %2692 = vmatpush.bf16.msra.mxu2 %v3541_v37  ;;  %v5103_v29 = vld [vmem:[%s5161_s14 + $0x9cc] sm:$0xf0]  ;;  %v2421_v37 = vpop.f32.mrf.mxu1 }
  0xe4   : > { %2781 = vmatpush.bf16.msrb.mxu0 %v2231_v43  ;;  %2768 = vmatpush.bf16.msrb.mxu1 %v3809_v3  ;;  %v4709_v39 = vor.u32 %v5103_v29, %v4708_v28  ;;  %v3553_v43 = vor.u32 %v4798_v35, %v3550_v36  ;;  %v5715_v23 = vadd.f32 %v2421_v37, %v2408_v47  ;;  %v5008_v3 = vld [vmem:[%s5161_s14 + $0x6d4] sm:$0xf0]  ;;  %v3812_v29 = vld [vmem:[%s5161_s14 + $0x250] sm:$0xf]  ;;  %v3814_v35 = vld [vmem:[%s5161_s14 + $0x2d0] sm:$0xf0] }
  0xe5   : > { %2719 = vmatmul.bf16.vlgmr.msra.gmra.mxu0 %v5256_v53  ;;  %v2382_v7 = vpop.f32.mrf.mxu2  ;;  %v477_v36 = vld [vmem:[%s5161_s14 + $0xa58] sm:$0xff] }
  0xe6   : > { %2693 = vmatmul.bf16.vlgmr.msra.gmra.mxu2 %v5256_v53  ;;  %v5733_v11 = vadd.f32 %v5656_v30, %v2382_v7  ;;  %v2410_v17 = vpop.f32.mrf.mxu0  ;;  %v4204_v30 = vld [vmem:[%s5161_s14 + $0x558] sm:$0xf]  ;;  %v1486_v48 = vunpack.c.l.b16 %v477_v36  ;;  %v1487_v49 = vunpack.c.h.b16 %v477_v36  ;;  %v4799_v7 = vld [vmem:[%s5161_s14 + $0x54] sm:$0xf] }
  0xe7   : > { %2755 = vmatpush.bf16.msrb.mxu2 %v2228_v42  ;;  %2742 = vmatpush.bf16.msrb.mxu3 %v3805_v45  ;;  %v4329_v42 = vor.u32 %v4991_v31, %v4326_v34  ;;  %v4580_v45 = vld [vmem:[%s5161_s14 + $0x850] sm:$0xf]  ;;  %v4205_v33 = vor.u32 %v4976_v25, %v4204_v30  ;;  %v4863_v34 = vld [vmem:[%s5161_s14 + $0x254] sm:$0xf]  ;;  %v4896_v17 = vld [vmem:[%s5161_s14 + $0x35c] sm:$0xf] }
  0xe8   : > { %2782 = vmatpush.bf16.msrb.mxu0 %v4705_v62  ;;  %2769 = vmatpush.bf16.msrb.mxu1 %v3681_v27  ;;  %v4581_v58 = vor.u32 %v5071_v46, %v4580_v45  ;;  %v4461_v62 = vor.u32 %v5040_v51, %v4460_v50  ;;  %v4334_v27 = vld [vmem:[%s5161_s14 + $0x6d8] sm:$0xf0]  ;;  %v4879_v31 = vld [vmem:[%s5161_s14 + $0x2cc] sm:$0xf0]  ;;  %v4831_v51 = vld [vmem:[%s5161_s14 + $0x154] sm:$0xf] }
  0xe9   : > { %v3813_v41 = vor.u32 %v4879_v31, %v3812_v29  ;;  %v3684_v45 = vld [vmem:[%s5161_s14 + $0x150] sm:$0xf]  ;;  %v4848_v31 = vld [vmem:[%s5161_s14 + $0x1d4] sm:$0xf0] }
  0xea   : > { %v4847_v46 = vld [vmem:[%s5161_s14 + $0x1cc] sm:$0xf0] }
  0xeb   : > { %2756 = vmatpush.bf16.msrb.mxu2 %v4701_v60  ;;  %2743 = vmatpush.bf16.msrb.mxu3 %v3677_v61  ;;  %v4068_v60 = vld [vmem:[%s5161_s14 + $0x450] sm:$0xf]  ;;  %v2423_v6 = vpop.f32.mrf.mxu1 }
  0xec   : > { %2783 = vmatpush.bf16.msrb.mxu0 %v4577_v19  ;;  %2770 = vmatpush.bf16.msrb.mxu1 %v3553_v43  ;;  %v4943_v61 = vld [vmem:[%s5161_s14 + $0x4cc] sm:$0xf0]  ;;  %v4585_v19 = vor.u32 %v5055_v4, %v4582_v5  ;;  %v4206_v43 = vld [vmem:[%s5161_s14 + $0x5d8] sm:$0xf0]  ;;  %v1838_v4 = vpack.c.b16 %v1486_v48, %v1486_v48  ;;  %v1839_v5 = vpack.c.b16 %v1487_v49, %v1487_v49 }
  0xed   : > { %v4069_v8 = vor.u32 %v4943_v61, %v4068_v60  ;;  %v2384_v40 = vpop.f32.mrf.mxu2  ;;  %v5056_v48 = vld [vmem:[%s5161_s14 + $0x85c] sm:$0xf] }
  0xee   : > { %v2473_v61 = vpop.f32.mrf.mxu0  ;;  %v2243_v30 = vsel %vm2172_vm0, %v1839_v5, 0  ;;  %v4590_v49 = vld [vmem:[%s5161_s14 + $0x8d8] sm:$0xf0]  ;;  %v4340_v5 = vld [vmem:[%s5161_s14 + $0x660] sm:$0xf] }
  0xef   : > { %2757 = vmatpush.bf16.msrb.mxu2 %v4573_v12  ;;  %2744 = vmatpush.bf16.msrb.mxu3 %v3549_v18  ;;  %v4073_v12 = vor.u32 %v4927_v0, %v4070_v1  ;;  %v4333_v18 = vor.u32 %v5008_v3, %v4332_v2  ;;  %v3689_v0 = vor.u32 %v4831_v51, %v3686_v52  ;;  %v3556_v2 = vld [vmem:[%s5161_s14 + $0x50] sm:$0xf]  ;;  %v4468_v51 = vld [vmem:[%s5161_s14 + $0x760] sm:$0xf] }
  0xf0   : > { %2815 = vmatpush.bf16.msra.mxu0 %v4457_v26  ;;  %2833 = vmatpush.bf16.msra.mxu1 %v2237_v44  ;;  %v4992_v26 = vld [vmem:[%s5161_s14 + $0x65c] sm:$0xf]  ;;  %v3817_v44 = vor.u32 %v4863_v34, %v3814_v35  ;;  %v4815_v3 = vld [vmem:[%s5161_s14 + $0xcc] sm:$0xf0]  ;;  %v5041_v52 = vld [vmem:[%s5161_s14 + $0x7dc] sm:$0xf0] }
  0xf1   : > { %2771 = vmatmul.bf16.vlgmr.msrb.gmra.mxu1 %v5256_v53  ;;  %v4337_v37 = vor.u32 %v4992_v26, %v4334_v27  ;;  %v2434_v47 = vpop.f32.mrf.mxu3  ;;  %v3557_v15 = vor.u32 %v4815_v3, %v3556_v2  ;;  %v3692_v26 = vld [vmem:[%s5161_s14 + $0x158] sm:$0xf]  ;;  %v4718_v34 = vld [vmem:[%s5161_s14 + $0x9d8] sm:$0xf0]  ;;  %v4593_v2 = vor.u32 %v5056_v48, %v4590_v49  ;;  %v4469_v3 = vor.u32 %v5041_v52, %v4468_v51  ;;  %v4929_v48 = vld [vmem:[%s5161_s14 + $0x464] sm:$0xf] }
  0xf2   : > { %2745 = vmatmul.bf16.vlgmr.msrb.gmra.mxu3 %v5256_v53  ;;  %v4716_v27 = vld [vmem:[%s5161_s14 + $0x958] sm:$0xf]  ;;  %v4086_v49 = vld [vmem:[%s5161_s14 + $0x4e0] sm:$0xf0] }
  0xf3   : > { %2789 = vmatpush.bf16.msra.mxu2 %v4453_v20  ;;  %2807 = vmatpush.bf16.msra.mxu3 %v2234_v21  ;;  %v4895_v20 = vld [vmem:[%s5161_s14 + $0x354] sm:$0xf]  ;;  %v2460_v60 = vpop.f32.mrf.mxu1 }
  0xf4   : > { %2816 = vmatpush.bf16.msra.mxu0 %v4329_v42  ;;  %2834 = vmatpush.bf16.msra.mxu1 %v4713_v63  ;;  %v3942_v21 = vld [vmem:[%s5161_s14 + $0x3d0] sm:$0xf0]  ;;  %v4960_v42 = vld [vmem:[%s5161_s14 + $0x55c] sm:$0xf]  ;;  %v5765_v1 = vadd.f32 %v2473_v61, %v2460_v60  ;;  %v4470_v60 = vld [vmem:[%s5161_s14 + $0x7e0] sm:$0xf0] }
  0xf5   : > { %4773 = vmatmul.msk.bf16.vlgmr.msrb.gmra.mxu0 %vm2168_vm1, %v5207_v55  ;;  %v3945_v28 = vor.u32 %v4895_v20, %v3942_v21  ;;  %v4209_v54 = vor.u32 %v4960_v42, %v4206_v43  ;;  %v4078_v63 = vld [vmem:[%s5161_s14 + $0x4d8] sm:$0xf0]  ;;  %v2447_v13 = vpop.f32.mrf.mxu2  ;;  %v3564_v43 = vld [vmem:[%s5161_s14 + $0x58] sm:$0xf] }
  0xf6   : > { %4772 = vmatmul.msk.bf16.vlgmr.msrb.gmra.mxu2 %vm2168_vm1, %v5207_v55  ;;  %v5778_v20 = vadd.f32 %v2447_v13, %v2434_v47  ;;  %v4816_v47 = vld [vmem:[%s5161_s14 + $0xd4] sm:$0xf0]  ;;  %v4832_v61 = vld [vmem:[%s5161_s14 + $0x15c] sm:$0xf] }
  0xf7   : > { %2790 = vmatpush.bf16.msra.mxu2 %v4325_v38  ;;  %2808 = vmatpush.bf16.msra.mxu3 %v4709_v39  ;;  %v4076_v38 = vld [vmem:[%s5161_s14 + $0x458] sm:$0xf] }
  0xf8   : > { %2817 = vmatpush.bf16.msra.mxu0 %v4201_v59  ;;  %2835 = vmatpush.bf16.msra.mxu1 %v4585_v19  ;;  %v4944_v39 = vld [vmem:[%s5161_s14 + $0x4d4] sm:$0xf0]  ;;  %v3685_v59 = vor.u32 %v4847_v46, %v3684_v45  ;;  %v5776_v19 = vld [vmem:[%s5161_s14 + $0xa60] sm:$0xff] }
  0xf9   : > { %v4077_v50 = vor.u32 %v4944_v39, %v4076_v38  ;;  %v2436_v25 = vpop.f32.mrf.mxu3  ;;  %v1488_v35 = vunpack.c.l.b16 %v5776_v19  ;;  %v3822_v38 = vld [vmem:[%s5161_s14 + $0x2d8] sm:$0xf0]  ;;  %v2475_v39 = vpop.f32.mrf.mxu0  ;;  %v5072_v45 = vld [vmem:[%s5161_s14 + $0x8d4] sm:$0xf0] }
  0xfa   : > { %v4977_v25 = vld [vmem:[%s5161_s14 + $0x5dc] sm:$0xf0]  ;;  %v5089_v39 = vld [vmem:[%s5161_s14 + $0x964] sm:$0xf] }
  0xfb   : > { %2791 = vmatpush.bf16.msra.mxu2 %v4197_v56  ;;  %2809 = vmatpush.bf16.msra.mxu3 %v4581_v58  ;;  %v3948_v56 = vld [vmem:[%s5161_s14 + $0x358] sm:$0xf]  ;;  %v2462_v36 = vpop.f32.mrf.mxu1 }
  0xfc   : > { %2818 = vmatpush.bf16.msra.mxu0 %v4073_v12  ;;  %2867 = vmatpush.bf16.msrb.mxu1 %v4465_v22  ;;  %v4912_v58 = vld [vmem:[%s5161_s14 + $0x3d4] sm:$0xf0]  ;;  %v2240_v22 = vsel %vm2172_vm0, %v1838_v4, 0  ;;  %v4476_v36 = vld [vmem:[%s5161_s14 + $0x768] sm:$0xf] }
  0xfd   : > { %v3949_v6 = vor.u32 %v4912_v58, %v3948_v56  ;;  %v4880_v12 = vld [vmem:[%s5161_s14 + $0x2d4] sm:$0xf0]  ;;  %v2449_v56 = vpop.f32.mrf.mxu2  ;;  %v1489_v58 = vunpack.c.h.b16 %v5776_v19 }
  0xfe   : > { %v5057_v56 = vld [vmem:[%s5161_s14 + $0x864] sm:$0xf] }
  0xff   : > { %2841 = vmatpush.bf16.msrb.mxu3 %v4461_v62  ;;  %2792 = vmatpush.bf16.msra.mxu2 %v4069_v8  ;;  %v4928_v62 = vld [vmem:[%s5161_s14 + $0x45c] sm:$0xf]  ;;  %v3558_v8 = vld [vmem:[%s5161_s14 + $0xd0] sm:$0xf0]  ;;  %v1841_v13 = vpack.c.b16 %v1489_v58, %v1489_v58  ;;  %v4598_v58 = vld [vmem:[%s5161_s14 + $0x8e0] sm:$0xf0] }
 0x100   : > { %2819 = vmatpush.bf16.msra.mxu0 %v3945_v28  ;;  %2868 = vmatpush.bf16.msrb.mxu1 %v4337_v37  ;;  %v4081_v9 = vor.u32 %v4928_v62, %v4078_v63  ;;  %v3561_v21 = vor.u32 %v4799_v7, %v3558_v8  ;;  %v5104_v28 = vld [vmem:[%s5161_s14 + $0x9d4] sm:$0xf0]  ;;  %v4864_v37 = vld [vmem:[%s5161_s14 + $0x25c] sm:$0xf] }
 0x101   : > { %4775 = vmatmul.msk.bf16.vlgmr.msra.gmra.mxu1 %vm2168_vm1, %v5207_v55  ;;  %v4717_v40 = vor.u32 %v5104_v28, %v4716_v27  ;;  %v3825_v46 = vor.u32 %v4864_v37, %v3822_v38  ;;  %v3694_v62 = vld [vmem:[%s5161_s14 + $0x1d8] sm:$0xf0]  ;;  %v5808_v63 = vpop.f32.mrf.mxu3  ;;  %v2249_v28 = vsel %vm2172_vm0, %v1841_v13, 0  ;;  %v5042_v38 = vld [vmem:[%s5161_s14 + $0x7e4] sm:$0xf0] }
 0x102   : > { %4774 = vmatmul.msk.bf16.vlgmr.msra.gmra.mxu3 %vm2168_vm1, %v5207_v55  ;;  %v3697_v8 = vor.u32 %v4832_v61, %v3694_v62  ;;  %v5026_v61 = vld [vmem:[%s5161_s14 + $0x76c] sm:$0xf] }
 0x103   : > { %2842 = vmatpush.bf16.msrb.mxu3 %v4333_v18  ;;  %2793 = vmatpush.bf16.msra.mxu2 %v3941_v24  ;;  %v3950_v18 = vld [vmem:[%s5161_s14 + $0x3d8] sm:$0xf0]  ;;  %v3821_v24 = vor.u32 %v4880_v12, %v3820_v10  ;;  %v5105_v10 = vld [vmem:[%s5161_s14 + $0x9dc] sm:$0xf0]  ;;  %v4993_v12 = vld [vmem:[%s5161_s14 + $0x664] sm:$0xf]  ;;  %v2525_v19 = vpop.f32.mrf.mxu1 }
 0x104   : > { %2820 = vmatpush.bf16.msra.mxu0 %v3817_v44  ;;  %2869 = vmatpush.bf16.msrb.mxu1 %v4209_v54  ;;  %v3953_v29 = vor.u32 %v4896_v17, %v3950_v18  ;;  %v4588_v44 = vld [vmem:[%s5161_s14 + $0x858] sm:$0xf]  ;;  %v5025_v54 = vld [vmem:[%s5161_s14 + $0x764] sm:$0xf]  ;;  %v4800_v17 = vld [vmem:[%s5161_s14 + $0x5c] sm:$0xf] }
 0x105   : > { %v4473_v7 = vor.u32 %v5025_v54, %v4470_v60  ;;  %v3566_v18 = vld [vmem:[%s5161_s14 + $0xd8] sm:$0xf0]  ;;  %v5010_v54 = vld [vmem:[%s5161_s14 + $0x6e4] sm:$0xf0]  ;;  %v4478_v62 = vld [vmem:[%s5161_s14 + $0x7e8] sm:$0xf0] }
 0x106   : > { %v3569_v27 = vor.u32 %v4800_v17, %v3566_v18  ;;  %v4994_v13 = vld [vmem:[%s5161_s14 + $0x66c] sm:$0xf]  ;;  %v3828_v18 = vld [vmem:[%s5161_s14 + $0x260] sm:$0xf] }
 0x107   : > { %2843 = vmatpush.bf16.msrb.mxu3 %v4205_v33  ;;  %2794 = vmatpush.bf16.msra.mxu2 %v3813_v41  ;;  %v5088_v33 = vld [vmem:[%s5161_s14 + $0x95c] sm:$0xf]  ;;  %v3693_v41 = vor.u32 %v4848_v31, %v3692_v26  ;;  %v5073_v31 = vld [vmem:[%s5161_s14 + $0x8dc] sm:$0xf0] }
 0x108   : > { %2821 = vmatpush.bf16.msra.mxu0 %v3689_v0  ;;  %2870 = vmatpush.bf16.msrb.mxu1 %v4081_v9  ;;  %v4721_v42 = vor.u32 %v5088_v33, %v4718_v34  ;;  %v3565_v0 = vor.u32 %v4816_v47, %v3564_v43  ;;  %v4724_v9 = vld [vmem:[%s5161_s14 + $0x960] sm:$0xf]  ;;  %v4961_v34 = vld [vmem:[%s5161_s14 + $0x564] sm:$0xf] }
 0x109   : > { %v2501_v37 = vpop.f32.mrf.mxu3 }
 0x10a   : > { %v3700_v37 = vld [vmem:[%s5161_s14 + $0x160] sm:$0xf] }
 0x10b   : > { %2844 = vmatpush.bf16.msrb.mxu3 %v4077_v50  ;;  %2795 = vmatpush.bf16.msra.mxu2 %v3685_v59  ;;  %v1840_v50 = vpack.c.b16 %v1488_v35, %v1488_v35  ;;  %v4589_v59 = vor.u32 %v5072_v45, %v4588_v44  ;;  %v4214_v35 = vld [vmem:[%s5161_s14 + $0x5e0] sm:$0xf0]  ;;  %v4084_v44 = vld [vmem:[%s5161_s14 + $0x460] sm:$0xf]  ;;  %v2527_v51 = vpop.f32.mrf.mxu1 }
 0x10c   : > { %2822 = vmatpush.bf16.msra.mxu0 %v3561_v21  ;;  %2871 = vmatpush.bf16.msrb.mxu1 %v3953_v29  ;;  %v4596_v29 = vld [vmem:[%s5161_s14 + $0x860] sm:$0xf]  ;;  %v4217_v43 = vor.u32 %v4961_v34, %v4214_v35  ;;  %v4222_v34 = vld [vmem:[%s5161_s14 + $0x5e8] sm:$0xf0] }
 0x10d   : > { %v2246_v4 = vsel %vm2172_vm0, %v1840_v50, 0  ;;  %v4945_v45 = vld [vmem:[%s5161_s14 + $0x4dc] sm:$0xf0]  ;;  %v4348_v50 = vld [vmem:[%s5161_s14 + $0x668] sm:$0xf] }
 0x10e   : > { %v4085_v60 = vor.u32 %v4945_v45, %v4084_v44  ;;  %v3964_v45 = vld [vmem:[%s5161_s14 + $0x368] sm:$0xf]  ;;  %v4930_v51 = vld [vmem:[%s5161_s14 + $0x46c] sm:$0xf] }
 0x10f   : > { %2845 = vmatpush.bf16.msrb.mxu3 %v3949_v6  ;;  %2796 = vmatpush.bf16.msra.mxu2 %v3557_v15  ;;  %v5009_v6 = vld [vmem:[%s5161_s14 + $0x6dc] sm:$0xf0]  ;;  %v4342_v15 = vld [vmem:[%s5161_s14 + $0x6e0] sm:$0xf0] }
 0x110   : > { %2885 = vmatpush.bf16.msrb.mxu0 %v2243_v30  ;;  %2872 = vmatpush.bf16.msrb.mxu1 %v3825_v46  ;;  %v4341_v21 = vor.u32 %v5009_v6, %v4340_v5  ;;  %v4212_v30 = vld [vmem:[%s5161_s14 + $0x560] sm:$0xf]  ;;  %v4345_v26 = vor.u32 %v4993_v12, %v4342_v15  ;;  %v4477_v46 = vor.u32 %v5042_v38, %v4476_v36  ;;  %v4897_v6 = vld [vmem:[%s5161_s14 + $0x364] sm:$0xf]  ;;  %v4350_v15 = vld [vmem:[%s5161_s14 + $0x6e8] sm:$0xf0] }
 0x111   : > { %2823 = vmatmul.bf16.vlgmr.msra.gmra.mxu0 %v5256_v53  ;;  %v2486_v52 = vpop.f32.mrf.mxu2  ;;  %v4601_v5 = vor.u32 %v5057_v56, %v4598_v58  ;;  %v4849_v38 = vld [vmem:[%s5161_s14 + $0x1dc] sm:$0xf0] }
 0x112   : > { %2797 = vmatmul.bf16.vlgmr.msra.gmra.mxu2 %v5256_v53  ;;  %v3572_v56 = vld [vmem:[%s5161_s14 + $0x60] sm:$0xf] }
 0x113   : > { %2859 = vmatpush.bf16.msrb.mxu2 %v2240_v22  ;;  %2846 = vmatpush.bf16.msrb.mxu3 %v3821_v24  ;;  %v4725_v22 = vor.u32 %v5105_v10, %v4724_v9  ;;  %v2512_v24 = vpop.f32.mrf.mxu0  ;;  %v4220_v9 = vld [vmem:[%s5161_s14 + $0x568] sm:$0xf]  ;;  %v4817_v58 = vld [vmem:[%s5161_s14 + $0xdc] sm:$0xf0] }
 0x114   : > { %2886 = vmatpush.bf16.msrb.mxu0 %v4721_v42  ;;  %2873 = vmatpush.bf16.msrb.mxu1 %v3697_v8  ;;  %v5824_v33 = vadd.f32 %v2525_v19, %v2512_v24  ;;  %v4597_v42 = vor.u32 %v5073_v31, %v4596_v29  ;;  %v4481_v8 = vor.u32 %v5026_v61, %v4478_v62  ;;  %v4978_v10 = vld [vmem:[%s5161_s14 + $0x5e4] sm:$0xf0]  ;;  %v4881_v19 = vld [vmem:[%s5161_s14 + $0x2dc] sm:$0xf0]  ;;  %v4962_v31 = vld [vmem:[%s5161_s14 + $0x56c] sm:$0xf] }
 0x115   : > { %v3829_v29 = vor.u32 %v4881_v19, %v3828_v18  ;;  %v4225_v44 = vor.u32 %v4962_v31, %v4222_v34  ;;  %v3708_v19 = vld [vmem:[%s5161_s14 + $0x168] sm:$0xf]  ;;  %v4866_v31 = vld [vmem:[%s5161_s14 + $0x26c] sm:$0xf] }
 0x116   : > { %v3838_v34 = vld [vmem:[%s5161_s14 + $0x2e8] sm:$0xf0] }
 0x117   : > { %2860 = vmatpush.bf16.msrb.mxu2 %v4717_v40  ;;  %2847 = vmatpush.bf16.msrb.mxu3 %v3693_v41  ;;  %v4726_v40 = vld [vmem:[%s5161_s14 + $0x9e0] sm:$0xf0]  ;;  %v4213_v41 = vor.u32 %v4977_v25, %v4212_v30  ;;  %v479_v25 = vld [vmem:[%s5161_s14 + $0xa68] sm:$0xff] }
 0x118   : > { %2887 = vmatpush.bf16.msrb.mxu0 %v4593_v2  ;;  %2874 = vmatpush.bf16.msrb.mxu1 %v3569_v27  ;;  %v4729_v47 = vor.u32 %v5089_v39, %v4726_v40  ;;  %v4089_v2 = vor.u32 %v4929_v48, %v4086_v49  ;;  %v3830_v30 = vld [vmem:[%s5161_s14 + $0x2e0] sm:$0xf0]  ;;  %v4092_v27 = vld [vmem:[%s5161_s14 + $0x468] sm:$0xf]  ;;  %v1490_v39 = vunpack.c.l.b16 %v479_v25  ;;  %v1491_v40 = vunpack.c.h.b16 %v479_v25 }
 0x119   : > { %v2488_v24 = vpop.f32.mrf.mxu2  ;;  %v3701_v49 = vor.u32 %v4849_v38, %v3700_v37  ;;  %v4850_v25 = vld [vmem:[%s5161_s14 + $0x1e4] sm:$0xf0] }
 0x11a   : > { %v1843_v61 = vpack.c.b16 %v1491_v40, %v1491_v40  ;;  %v5090_v24 = vld [vmem:[%s5161_s14 + $0x96c] sm:$0xf]  ;;  %v3580_v38 = vld [vmem:[%s5161_s14 + $0x68] sm:$0xf] }
 0x11b   : > { %2861 = vmatpush.bf16.msrb.mxu2 %v4589_v59  ;;  %2848 = vmatpush.bf16.msrb.mxu3 %v3565_v0  ;;  %v5842_v59 = vadd.f32 %v5808_v63, %v2486_v52  ;;  %v2514_v0 = vpop.f32.mrf.mxu0  ;;  %v4349_v63 = vor.u32 %v5010_v54, %v4348_v50  ;;  %v4094_v52 = vld [vmem:[%s5161_s14 + $0x4e8] sm:$0xf0]  ;;  %v5074_v40 = vld [vmem:[%s5161_s14 + $0x8e4] sm:$0xf0] }
 0x11c   : > { %2919 = vmatpush.bf16.msra.mxu0 %v4473_v7  ;;  %2937 = vmatpush.bf16.msra.mxu1 %v2249_v28  ;;  %v3958_v7 = vld [vmem:[%s5161_s14 + $0x3e0] sm:$0xf0]  ;;  %v4946_v28 = vld [vmem:[%s5161_s14 + $0x4e4] sm:$0xf0] }
 0x11d   : > { %2875 = vmatmul.bf16.vlgmr.msrb.gmra.mxu1 %v5256_v53  ;;  %v3961_v17 = vor.u32 %v4897_v6, %v3958_v7  ;;  %v2538_v35 = vpop.f32.mrf.mxu3  ;;  %v4801_v0 = vld [vmem:[%s5161_s14 + $0x64] sm:$0xf]  ;;  %v3573_v7 = vor.u32 %v4817_v58, %v3572_v56  ;;  %v4834_v56 = vld [vmem:[%s5161_s14 + $0x16c] sm:$0xf] }
 0x11e   : > { %2849 = vmatmul.bf16.vlgmr.msrb.gmra.mxu3 %v5256_v53  ;;  %v3710_v58 = vld [vmem:[%s5161_s14 + $0x1e8] sm:$0xf0] }
 0x11f   : > { %2893 = vmatpush.bf16.msra.mxu2 %v4469_v3  ;;  %2911 = vmatpush.bf16.msra.mxu3 %v2246_v4  ;;  %v3956_v3 = vld [vmem:[%s5161_s14 + $0x360] sm:$0xf] }
 0x120   : > { %2920 = vmatpush.bf16.msra.mxu0 %v4345_v26  ;;  %v4913_v4 = vld [vmem:[%s5161_s14 + $0x3dc] sm:$0xf0]  ;;  %2938 = vmatpush.bf16.msra.mxu1 %v4729_v47  ;;  %v4353_v26 = vor.u32 %v4994_v13, %v4350_v15  ;;  %v2564_v47 = vpop.f32.mrf.mxu1 }
 0x121   : > { %4777 = vmatmul.msk.bf16.vlgmr.msrb.gmra.mxu0 %vm2168_vm1, %v5207_v55  ;;  %v3957_v12 = vor.u32 %v4913_v4, %v3956_v3  ;;  %v2551_v3 = vpop.f32.mrf.mxu2  ;;  %v4097_v4 = vor.u32 %v4930_v51, %v4094_v52 }
 0x122   : > { %4776 = vmatmul.msk.bf16.vlgmr.msrb.gmra.mxu2 %vm2168_vm1, %v5207_v55  ;;  %v5886_v6 = vadd.f32 %v2551_v3, %v2538_v35  ;;  %v4356_v3 = vld [vmem:[%s5161_s14 + $0x670] sm:$0xf] }
 0x123   : > { %2894 = vmatpush.bf16.msra.mxu2 %v4341_v21  ;;  %2912 = vmatpush.bf16.msra.mxu3 %v4725_v22  ;;  %v4221_v21 = vor.u32 %v4978_v10, %v4220_v9  ;;  %v4865_v22 = vld [vmem:[%s5161_s14 + $0x264] sm:$0xf]  ;;  %v2577_v48 = vpop.f32.mrf.mxu0  ;;  %v3966_v9 = vld [vmem:[%s5161_s14 + $0x3e8] sm:$0xf0] }
 0x124   : > { %2921 = vmatpush.bf16.msra.mxu0 %v4217_v43  ;;  %2939 = vmatpush.bf16.msra.mxu1 %v4601_v5  ;;  %v3833_v36 = vor.u32 %v4865_v22, %v3830_v30  ;;  %v3702_v43 = vld [vmem:[%s5161_s14 + $0x1e0] sm:$0xf0]  ;;  %v5876_v50 = vadd.f32 %v2577_v48, %v2564_v47  ;;  %v4882_v5 = vld [vmem:[%s5161_s14 + $0x2e4] sm:$0xf0]  ;;  %v4484_v47 = vld [vmem:[%s5161_s14 + $0x770] sm:$0xf] }
 0x125   : > { %v2540_v10 = vpop.f32.mrf.mxu3  ;;  %v5106_v22 = vld [vmem:[%s5161_s14 + $0x9e4] sm:$0xf0]  ;;  %v5043_v48 = vld [vmem:[%s5161_s14 + $0x7ec] sm:$0xf0] }
 0x127   : > { %2895 = vmatpush.bf16.msra.mxu2 %v4213_v41  ;;  %2913 = vmatpush.bf16.msra.mxu3 %v4597_v42  ;;  %v4093_v41 = vor.u32 %v4946_v28, %v4092_v27  ;;  %v4833_v42 = vld [vmem:[%s5161_s14 + $0x164] sm:$0xf] }
 0x128   : > { %2922 = vmatpush.bf16.msra.mxu0 %v4089_v2  ;;  %2971 = vmatpush.bf16.msrb.mxu1 %v4481_v8  ;;  %v3705_v54 = vor.u32 %v4833_v42, %v3702_v43  ;;  %v3574_v2 = vld [vmem:[%s5161_s14 + $0xe0] sm:$0xf0]  ;;  %v4898_v8 = vld [vmem:[%s5161_s14 + $0x36c] sm:$0xf]  ;;  %v2566_v27 = vpop.f32.mrf.mxu1  ;;  %v4818_v42 = vld [vmem:[%s5161_s14 + $0xe4] sm:$0xf0] }
 0x129   : > { %v3577_v13 = vor.u32 %v4801_v0, %v3574_v2  ;;  %v3969_v30 = vor.u32 %v4898_v8, %v3966_v9  ;;  %v5058_v43 = vld [vmem:[%s5161_s14 + $0x86c] sm:$0xf]  ;;  %v4485_v0 = vor.u32 %v5043_v48, %v4484_v47  ;;  %v5107_v8 = vld [vmem:[%s5161_s14 + $0x9ec] sm:$0xf0]  ;;  %v4995_v9 = vld [vmem:[%s5161_s14 + $0x674] sm:$0xf] }
 0x12a   : > { %v5075_v27 = vld [vmem:[%s5161_s14 + $0x8ec] sm:$0xf0] }
 0x12b   : > { %2945 = vmatpush.bf16.msrb.mxu3 %v4477_v46  ;;  %2896 = vmatpush.bf16.msra.mxu2 %v4085_v60  ;;  %v4914_v46 = vld [vmem:[%s5161_s14 + $0x3e4] sm:$0xf0]  ;;  %v1842_v60 = vpack.c.b16 %v1490_v39, %v1490_v39 }
 0x12c   : > { %2923 = vmatpush.bf16.msra.mxu0 %v3961_v17  ;;  %2972 = vmatpush.bf16.msrb.mxu1 %v4353_v26  ;;  %v3965_v62 = vor.u32 %v4914_v46, %v3964_v45  ;;  %v2255_v17 = vsel %vm2172_vm0, %v1843_v61, 0  ;;  %v4734_v26 = vld [vmem:[%s5161_s14 + $0x9e8] sm:$0xf0]  ;;  %v4604_v39 = vld [vmem:[%s5161_s14 + $0x868] sm:$0xf]  ;;  %v2553_v46 = vpop.f32.mrf.mxu2  ;;  %v3581_v61 = vor.u32 %v4818_v42, %v3580_v38 }
 0x12d   : > { %v2252_v15 = vsel %vm2172_vm0, %v1842_v60, 0  ;;  %4779 = vmatmul.msk.bf16.vlgmr.msra.gmra.mxu1 %vm2168_vm1, %v5207_v55  ;;  %v4737_v37 = vor.u32 %v5090_v24, %v4734_v26  ;;  %v4605_v52 = vor.u32 %v5074_v40, %v4604_v39  ;;  %v5921_v60 = vpop.f32.mrf.mxu3  ;;  %v4612_v26 = vld [vmem:[%s5161_s14 + $0x870] sm:$0xf]  ;;  %v5091_v38 = vld [vmem:[%s5161_s14 + $0x974] sm:$0xf] }
 0x12e   : > { %4778 = vmatmul.msk.bf16.vlgmr.msra.gmra.mxu3 %vm2168_vm1, %v5207_v55  ;;  %v4742_v39 = vld [vmem:[%s5161_s14 + $0x9f0] sm:$0xf0] }
 0x12f   : > { %2946 = vmatpush.bf16.msrb.mxu3 %v4349_v63  ;;  %2897 = vmatpush.bf16.msra.mxu2 %v3957_v12  ;;  %v3836_v63 = vld [vmem:[%s5161_s14 + $0x268] sm:$0xf]  ;;  %v5891_v12 = vld [vmem:[%s5161_s14 + $0xa70] sm:$0xff]  ;;  %v4745_v48 = vor.u32 %v5091_v38, %v4742_v39 }
 0x130   : > { %2924 = vmatpush.bf16.msra.mxu0 %v3833_v36  ;;  %2973 = vmatpush.bf16.msrb.mxu1 %v4225_v44  ;;  %v3837_v18 = vor.u32 %v4882_v5, %v3836_v63  ;;  %v1492_v28 = vunpack.c.l.b16 %v5891_v12  ;;  %v3709_v36 = vor.u32 %v4850_v25, %v3708_v19  ;;  %v4606_v44 = vld [vmem:[%s5161_s14 + $0x8e8] sm:$0xf0]  ;;  %v1493_v51 = vunpack.c.h.b16 %v5891_v12  ;;  %v2629_v12 = vpop.f32.mrf.mxu1 }
 0x131   : > { %v3713_v5 = vor.u32 %v4834_v56, %v3710_v58  ;;  %v5012_v56 = vld [vmem:[%s5161_s14 + $0x6f4] sm:$0xf0]  ;;  %v5059_v58 = vld [vmem:[%s5161_s14 + $0x874] sm:$0xf] }
 0x132   : > { %v1844_v45 = vpack.c.b16 %v1492_v28, %v1492_v28  ;;  %v1845_v10 = vpack.c.b16 %v1493_v51, %v1493_v51  ;;  %v4102_v51 = vld [vmem:[%s5161_s14 + $0x4f0] sm:$0xf0] }
 0x133   : > { %2947 = vmatpush.bf16.msrb.mxu3 %v4221_v21  ;;  %2898 = vmatpush.bf16.msra.mxu2 %v3829_v29  ;;  %v4732_v21 = vld [vmem:[%s5161_s14 + $0x968] sm:$0xf]  ;;  %v2579_v29 = vpop.f32.mrf.mxu0 }
 0x134   : > { %2925 = vmatpush.bf16.msra.mxu0 %v3705_v54  ;;  %2974 = vmatpush.bf16.msrb.mxu1 %v4097_v4  ;;  %v4733_v35 = vor.u32 %v5106_v22, %v4732_v21  ;;  %v4486_v54 = vld [vmem:[%s5161_s14 + $0x7f0] sm:$0xf0]  ;;  %v2258_v2 = vsel %vm2172_vm0, %v1844_v45, 0  ;;  %v5011_v4 = vld [vmem:[%s5161_s14 + $0x6ec] sm:$0xf0]  ;;  %v2261_v24 = vsel %vm2172_vm0, %v1845_v10, 0 }
 0x135   : > { %v4228_v21 = vld [vmem:[%s5161_s14 + $0x570] sm:$0xf]  ;;  %v4963_v29 = vld [vmem:[%s5161_s14 + $0x574] sm:$0xf] }
 0x136   : > { %v4979_v22 = vld [vmem:[%s5161_s14 + $0x5ec] sm:$0xf0] }
 0x137   : > { %2948 = vmatpush.bf16.msrb.mxu3 %v4093_v41  ;;  %2899 = vmatpush.bf16.msra.mxu2 %v3701_v49  ;;  %v3841_v41 = vor.u32 %v4866_v31, %v3838_v34  ;;  %v5027_v49 = vld [vmem:[%s5161_s14 + $0x774] sm:$0xf]  ;;  %v4492_v34 = vld [vmem:[%s5161_s14 + $0x778] sm:$0xf]  ;;  %v4229_v40 = vor.u32 %v4979_v22, %v4228_v21  ;;  %v3844_v21 = vld [vmem:[%s5161_s14 + $0x270] sm:$0xf] }
 0x138   : > { %2926 = vmatpush.bf16.msra.mxu0 %v3577_v13  ;;  %2975 = vmatpush.bf16.msrb.mxu1 %v3969_v30  ;;  %v4489_v63 = vor.u32 %v5027_v49, %v4486_v54  ;;  %v4358_v13 = vld [vmem:[%s5161_s14 + $0x6f0] sm:$0xf0]  ;;  %v2631_v45 = vpop.f32.mrf.mxu1  ;;  %v4883_v22 = vld [vmem:[%s5161_s14 + $0x2ec] sm:$0xf0] }
 0x139   : > { %v4361_v30 = vor.u32 %v4995_v9, %v4358_v13  ;;  %v4230_v31 = vld [vmem:[%s5161_s14 + $0x5f0] sm:$0xf0]  ;;  %v4980_v13 = vld [vmem:[%s5161_s14 + $0x5f4] sm:$0xf0] }
 0x13a   : > { %v4233_v42 = vor.u32 %v4963_v29, %v4230_v31  ;;  %v4931_v49 = vld [vmem:[%s5161_s14 + $0x474] sm:$0xf]  ;;  %v4948_v29 = vld [vmem:[%s5161_s14 + $0x4f4] sm:$0xf0] }
 0x13b   : > { %2949 = vmatpush.bf16.msrb.mxu3 %v3965_v62  ;;  %2900 = vmatpush.bf16.msra.mxu2 %v3573_v7  ;;  %v4609_v62 = vor.u32 %v5058_v43, %v4606_v44  ;;  %v4740_v7 = vld [vmem:[%s5161_s14 + $0x970] sm:$0xf]  ;;  %v2616_v28 = vpop.f32.mrf.mxu0  ;;  %v3974_v9 = vld [vmem:[%s5161_s14 + $0x3f0] sm:$0xf0]  ;;  %v481_v31 = vld [vmem:[%s5161_s14 + $0xa78] sm:$0xff] }
 0x13c   : > { %2989 = vmatpush.bf16.msrb.mxu0 %v2255_v17  ;;  %2976 = vmatpush.bf16.msrb.mxu1 %v3841_v41  ;;  %v3582_v17 = vld [vmem:[%s5161_s14 + $0xe8] sm:$0xf0]  ;;  %v4741_v19 = vor.u32 %v5107_v8, %v4740_v7  ;;  %v4613_v41 = vor.u32 %v5075_v27, %v4612_v26  ;;  %v4100_v43 = vld [vmem:[%s5161_s14 + $0x470] sm:$0xf]  ;;  %v4899_v8 = vld [vmem:[%s5161_s14 + $0x374] sm:$0xf]  ;;  %v1494_v45 = vunpack.c.l.b16 %v481_v31 }
 0x13d   : > { %2927 = vmatmul.bf16.vlgmr.msra.gmra.mxu0 %v5256_v53  ;;  %v4947_v44 = vld [vmem:[%s5161_s14 + $0x4ec] sm:$0xf0]  ;;  %v2590_v47 = vpop.f32.mrf.mxu2  ;;  %v3846_v26 = vld [vmem:[%s5161_s14 + $0x2f0] sm:$0xf0] }
 0x13e   : > { %2901 = vmatmul.bf16.vlgmr.msra.gmra.mxu2 %v5256_v53  ;;  %v5952_v54 = vadd.f32 %v5921_v60, %v2590_v47  ;;  %v4915_v60 = vld [vmem:[%s5161_s14 + $0x3ec] sm:$0xf0]  ;;  %v3980_v47 = vld [vmem:[%s5161_s14 + $0x378] sm:$0xf] }
 0x13f   : > { %2963 = vmatpush.bf16.msrb.mxu2 %v2252_v15  ;;  %2950 = vmatpush.bf16.msrb.mxu3 %v3837_v18  ;;  %v4802_v15 = vld [vmem:[%s5161_s14 + $0x6c] sm:$0xf]  ;;  %v4357_v18 = vor.u32 %v5011_v4, %v4356_v3  ;;  %v4105_v3 = vor.u32 %v4931_v49, %v4102_v51  ;;  %v3972_v4 = vld [vmem:[%s5161_s14 + $0x370] sm:$0xf] }
 0x140   : > { %2990 = vmatpush.bf16.msrb.mxu0 %v4737_v37  ;;  %2977 = vmatpush.bf16.msrb.mxu1 %v3713_v5  ;;  %v3585_v25 = vor.u32 %v4802_v15, %v3582_v17  ;;  %v5044_v37 = vld [vmem:[%s5161_s14 + $0x7f4] sm:$0xf0]  ;;  %v3973_v15 = vor.u32 %v4915_v60, %v3972_v4  ;;  %v4996_v17 = vld [vmem:[%s5161_s14 + $0x67c] sm:$0xf]  ;;  %v4803_v60 = vld [vmem:[%s5161_s14 + $0x74] sm:$0xf] }
 0x141   : > { %v4493_v46 = vor.u32 %v5044_v37, %v4492_v34  ;;  %v3845_v34 = vor.u32 %v4883_v22, %v3844_v21  ;;  %v4238_v37 = vld [vmem:[%s5161_s14 + $0x5f8] sm:$0xf0]  ;;  %v3724_v22 = vld [vmem:[%s5161_s14 + $0x178] sm:$0xf] }
 0x142   : > { %v2668_v49 = vpop.f32.mrf.mxu1 }
 0x143   : > { %2964 = vmatpush.bf16.msrb.mxu2 %v4733_v35  ;;  %2951 = vmatpush.bf16.msrb.mxu3 %v3709_v36  ;;  %v5941_v35 = vadd.f32 %v2629_v12, %v2616_v28  ;;  %v2605_v36 = vpop.f32.mrf.mxu3  ;;  %v4236_v12 = vld [vmem:[%s5161_s14 + $0x578] sm:$0xf] }
 0x144   : > { %2991 = vmatpush.bf16.msrb.mxu0 %v4609_v62  ;;  %2978 = vmatpush.bf16.msrb.mxu1 %v3585_v25  ;;  %v4101_v62 = vor.u32 %v4947_v44, %v4100_v43  ;;  %v4108_v28 = vld [vmem:[%s5161_s14 + $0x478] sm:$0xf]  ;;  %v4964_v36 = vld [vmem:[%s5161_s14 + $0x57c] sm:$0xf]  ;;  %v4835_v43 = vld [vmem:[%s5161_s14 + $0x174] sm:$0xf] }
 0x145   : > { %v2592_v25 = vpop.f32.mrf.mxu2  ;;  %v3718_v44 = vld [vmem:[%s5161_s14 + $0x1f0] sm:$0xf0] }
 0x147   : > { %2965 = vmatpush.bf16.msrb.mxu2 %v4605_v52  ;;  %2952 = vmatpush.bf16.msrb.mxu3 %v3581_v61  ;;  %v4364_v52 = vld [vmem:[%s5161_s14 + $0x678] sm:$0xf]  ;;  %v4614_v61 = vld [vmem:[%s5161_s14 + $0x8f0] sm:$0xf0] }
 0x148   : > { %3023 = vmatpush.bf16.msra.mxu0 %v4489_v63  ;;  %3041 = vmatpush.bf16.msra.mxu1 %v2261_v24  ;;  %v2618_v63 = vpop.f32.mrf.mxu0  ;;  %v4365_v5 = vor.u32 %v5012_v56, %v4364_v52  ;;  %v4617_v7 = vor.u32 %v5059_v58, %v4614_v61  ;;  %v4867_v24 = vld [vmem:[%s5161_s14 + $0x274] sm:$0xf]  ;;  %v1495_v52 = vunpack.c.h.b16 %v481_v31  ;;  %v4932_v61 = vld [vmem:[%s5161_s14 + $0x47c] sm:$0xf] }
 0x149   : > { %2979 = vmatmul.bf16.vlgmr.msrb.gmra.mxu1 %v5256_v53  ;;  %v3849_v39 = vor.u32 %v4867_v24, %v3846_v26  ;;  %v3590_v63 = vld [vmem:[%s5161_s14 + $0xf0] sm:$0xf0]  ;;  %v4748_v26 = vld [vmem:[%s5161_s14 + $0x978] sm:$0xf] }
 0x14a   : > { %2953 = vmatmul.bf16.vlgmr.msrb.gmra.mxu3 %v5256_v53  ;;  %v3593_v21 = vor.u32 %v4803_v60, %v3590_v63  ;;  %v3598_v60 = vld [vmem:[%s5161_s14 + $0xf8] sm:$0xf0] }
 0x14b   : > { %2997 = vmatpush.bf16.msra.mxu2 %v4485_v0  ;;  %3015 = vmatpush.bf16.msra.mxu3 %v2258_v2  ;;  %v5028_v0 = vld [vmem:[%s5161_s14 + $0x77c] sm:$0xf]  ;;  %v2642_v38 = vpop.f32.mrf.mxu3 }
 0x14c   : > { %3024 = vmatpush.bf16.msra.mxu0 %v4361_v30  ;;  %v4494_v2 = vld [vmem:[%s5161_s14 + $0x7f8] sm:$0xf0]  ;;  %3042 = vmatpush.bf16.msra.mxu1 %v4745_v48  ;;  %v4237_v30 = vor.u32 %v4980_v13, %v4236_v12  ;;  %v4916_v48 = vld [vmem:[%s5161_s14 + $0x3f4] sm:$0xf0]  ;;  %v1847_v12 = vpack.c.b16 %v1495_v52, %v1495_v52 }
 0x14d   : > { %4781 = vmatmul.msk.bf16.vlgmr.msrb.gmra.mxu0 %vm2168_vm1, %v5207_v55  ;;  %v4497_v10 = vor.u32 %v5028_v0, %v4494_v2  ;;  %v3721_v0 = vor.u32 %v4835_v43, %v3718_v44  ;;  %v3588_v2 = vld [vmem:[%s5161_s14 + $0x70] sm:$0xf]  ;;  %v3981_v4 = vor.u32 %v4916_v48, %v3980_v47  ;;  %v4620_v44 = vld [vmem:[%s5161_s14 + $0x878] sm:$0xf]  ;;  %v4836_v52 = vld [vmem:[%s5161_s14 + $0x17c] sm:$0xf] }
 0x14e   : > { %4780 = vmatmul.msk.bf16.vlgmr.msrb.gmra.mxu2 %vm2168_vm1, %v5207_v55  ;;  %v2267_v31 = vsel %vm2172_vm0, %v1847_v12, 0  ;;  %v4820_v47 = vld [vmem:[%s5161_s14 + $0xf4] sm:$0xf0] }
 0x14f   : > { %2998 = vmatpush.bf16.msra.mxu2 %v4357_v18  ;;  %3016 = vmatpush.bf16.msra.mxu3 %v4741_v19  ;;  %v4366_v18 = vld [vmem:[%s5161_s14 + $0x6f8] sm:$0xf0]  ;;  %v3977_v19 = vor.u32 %v4899_v8, %v3974_v9  ;;  %v3852_v9 = vld [vmem:[%s5161_s14 + $0x278] sm:$0xf] }
 0x150   : > { %3025 = vmatpush.bf16.msra.mxu0 %v4233_v42  ;;  %3043 = vmatpush.bf16.msra.mxu1 %v4617_v7  ;;  %v4369_v27 = vor.u32 %v4996_v17, %v4366_v18  ;;  %v4109_v42 = vor.u32 %v4948_v29, %v4108_v28  ;;  %v2681_v51 = vpop.f32.mrf.mxu0  ;;  %v2655_v7 = vpop.f32.mrf.mxu2  ;;  %v4900_v17 = vld [vmem:[%s5161_s14 + $0x37c] sm:$0xf] }
 0x151   : > { %v5989_v58 = vadd.f32 %v2681_v51, %v2668_v49  ;;  %v5999_v13 = vadd.f32 %v2655_v7, %v2642_v38  ;;  %v3982_v18 = vld [vmem:[%s5161_s14 + $0x3f8] sm:$0xf0]  ;;  %v2670_v29 = vpop.f32.mrf.mxu1 }
 0x152   : > { %v3985_v28 = vor.u32 %v4900_v17, %v3982_v18  ;;  %v4868_v38 = vld [vmem:[%s5161_s14 + $0x27c] sm:$0xf] }
 0x153   : > { %2999 = vmatpush.bf16.msra.mxu2 %v4229_v40  ;;  %3017 = vmatpush.bf16.msra.mxu3 %v4613_v41  ;;  %v3716_v40 = vld [vmem:[%s5161_s14 + $0x170] sm:$0xf]  ;;  %v5060_v49 = vld [vmem:[%s5161_s14 + $0x87c] sm:$0xf] }
 0x154   : > { %3026 = vmatpush.bf16.msra.mxu0 %v4105_v3  ;;  %3075 = vmatpush.bf16.msrb.mxu1 %v4497_v10  ;;  %v4851_v41 = vld [vmem:[%s5161_s14 + $0x1ec] sm:$0xf0]  ;;  %v4884_v10 = vld [vmem:[%s5161_s14 + $0x2f4] sm:$0xf0]  ;;  %v4622_v51 = vld [vmem:[%s5161_s14 + $0x8f8] sm:$0xf0] }
 0x155   : > { %v3717_v56 = vor.u32 %v4851_v41, %v3716_v40  ;;  %v4819_v3 = vld [vmem:[%s5161_s14 + $0xec] sm:$0xf0]  ;;  %v3853_v25 = vor.u32 %v4884_v10, %v3852_v9 }
 0x157   : > { %3049 = vmatpush.bf16.msrb.mxu3 %v4493_v46  ;;  %3000 = vmatpush.bf16.msra.mxu2 %v4101_v62  ;;  %v4241_v46 = vor.u32 %v4964_v36, %v4238_v37  ;;  %v4110_v62 = vld [vmem:[%s5161_s14 + $0x4f8] sm:$0xf0] }
 0x158   : > { %3027 = vmatpush.bf16.msra.mxu0 %v3977_v19  ;;  %3076 = vmatpush.bf16.msrb.mxu1 %v4369_v27  ;;  %v4113_v8 = vor.u32 %v4932_v61, %v4110_v62  ;;  %v2644_v19 = vpop.f32.mrf.mxu3  ;;  %v5108_v27 = vld [vmem:[%s5161_s14 + $0x9f4] sm:$0xf0]  ;;  %v4750_v36 = vld [vmem:[%s5161_s14 + $0x9f8] sm:$0xf0]  ;;  %v2683_v37 = vpop.f32.mrf.mxu0 }
 0x159   : > { %4783 = vmatmul.msk.bf16.vlgmr.msra.gmra.mxu1 %vm2168_vm1, %v5207_v55  ;;  %v4749_v40 = vor.u32 %v5108_v27, %v4748_v26  ;;  %v2657_v48 = vpop.f32.mrf.mxu2  ;;  %v2733_v63 = vpop.f32.mrf.mxu1 }
 0x15a   : > { %4782 = vmatmul.msk.bf16.vlgmr.msra.gmra.mxu3 %vm2168_vm1, %v5207_v55 }
 0x15b   : > { %3050 = vmatpush.bf16.msrb.mxu3 %v4365_v5  ;;  %3001 = vmatpush.bf16.msra.mxu2 %v3973_v15  ;;  %v1846_v5 = vpack.c.b16 %v1494_v45, %v1494_v45  ;;  %v3589_v15 = vor.u32 %v4819_v3, %v3588_v2  ;;  %v5076_v45 = vld [vmem:[%s5161_s14 + $0x8f4] sm:$0xf0]  ;;  %v4625_v2 = vor.u32 %v5060_v49, %v4622_v51 }
 0x15c   : > { %3028 = vmatpush.bf16.msra.mxu0 %v3849_v39  ;;  %3077 = vmatpush.bf16.msrb.mxu1 %v4241_v46  ;;  %v3854_v39 = vld [vmem:[%s5161_s14 + $0x2f8] sm:$0xf0]  ;;  %v4621_v61 = vor.u32 %v5076_v45, %v4620_v44 }
 0x15d   : > { %v2264_v24 = vsel %vm2172_vm0, %v1846_v5, 0  ;;  %v3857_v46 = vor.u32 %v4868_v38, %v3854_v39 }
 0x15f   : > { %3051 = vmatpush.bf16.msrb.mxu3 %v4237_v30  ;;  %3002 = vmatpush.bf16.msra.mxu2 %v3845_v34  ;;  %v4852_v30 = vld [vmem:[%s5161_s14 + $0x1f4] sm:$0xf0]  ;;  %v5092_v34 = vld [vmem:[%s5161_s14 + $0x97c] sm:$0xf] }
 0x160   : > { %3029 = vmatpush.bf16.msra.mxu0 %v3721_v0  ;;  %3078 = vmatpush.bf16.msrb.mxu1 %v4113_v8  ;;  %v3725_v41 = vor.u32 %v4852_v30, %v3724_v22  ;;  %v4753_v43 = vor.u32 %v5092_v34, %v4750_v36  ;;  %v2707_v62 = vpop.f32.mrf.mxu3 }
 0x161   : > { %v2735_v10 = vpop.f32.mrf.mxu1 }
 0x162   : > { %v2720_v7 = vpop.f32.mrf.mxu0 }
 0x163   : > { %3052 = vmatpush.bf16.msrb.mxu3 %v4109_v42  ;;  %3003 = vmatpush.bf16.msra.mxu2 %v3717_v56  ;;  %v3596_v42 = vld [vmem:[%s5161_s14 + $0x78] sm:$0xf]  ;;  %v3726_v56 = vld [vmem:[%s5161_s14 + $0x1f8] sm:$0xf0]  ;;  %v6028_v8 = vadd.f32 %v2733_v63, %v2720_v7 }
 0x164   : > { %3030 = vmatpush.bf16.msra.mxu0 %v3593_v21  ;;  %3079 = vmatpush.bf16.msrb.mxu1 %v3985_v28  ;;  %v3597_v0 = vor.u32 %v4820_v47, %v3596_v42  ;;  %v3729_v3 = vor.u32 %v4836_v52, %v3726_v56 }
 0x167   : > { %3053 = vmatpush.bf16.msrb.mxu3 %v3981_v4  ;;  %3004 = vmatpush.bf16.msra.mxu2 %v3589_v15  ;;  %v4804_v4 = vld [vmem:[%s5161_s14 + $0x7c] sm:$0xf] }
 0x168   : > { %3093 = vmatpush.bf16.msrb.mxu0 %v2267_v31  ;;  %3080 = vmatpush.bf16.msrb.mxu1 %v3857_v46  ;;  %v3601_v5 = vor.u32 %v4804_v4, %v3598_v60  ;;  %v2709_v9 = vpop.f32.mrf.mxu3 }
 0x169   : > { %3031 = vmatmul.bf16.vlgmr.msra.gmra.mxu0 %v5256_v53  ;;  %v2694_v12 = vpop.f32.mrf.mxu2 }
 0x16a   : > { %3005 = vmatmul.bf16.vlgmr.msra.gmra.mxu2 %v5256_v53  ;;  %v6031_v15 = vadd.f32 %v2707_v62, %v2694_v12  ;;  %v2722_v17 = vpop.f32.mrf.mxu0 }
 0x16b   : > { %3067 = vmatpush.bf16.msrb.mxu2 %v2264_v24  ;;  %3054 = vmatpush.bf16.msrb.mxu3 %v3853_v25 }
 0x16c   : > { %3094 = vmatpush.bf16.msrb.mxu0 %v4753_v43  ;;  %3081 = vmatpush.bf16.msrb.mxu1 %v3729_v3  ;;  %v3101_v43 = vadd.f32 %v5646_v16, %v5602_v14 }
 0x16e   : > { %v2772_v21 = vpop.f32.mrf.mxu1  ;;  %v3102_v47 = vadd.f32 %v3101_v43, %v5612_v32 }
 0x16f   : > { %3068 = vmatpush.bf16.msrb.mxu2 %v4749_v40  ;;  %3055 = vmatpush.bf16.msrb.mxu3 %v3725_v41 }
 0x170   : > { %3095 = vmatpush.bf16.msrb.mxu0 %v4625_v2  ;;  %3082 = vmatpush.bf16.msrb.mxu1 %v3601_v5  ;;  %v3103_v48 = vadd.f32 %v3102_v47, %v5676_v57 }
 0x171   : > { %v2696_v18 = vpop.f32.mrf.mxu2 }
 0x172   : > { %v2785_v22 = vpop.f32.mrf.mxu0  ;;  %v3104_v52 = vadd.f32 %v3103_v48, %v5733_v11 }
 0x173   : > { %3069 = vmatpush.bf16.msrb.mxu2 %v4621_v61  ;;  %3056 = vmatpush.bf16.msrb.mxu3 %v3597_v0  ;;  %v6037_v30 = vadd.f32 %v2785_v22, %v2772_v21 }
 0x174   : > { %3083 = vmatmul.bf16.vlgmr.msrb.gmra.mxu1 %v5256_v53  ;;  %v3105_v62 = vadd.f32 %v3104_v52, %v5715_v23 }
 0x175   : > { %v2746_v19 = vpop.f32.mrf.mxu3 }
 0x176   : > { %3057 = vmatmul.bf16.vlgmr.msrb.gmra.mxu3 %v5256_v53  ;;  %v2774_v53 = vpop.f32.mrf.mxu1  ;;  %v3106_v0 = vadd.f32 %v3105_v62, %v5778_v20 }
 0x178   : > { %v3107_v4 = vadd.f32 %v3106_v0, %v5765_v1 }
 0x179   : > { %4785 = vmatmul.msk.bf16.vlgmr.msrb.gmra.mxu0 %vm2168_vm1, %v5207_v55  ;;  %v2759_v25 = vpop.f32.mrf.mxu2 }
 0x17a   : > { %4784 = vmatmul.msk.bf16.vlgmr.msrb.gmra.mxu2 %vm2168_vm1, %v5207_v55  ;;  %v6039_v24 = vadd.f32 %v2759_v25, %v2746_v19  ;;  %v2787_v27 = vpop.f32.mrf.mxu0  ;;  %v3108_v63 = vadd.f32 %v3107_v4, %v5842_v59 }
 0x17c   : > { %v3109_v7 = vadd.f32 %v3108_v63, %v5824_v33 }
 0x17d   : > { %v2748_v26 = vpop.f32.mrf.mxu3 }
 0x17e   : > { %v2837_v31 = vpop.f32.mrf.mxu1  ;;  %v3110_v10 = vadd.f32 %v3109_v7, %v5886_v6 }
 0x180   : > { %v3111_v18 = vadd.f32 %v3110_v10, %v5876_v50 }
 0x181   : > { %v2761_v28 = vpop.f32.mrf.mxu2 }
 0x182   : > { %v3112_v21 = vadd.f32 %v3111_v18, %v5952_v54 }
 0x184   : > { %v3113_v22 = vadd.f32 %v3112_v21, %v5941_v35 }
 0x185   : > { %v2811_v29 = vpop.f32.mrf.mxu3 }
 0x186   : > { %v2839_v37 = vpop.f32.mrf.mxu1  ;;  %v3114_v26 = vadd.f32 %v3113_v22, %v5999_v13 }
 0x18d   : > { %v2813_v55 = vpop.f32.mrf.mxu3 }
 0x18e   : > { %v2824_v34 = vpop.f32.mrf.mxu0 }
 0x18f   : > { %v6041_v36 = vadd.f32 %v2837_v31, %v2824_v34 }
 0x195   : > { %v2798_v38 = vpop.f32.mrf.mxu2 }
 0x196   : > { %v6043_v39 = vadd.f32 %v2811_v29, %v2798_v38  ;;  %v2826_v40 = vpop.f32.mrf.mxu0  ;;  %v3115_v29 = vadd.f32 %v3114_v26, %v5989_v58 }
 0x198   : > { %v3116_v31 = vadd.f32 %v3115_v29, %v6031_v15 }
 0x19a   : > { %v2876_v44 = vpop.f32.mrf.mxu1  ;;  %v3117_v37 = vadd.f32 %v3116_v31, %v6028_v8 }
 0x19d   : > { %v2800_v41 = vpop.f32.mrf.mxu2 }
 0x19e   : > { %v2889_v45 = vpop.f32.mrf.mxu0  ;;  %v3118_v41 = vadd.f32 %v3117_v37, %v6039_v24 }
 0x19f   : > { %v6047_v46 = vadd.f32 %v2889_v45, %v2876_v44 }
 0x1a0   : > { %v3119_v44 = vadd.f32 %v3118_v41, %v6037_v30 }
 0x1a1   : > { %v2850_v42 = vpop.f32.mrf.mxu3 }
 0x1a2   : > { %v2878_v56 = vpop.f32.mrf.mxu1  ;;  %v3120_v47 = vadd.f32 %v3119_v44, %v6043_v39 }
 0x1a4   : > { %v3121_v52 = vadd.f32 %v3120_v47, %v6041_v36 }
 0x1a5   : > { %v2863_v49 = vpop.f32.mrf.mxu2 }
 0x1a6   : > { %v2891_v61 = vpop.f32.mrf.mxu0  ;;  %v6068_v48 = vadd.f32 %v2863_v49, %v2850_v42 }
 0x1a8   : > { %v3122_v56 = vadd.f32 %v3121_v52, %v6068_v48 }
 0x1a9   : > { %v2852_v51 = vpop.f32.mrf.mxu3 }
 0x1aa   : > { %v2941_v60 = vpop.f32.mrf.mxu1 }
 0x1ad   : > { %v2865_v2 = vpop.f32.mrf.mxu2 }
 0x1ae   : > { %v3123_v2 = vadd.f32 %v3122_v56, %v6047_v46 }
 0x1b1   : > { %v2915_v3 = vpop.f32.mrf.mxu3 }
 0x1b2   : > { %v2943_v12 = vpop.f32.mrf.mxu1 }
 0x1b9   : > { %v2917_v9 = vpop.f32.mrf.mxu3 }
 0x1ba   : > { %v2928_v5 = vpop.f32.mrf.mxu0 }
 0x1bb   : > { %v6076_v9 = vadd.f32 %v2941_v60, %v2928_v5 }
 0x1c1   : > { %v2902_v17 = vpop.f32.mrf.mxu2 }
 0x1c2   : > { %v2930_v19 = vpop.f32.mrf.mxu0  ;;  %v6072_v0 = vadd.f32 %v2915_v3, %v2902_v17 }
 0x1c4   : > { %v3124_v7 = vadd.f32 %v3123_v2, %v6072_v0 }
 0x1c6   : > { %v2980_v27 = vpop.f32.mrf.mxu1  ;;  %v3125_v49 = vadd.f32 %v3124_v7, %v6076_v9 }
 0x1c9   : > { %v2904_v25 = vpop.f32.mrf.mxu2 }
 0x1ca   : > { %v2993_v28 = vpop.f32.mrf.mxu0 }
 0x1cb   : > { %v6082_v18 = vadd.f32 %v2993_v28, %v2980_v27 }
 0x1cd   : > { %v2954_v53 = vpop.f32.mrf.mxu3 }
 0x1ce   : > { %v2982_v38 = vpop.f32.mrf.mxu1 }
 0x1d1   : > { %v2967_v34 = vpop.f32.mrf.mxu2 }
 0x1d2   : > { %v2995_v40 = vpop.f32.mrf.mxu0  ;;  %v6078_v10 = vadd.f32 %v2967_v34, %v2954_v53 }
 0x1d3   : > { %v5131_v40 = vmov 4096.0  }
 0x1d4   : > { %v3126_v12 = vadd.f32 %v3125_v49, %v6078_v10  ;;  %5119 = vrcp.f32 %v5131_v40 }
 0x1d5   : > { %v2956_v55 = vpop.f32.mrf.mxu3 }
 0x1d6   : > { %v3045_v51 = vpop.f32.mrf.mxu1  ;;  %v3127_v22 = vadd.f32 %v3126_v12, %v6082_v18 }
 0x1d9   : > { %v2969_v43 = vpop.f32.mrf.mxu2 }
 0x1da   : > { %v5120_v41 = vpop.eup %5119 }
 0x1db   : > { %v3135_v43 = vmul.f32 4096.0, %v5120_v41  ;;  %vm3139_vm2 = vweird.f32 %v5120_v41 }
 0x1dd   : > { %v3019_v45 = vpop.f32.mrf.mxu3  ;;  %v3136_v44 = vsub.f32 1.0, %v3135_v43 }
 0x1de   : > { %v3047_v4 = vpop.f32.mrf.mxu1 }
 0x1e5   : > { %v3021_v62 = vpop.f32.mrf.mxu3 }
 0x1e6   : > { %v3032_v61 = vpop.f32.mrf.mxu0 }
 0x1e7   : > { %v6087_v26 = vadd.f32 %v3045_v51, %v3032_v61 }
 0x1ed   : > { %v3006_v63 = vpop.f32.mrf.mxu2 }
 0x1ee   : > { %v3034_v42 = vpop.f32.mrf.mxu0  ;;  %v6084_v3 = vadd.f32 %v3019_v45, %v3006_v63  ;;  %v3137_v45 = vmul.f32 %v5120_v41, %v3136_v44 }
 0x1f0   : > { %v3128_v60 = vadd.f32 %v3127_v22, %v6084_v3  ;;  %v3138_v47 = vadd.f32 %v5120_v41, %v3137_v45 }
 0x1f1   : > { %v3084_v17 = vpop.f32.mrf.mxu1 }
 0x1f2   : > { %v3129_v27 = vadd.f32 %v3128_v60, %v6087_v26  ;;  %v6097_v51 = vsel %vm3139_vm2, %v5120_v41, %v3138_v47 }
 0x1f5   : > { %v3008_v19 = vpop.f32.mrf.mxu2 }
 0x1f6   : > { %v3097_v25 = vpop.f32.mrf.mxu0 }
 0x1f7   : > { %v6090_v53 = vadd.f32 %v3097_v25, %v3084_v17 }
 0x1f9   : > { %v3058_v21 = vpop.f32.mrf.mxu3  ;;  %v3086_v31 = vpop.f32.mrf.mxu1 }
 0x1fd   : > { %v3071_v5 = vpop.f32.mrf.mxu2 }
 0x1fe   : > { %v6092_v29 = vadd.f32 %v3071_v5, %v3058_v21  ;;  %v3099_v34 = vpop.f32.mrf.mxu0 }
 0x200   : > { %v3130_v55 = vadd.f32 %v3129_v27, %v6092_v29 }
 0x201   : > { %v3060_v28 = vpop.f32.mrf.mxu3 }
 0x202   : > { %v3131_v37 = vadd.f32 %v3130_v55, %v6090_v53 }
 0x204   : > { %3132 = vadd.xlane.f32.xlu0 %v3131_v37 }
 0x205   : > { %v3073_v38 = vpop.f32.mrf.mxu2 }
 0x277   : > { %v3133_v52 = vpop.xlane.xlu0 %3132 }
 0x278   : > { %v6100_v56 = vmul.f32 %v6097_v51, %v3133_v52 }
 0x27a   : > { %v6104_v61 = vsub.f32 %v5602_v14, %v6100_v56  ;;  %v6108_v62 = vsub.f32 %v5646_v16, %v6100_v56  ;;  %v6112_v2 = vsub.f32 %v5612_v32, %v6100_v56  ;;  %v6120_v7 = vsub.f32 %v5676_v57, %v6100_v56 }
 0x27b   : > { %v6124_v14 = vsub.f32 %v5733_v11, %v6100_v56  ;;  %v6130_v32 = vsub.f32 %v5715_v23, %v6100_v56  ;;  %v6136_v57 = vsub.f32 %v5778_v20, %v6100_v56  ;;  %v6142_v17 = vsub.f32 %v5765_v1, %v6100_v56 }
 0x27c   : > { %v3174_v4 = vmul.f32 %v6104_v61, %v6104_v61  ;;  %v3175_v63 = vmul.f32 %v6108_v62, %v6108_v62  ;;  %v3176_v16 = vmul.f32 %v6112_v2, %v6112_v2  ;;  %v3177_v49 = vmul.f32 %v6120_v7, %v6120_v7 }
 0x27d   : > { %v3178_v11 = vmul.f32 %v6124_v14, %v6124_v14  ;;  %v3179_v23 = vmul.f32 %v6130_v32, %v6130_v32  ;;  %v6148_v22 = vsub.f32 %v5842_v59, %v6100_v56  ;;  %v3180_v20 = vmul.f32 %v6136_v57, %v6136_v57 }
 0x27e   : > { %v3206_v42 = vadd.f32 %v3175_v63, %v3174_v4  ;;  %v6154_v60 = vsub.f32 %v5824_v33, %v6100_v56  ;;  %v3181_v1 = vmul.f32 %v6142_v17, %v6142_v17  ;;  %v6160_v31 = vsub.f32 %v5886_v6, %v6100_v56 }
 0x27f   : > { %v3182_v59 = vmul.f32 %v6148_v22, %v6148_v22  ;;  %v6166_v28 = vsub.f32 %v5876_v50, %v6100_v56  ;;  %v6172_v55 = vsub.f32 %v5952_v54, %v6100_v56  ;;  %v6178_v38 = vsub.f32 %v5941_v35, %v6100_v56 }
 0x280   : > { %v3207_v12 = vadd.f32 %v3206_v42, %v3176_v16  ;;  %v3183_v33 = vmul.f32 %v6154_v60, %v6154_v60  ;;  %v3184_v6 = vmul.f32 %v6160_v31, %v6160_v31  ;;  %v6184_v41 = vsub.f32 %v5999_v13, %v6100_v56 }
 0x281   : > { %v3185_v50 = vmul.f32 %v6166_v28, %v6166_v28  ;;  %v3186_v54 = vmul.f32 %v6172_v55, %v6172_v55  ;;  %v6190_v44 = vsub.f32 %v5989_v58, %v6100_v56  ;;  %v3187_v35 = vmul.f32 %v6178_v38, %v6178_v38 }
 0x282   : > { %v3208_v19 = vadd.f32 %v3207_v12, %v3177_v49  ;;  %v6196_v47 = vsub.f32 %v6031_v15, %v6100_v56  ;;  %v3188_v13 = vmul.f32 %v6184_v41, %v6184_v41  ;;  %v6202_v4 = vsub.f32 %v6028_v8, %v6100_v56 }
 0x283   : > { %v3189_v58 = vmul.f32 %v6190_v44, %v6190_v44  ;;  %v6208_v16 = vsub.f32 %v6039_v24, %v6100_v56  ;;  %v6214_v49 = vsub.f32 %v6037_v30, %v6100_v56 }
 0x284   : > { %v3209_v21 = vadd.f32 %v3208_v19, %v3178_v11  ;;  %v3190_v15 = vmul.f32 %v6196_v47, %v6196_v47  ;;  %v3191_v8 = vmul.f32 %v6202_v4, %v6202_v4  ;;  %v6220_v11 = vsub.f32 %v6043_v39, %v6100_v56 }
 0x285   : > { %v3192_v24 = vmul.f32 %v6208_v16, %v6208_v16  ;;  %v3193_v30 = vmul.f32 %v6214_v49, %v6214_v49 }
 0x286   : > { %v3210_v25 = vadd.f32 %v3209_v21, %v3179_v23  ;;  %v6226_v23 = vsub.f32 %v6041_v36, %v6100_v56  ;;  %v3194_v39 = vmul.f32 %v6220_v11, %v6220_v11 }
 0x288   : > { %v3211_v5 = vadd.f32 %v3210_v25, %v3180_v20  ;;  %v6232_v20 = vsub.f32 %v6068_v48, %v6100_v56  ;;  %v3195_v36 = vmul.f32 %v6226_v23, %v6226_v23 }
 0x28a   : > { %v3212_v27 = vadd.f32 %v3211_v5, %v3181_v1  ;;  %v6238_v1 = vsub.f32 %v6047_v46, %v6100_v56  ;;  %v3196_v48 = vmul.f32 %v6232_v20, %v6232_v20 }
 0x28c   : > { %v3213_v34 = vadd.f32 %v3212_v27, %v3182_v59  ;;  %v6244_v59 = vsub.f32 %v6072_v0, %v6100_v56  ;;  %v3197_v46 = vmul.f32 %v6238_v1, %v6238_v1 }
 0x28e   : > { %v3214_v37 = vadd.f32 %v3213_v34, %v3183_v33  ;;  %v6250_v33 = vsub.f32 %v6076_v9, %v6100_v56  ;;  %v3198_v0 = vmul.f32 %v6244_v59, %v6244_v59 }
 0x290   : > { %v3215_v40 = vadd.f32 %v3214_v37, %v3184_v6  ;;  %v6256_v6 = vsub.f32 %v6078_v10, %v6100_v56  ;;  %v3199_v9 = vmul.f32 %v6250_v33, %v6250_v33 }
 0x292   : > { %v3216_v43 = vadd.f32 %v3215_v40, %v3185_v50  ;;  %v6262_v50 = vsub.f32 %v6082_v18, %v6100_v56  ;;  %v3200_v10 = vmul.f32 %v6256_v6, %v6256_v6 }
 0x294   : > { %v3217_v45 = vadd.f32 %v3216_v43, %v3186_v54  ;;  %v6268_v54 = vsub.f32 %v6084_v3, %v6100_v56  ;;  %v3201_v18 = vmul.f32 %v6262_v50, %v6262_v50 }
 0x296   : > { %v3218_v52 = vadd.f32 %v3217_v45, %v3187_v35  ;;  %v6274_v35 = vsub.f32 %v6087_v26, %v6100_v56  ;;  %v3202_v3 = vmul.f32 %v6268_v54, %v6268_v54 }
 0x298   : > { %v3219_v63 = vadd.f32 %v3218_v52, %v3188_v13  ;;  %v6280_v13 = vsub.f32 %v6092_v29, %v6100_v56  ;;  %v3203_v26 = vmul.f32 %v6274_v35, %v6274_v35 }
 0x29a   : > { %v3220_v42 = vadd.f32 %v3219_v63, %v3189_v58  ;;  %v6286_v58 = vsub.f32 %v6090_v53, %v6100_v56 }
 0x29c   : > { %v3221_v12 = vadd.f32 %v3220_v42, %v3190_v15  ;;  %v3204_v15 = vmul.f32 %v6280_v13, %v6280_v13  ;;  %v3205_v29 = vmul.f32 %v6286_v58, %v6286_v58 }
 0x29e   : > { %v3222_v19 = vadd.f32 %v3221_v12, %v3191_v8 }
 0x2a0   : > { %v3223_v21 = vadd.f32 %v3222_v19, %v3192_v24 }
 0x2a2   : > { %v3224_v25 = vadd.f32 %v3223_v21, %v3193_v30 }
 0x2a4   : > { %v3225_v5 = vadd.f32 %v3224_v25, %v3194_v39 }
 0x2a6   : > { %v3226_v27 = vadd.f32 %v3225_v5, %v3195_v36 }
 0x2a8   : > { %v3227_v34 = vadd.f32 %v3226_v27, %v3196_v48 }
 0x2aa   : > { %v3228_v37 = vadd.f32 %v3227_v34, %v3197_v46 }
 0x2ac   : > { %v3229_v40 = vadd.f32 %v3228_v37, %v3198_v0 }
 0x2ae   : > { %v3230_v43 = vadd.f32 %v3229_v40, %v3199_v9 }
 0x2b0   : > { %v3231_v45 = vadd.f32 %v3230_v43, %v3200_v10 }
 0x2b2   : > { %v3232_v52 = vadd.f32 %v3231_v45, %v3201_v18 }
 0x2b4   : > { %v3233_v63 = vadd.f32 %v3232_v52, %v3202_v3 }
 0x2b6   : > { %v3234_v42 = vadd.f32 %v3233_v63, %v3203_v26 }
 0x2b8   : > { %v3235_v8 = vadd.f32 %v3234_v42, %v3204_v15 }
 0x2ba   : > { %v3236_v12 = vadd.f32 %v3235_v8, %v3205_v29 }
 0x2bc   : > { %3237 = vadd.xlane.f32.xlu0 %v3236_v12 }
 0x32f   : > { %v3238_v24 = vpop.xlane.xlu0 %3237 }
 0x330   : > { %v3239_v19 = vmul.f32 %v3238_v24, %v6097_v51 }
 0x332   : > { %v3240_v53 = vadd.f32 1e-05, %v3239_v19 }
 0x334   : > { %5121 = vrsqrt.f32 %v3240_v53  ;;  %vm3247_vm4 = vweird.f32 %v3240_v53 }
 0x33a   : > { %v5122_v56 = vpop.eup %5121 }
 0x33b   : > { %v3242_v30 = vmul.f32 %v5122_v56, %v3240_v53  ;;  %vm3248_vm3 = vweird.f32 %v5122_v56 }
 0x33c   : > { %vm3249_vm5 = vmor %vm3247_vm4, %vm3248_vm3 }
 0x33d   : > { %v3243_v21 = vmul.f32 %v5122_v56, %v3242_v30 }
 0x33f   : > { %v3244_v39 = vmul.f32 0.5, %v3243_v21 }
 0x341   : > { %v3245_v25 = vsub.f32 1.5, %v3244_v39 }
 0x343   : > { %v3246_v36 = vmul.f32 %v5122_v56, %v3245_v25 }
 0x345   : > { %v6295_v5 = vsel %vm3249_vm5, %v5122_v56, %v3246_v36 }
 0x346   : > { %v3251_v48 = vmul.f32 %v6295_v5, %v6104_v61  ;;  %v3252_v51 = vmul.f32 %v6295_v5, %v6108_v62  ;;  %v3253_v27 = vmul.f32 %v6295_v5, %v6112_v2  ;;  %v3254_v34 = vmul.f32 %v6295_v5, %v6120_v7 }
 0x347   : > { %v3255_v61 = vmul.f32 %v6295_v5, %v6124_v14  ;;  %v3256_v62 = vmul.f32 %v6295_v5, %v6130_v32  ;;  %v3257_v9 = vmul.f32 %v6295_v5, %v6136_v57  ;;  %v3258_v2 = vmul.f32 %v6295_v5, %v6142_v17 }
 0x348   : > { %vm3283_vm6 = vcmp.ge.f32.partialorder %v3251_v48, 0.0  ;;  %v3315_v46 = vmul.f32 0.01, %v3251_v48  ;;  %v3316_v37 = vmul.f32 0.01, %v3252_v51  ;;  %vm3284_vm7 = vcmp.ge.f32.partialorder %v3252_v51, 0.0 }
 0x349   : > { %v3317_v40 = vmul.f32 0.01, %v3253_v27  ;;  %vm3285_vm8 = vcmp.ge.f32.partialorder %v3253_v27, 0.0  ;;  %v3318_v10 = vmul.f32 0.01, %v3254_v34  ;;  %v3259_v7 = vmul.f32 %v6295_v5, %v6148_v22 }
 0x34a   : > { %v3347_v0 = vsel %vm3283_vm6, %v3251_v48, %v3315_v46  ;;  %vm3286_vm9 = vcmp.ge.f32.partialorder %v3254_v34, 0.0  ;;  %v3319_v14 = vmul.f32 0.01, %v3255_v61  ;;  %v3260_v32 = vmul.f32 %v6295_v5, %v6154_v60 }
 0x34b   : > { %3379 = vst [vmem:[%s6305_s20] sm:$0xff] %v3347_v0  ;;  %vm3287_vm10 = vcmp.ge.f32.partialorder %v3255_v61, 0.0  ;;  %v3320_v43 = vmul.f32 0.01, %v3256_v62  ;;  %v3348_v18 = vsel %vm3284_vm7, %v3252_v51, %v3316_v37  ;;  %v3261_v57 = vmul.f32 %v6295_v5, %v6160_v31 }
 0x34c   : > { %vm3288_vm11 = vcmp.ge.f32.partialorder %v3256_v62, 0.0  ;;  %v3321_v17 = vmul.f32 0.01, %v3257_v9  ;;  %v3349_v45 = vsel %vm3285_vm8, %v3253_v27, %v3317_v40  ;;  %v3262_v3 = vmul.f32 %v6295_v5, %v6166_v28  ;;  %3380 = vst [vmem:[%s6305_s20 + $0x8] sm:$0xff] %v3348_v18 }
 0x34d   : > { %vm3289_vm12 = vcmp.ge.f32.partialorder %v3257_v9, 0.0  ;;  %v3322_v22 = vmul.f32 0.01, %v3258_v2  ;;  %v3350_v52 = vsel %vm3286_vm9, %v3254_v34, %v3318_v10  ;;  %v3263_v60 = vmul.f32 %v6295_v5, %v6172_v55  ;;  %3381 = vst [vmem:[%s6305_s20 + $0x10] sm:$0xff] %v3349_v45 }
 0x34e   : > { %vm3290_vm13 = vcmp.ge.f32.partialorder %v3258_v2, 0.0  ;;  %v3323_v26 = vmul.f32 0.01, %v3259_v7  ;;  %v3351_v63 = vsel %vm3287_vm10, %v3255_v61, %v3319_v14  ;;  %v3264_v31 = vmul.f32 %v6295_v5, %v6178_v38  ;;  %3382 = vst [vmem:[%s6305_s20 + $0x18] sm:$0xff] %v3350_v52 }
 0x34f   : > { %vm3291_vm14 = vcmp.ge.f32.partialorder %v3259_v7, 0.0  ;;  %v3324_v15 = vmul.f32 0.01, %v3260_v32  ;;  %v3352_v42 = vsel %vm3288_vm11, %v3256_v62, %v3320_v43  ;;  %v3265_v28 = vmul.f32 %v6295_v5, %v6184_v41  ;;  %3383 = vst [vmem:[%s6305_s20 + $0x20] sm:$0xff] %v3351_v63 }
 0x350   : > { %vm3292_vm15 = vcmp.ge.f32.partialorder %v3260_v32, 0.0  ;;  %v3325_v29 = vmul.f32 0.01, %v3261_v57  ;;  %v3353_v55 = vsel %vm3289_vm12, %v3257_v9, %v3321_v17  ;;  %v3266_v8 = vmul.f32 %v6295_v5, %v6190_v44  ;;  %3384 = vst [vmem:[%s6305_s20 + $0x28] sm:$0xff] %v3352_v42 }
 0x351   : > { %vm3293_vm0 = vcmp.ge.f32.partialorder %v3261_v57, 0.0  ;;  %v3326_v12 = vmul.f32 0.01, %v3262_v3  ;;  %v3354_v38 = vsel %vm3290_vm13, %v3258_v2, %v3322_v22  ;;  %v3267_v24 = vmul.f32 %v6295_v5, %v6196_v47  ;;  %3385 = vst [vmem:[%s6305_s20 + $0x30] sm:$0xff] %v3353_v55 }
 0x352   : > { %vm3294_vm1 = vcmp.ge.f32.partialorder %v3262_v3, 0.0  ;;  %v3327_v41 = vmul.f32 0.01, %v3263_v60  ;;  %v3355_v19 = vsel %vm3291_vm14, %v3259_v7, %v3323_v26  ;;  %v3268_v53 = vmul.f32 %v6295_v5, %v6202_v4  ;;  %3386 = vst [vmem:[%s6305_s20 + $0x38] sm:$0xff] %v3354_v38 }
 0x353   : > { %vm3295_vm2 = vcmp.ge.f32.partialorder %v3263_v60, 0.0  ;;  %v3328_v44 = vmul.f32 0.01, %v3264_v31  ;;  %v3356_v56 = vsel %vm3292_vm15, %v3260_v32, %v3324_v15  ;;  %v3269_v30 = vmul.f32 %v6295_v5, %v6208_v16  ;;  %3387 = vst [vmem:[%s6305_s20 + $0x40] sm:$0xff] %v3355_v19 }
 0x354   : > { %vm3296_vm3 = vcmp.ge.f32.partialorder %v3264_v31, 0.0  ;;  %v3329_v47 = vmul.f32 0.01, %v3265_v28  ;;  %v3357_v21 = vsel %vm3293_vm0, %v3261_v57, %v3325_v29  ;;  %v3270_v39 = vmul.f32 %v6295_v5, %v6214_v49  ;;  %3388 = vst [vmem:[%s6305_s20 + $0x48] sm:$0xff] %v3356_v56 }
 0x355   : > { %vm3297_vm4 = vcmp.ge.f32.partialorder %v3265_v28, 0.0  ;;  %v3330_v4 = vmul.f32 0.01, %v3266_v8  ;;  %v3358_v25 = vsel %vm3294_vm1, %v3262_v3, %v3326_v12  ;;  %v3271_v36 = vmul.f32 %v6295_v5, %v6220_v11  ;;  %3389 = vst [vmem:[%s6305_s20 + $0x50] sm:$0xff] %v3357_v21 }
 0x356   : > { %vm3298_vm5 = vcmp.ge.f32.partialorder %v3266_v8, 0.0  ;;  %v3331_v16 = vmul.f32 0.01, %v3267_v24  ;;  %v3359_v48 = vsel %vm3295_vm2, %v3263_v60, %v3327_v41  ;;  %v3272_v51 = vmul.f32 %v6295_v5, %v6226_v23  ;;  %3390 = vst [vmem:[%s6305_s20 + $0x58] sm:$0xff] %v3358_v25 }
 0x357   : > { %vm3299_vm6 = vcmp.ge.f32.partialorder %v3267_v24, 0.0  ;;  %v3332_v49 = vmul.f32 0.01, %v3268_v53  ;;  %v3360_v27 = vsel %vm3296_vm3, %v3264_v31, %v3328_v44  ;;  %v3273_v46 = vmul.f32 %v6295_v5, %v6232_v20  ;;  %3391 = vst [vmem:[%s6305_s20 + $0x60] sm:$0xff] %v3359_v48 }
 0x358   : > { %vm3300_vm7 = vcmp.ge.f32.partialorder %v3268_v53, 0.0  ;;  %v3333_v11 = vmul.f32 0.01, %v3269_v30  ;;  %v3361_v34 = vsel %vm3297_vm4, %v3265_v28, %v3329_v47  ;;  %v3274_v61 = vmul.f32 %v6295_v5, %v6238_v1  ;;  %3392 = vst [vmem:[%s6305_s20 + $0x68] sm:$0xff] %v3360_v27 }
 0x359   : > { %vm3301_vm8 = vcmp.ge.f32.partialorder %v3269_v30, 0.0  ;;  %v3334_v23 = vmul.f32 0.01, %v3270_v39  ;;  %v3362_v0 = vsel %vm3298_vm5, %v3266_v8, %v3330_v4  ;;  %v3275_v62 = vmul.f32 %v6295_v5, %v6244_v59  ;;  %3393 = vst [vmem:[%s6305_s20 + $0x70] sm:$0xff] %v3361_v34 }
 0x35a   : > { %vm3302_vm9 = vcmp.ge.f32.partialorder %v3270_v39, 0.0  ;;  %v3335_v20 = vmul.f32 0.01, %v3271_v36  ;;  %v3363_v37 = vsel %vm3299_vm6, %v3267_v24, %v3331_v16  ;;  %v3276_v9 = vmul.f32 %v6295_v5, %v6250_v33  ;;  %3394 = vst [vmem:[%s6305_s20 + $0x78] sm:$0xff] %v3362_v0 }
 0x35b   : > { %vm3303_vm10 = vcmp.ge.f32.partialorder %v3271_v36, 0.0  ;;  %v3336_v1 = vmul.f32 0.01, %v3272_v51  ;;  %v3364_v40 = vsel %vm3300_vm7, %v3268_v53, %v3332_v49  ;;  %v3277_v2 = vmul.f32 %v6295_v5, %v6256_v6  ;;  %3395 = vst [vmem:[%s6305_s20 + $0x80] sm:$0xff] %v3363_v37 }
 0x35c   : > { %vm3304_vm11 = vcmp.ge.f32.partialorder %v3272_v51, 0.0  ;;  %v3337_v59 = vmul.f32 0.01, %v3273_v46  ;;  %v3365_v10 = vsel %vm3301_vm8, %v3269_v30, %v3333_v11  ;;  %v3278_v7 = vmul.f32 %v6295_v5, %v6262_v50  ;;  %3396 = vst [vmem:[%s6305_s20 + $0x88] sm:$0xff] %v3364_v40 }
 0x35d   : > { %vm3305_vm12 = vcmp.ge.f32.partialorder %v3273_v46, 0.0  ;;  %v3338_v33 = vmul.f32 0.01, %v3274_v61  ;;  %v3366_v14 = vsel %vm3302_vm9, %v3270_v39, %v3334_v23  ;;  %v3279_v32 = vmul.f32 %v6295_v5, %v6268_v54  ;;  %3397 = vst [vmem:[%s6305_s20 + $0x90] sm:$0xff] %v3365_v10 }
 0x35e   : > { %vm3306_vm13 = vcmp.ge.f32.partialorder %v3274_v61, 0.0  ;;  %v3339_v6 = vmul.f32 0.01, %v3275_v62  ;;  %v3367_v43 = vsel %vm3303_vm10, %v3271_v36, %v3335_v20  ;;  %v3280_v18 = vmul.f32 %v6295_v5, %v6274_v35  ;;  %3398 = vst [vmem:[%s6305_s20 + $0x98] sm:$0xff] %v3366_v14 }
 0x35f   : > { %vm3307_vm14 = vcmp.ge.f32.partialorder %v3275_v62, 0.0  ;;  %v3340_v50 = vmul.f32 0.01, %v3276_v9  ;;  %v3368_v57 = vsel %vm3304_vm11, %v3272_v51, %v3336_v1  ;;  %v3281_v17 = vmul.f32 %v6295_v5, %v6280_v13  ;;  %3399 = vst [vmem:[%s6305_s20 + $0xa0] sm:$0xff] %v3367_v43 }
 0x360   : > { %vm3308_vm15 = vcmp.ge.f32.partialorder %v3276_v9, 0.0  ;;  %v3341_v54 = vmul.f32 0.01, %v3277_v2  ;;  %v3369_v45 = vsel %vm3305_vm12, %v3273_v46, %v3337_v59  ;;  %v3282_v3 = vmul.f32 %v6295_v5, %v6286_v58  ;;  %3400 = vst [vmem:[%s6305_s20 + $0xa8] sm:$0xff] %v3368_v57 }
 0x361   : > { %vm3309_vm0 = vcmp.ge.f32.partialorder %v3277_v2, 0.0  ;;  %v3342_v35 = vmul.f32 0.01, %v3278_v7  ;;  %v3370_v22 = vsel %vm3306_vm13, %v3274_v61, %v3338_v33  ;;  %vm3310_vm1 = vcmp.ge.f32.partialorder %v3278_v7, 0.0  ;;  %3401 = vst [vmem:[%s6305_s20 + $0xb0] sm:$0xff] %v3369_v45 }
 0x362   : > { %v3343_v52 = vmul.f32 0.01, %v3279_v32  ;;  %v3371_v13 = vsel %vm3307_vm14, %v3275_v62, %v3339_v6  ;;  %vm3311_vm2 = vcmp.ge.f32.partialorder %v3279_v32, 0.0  ;;  %v3344_v60 = vmul.f32 0.01, %v3280_v18  ;;  %3402 = vst [vmem:[%s6305_s20 + $0xb8] sm:$0xff] %v3370_v22 }
 0x363   : > { %v3372_v26 = vsel %vm3308_vm15, %v3276_v9, %v3340_v50  ;;  %vm3312_vm3 = vcmp.ge.f32.partialorder %v3280_v18, 0.0  ;;  %v3345_v58 = vmul.f32 0.01, %v3281_v17  ;;  %v3373_v5 = vsel %vm3309_vm0, %v3277_v2, %v3341_v54  ;;  %3403 = vst [vmem:[%s6305_s20 + $0xc0] sm:$0xff] %v3371_v13 }
 0x364   : > { %vm3313_vm4 = vcmp.ge.f32.partialorder %v3281_v17, 0.0  ;;  %v3346_v63 = vmul.f32 0.01, %v3282_v3  ;;  %v3374_v31 = vsel %vm3310_vm1, %v3278_v7, %v3342_v35  ;;  %vm3314_vm5 = vcmp.ge.f32.partialorder %v3282_v3, 0.0  ;;  %3404 = vst [vmem:[%s6305_s20 + $0xc8] sm:$0xff] %v3372_v26 }
 0x365   : > { %v3375_v15 = vsel %vm3311_vm2, %v3279_v32, %v3343_v52  ;;  %v3376_v42 = vsel %vm3312_vm3, %v3280_v18, %v3344_v60  ;;  %3405 = vst [vmem:[%s6305_s20 + $0xd0] sm:$0xff] %v3373_v5  ;;  %v3377_v28 = vsel %vm3313_vm4, %v3281_v17, %v3345_v58 }
 0x366   : > { %3406 = vst [vmem:[%s6305_s20 + $0xd8] sm:$0xff] %v3374_v31  ;;  %v3378_v29 = vsel %vm3314_vm5, %v3282_v3, %v3346_v63 }
 0x367   : > { %3407 = vst [vmem:[%s6305_s20 + $0xe0] sm:$0xff] %v3375_v15 }
 0x368   : > { %3408 = vst [vmem:[%s6305_s20 + $0xe8] sm:$0xff] %v3376_v42 }
 0x369   : > { %3409 = vst [vmem:[%s6305_s20 + $0xf0] sm:$0xff] %v3377_v28 }
 0x36a   : > { %3410 = vst [vmem:[%s6305_s20 + $0xf8] sm:$0xff] %v3378_v29 }
 0x36b PF: > { %s12_s9 = sadd.s32 1, %s5129_s9  }
 0x36c   : > { %p9_p4 = scmp.ge.s32.totalorder %s12_s9, 4  }
 0x36e   :  { %11 = sbr.rel (!%p9_p4) target bundleno = 1 (0x1), region = 58 }

// kernel: _decoder_forward.11
= control target key start
LH: loop header
LB: loop body
LE: loop exit
PB: predicated region body
PF: predicated region fallthrough
CT: control target
= control target key end

     0   :  { %s4431_s15 = smov 0   ;;  %s5974_s0 = inlined_call_operand.vmem [shape: bf16[2,112,4096], index: 0, kind: input, shape index: {}]   ;;  %s5975_s1 = inlined_call_operand.vmem [shape: bf16[8,112], index: 1, kind: input, shape index: {}]   ;;  %s5976_s2 = inlined_call_operand.vmem [shape: bf16[2,8,4096], index: 2, kind: input, shape index: {}]   ;;  %s5977_s3 = inlined_call_operand.vmem [shape: bf16[8,8], index: 3, kind: input, shape index: {}]   ;;  %s5978_s4 = inlined_call_operand.vmem [shape: f32[2,8,4096], index: 4, kind: output, shape index: {}]  }
   0x1 LB: > { %s3182_s16 = sadd.s32 4294967295, %s4403_s15   ;;  %p3186_p0 = scmp.ge.s32.totalorder %s4403_s15, 1  ;;  %s4403_s15 = sphi %s4431_s15, %s14_s15  }
   0x2   : > { %p172_p1 = scmp.lt.s32.totalorder %s4403_s15, 3 }
   0x4   : > { %p173_p2 = pnand %p3186_p0, %p172_p1 }
   0x6   : > { %176 = sbr.rel (%p173_p2) target bundleno = 876 (0x36c), region = 36 }
   0xb   : > { %p203_p3 = scmp.lt.s32.totalorder %s3182_s16, 1  ;;  %vm1564_vm0 = vcmask 916480   ;;  %vm2085_vm1 = vcmask 1043456   ;;  %vm2081_vm2 = vcmask 64512  }
   0xd   : > { %s6086_s16 = smov (!%p203_p3, %s3182_s16), 1 }
   0xe   : > { %s4380_s17 = smul.u32 1792, %s6086_s16  ;;  %s4154_s25 = sshll.u32 %s6086_s16, 7 }
   0xf   : > { %s4960_s28 = scalar_lea.vmem %s5976_s2, %s4154_s25  ;;  %s4155_s5 = sshll.u32 %s6086_s16, 8 }
  0x10   : > { %s4445_s20 = scalar_lea.vmem %s5974_s0, %s4380_s17  ;;  %s5824_s8 = scalar_lea.vmem %s5978_s4, %s4155_s5 }
  0x11   : > { %v3962_v0 = vld [vmem:[%s4445_s20 + $0x600] sm:$0xf]  ;;  %v4348_v2 = vld [vmem:[%s4445_s20 + $0x604] sm:$0xf]  ;;  %v3970_v5 = vld [vmem:[%s4445_s20 + $0x608] sm:$0xf] }
  0x12   : > { %v4364_v1 = vld [vmem:[%s4445_s20 + $0x67c] sm:$0xf0]  ;;  %v3964_v4 = vld [vmem:[%s4445_s20 + $0x680] sm:$0xf0]  ;;  %v4365_v6 = vld [vmem:[%s4445_s20 + $0x684] sm:$0xf0] }
  0x13   : > { %v3963_v3 = vor.u32 %v4364_v1, %v3962_v0  ;;  %v3967_v7 = vor.u32 %v4348_v2, %v3964_v4  ;;  %v3971_v8 = vor.u32 %v4365_v6, %v3970_v5  ;;  %v4349_v9 = vld [vmem:[%s4445_s20 + $0x60c] sm:$0xf]  ;;  %v3834_v11 = vld [vmem:[%s4445_s20 + $0x500] sm:$0xf]  ;;  %v4316_v14 = vld [vmem:[%s4445_s20 + $0x504] sm:$0xf] }
  0x14   : > { %v3972_v10 = vld [vmem:[%s4445_s20 + $0x688] sm:$0xf0]  ;;  %v4332_v13 = vld [vmem:[%s4445_s20 + $0x57c] sm:$0xf0]  ;;  %v3836_v15 = vld [vmem:[%s4445_s20 + $0x580] sm:$0xf0] }
  0x15   : > { %1569 = vmatpush.bf16.msra.mxu0 %v3963_v3  ;;  %v3975_v12 = vor.u32 %v4349_v9, %v3972_v10  ;;  %1582 = vmatpush.bf16.msra.mxu1 %v3967_v7  ;;  %v3835_v16 = vor.u32 %v4332_v13, %v3834_v11  ;;  %v3839_v17 = vor.u32 %v4316_v14, %v3836_v15  ;;  %v3842_v18 = vld [vmem:[%s4445_s20 + $0x508] sm:$0xf]  ;;  %v4317_v20 = vld [vmem:[%s4445_s20 + $0x50c] sm:$0xf]  ;;  %v3706_v23 = vld [vmem:[%s4445_s20 + $0x400] sm:$0xf] }
  0x16   : > { %1595 = vmatpush.bf16.msra.mxu2 %v3971_v8  ;;  %v4333_v19 = vld [vmem:[%s4445_s20 + $0x584] sm:$0xf0]  ;;  %v3844_v22 = vld [vmem:[%s4445_s20 + $0x588] sm:$0xf0]  ;;  %v4300_v24 = vld [vmem:[%s4445_s20 + $0x47c] sm:$0xf0] }
  0x17   : > { %1608 = vmatpush.bf16.msra.mxu3 %v3975_v12  ;;  %v3843_v21 = vor.u32 %v4333_v19, %v3842_v18  ;;  %v3847_v25 = vor.u32 %v4317_v20, %v3844_v22  ;;  %v4284_v26 = vld [vmem:[%s4445_s20 + $0x404] sm:$0xf]  ;;  %v3714_v28 = vld [vmem:[%s4445_s20 + $0x408] sm:$0xf]  ;;  %v3707_v29 = vor.u32 %v4300_v24, %v3706_v23  ;;  %v4285_v31 = vld [vmem:[%s4445_s20 + $0x40c] sm:$0xf] }
  0x18   : > { %v3708_v27 = vld [vmem:[%s4445_s20 + $0x480] sm:$0xf0]  ;;  %v4301_v30 = vld [vmem:[%s4445_s20 + $0x484] sm:$0xf0]  ;;  %v3716_v32 = vld [vmem:[%s4445_s20 + $0x488] sm:$0xf0] }
  0x19   : > { %1570 = vmatpush.bf16.msra.mxu0 %v3835_v16  ;;  %1583 = vmatpush.bf16.msra.mxu1 %v3839_v17  ;;  %v3711_v33 = vor.u32 %v4284_v26, %v3708_v27  ;;  %v3715_v34 = vor.u32 %v4301_v30, %v3714_v28  ;;  %v3578_v35 = vld [vmem:[%s4445_s20 + $0x300] sm:$0xf]  ;;  %v4252_v37 = vld [vmem:[%s4445_s20 + $0x304] sm:$0xf]  ;;  %v3719_v38 = vor.u32 %v4285_v31, %v3716_v32  ;;  %v3586_v40 = vld [vmem:[%s4445_s20 + $0x308] sm:$0xf] }
  0x1a   : > { %1596 = vmatpush.bf16.msra.mxu2 %v3843_v21  ;;  %v4268_v36 = vld [vmem:[%s4445_s20 + $0x37c] sm:$0xf0]  ;;  %v3580_v39 = vld [vmem:[%s4445_s20 + $0x380] sm:$0xf0]  ;;  %v4269_v41 = vld [vmem:[%s4445_s20 + $0x384] sm:$0xf0] }
  0x1b   : > { %1609 = vmatpush.bf16.msra.mxu3 %v3847_v25  ;;  %v4253_v42 = vld [vmem:[%s4445_s20 + $0x30c] sm:$0xf]  ;;  %v3579_v44 = vor.u32 %v4268_v36, %v3578_v35  ;;  %v3583_v45 = vor.u32 %v4252_v37, %v3580_v39  ;;  %v3587_v46 = vor.u32 %v4269_v41, %v3586_v40  ;;  %v3450_v47 = vld [vmem:[%s4445_s20 + $0x200] sm:$0xf]  ;;  %v4220_v49 = vld [vmem:[%s4445_s20 + $0x204] sm:$0xf] }
  0x1c   : > { %v3588_v43 = vld [vmem:[%s4445_s20 + $0x388] sm:$0xf0]  ;;  %v4236_v48 = vld [vmem:[%s4445_s20 + $0x27c] sm:$0xf0]  ;;  %v3452_v51 = vld [vmem:[%s4445_s20 + $0x280] sm:$0xf0] }
  0x1d   : > { %1571 = vmatpush.bf16.msra.mxu0 %v3707_v29  ;;  %1584 = vmatpush.bf16.msra.mxu1 %v3711_v33  ;;  %v3591_v50 = vor.u32 %v4253_v42, %v3588_v43  ;;  %v3458_v52 = vld [vmem:[%s4445_s20 + $0x208] sm:$0xf]  ;;  %v4221_v54 = vld [vmem:[%s4445_s20 + $0x20c] sm:$0xf]  ;;  %v3451_v56 = vor.u32 %v4236_v48, %v3450_v47  ;;  %v3455_v57 = vor.u32 %v4220_v49, %v3452_v51  ;;  %v3322_v59 = vld [vmem:[%s4445_s20 + $0x100] sm:$0xf] }
  0x1e   : > { %1597 = vmatpush.bf16.msra.mxu2 %v3715_v34  ;;  %v4237_v53 = vld [vmem:[%s4445_s20 + $0x284] sm:$0xf0]  ;;  %v3460_v55 = vld [vmem:[%s4445_s20 + $0x288] sm:$0xf0]  ;;  %v4204_v60 = vld [vmem:[%s4445_s20 + $0x17c] sm:$0xf0] }
  0x1f   : > { %1610 = vmatpush.bf16.msra.mxu3 %v3719_v38  ;;  %v3459_v58 = vor.u32 %v4237_v53, %v3458_v52  ;;  %v4188_v61 = vld [vmem:[%s4445_s20 + $0x104] sm:$0xf]  ;;  %v3463_v62 = vor.u32 %v4221_v54, %v3460_v55  ;;  %v3330_v0 = vld [vmem:[%s4445_s20 + $0x108] sm:$0xf]  ;;  %v4189_v2 = vld [vmem:[%s4445_s20 + $0x10c] sm:$0xf]  ;;  %v3323_v4 = vor.u32 %v4204_v60, %v3322_v59 }
  0x20   : > { %v3324_v63 = vld [vmem:[%s4445_s20 + $0x180] sm:$0xf0]  ;;  %v4205_v1 = vld [vmem:[%s4445_s20 + $0x184] sm:$0xf0]  ;;  %v3332_v3 = vld [vmem:[%s4445_s20 + $0x188] sm:$0xf0] }
  0x21   : > { %1572 = vmatpush.bf16.msra.mxu0 %v3579_v44  ;;  %1585 = vmatpush.bf16.msra.mxu1 %v3583_v45  ;;  %v3194_v5 = vld [vmem:[%s4445_s20] sm:$0xf]  ;;  %v3327_v7 = vor.u32 %v4188_v61, %v3324_v63  ;;  %v3331_v8 = vor.u32 %v4205_v1, %v3330_v0  ;;  %v4156_v9 = vld [vmem:[%s4445_s20 + $0x4] sm:$0xf]  ;;  %v3202_v11 = vld [vmem:[%s4445_s20 + $0x8] sm:$0xf]  ;;  %v3335_v12 = vor.u32 %v4189_v2, %v3332_v3 }
  0x22   : > { %1598 = vmatpush.bf16.msra.mxu2 %v3587_v46  ;;  %v4172_v6 = vld [vmem:[%s4445_s20 + $0x7c] sm:$0xf0]  ;;  %v3196_v10 = vld [vmem:[%s4445_s20 + $0x80] sm:$0xf0]  ;;  %v4173_v13 = vld [vmem:[%s4445_s20 + $0x84] sm:$0xf0] }
  0x23   : > { %1611 = vmatpush.bf16.msra.mxu3 %v3591_v50  ;;  %v4157_v14 = vld [vmem:[%s4445_s20 + $0xc] sm:$0xf]  ;;  %v3978_v16 = vld [vmem:[%s4445_s20 + $0x610] sm:$0xf]  ;;  %v4350_v18 = vld [vmem:[%s4445_s20 + $0x614] sm:$0xf]  ;;  %v3195_v19 = vor.u32 %v4172_v6, %v3194_v5  ;;  %v3199_v23 = vor.u32 %v4156_v9, %v3196_v10  ;;  %v3203_v24 = vor.u32 %v4173_v13, %v3202_v11 }
  0x24   : > { %v3204_v15 = vld [vmem:[%s4445_s20 + $0x88] sm:$0xf0]  ;;  %v4366_v17 = vld [vmem:[%s4445_s20 + $0x68c] sm:$0xf0]  ;;  %v3980_v20 = vld [vmem:[%s4445_s20 + $0x690] sm:$0xf0] }
  0x25   : > { %1573 = vmatpush.bf16.msra.mxu0 %v3451_v56  ;;  %1586 = vmatpush.bf16.msra.mxu1 %v3455_v57  ;;  %v3986_v21 = vld [vmem:[%s4445_s20 + $0x618] sm:$0xf]  ;;  %v4351_v25 = vld [vmem:[%s4445_s20 + $0x61c] sm:$0xf]  ;;  %v3207_v27 = vor.u32 %v4157_v14, %v3204_v15  ;;  %v3979_v28 = vor.u32 %v4366_v17, %v3978_v16  ;;  %v3983_v29 = vor.u32 %v4350_v18, %v3980_v20  ;;  %v3850_v31 = vld [vmem:[%s4445_s20 + $0x510] sm:$0xf] }
  0x26   : > { %1599 = vmatpush.bf16.msra.mxu2 %v3459_v58  ;;  %v4367_v22 = vld [vmem:[%s4445_s20 + $0x694] sm:$0xf0]  ;;  %v3988_v26 = vld [vmem:[%s4445_s20 + $0x698] sm:$0xf0]  ;;  %v4334_v32 = vld [vmem:[%s4445_s20 + $0x58c] sm:$0xf0] }
  0x27   : > { %1612 = vmatpush.bf16.msra.mxu3 %v3463_v62  ;;  %v3987_v30 = vor.u32 %v4367_v22, %v3986_v21  ;;  %v4318_v33 = vld [vmem:[%s4445_s20 + $0x514] sm:$0xf]  ;;  %v3991_v34 = vor.u32 %v4351_v25, %v3988_v26  ;;  %v3858_v36 = vld [vmem:[%s4445_s20 + $0x518] sm:$0xf]  ;;  %v4319_v38 = vld [vmem:[%s4445_s20 + $0x51c] sm:$0xf]  ;;  %v3851_v40 = vor.u32 %v4334_v32, %v3850_v31 }
  0x28   : > { %v3852_v35 = vld [vmem:[%s4445_s20 + $0x590] sm:$0xf0]  ;;  %v4335_v37 = vld [vmem:[%s4445_s20 + $0x594] sm:$0xf0]  ;;  %v3860_v39 = vld [vmem:[%s4445_s20 + $0x598] sm:$0xf0] }
  0x29   : > { %1574 = vmatpush.bf16.msra.mxu0 %v3323_v4  ;;  %1587 = vmatpush.bf16.msra.mxu1 %v3327_v7  ;;  %v4522_v41 = vld [vmem:[%s5975_s1] sm:$0xf]  ;;  %v3855_v42 = vor.u32 %v4318_v33, %v3852_v35  ;;  %v3859_v43 = vor.u32 %v4335_v37, %v3858_v36  ;;  %v3722_v44 = vld [vmem:[%s4445_s20 + $0x410] sm:$0xf]  ;;  %v4286_v46 = vld [vmem:[%s4445_s20 + $0x414] sm:$0xf]  ;;  %v3863_v47 = vor.u32 %v4319_v38, %v3860_v39 }
  0x2a   : > { %1600 = vmatpush.bf16.msra.mxu2 %v3331_v8  ;;  %v4302_v45 = vld [vmem:[%s4445_s20 + $0x48c] sm:$0xf0]  ;;  %v3724_v48 = vld [vmem:[%s4445_s20 + $0x490] sm:$0xf0]  ;;  %v3730_v49 = vld [vmem:[%s4445_s20 + $0x418] sm:$0xf] }
  0x2b   : > { %1613 = vmatpush.bf16.msra.mxu3 %v3335_v12  ;;  %v4303_v50 = vld [vmem:[%s4445_s20 + $0x494] sm:$0xf0]  ;;  %v4287_v51 = vld [vmem:[%s4445_s20 + $0x41c] sm:$0xf]  ;;  %v3723_v53 = vor.u32 %v4302_v45, %v3722_v44  ;;  %v3727_v54 = vor.u32 %v4286_v46, %v3724_v48  ;;  %v3594_v56 = vld [vmem:[%s4445_s20 + $0x310] sm:$0xf] }
  0x2c   : > { %v3732_v52 = vld [vmem:[%s4445_s20 + $0x498] sm:$0xf0]  ;;  %v3731_v55 = vor.u32 %v4303_v50, %v3730_v49  ;;  %v4270_v57 = vld [vmem:[%s4445_s20 + $0x38c] sm:$0xf0]  ;;  %v4254_v58 = vld [vmem:[%s4445_s20 + $0x314] sm:$0xf] }
  0x2d   : > { %1575 = vmatpush.bf16.msra.mxu0 %v3195_v19  ;;  %1588 = vmatpush.bf16.msra.mxu1 %v3199_v23  ;;  %v3735_v59 = vor.u32 %v4287_v51, %v3732_v52  ;;  %v3596_v60 = vld [vmem:[%s4445_s20 + $0x390] sm:$0xf0]  ;;  %v3602_v61 = vld [vmem:[%s4445_s20 + $0x318] sm:$0xf]  ;;  %v4255_v63 = vld [vmem:[%s4445_s20 + $0x31c] sm:$0xf]  ;;  %v3595_v1 = vor.u32 %v4270_v57, %v3594_v56 }
  0x2e   : > { %1601 = vmatpush.bf16.msra.mxu2 %v3203_v24  ;;  %v4271_v62 = vld [vmem:[%s4445_s20 + $0x394] sm:$0xf0]  ;;  %v3604_v0 = vld [vmem:[%s4445_s20 + $0x398] sm:$0xf0]  ;;  %v3599_v2 = vor.u32 %v4254_v58, %v3596_v60  ;;  %v3466_v4 = vld [vmem:[%s4445_s20 + $0x210] sm:$0xf] }
  0x2f   : > { %1614 = vmatpush.bf16.msra.mxu3 %v3207_v27  ;;  %v3603_v3 = vor.u32 %v4271_v62, %v3602_v61  ;;  %v4238_v5 = vld [vmem:[%s4445_s20 + $0x28c] sm:$0xf0]  ;;  %v4222_v6 = vld [vmem:[%s4445_s20 + $0x214] sm:$0xf]  ;;  %v3607_v7 = vor.u32 %v4255_v63, %v3604_v0  ;;  %v3474_v9 = vld [vmem:[%s4445_s20 + $0x218] sm:$0xf] }
  0x30   : > { %4088 = vmatmul.msk.bf16.vlgmr.msra.gmra.mxu0 %vm1564_vm0, %v4522_v41  ;;  %4089 = vmatmul.msk.bf16.vlgmr.msra.gmra.mxu1 %vm1564_vm0, %v4522_v41  ;;  %v3468_v8 = vld [vmem:[%s4445_s20 + $0x290] sm:$0xf0]  ;;  %v4239_v10 = vld [vmem:[%s4445_s20 + $0x294] sm:$0xf0]  ;;  %v4223_v11 = vld [vmem:[%s4445_s20 + $0x21c] sm:$0xf]  ;;  %v3467_v13 = vor.u32 %v4238_v5, %v3466_v4 }
  0x31   : > { %1621 = vmatpush.bf16.msrb.mxu0 %v3979_v28  ;;  %1634 = vmatpush.bf16.msrb.mxu1 %v3983_v29  ;;  %v3476_v12 = vld [vmem:[%s4445_s20 + $0x298] sm:$0xf0]  ;;  %v3471_v14 = vor.u32 %v4222_v6, %v3468_v8  ;;  %v3475_v15 = vor.u32 %v4239_v10, %v3474_v9  ;;  %v3338_v16 = vld [vmem:[%s4445_s20 + $0x110] sm:$0xf]  ;;  %v4190_v18 = vld [vmem:[%s4445_s20 + $0x114] sm:$0xf] }
  0x32   : > { %1647 = vmatpush.bf16.msrb.mxu2 %v3987_v30  ;;  %4091 = vmatmul.msk.bf16.vlgmr.msra.gmra.mxu3 %vm1564_vm0, %v4522_v41  ;;  %v4206_v17 = vld [vmem:[%s4445_s20 + $0x18c] sm:$0xf0]  ;;  %v3479_v19 = vor.u32 %v4223_v11, %v3476_v12  ;;  %v3340_v20 = vld [vmem:[%s4445_s20 + $0x190] sm:$0xf0]  ;;  %v3346_v21 = vld [vmem:[%s4445_s20 + $0x118] sm:$0xf] }
  0x33   : > { %1660 = vmatpush.bf16.msrb.mxu3 %v3991_v34  ;;  %4090 = vmatmul.msk.bf16.vlgmr.msra.gmra.mxu2 %vm1564_vm0, %v4522_v41  ;;  %v4207_v22 = vld [vmem:[%s4445_s20 + $0x194] sm:$0xf0]  ;;  %v4191_v23 = vld [vmem:[%s4445_s20 + $0x11c] sm:$0xf]  ;;  %v3339_v25 = vor.u32 %v4206_v17, %v3338_v16  ;;  %v3210_v26 = vld [vmem:[%s4445_s20 + $0x10] sm:$0xf]  ;;  %v3343_v28 = vor.u32 %v4190_v18, %v3340_v20 }
  0x34   : > { %v3348_v24 = vld [vmem:[%s4445_s20 + $0x198] sm:$0xf0]  ;;  %v4174_v27 = vld [vmem:[%s4445_s20 + $0x8c] sm:$0xf0]  ;;  %v3347_v29 = vor.u32 %v4207_v22, %v3346_v21  ;;  %v4158_v30 = vld [vmem:[%s4445_s20 + $0x14] sm:$0xf] }
  0x35   : > { %1622 = vmatpush.bf16.msrb.mxu0 %v3851_v40  ;;  %1635 = vmatpush.bf16.msrb.mxu1 %v3855_v42  ;;  %v3212_v31 = vld [vmem:[%s4445_s20 + $0x90] sm:$0xf0]  ;;  %v3218_v32 = vld [vmem:[%s4445_s20 + $0x18] sm:$0xf]  ;;  %v3351_v33 = vor.u32 %v4191_v23, %v3348_v24  ;;  %v4159_v35 = vld [vmem:[%s4445_s20 + $0x1c] sm:$0xf]  ;;  %v3211_v40 = vor.u32 %v4174_v27, %v3210_v26 }
  0x36   : > { %1648 = vmatpush.bf16.msrb.mxu2 %v3859_v43  ;;  %v4175_v34 = vld [vmem:[%s4445_s20 + $0x94] sm:$0xf0]  ;;  %v3220_v36 = vld [vmem:[%s4445_s20 + $0x98] sm:$0xf0]  ;;  %v3994_v37 = vld [vmem:[%s4445_s20 + $0x620] sm:$0xf]  ;;  %v3215_v45 = vor.u32 %v4158_v30, %v3212_v31 }
  0x37   : > { %1661 = vmatpush.bf16.msrb.mxu3 %v3863_v47  ;;  %v4368_v38 = vld [vmem:[%s4445_s20 + $0x69c] sm:$0xf0]  ;;  %v4352_v39 = vld [vmem:[%s4445_s20 + $0x624] sm:$0xf]  ;;  %v4002_v43 = vld [vmem:[%s4445_s20 + $0x628] sm:$0xf]  ;;  %v3219_v46 = vor.u32 %v4175_v34, %v3218_v32  ;;  %v3223_v49 = vor.u32 %v4159_v35, %v3220_v36 }
  0x38   : > { %v3996_v42 = vld [vmem:[%s4445_s20 + $0x6a0] sm:$0xf0]  ;;  %v4369_v44 = vld [vmem:[%s4445_s20 + $0x6a4] sm:$0xf0]  ;;  %v4353_v47 = vld [vmem:[%s4445_s20 + $0x62c] sm:$0xf]  ;;  %v3995_v50 = vor.u32 %v4368_v38, %v3994_v37 }
  0x39   : > { %1623 = vmatpush.bf16.msrb.mxu0 %v3723_v53  ;;  %1636 = vmatpush.bf16.msrb.mxu1 %v3727_v54  ;;  %v4004_v48 = vld [vmem:[%s4445_s20 + $0x6a8] sm:$0xf0]  ;;  %v3999_v51 = vor.u32 %v4352_v39, %v3996_v42  ;;  %v4003_v52 = vor.u32 %v4369_v44, %v4002_v43  ;;  %v3866_v53 = vld [vmem:[%s4445_s20 + $0x520] sm:$0xf]  ;;  %v3868_v57 = vld [vmem:[%s4445_s20 + $0x5a0] sm:$0xf0] }
  0x3a   : > { %1649 = vmatpush.bf16.msrb.mxu2 %v3731_v55  ;;  %v4336_v54 = vld [vmem:[%s4445_s20 + $0x59c] sm:$0xf0]  ;;  %v4320_v55 = vld [vmem:[%s4445_s20 + $0x524] sm:$0xf]  ;;  %v4007_v56 = vor.u32 %v4353_v47, %v4004_v48  ;;  %v3874_v58 = vld [vmem:[%s4445_s20 + $0x528] sm:$0xf] }
  0x3b   : > { %1662 = vmatpush.bf16.msrb.mxu3 %v3735_v59  ;;  %v4337_v59 = vld [vmem:[%s4445_s20 + $0x5a4] sm:$0xf0]  ;;  %v4321_v60 = vld [vmem:[%s4445_s20 + $0x52c] sm:$0xf]  ;;  %v3867_v62 = vor.u32 %v4336_v54, %v3866_v53  ;;  %v3871_v63 = vor.u32 %v4320_v55, %v3868_v57  ;;  %v3740_v5 = vld [vmem:[%s4445_s20 + $0x4a0] sm:$0xf0] }
  0x3c   : > { %v3876_v61 = vld [vmem:[%s4445_s20 + $0x5a8] sm:$0xf0]  ;;  %v3875_v0 = vor.u32 %v4337_v59, %v3874_v58  ;;  %v3746_v6 = vld [vmem:[%s4445_s20 + $0x428] sm:$0xf]  ;;  %v3612_v17 = vld [vmem:[%s4445_s20 + $0x3a0] sm:$0xf0] }
  0x3d   : > { %1624 = vmatpush.bf16.msrb.mxu0 %v3595_v1  ;;  %1637 = vmatpush.bf16.msrb.mxu1 %v3599_v2  ;;  %v3738_v1 = vld [vmem:[%s4445_s20 + $0x420] sm:$0xf]  ;;  %v3879_v4 = vor.u32 %v4321_v60, %v3876_v61  ;;  %v4289_v8 = vld [vmem:[%s4445_s20 + $0x42c] sm:$0xf]  ;;  %v3618_v18 = vld [vmem:[%s4445_s20 + $0x328] sm:$0xf] }
  0x3e   : > { %1650 = vmatpush.bf16.msrb.mxu2 %v3603_v3  ;;  %v4304_v2 = vld [vmem:[%s4445_s20 + $0x49c] sm:$0xf0]  ;;  %v4288_v3 = vld [vmem:[%s4445_s20 + $0x424] sm:$0xf]  ;;  %v3748_v9 = vld [vmem:[%s4445_s20 + $0x4a8] sm:$0xf0] }
  0x3f   : > { %1663 = vmatpush.bf16.msrb.mxu3 %v3607_v7  ;;  %v4305_v7 = vld [vmem:[%s4445_s20 + $0x4a4] sm:$0xf0]  ;;  %v3739_v10 = vor.u32 %v4304_v2, %v3738_v1  ;;  %v3743_v11 = vor.u32 %v4288_v3, %v3740_v5  ;;  %v3751_v16 = vor.u32 %v4289_v8, %v3748_v9  ;;  %v4257_v20 = vld [vmem:[%s4445_s20 + $0x32c] sm:$0xf]  ;;  %v4240_v26 = vld [vmem:[%s4445_s20 + $0x29c] sm:$0xf0] }
  0x40   : > { %v3747_v12 = vor.u32 %v4305_v7, %v3746_v6  ;;  %v3620_v21 = vld [vmem:[%s4445_s20 + $0x3a8] sm:$0xf0]  ;;  %v4224_v27 = vld [vmem:[%s4445_s20 + $0x224] sm:$0xf]  ;;  %v3490_v30 = vld [vmem:[%s4445_s20 + $0x228] sm:$0xf] }
  0x41   : > { %1625 = vmatpush.bf16.msrb.mxu0 %v3467_v13  ;;  %1638 = vmatpush.bf16.msrb.mxu1 %v3471_v14  ;;  %v3610_v13 = vld [vmem:[%s4445_s20 + $0x320] sm:$0xf]  ;;  %v4241_v31 = vld [vmem:[%s4445_s20 + $0x2a4] sm:$0xf0]  ;;  %v4225_v32 = vld [vmem:[%s4445_s20 + $0x22c] sm:$0xf] }
  0x42   : > { %1651 = vmatpush.bf16.msrb.mxu2 %v3475_v15  ;;  %v4272_v14 = vld [vmem:[%s4445_s20 + $0x39c] sm:$0xf0]  ;;  %v4256_v15 = vld [vmem:[%s4445_s20 + $0x324] sm:$0xf]  ;;  %v3491_v36 = vor.u32 %v4241_v31, %v3490_v30  ;;  %v3362_v43 = vld [vmem:[%s4445_s20 + $0x128] sm:$0xf] }
  0x43   : > { %1664 = vmatpush.bf16.msrb.mxu3 %v3479_v19  ;;  %v4273_v19 = vld [vmem:[%s4445_s20 + $0x3a4] sm:$0xf0]  ;;  %v3611_v22 = vor.u32 %v4272_v14, %v3610_v13  ;;  %v3615_v23 = vor.u32 %v4256_v15, %v3612_v17  ;;  %v3354_v37 = vld [vmem:[%s4445_s20 + $0x120] sm:$0xf]  ;;  %v4192_v39 = vld [vmem:[%s4445_s20 + $0x124] sm:$0xf] }
  0x44   : > { %v3619_v24 = vor.u32 %v4273_v19, %v3618_v18  ;;  %v4208_v38 = vld [vmem:[%s4445_s20 + $0x19c] sm:$0xf0]  ;;  %v3356_v42 = vld [vmem:[%s4445_s20 + $0x1a0] sm:$0xf0]  ;;  %v4209_v44 = vld [vmem:[%s4445_s20 + $0x1a4] sm:$0xf0] }
  0x45   : > { %1626 = vmatpush.bf16.msrb.mxu0 %v3339_v25  ;;  %1639 = vmatpush.bf16.msrb.mxu1 %v3343_v28  ;;  %v3482_v25 = vld [vmem:[%s4445_s20 + $0x220] sm:$0xf]  ;;  %v3623_v28 = vor.u32 %v4257_v20, %v3620_v21  ;;  %v3355_v47 = vor.u32 %v4208_v38, %v3354_v37  ;;  %v3228_v53 = vld [vmem:[%s4445_s20 + $0xa0] sm:$0xf0]  ;;  %v3234_v54 = vld [vmem:[%s4445_s20 + $0x28] sm:$0xf] }
  0x46   : > { %1652 = vmatpush.bf16.msrb.mxu2 %v3347_v29  ;;  %v3484_v29 = vld [vmem:[%s4445_s20 + $0x2a0] sm:$0xf0]  ;;  %v3483_v34 = vor.u32 %v4240_v26, %v3482_v25  ;;  %v3226_v48 = vld [vmem:[%s4445_s20 + $0x20] sm:$0xf]  ;;  %v4161_v57 = vld [vmem:[%s4445_s20 + $0x2c] sm:$0xf] }
  0x47   : > { %1665 = vmatpush.bf16.msrb.mxu3 %v3351_v33  ;;  %v3492_v33 = vld [vmem:[%s4445_s20 + $0x2a8] sm:$0xf0]  ;;  %v3487_v35 = vor.u32 %v4224_v27, %v3484_v29  ;;  %v4010_v59 = vld [vmem:[%s4445_s20 + $0x630] sm:$0xf]  ;;  %v4354_v61 = vld [vmem:[%s4445_s20 + $0x634] sm:$0xf] }
  0x48   : > { %v3236_v58 = vld [vmem:[%s4445_s20 + $0xa8] sm:$0xf0]  ;;  %v4370_v60 = vld [vmem:[%s4445_s20 + $0x6ac] sm:$0xf0]  ;;  %v4371_v1 = vld [vmem:[%s4445_s20 + $0x6b4] sm:$0xf0] }
  0x49   : > { %1627 = vmatpush.bf16.msrb.mxu0 %v3211_v40  ;;  %1640 = vmatpush.bf16.msrb.mxu1 %v3215_v45  ;;  %v3495_v40 = vor.u32 %v4225_v32, %v3492_v33  ;;  %v4193_v45 = vld [vmem:[%s4445_s20 + $0x12c] sm:$0xf]  ;;  %v4020_v5 = vld [vmem:[%s4445_s20 + $0x6b8] sm:$0xf0]  ;;  %v3239_v6 = vor.u32 %v4161_v57, %v3236_v58  ;;  %v4011_v7 = vor.u32 %v4370_v60, %v4010_v59  ;;  %v3884_v14 = vld [vmem:[%s4445_s20 + $0x5b0] sm:$0xf0] }
  0x4a   : > { %1653 = vmatpush.bf16.msrb.mxu2 %v3219_v46  ;;  %v3364_v46 = vld [vmem:[%s4445_s20 + $0x1a8] sm:$0xf0]  ;;  %v3890_v15 = vld [vmem:[%s4445_s20 + $0x538] sm:$0xf]  ;;  %v4323_v17 = vld [vmem:[%s4445_s20 + $0x53c] sm:$0xf] }
  0x4b   : > { %1666 = vmatpush.bf16.msrb.mxu3 %v3223_v49  ;;  %v4176_v49 = vld [vmem:[%s4445_s20 + $0x9c] sm:$0xf0]  ;;  %v3367_v55 = vor.u32 %v4193_v45, %v3364_v46  ;;  %v3892_v18 = vld [vmem:[%s4445_s20 + $0x5b8] sm:$0xf0]  ;;  %v3756_v26 = vld [vmem:[%s4445_s20 + $0x4b0] sm:$0xf0] }
  0x4c   : > { %4092 = vmatmul.msk.bf16.vlgmr.msrb.gmra.mxu0 %vm1564_vm0, %v4522_v41  ;;  %4093 = vmatmul.msk.bf16.vlgmr.msrb.gmra.mxu1 %vm1564_vm0, %v4522_v41  ;;  %v3895_v25 = vor.u32 %v4323_v17, %v3892_v18  ;;  %v3762_v27 = vld [vmem:[%s4445_s20 + $0x438] sm:$0xf]  ;;  %v4291_v29 = vld [vmem:[%s4445_s20 + $0x43c] sm:$0xf]  ;;  %v3628_v38 = vld [vmem:[%s4445_s20 + $0x3b0] sm:$0xf0] }
  0x4d   : > { %1673 = vmatpush.bf16.msra.mxu0 %v3995_v50  ;;  %1686 = vmatpush.bf16.msra.mxu1 %v3999_v51  ;;  %v3359_v50 = vor.u32 %v4192_v39, %v3356_v42  ;;  %v3363_v51 = vor.u32 %v4209_v44, %v3362_v43  ;;  %v3764_v30 = vld [vmem:[%s4445_s20 + $0x4b8] sm:$0xf0]  ;;  %v3634_v39 = vld [vmem:[%s4445_s20 + $0x338] sm:$0xf]  ;;  %v3370_v59 = vld [vmem:[%s4445_s20 + $0x130] sm:$0xf] }
  0x4e   : > { %1699 = vmatpush.bf16.msra.mxu2 %v4003_v52  ;;  %4095 = vmatmul.msk.bf16.vlgmr.msrb.gmra.mxu3 %vm1564_vm0, %v4522_v41  ;;  %v4160_v52 = vld [vmem:[%s4445_s20 + $0x24] sm:$0xf]  ;;  %v3767_v37 = vor.u32 %v4291_v29, %v3764_v30  ;;  %v4259_v42 = vld [vmem:[%s4445_s20 + $0x33c] sm:$0xf]  ;;  %v4210_v60 = vld [vmem:[%s4445_s20 + $0x1ac] sm:$0xf0] }
  0x4f   : > { %1712 = vmatpush.bf16.msra.mxu3 %v4007_v56  ;;  %4094 = vmatmul.msk.bf16.vlgmr.msrb.gmra.mxu2 %vm1564_vm0, %v4522_v41  ;;  %v4177_v56 = vld [vmem:[%s4445_s20 + $0xa4] sm:$0xf0]  ;;  %v3231_v2 = vor.u32 %v4160_v52, %v3228_v53  ;;  %v3636_v43 = vld [vmem:[%s4445_s20 + $0x3b8] sm:$0xf0]  ;;  %v3506_v52 = vld [vmem:[%s4445_s20 + $0x238] sm:$0xf] }
  0x50   : > { %v3235_v3 = vor.u32 %v4177_v56, %v3234_v54  ;;  %v4243_v53 = vld [vmem:[%s4445_s20 + $0x2b4] sm:$0xf0]  ;;  %v4227_v54 = vld [vmem:[%s4445_s20 + $0x23c] sm:$0xf]  ;;  %v4372_v17 = vld [vmem:[%s4445_s20 + $0x6bc] sm:$0xf0] }
  0x51   : > { %1674 = vmatpush.bf16.msra.mxu0 %v3867_v62  ;;  %1687 = vmatpush.bf16.msra.mxu1 %v3871_v63  ;;  %v3227_v62 = vor.u32 %v4176_v49, %v3226_v48  ;;  %v4012_v63 = vld [vmem:[%s4445_s20 + $0x6b0] sm:$0xf0]  ;;  %v4242_v48 = vld [vmem:[%s4445_s20 + $0x2ac] sm:$0xf0]  ;;  %v3507_v58 = vor.u32 %v4243_v53, %v3506_v52  ;;  %v4356_v18 = vld [vmem:[%s4445_s20 + $0x644] sm:$0xf] }
  0x52   : > { %1700 = vmatpush.bf16.msra.mxu2 %v3875_v0  ;;  %v4018_v0 = vld [vmem:[%s4445_s20 + $0x638] sm:$0xf]  ;;  %v4015_v8 = vor.u32 %v4354_v61, %v4012_v63  ;;  %v4226_v49 = vld [vmem:[%s4445_s20 + $0x234] sm:$0xf]  ;;  %v3780_v52 = vld [vmem:[%s4445_s20 + $0x4c8] sm:$0xf0] }
  0x53   : > { %1713 = vmatpush.bf16.msra.mxu3 %v3879_v4  ;;  %v4355_v4 = vld [vmem:[%s4445_s20 + $0x63c] sm:$0xf]  ;;  %v4019_v9 = vor.u32 %v4371_v1, %v4018_v0  ;;  %v4194_v61 = vld [vmem:[%s4445_s20 + $0x134] sm:$0xf]  ;;  %v3378_v0 = vld [vmem:[%s4445_s20 + $0x138] sm:$0xf] }
  0x54   : > { %v4023_v13 = vor.u32 %v4355_v4, %v4020_v5  ;;  %v3372_v63 = vld [vmem:[%s4445_s20 + $0x1b0] sm:$0xf0]  ;;  %v4211_v1 = vld [vmem:[%s4445_s20 + $0x1b4] sm:$0xf0]  ;;  %v3371_v4 = vor.u32 %v4210_v60, %v3370_v59  ;;  %v3242_v5 = vld [vmem:[%s4445_s20 + $0x30] sm:$0xf] }
  0x55   : > { %1675 = vmatpush.bf16.msra.mxu0 %v3739_v10  ;;  %1688 = vmatpush.bf16.msra.mxu1 %v3743_v11  ;;  %v3882_v10 = vld [vmem:[%s4445_s20 + $0x530] sm:$0xf]  ;;  %v3644_v60 = vld [vmem:[%s4445_s20 + $0x3c0] sm:$0xf0] }
  0x56   : > { %1701 = vmatpush.bf16.msra.mxu2 %v3747_v12  ;;  %v4338_v11 = vld [vmem:[%s4445_s20 + $0x5ac] sm:$0xf0]  ;;  %v4322_v12 = vld [vmem:[%s4445_s20 + $0x534] sm:$0xf] }
  0x57   : > { %1714 = vmatpush.bf16.msra.mxu3 %v3751_v16  ;;  %v4339_v16 = vld [vmem:[%s4445_s20 + $0x5b4] sm:$0xf0]  ;;  %v3883_v19 = vor.u32 %v4338_v11, %v3882_v10  ;;  %v3887_v20 = vor.u32 %v4322_v12, %v3884_v14  ;;  %v3244_v10 = vld [vmem:[%s4445_s20 + $0xb0] sm:$0xf0]  ;;  %v4163_v14 = vld [vmem:[%s4445_s20 + $0x3c] sm:$0xf] }
  0x58   : > { %v3891_v21 = vor.u32 %v4339_v16, %v3890_v15  ;;  %v3250_v11 = vld [vmem:[%s4445_s20 + $0x38] sm:$0xf]  ;;  %v3252_v15 = vld [vmem:[%s4445_s20 + $0xb8] sm:$0xf0]  ;;  %v4026_v16 = vld [vmem:[%s4445_s20 + $0x640] sm:$0xf] }
  0x59   : > { %1676 = vmatpush.bf16.msra.mxu0 %v3611_v22  ;;  %1689 = vmatpush.bf16.msra.mxu1 %v3615_v23  ;;  %v3754_v22 = vld [vmem:[%s4445_s20 + $0x430] sm:$0xf] }
  0x5a   : > { %1702 = vmatpush.bf16.msra.mxu2 %v3619_v24  ;;  %v4306_v23 = vld [vmem:[%s4445_s20 + $0x4ac] sm:$0xf0]  ;;  %v4290_v24 = vld [vmem:[%s4445_s20 + $0x434] sm:$0xf] }
  0x5b   : > { %1715 = vmatpush.bf16.msra.mxu3 %v3623_v28  ;;  %v4307_v28 = vld [vmem:[%s4445_s20 + $0x4b4] sm:$0xf0]  ;;  %v3755_v31 = vor.u32 %v4306_v23, %v3754_v22  ;;  %v3759_v32 = vor.u32 %v4290_v24, %v3756_v26  ;;  %v4373_v22 = vld [vmem:[%s4445_s20 + $0x6c4] sm:$0xf0]  ;;  %v4036_v26 = vld [vmem:[%s4445_s20 + $0x6c8] sm:$0xf0] }
  0x5c   : > { %v3763_v33 = vor.u32 %v4307_v28, %v3762_v27  ;;  %v3255_v27 = vor.u32 %v4163_v14, %v3252_v15  ;;  %v4027_v28 = vor.u32 %v4372_v17, %v4026_v16  ;;  %v3386_v16 = vld [vmem:[%s4445_s20 + $0x140] sm:$0xf] }
  0x5d   : > { %1677 = vmatpush.bf16.msra.mxu0 %v3483_v34  ;;  %1690 = vmatpush.bf16.msra.mxu1 %v3487_v35  ;;  %v3626_v34 = vld [vmem:[%s4445_s20 + $0x330] sm:$0xf]  ;;  %v4212_v17 = vld [vmem:[%s4445_s20 + $0x1bc] sm:$0xf0] }
  0x5e   : > { %1703 = vmatpush.bf16.msra.mxu2 %v3491_v36  ;;  %v4274_v35 = vld [vmem:[%s4445_s20 + $0x3ac] sm:$0xf0]  ;;  %v4258_v36 = vld [vmem:[%s4445_s20 + $0x334] sm:$0xf] }
  0x5f   : > { %1716 = vmatpush.bf16.msra.mxu3 %v3495_v40  ;;  %v4275_v40 = vld [vmem:[%s4445_s20 + $0x3b4] sm:$0xf0]  ;;  %v3627_v44 = vor.u32 %v4274_v35, %v3626_v34  ;;  %v3631_v45 = vor.u32 %v4258_v36, %v3628_v38  ;;  %v3900_v35 = vld [vmem:[%s4445_s20 + $0x5c0] sm:$0xf0]  ;;  %v3906_v36 = vld [vmem:[%s4445_s20 + $0x548] sm:$0xf] }
  0x60   : > { %v3635_v46 = vor.u32 %v4275_v40, %v3634_v39  ;;  %v4325_v38 = vld [vmem:[%s4445_s20 + $0x54c] sm:$0xf] }
  0x61   : > { %1678 = vmatpush.bf16.msra.mxu0 %v3355_v47  ;;  %1691 = vmatpush.bf16.msra.mxu1 %v3359_v50  ;;  %v3498_v47 = vld [vmem:[%s4445_s20 + $0x230] sm:$0xf]  ;;  %v3639_v50 = vor.u32 %v4259_v42, %v3636_v43  ;;  %v3908_v39 = vld [vmem:[%s4445_s20 + $0x5c8] sm:$0xf0] }
  0x62   : > { %1704 = vmatpush.bf16.msra.mxu2 %v3363_v51  ;;  %v3500_v51 = vld [vmem:[%s4445_s20 + $0x2b0] sm:$0xf0]  ;;  %v3499_v56 = vor.u32 %v4242_v48, %v3498_v47  ;;  %v3911_v47 = vor.u32 %v4325_v38, %v3908_v39  ;;  %v3772_v48 = vld [vmem:[%s4445_s20 + $0x4c0] sm:$0xf0]  ;;  %v4374_v38 = vld [vmem:[%s4445_s20 + $0x6cc] sm:$0xf0] }
  0x63   : > { %1717 = vmatpush.bf16.msra.mxu3 %v3367_v55  ;;  %v3508_v55 = vld [vmem:[%s4445_s20 + $0x2b8] sm:$0xf0]  ;;  %v3503_v57 = vor.u32 %v4226_v49, %v3500_v51  ;;  %v3778_v49 = vld [vmem:[%s4445_s20 + $0x448] sm:$0xf]  ;;  %v4293_v51 = vld [vmem:[%s4445_s20 + $0x44c] sm:$0xf] }
  0x64   : > { %v3783_v59 = vor.u32 %v4293_v51, %v3780_v52  ;;  %v4358_v39 = vld [vmem:[%s4445_s20 + $0x654] sm:$0xf] }
  0x65   : > { %1679 = vmatpush.bf16.msra.mxu0 %v3227_v62  ;;  %1692 = vmatpush.bf16.msra.mxu1 %v3231_v2  ;;  %v3511_v62 = vor.u32 %v4227_v54, %v3508_v55  ;;  %v4195_v2 = vld [vmem:[%s4445_s20 + $0x13c] sm:$0xf] }
  0x66   : > { %1705 = vmatpush.bf16.msra.mxu2 %v3235_v3  ;;  %v3380_v3 = vld [vmem:[%s4445_s20 + $0x1b8] sm:$0xf0] }
  0x67   : > { %1718 = vmatpush.bf16.msra.mxu3 %v3239_v6  ;;  %v4178_v6 = vld [vmem:[%s4445_s20 + $0xac] sm:$0xf0]  ;;  %v3383_v12 = vor.u32 %v4195_v2, %v3380_v3 }
  0x68   : > { %4096 = vmatmul.msk.bf16.vlgmr.msra.gmra.mxu0 %vm1564_vm0, %v4522_v41  ;;  %4097 = vmatmul.msk.bf16.vlgmr.msra.gmra.mxu1 %vm1564_vm0, %v4522_v41 }
  0x69   : > { %1725 = vmatpush.bf16.msrb.mxu0 %v4011_v7  ;;  %1738 = vmatpush.bf16.msrb.mxu1 %v4015_v8  ;;  %v3375_v7 = vor.u32 %v4194_v61, %v3372_v63  ;;  %v3379_v8 = vor.u32 %v4211_v1, %v3378_v0  ;;  %v3650_v61 = vld [vmem:[%s4445_s20 + $0x348] sm:$0xf]  ;;  %v4261_v63 = vld [vmem:[%s4445_s20 + $0x34c] sm:$0xf] }
  0x6a   : > { %1751 = vmatpush.bf16.msrb.mxu2 %v4019_v9  ;;  %4099 = vmatmul.msk.bf16.vlgmr.msra.gmra.mxu3 %vm1564_vm0, %v4522_v41  ;;  %v4162_v9 = vld [vmem:[%s4445_s20 + $0x34] sm:$0xf]  ;;  %v3652_v0 = vld [vmem:[%s4445_s20 + $0x3c8] sm:$0xf0] }
  0x6b   : > { %1764 = vmatpush.bf16.msrb.mxu3 %v4023_v13  ;;  %4098 = vmatmul.msk.bf16.vlgmr.msra.gmra.mxu2 %vm1564_vm0, %v4522_v41  ;;  %v4179_v13 = vld [vmem:[%s4445_s20 + $0xb4] sm:$0xf0]  ;;  %v3247_v23 = vor.u32 %v4162_v9, %v3244_v10  ;;  %v3522_v9 = vld [vmem:[%s4445_s20 + $0x248] sm:$0xf] }
  0x6c   : > { %v3251_v24 = vor.u32 %v4179_v13, %v3250_v11  ;;  %v4245_v10 = vld [vmem:[%s4445_s20 + $0x2c4] sm:$0xf0]  ;;  %v4229_v11 = vld [vmem:[%s4445_s20 + $0x24c] sm:$0xf] }
  0x6d   : > { %1726 = vmatpush.bf16.msrb.mxu0 %v3883_v19  ;;  %1739 = vmatpush.bf16.msrb.mxu1 %v3887_v20  ;;  %v3243_v19 = vor.u32 %v4178_v6, %v3242_v5  ;;  %v4028_v20 = vld [vmem:[%s4445_s20 + $0x6c0] sm:$0xf0]  ;;  %v4244_v5 = vld [vmem:[%s4445_s20 + $0x2bc] sm:$0xf0]  ;;  %v3523_v15 = vor.u32 %v4245_v10, %v3522_v9  ;;  %v3796_v9 = vld [vmem:[%s4445_s20 + $0x4d8] sm:$0xf0] }
  0x6e   : > { %1752 = vmatpush.bf16.msrb.mxu2 %v3891_v21  ;;  %v4034_v21 = vld [vmem:[%s4445_s20 + $0x648] sm:$0xf]  ;;  %v4031_v29 = vor.u32 %v4356_v18, %v4028_v20  ;;  %v4228_v6 = vld [vmem:[%s4445_s20 + $0x244] sm:$0xf] }
  0x6f   : > { %1765 = vmatpush.bf16.msrb.mxu3 %v3895_v25  ;;  %v4357_v25 = vld [vmem:[%s4445_s20 + $0x64c] sm:$0xf]  ;;  %v4035_v30 = vor.u32 %v4373_v22, %v4034_v21  ;;  %v4196_v18 = vld [vmem:[%s4445_s20 + $0x144] sm:$0xf]  ;;  %v3394_v21 = vld [vmem:[%s4445_s20 + $0x148] sm:$0xf] }
  0x70   : > { %v4039_v34 = vor.u32 %v4357_v25, %v4036_v26  ;;  %v3388_v20 = vld [vmem:[%s4445_s20 + $0x1c0] sm:$0xf0]  ;;  %v4213_v22 = vld [vmem:[%s4445_s20 + $0x1c4] sm:$0xf0]  ;;  %v3387_v25 = vor.u32 %v4212_v17, %v3386_v16  ;;  %v3258_v26 = vld [vmem:[%s4445_s20 + $0x40] sm:$0xf] }
  0x71   : > { %1727 = vmatpush.bf16.msrb.mxu0 %v3755_v31  ;;  %1740 = vmatpush.bf16.msrb.mxu1 %v3759_v32  ;;  %v3898_v31 = vld [vmem:[%s4445_s20 + $0x540] sm:$0xf]  ;;  %v3660_v17 = vld [vmem:[%s4445_s20 + $0x3d0] sm:$0xf0] }
  0x72   : > { %1753 = vmatpush.bf16.msrb.mxu2 %v3763_v33  ;;  %v4340_v32 = vld [vmem:[%s4445_s20 + $0x5bc] sm:$0xf0]  ;;  %v4324_v33 = vld [vmem:[%s4445_s20 + $0x544] sm:$0xf] }
  0x73   : > { %1766 = vmatpush.bf16.msrb.mxu3 %v3767_v37  ;;  %v4341_v37 = vld [vmem:[%s4445_s20 + $0x5c4] sm:$0xf0]  ;;  %v3899_v40 = vor.u32 %v4340_v32, %v3898_v31  ;;  %v3903_v42 = vor.u32 %v4324_v33, %v3900_v35  ;;  %v3260_v31 = vld [vmem:[%s4445_s20 + $0xc0] sm:$0xf0]  ;;  %v4165_v35 = vld [vmem:[%s4445_s20 + $0x4c] sm:$0xf] }
  0x74   : > { %v3907_v43 = vor.u32 %v4341_v37, %v3906_v36  ;;  %v3266_v32 = vld [vmem:[%s4445_s20 + $0x48] sm:$0xf]  ;;  %v3268_v36 = vld [vmem:[%s4445_s20 + $0xc8] sm:$0xf0]  ;;  %v4042_v37 = vld [vmem:[%s4445_s20 + $0x650] sm:$0xf] }
  0x75   : > { %1728 = vmatpush.bf16.msrb.mxu0 %v3627_v44  ;;  %1741 = vmatpush.bf16.msrb.mxu1 %v3631_v45  ;;  %v3770_v44 = vld [vmem:[%s4445_s20 + $0x440] sm:$0xf] }
  0x76   : > { %1754 = vmatpush.bf16.msrb.mxu2 %v3635_v46  ;;  %v4308_v45 = vld [vmem:[%s4445_s20 + $0x4bc] sm:$0xf0]  ;;  %v4292_v46 = vld [vmem:[%s4445_s20 + $0x444] sm:$0xf] }
  0x77   : > { %1767 = vmatpush.bf16.msrb.mxu3 %v3639_v50  ;;  %v4309_v50 = vld [vmem:[%s4445_s20 + $0x4c4] sm:$0xf0]  ;;  %v3771_v53 = vor.u32 %v4308_v45, %v3770_v44  ;;  %v3775_v54 = vor.u32 %v4292_v46, %v3772_v48  ;;  %v4375_v44 = vld [vmem:[%s4445_s20 + $0x6d4] sm:$0xf0]  ;;  %v4052_v48 = vld [vmem:[%s4445_s20 + $0x6d8] sm:$0xf0] }
  0x78   : > { %v3779_v55 = vor.u32 %v4309_v50, %v3778_v49  ;;  %v3271_v49 = vor.u32 %v4165_v35, %v3268_v36  ;;  %v4043_v50 = vor.u32 %v4374_v38, %v4042_v37  ;;  %v3402_v36 = vld [vmem:[%s4445_s20 + $0x150] sm:$0xf]  ;;  %v4198_v38 = vld [vmem:[%s4445_s20 + $0x154] sm:$0xf] }
  0x79   : > { %1729 = vmatpush.bf16.msrb.mxu0 %v3499_v56  ;;  %1742 = vmatpush.bf16.msrb.mxu1 %v3503_v57  ;;  %v3642_v56 = vld [vmem:[%s4445_s20 + $0x340] sm:$0xf]  ;;  %v4214_v37 = vld [vmem:[%s4445_s20 + $0x1cc] sm:$0xf0] }
  0x7a   : > { %1755 = vmatpush.bf16.msrb.mxu2 %v3507_v58  ;;  %v4276_v57 = vld [vmem:[%s4445_s20 + $0x3bc] sm:$0xf0]  ;;  %v4260_v58 = vld [vmem:[%s4445_s20 + $0x344] sm:$0xf] }
  0x7b   : > { %1768 = vmatpush.bf16.msrb.mxu3 %v3511_v62  ;;  %v4277_v62 = vld [vmem:[%s4445_s20 + $0x3c4] sm:$0xf0]  ;;  %v3643_v1 = vor.u32 %v4276_v57, %v3642_v56  ;;  %v3647_v2 = vor.u32 %v4260_v58, %v3644_v60  ;;  %v3916_v57 = vld [vmem:[%s4445_s20 + $0x5d0] sm:$0xf0]  ;;  %v3922_v58 = vld [vmem:[%s4445_s20 + $0x558] sm:$0xf] }
  0x7c   : > { %v3651_v3 = vor.u32 %v4277_v62, %v3650_v61  ;;  %v4327_v60 = vld [vmem:[%s4445_s20 + $0x55c] sm:$0xf] }
  0x7d   : > { %1730 = vmatpush.bf16.msrb.mxu0 %v3371_v4  ;;  %1743 = vmatpush.bf16.msrb.mxu1 %v3375_v7  ;;  %v3514_v4 = vld [vmem:[%s4445_s20 + $0x240] sm:$0xf]  ;;  %v3655_v7 = vor.u32 %v4261_v63, %v3652_v0  ;;  %v3924_v61 = vld [vmem:[%s4445_s20 + $0x5d8] sm:$0xf0] }
  0x7e   : > { %1756 = vmatpush.bf16.msrb.mxu2 %v3379_v8  ;;  %v3516_v8 = vld [vmem:[%s4445_s20 + $0x2c0] sm:$0xf0]  ;;  %v3515_v13 = vor.u32 %v4244_v5, %v3514_v4  ;;  %v3927_v4 = vor.u32 %v4327_v60, %v3924_v61  ;;  %v3788_v5 = vld [vmem:[%s4445_s20 + $0x4d0] sm:$0xf0] }
  0x7f   : > { %1769 = vmatpush.bf16.msrb.mxu3 %v3383_v12  ;;  %v3524_v12 = vld [vmem:[%s4445_s20 + $0x2c8] sm:$0xf0]  ;;  %v3519_v14 = vor.u32 %v4228_v6, %v3516_v8  ;;  %v3794_v6 = vld [vmem:[%s4445_s20 + $0x458] sm:$0xf]  ;;  %v4295_v8 = vld [vmem:[%s4445_s20 + $0x45c] sm:$0xf] }
  0x80   : > { %v3799_v16 = vor.u32 %v4295_v8, %v3796_v9  ;;  %v4360_v60 = vld [vmem:[%s4445_s20 + $0x664] sm:$0xf]  ;;  %v3930_v9 = vld [vmem:[%s4445_s20 + $0x560] sm:$0xf] }
  0x81   : > { %1731 = vmatpush.bf16.msrb.mxu0 %v3243_v19  ;;  %1744 = vmatpush.bf16.msrb.mxu1 %v3247_v23  ;;  %v3527_v19 = vor.u32 %v4229_v11, %v3524_v12  ;;  %v4197_v23 = vld [vmem:[%s4445_s20 + $0x14c] sm:$0xf] }
  0x82   : > { %1757 = vmatpush.bf16.msrb.mxu2 %v3251_v24  ;;  %v3396_v24 = vld [vmem:[%s4445_s20 + $0x1c8] sm:$0xf0] }
  0x83   : > { %1770 = vmatpush.bf16.msrb.mxu3 %v3255_v27  ;;  %v4180_v27 = vld [vmem:[%s4445_s20 + $0xbc] sm:$0xf0]  ;;  %v3399_v33 = vor.u32 %v4197_v23, %v3396_v24  ;;  %v3530_v24 = vld [vmem:[%s4445_s20 + $0x250] sm:$0xf] }
  0x84   : > { %4100 = vmatmul.msk.bf16.vlgmr.msrb.gmra.mxu0 %vm1564_vm0, %v4522_v41  ;;  %4101 = vmatmul.msk.bf16.vlgmr.msrb.gmra.mxu1 %vm1564_vm0, %v4522_v41 }
  0x85   : > { %1777 = vmatpush.bf16.msra.mxu0 %v4027_v28  ;;  %1790 = vmatpush.bf16.msra.mxu1 %v4031_v29  ;;  %v3391_v28 = vor.u32 %v4196_v18, %v3388_v20  ;;  %v3395_v29 = vor.u32 %v4213_v22, %v3394_v21  ;;  %v3666_v18 = vld [vmem:[%s4445_s20 + $0x358] sm:$0xf]  ;;  %v3668_v20 = vld [vmem:[%s4445_s20 + $0x3d8] sm:$0xf0] }
  0x86   : > { %1803 = vmatpush.bf16.msra.mxu2 %v4035_v30  ;;  %4103 = vmatmul.msk.bf16.vlgmr.msrb.gmra.mxu3 %vm1564_vm0, %v4522_v41  ;;  %v4164_v30 = vld [vmem:[%s4445_s20 + $0x44] sm:$0xf] }
  0x87   : > { %1816 = vmatpush.bf16.msra.mxu3 %v4039_v34  ;;  %4102 = vmatmul.msk.bf16.vlgmr.msrb.gmra.mxu2 %vm1564_vm0, %v4522_v41  ;;  %v4181_v34 = vld [vmem:[%s4445_s20 + $0xc4] sm:$0xf0]  ;;  %v3263_v45 = vor.u32 %v4164_v30, %v3260_v31  ;;  %v4247_v30 = vld [vmem:[%s4445_s20 + $0x2d4] sm:$0xf0]  ;;  %v4231_v31 = vld [vmem:[%s4445_s20 + $0x25c] sm:$0xf] }
  0x88   : > { %v3267_v46 = vor.u32 %v4181_v34, %v3266_v32  ;;  %v3540_v32 = vld [vmem:[%s4445_s20 + $0x2d8] sm:$0xf0] }
  0x89   : > { %1778 = vmatpush.bf16.msra.mxu0 %v3899_v40  ;;  %1791 = vmatpush.bf16.msra.mxu1 %v3903_v42  ;;  %v3259_v40 = vor.u32 %v4180_v27, %v3258_v26  ;;  %v4044_v42 = vld [vmem:[%s4445_s20 + $0x6d0] sm:$0xf0] }
  0x8a   : > { %1804 = vmatpush.bf16.msra.mxu2 %v3907_v43  ;;  %v4050_v43 = vld [vmem:[%s4445_s20 + $0x658] sm:$0xf]  ;;  %v4047_v51 = vor.u32 %v4358_v39, %v4044_v42  ;;  %v4230_v26 = vld [vmem:[%s4445_s20 + $0x254] sm:$0xf]  ;;  %v3543_v39 = vor.u32 %v4231_v31, %v3540_v32  ;;  %v3812_v31 = vld [vmem:[%s4445_s20 + $0x4e8] sm:$0xf0] }
  0x8b   : > { %1817 = vmatpush.bf16.msra.mxu3 %v3911_v47  ;;  %v4359_v47 = vld [vmem:[%s4445_s20 + $0x65c] sm:$0xf]  ;;  %v4051_v52 = vor.u32 %v4375_v44, %v4050_v43  ;;  %v3410_v42 = vld [vmem:[%s4445_s20 + $0x158] sm:$0xf] }
  0x8c   : > { %v4055_v56 = vor.u32 %v4359_v47, %v4052_v48  ;;  %v4215_v43 = vld [vmem:[%s4445_s20 + $0x1d4] sm:$0xf0]  ;;  %v4199_v44 = vld [vmem:[%s4445_s20 + $0x15c] sm:$0xf]  ;;  %v3274_v47 = vld [vmem:[%s4445_s20 + $0x50] sm:$0xf] }
  0x8d   : > { %1779 = vmatpush.bf16.msra.mxu0 %v3771_v53  ;;  %1792 = vmatpush.bf16.msra.mxu1 %v3775_v54  ;;  %v3914_v53 = vld [vmem:[%s4445_s20 + $0x550] sm:$0xf] }
  0x8e   : > { %1805 = vmatpush.bf16.msra.mxu2 %v3779_v55  ;;  %v4342_v54 = vld [vmem:[%s4445_s20 + $0x5cc] sm:$0xf0]  ;;  %v4326_v55 = vld [vmem:[%s4445_s20 + $0x554] sm:$0xf] }
  0x8f   : > { %1818 = vmatpush.bf16.msra.mxu3 %v3783_v59  ;;  %v4343_v59 = vld [vmem:[%s4445_s20 + $0x5d4] sm:$0xf0]  ;;  %v3915_v62 = vor.u32 %v4342_v54, %v3914_v53  ;;  %v3919_v63 = vor.u32 %v4326_v55, %v3916_v57  ;;  %v4182_v48 = vld [vmem:[%s4445_s20 + $0xcc] sm:$0xf0]  ;;  %v3284_v57 = vld [vmem:[%s4445_s20 + $0xd8] sm:$0xf0] }
  0x90   : > { %v3923_v0 = vor.u32 %v4343_v59, %v3922_v58  ;;  %v3282_v53 = vld [vmem:[%s4445_s20 + $0x58] sm:$0xf]  ;;  %v4058_v58 = vld [vmem:[%s4445_s20 + $0x660] sm:$0xf]  ;;  %v3275_v61 = vor.u32 %v4182_v48, %v3274_v47  ;;  %v3684_v47 = vld [vmem:[%s4445_s20 + $0x3e8] sm:$0xf0] }
  0x91   : > { %1780 = vmatpush.bf16.msra.mxu0 %v3643_v1  ;;  %1793 = vmatpush.bf16.msra.mxu1 %v3647_v2  ;;  %v3786_v1 = vld [vmem:[%s4445_s20 + $0x450] sm:$0xf]  ;;  %v4183_v55 = vld [vmem:[%s4445_s20 + $0xd4] sm:$0xf0]  ;;  %v4376_v59 = vld [vmem:[%s4445_s20 + $0x6dc] sm:$0xf0] }
  0x92   : > { %1806 = vmatpush.bf16.msra.mxu2 %v3651_v3  ;;  %v4310_v2 = vld [vmem:[%s4445_s20 + $0x4cc] sm:$0xf0]  ;;  %v4294_v3 = vld [vmem:[%s4445_s20 + $0x454] sm:$0xf] }
  0x93   : > { %1819 = vmatpush.bf16.msra.mxu3 %v3655_v7  ;;  %v4311_v7 = vld [vmem:[%s4445_s20 + $0x4d4] sm:$0xf0]  ;;  %v3787_v10 = vor.u32 %v4310_v2, %v3786_v1  ;;  %v3791_v11 = vor.u32 %v4294_v3, %v3788_v5  ;;  %v3283_v2 = vor.u32 %v4183_v55, %v3282_v53  ;;  %v4361_v3 = vld [vmem:[%s4445_s20 + $0x66c] sm:$0xf]  ;;  %v4248_v53 = vld [vmem:[%s4445_s20 + $0x2dc] sm:$0xf0] }
  0x94   : > { %v3795_v12 = vor.u32 %v4311_v7, %v3794_v6  ;;  %v4059_v6 = vor.u32 %v4376_v59, %v4058_v58  ;;  %v4249_v58 = vld [vmem:[%s4445_s20 + $0x2e4] sm:$0xf0]  ;;  %v4233_v59 = vld [vmem:[%s4445_s20 + $0x26c] sm:$0xf] }
  0x95   : > { %1781 = vmatpush.bf16.msra.mxu0 %v3515_v13  ;;  %1794 = vmatpush.bf16.msra.mxu1 %v3519_v14  ;;  %v3658_v13 = vld [vmem:[%s4445_s20 + $0x350] sm:$0xf] }
  0x96   : > { %1807 = vmatpush.bf16.msra.mxu2 %v3523_v15  ;;  %v4278_v14 = vld [vmem:[%s4445_s20 + $0x3cc] sm:$0xf0]  ;;  %v4262_v15 = vld [vmem:[%s4445_s20 + $0x354] sm:$0xf] }
  0x97   : > { %1820 = vmatpush.bf16.msra.mxu3 %v3527_v19  ;;  %v4263_v19 = vld [vmem:[%s4445_s20 + $0x35c] sm:$0xf]  ;;  %v3659_v21 = vor.u32 %v4278_v14, %v3658_v13  ;;  %v3663_v22 = vor.u32 %v4262_v15, %v3660_v17  ;;  %v3932_v13 = vld [vmem:[%s4445_s20 + $0x5e0] sm:$0xf0]  ;;  %v3938_v14 = vld [vmem:[%s4445_s20 + $0x568] sm:$0xf] }
  0x98   : > { %v3671_v27 = vor.u32 %v4263_v19, %v3668_v20  ;;  %v4345_v15 = vld [vmem:[%s4445_s20 + $0x5e4] sm:$0xf0]  ;;  %v4329_v17 = vld [vmem:[%s4445_s20 + $0x56c] sm:$0xf] }
  0x99   : > { %1782 = vmatpush.bf16.msra.mxu0 %v3387_v25  ;;  %1795 = vmatpush.bf16.msra.mxu1 %v3391_v28  ;;  %v4246_v25 = vld [vmem:[%s4445_s20 + $0x2cc] sm:$0xf0]  ;;  %v3532_v28 = vld [vmem:[%s4445_s20 + $0x2d0] sm:$0xf0] }
  0x9a   : > { %1808 = vmatpush.bf16.msra.mxu2 %v3395_v29  ;;  %v3538_v29 = vld [vmem:[%s4445_s20 + $0x258] sm:$0xf]  ;;  %v3535_v34 = vor.u32 %v4230_v26, %v3532_v28  ;;  %v3810_v28 = vld [vmem:[%s4445_s20 + $0x468] sm:$0xf] }
  0x9b   : > { %1821 = vmatpush.bf16.msra.mxu3 %v3399_v33  ;;  %v3531_v33 = vor.u32 %v4246_v25, %v3530_v24  ;;  %v3539_v35 = vor.u32 %v4247_v30, %v3538_v29  ;;  %v4296_v24 = vld [vmem:[%s4445_s20 + $0x464] sm:$0xf]  ;;  %v4854_v25 = vld [vmem:[%s5975_s1] sm:$0xf]  ;;  %v4313_v29 = vld [vmem:[%s4445_s20 + $0x4e4] sm:$0xf0] }
  0x9c   : > { %v4297_v30 = vld [vmem:[%s4445_s20 + $0x46c] sm:$0xf] }
  0x9d   : > { %1783 = vmatpush.bf16.msra.mxu0 %v3259_v40  ;;  %1796 = vmatpush.bf16.msra.mxu1 %v3263_v45  ;;  %v3404_v40 = vld [vmem:[%s4445_s20 + $0x1d0] sm:$0xf0]  ;;  %v3412_v45 = vld [vmem:[%s4445_s20 + $0x1d8] sm:$0xf0] }
  0x9e   : > { %1809 = vmatpush.bf16.msra.mxu2 %v3267_v46  ;;  %v3403_v46 = vor.u32 %v4214_v37, %v3402_v36  ;;  %v3415_v54 = vor.u32 %v4199_v44, %v3412_v45  ;;  %v3811_v36 = vor.u32 %v4313_v29, %v3810_v28  ;;  %v3674_v37 = vld [vmem:[%s4445_s20 + $0x360] sm:$0xf]  ;;  %v4281_v44 = vld [vmem:[%s4445_s20 + $0x3e4] sm:$0xf0]  ;;  %v4076_v29 = vld [vmem:[%s4445_s20 + $0x6f0] sm:$0xf0] }
  0x9f   : > { %1822 = vmatpush.bf16.msra.mxu3 %v3271_v49  ;;  %v3407_v49 = vor.u32 %v4198_v38, %v3404_v40  ;;  %v4280_v38 = vld [vmem:[%s4445_s20 + $0x3dc] sm:$0xf0]  ;;  %v3815_v40 = vor.u32 %v4297_v30, %v3812_v31  ;;  %v4082_v30 = vld [vmem:[%s4445_s20 + $0x678] sm:$0xf] }
  0xa0   : > { %4104 = vmatmul.msk.bf16.vlgmr.msra.gmra.mxu0 %vm1564_vm0, %v4522_v41  ;;  %4105 = vmatmul.msk.bf16.vlgmr.msra.gmra.mxu1 %vm1564_vm0, %v4522_v41  ;;  %v4379_v31 = vld [vmem:[%s4445_s20 + $0x6f4] sm:$0xf0] }
  0xa1   : > { %1829 = vmatpush.bf16.msrb.mxu0 %v4043_v50  ;;  %1842 = vmatpush.bf16.msrb.mxu1 %v4047_v51  ;;  %v3411_v50 = vor.u32 %v4215_v43, %v3410_v42  ;;  %v4166_v51 = vld [vmem:[%s4445_s20 + $0x54] sm:$0xf]  ;;  %v3676_v42 = vld [vmem:[%s4445_s20 + $0x3e0] sm:$0xf0]  ;;  %v3682_v43 = vld [vmem:[%s4445_s20 + $0x368] sm:$0xf] }
  0xa2   : > { %1855 = vmatpush.bf16.msrb.mxu2 %v4051_v52  ;;  %4107 = vmatmul.msk.bf16.vlgmr.msra.gmra.mxu3 %vm1564_vm0, %v4522_v41  ;;  %v3276_v52 = vld [vmem:[%s4445_s20 + $0xd0] sm:$0xf0] }
  0xa3   : > { %1868 = vmatpush.bf16.msrb.mxu3 %v4055_v56  ;;  %4106 = vmatmul.msk.bf16.vlgmr.msra.gmra.mxu2 %vm1564_vm0, %v4522_v41  ;;  %v4279_v41 = vld [vmem:[%s4445_s20 + $0x3d4] sm:$0xf0]  ;;  %v4167_v56 = vld [vmem:[%s4445_s20 + $0x5c] sm:$0xf]  ;;  %v3279_v1 = vor.u32 %v4166_v51, %v3276_v52  ;;  %v3683_v51 = vor.u32 %v4281_v44, %v3682_v43  ;;  %v3546_v52 = vld [vmem:[%s4445_s20 + $0x260] sm:$0xf] }
  0xa4   : > { %v3667_v23 = vor.u32 %v4279_v41, %v3666_v18  ;;  %v3287_v5 = vor.u32 %v4167_v56, %v3284_v57  ;;  %v3940_v18 = vld [vmem:[%s4445_s20 + $0x5e8] sm:$0xf0]  ;;  %v3548_v56 = vld [vmem:[%s4445_s20 + $0x2e0] sm:$0xf0]  ;;  %v3554_v57 = vld [vmem:[%s4445_s20 + $0x268] sm:$0xf] }
  0xa5   : > { %1830 = vmatpush.bf16.msrb.mxu0 %v3915_v62  ;;  %1843 = vmatpush.bf16.msrb.mxu1 %v3919_v63  ;;  %v4060_v62 = vld [vmem:[%s4445_s20 + $0x6e0] sm:$0xf0]  ;;  %v4066_v63 = vld [vmem:[%s4445_s20 + $0x668] sm:$0xf]  ;;  %v3943_v26 = vor.u32 %v4329_v17, %v3940_v18  ;;  %v3946_v43 = vld [vmem:[%s4445_s20 + $0x570] sm:$0xf] }
  0xa6   : > { %1856 = vmatpush.bf16.msrb.mxu2 %v3923_v0  ;;  %v4377_v0 = vld [vmem:[%s4445_s20 + $0x6e4] sm:$0xf0]  ;;  %v4063_v7 = vor.u32 %v4360_v60, %v4060_v62  ;;  %v3556_v60 = vld [vmem:[%s4445_s20 + $0x2e8] sm:$0xf0]  ;;  %v3547_v62 = vor.u32 %v4248_v53, %v3546_v52  ;;  %v4168_v17 = vld [vmem:[%s4445_s20 + $0x64] sm:$0xf] }
  0xa7   : > { %1869 = vmatpush.bf16.msrb.mxu3 %v3927_v4  ;;  %v4068_v4 = vld [vmem:[%s4445_s20 + $0x6e8] sm:$0xf0]  ;;  %v4067_v8 = vor.u32 %v4377_v0, %v4066_v63  ;;  %v3292_v18 = vld [vmem:[%s4445_s20 + $0xe0] sm:$0xf0]  ;;  %v4346_v44 = vld [vmem:[%s4445_s20 + $0x5ec] sm:$0xf0] }
  0xa8   : > { %v3956_v52 = vld [vmem:[%s4445_s20 + $0x5f8] sm:$0xf0] }
  0xa9   : > { %1831 = vmatpush.bf16.msrb.mxu0 %v3787_v10  ;;  %1844 = vmatpush.bf16.msrb.mxu1 %v3791_v11  ;;  %v4344_v10 = vld [vmem:[%s4445_s20 + $0x5dc] sm:$0xf0]  ;;  %v4328_v11 = vld [vmem:[%s4445_s20 + $0x564] sm:$0xf] }
  0xaa   : > { %1857 = vmatpush.bf16.msrb.mxu2 %v3795_v12  ;;  %v4071_v12 = vor.u32 %v4361_v3, %v4068_v4  ;;  %v3931_v19 = vor.u32 %v4344_v10, %v3930_v9  ;;  %v3935_v20 = vor.u32 %v4328_v11, %v3932_v13  ;;  %v4216_v3 = vld [vmem:[%s4445_s20 + $0x1dc] sm:$0xf0]  ;;  %v4200_v4 = vld [vmem:[%s4445_s20 + $0x164] sm:$0xf]  ;;  %v4201_v9 = vld [vmem:[%s4445_s20 + $0x16c] sm:$0xf] }
  0xab   : > { %1870 = vmatpush.bf16.msrb.mxu3 %v3799_v16  ;;  %v3428_v10 = vld [vmem:[%s4445_s20 + $0x1e8] sm:$0xf0]  ;;  %v4184_v13 = vld [vmem:[%s4445_s20 + $0xdc] sm:$0xf0] }
  0xad   : > { %1832 = vmatpush.bf16.msrb.mxu0 %v3659_v21  ;;  %1845 = vmatpush.bf16.msrb.mxu1 %v3663_v22  ;;  %v4842_v16 = vpop.f32.mrf.mxu0  ;;  %v4846_v41 = vpop.f32.mrf.mxu1  ;;  %v3939_v21 = vor.u32 %v4345_v15, %v3938_v14  ;;  %v3802_v22 = vld [vmem:[%s4445_s20 + $0x460] sm:$0xf] }
  0xae   : > { %1858 = vmatpush.bf16.msrb.mxu2 %v3667_v23  ;;  %v4312_v23 = vld [vmem:[%s4445_s20 + $0x4dc] sm:$0xf0] }
  0xaf   : > { %1871 = vmatpush.bf16.msrb.mxu3 %v3671_v27  ;;  %v3804_v27 = vld [vmem:[%s4445_s20 + $0x4e0] sm:$0xf0] }
  0xb1   : > { %1833 = vmatpush.bf16.msrb.mxu0 %v3531_v33  ;;  %1846 = vmatpush.bf16.msrb.mxu1 %v3535_v34  ;;  %v3803_v33 = vor.u32 %v4312_v23, %v3802_v22  ;;  %v4169_v22 = vld [vmem:[%s4445_s20 + $0x6c] sm:$0xf] }
  0xb2   : > { %1859 = vmatpush.bf16.msrb.mxu2 %v3539_v35  ;;  %v3807_v35 = vor.u32 %v4296_v24, %v3804_v27  ;;  %v3300_v23 = vld [vmem:[%s4445_s20 + $0xe8] sm:$0xf0]  ;;  %v4074_v24 = vld [vmem:[%s4445_s20 + $0x670] sm:$0xf]  ;;  %v4362_v27 = vld [vmem:[%s4445_s20 + $0x674] sm:$0xf] }
  0xb3   : > { %1872 = vmatpush.bf16.msrb.mxu3 %v3543_v39  ;;  %v4264_v39 = vld [vmem:[%s4445_s20 + $0x364] sm:$0xf] }
  0xb5   : > { %1834 = vmatpush.bf16.msrb.mxu0 %v3403_v46  ;;  %1847 = vmatpush.bf16.msrb.mxu1 %v3407_v49  ;;  %v4871_v34 = vpop.f32.mrf.mxu3  ;;  %v1579_v45 = vpop.f32.mrf.mxu0  ;;  %v4265_v46 = vld [vmem:[%s4445_s20 + $0x36c] sm:$0xf]  ;;  %v3675_v49 = vor.u32 %v4280_v38, %v3674_v37  ;;  %v4084_v37 = vld [vmem:[%s4445_s20 + $0x6f8] sm:$0xf0]  ;;  %v3303_v38 = vor.u32 %v4169_v22, %v3300_v23  ;;  %v3562_v22 = vld [vmem:[%s4445_s20 + $0x270] sm:$0xf] }
  0xb6   : > { %1860 = vmatpush.bf16.msrb.mxu2 %v3411_v50  ;;  %v4867_v32 = vpop.f32.mrf.mxu2  ;;  %v1592_v48 = vpop.f32.mrf.mxu1  ;;  %v3679_v50 = vor.u32 %v4264_v39, %v3676_v42  ;;  %v3687_v55 = vor.u32 %v4265_v46, %v3684_v47  ;;  %v4083_v42 = vor.u32 %v4379_v31, %v4082_v30  ;;  %v4330_v45 = vld [vmem:[%s4445_s20 + $0x574] sm:$0xf]  ;;  %v4250_v23 = vld [vmem:[%s4445_s20 + $0x2ec] sm:$0xf0]  ;;  %v4235_v30 = vld [vmem:[%s4445_s20 + $0x27c] sm:$0xf] }
  0xb7   : > { %1873 = vmatpush.bf16.msrb.mxu3 %v3415_v54  ;;  %v4232_v54 = vld [vmem:[%s4445_s20 + $0x264] sm:$0xf]  ;;  %v3948_v47 = vld [vmem:[%s4445_s20 + $0x5f0] sm:$0xf0]  ;;  %v3954_v48 = vld [vmem:[%s4445_s20 + $0x578] sm:$0xf] }
  0xb8   : > { %v3551_v0 = vor.u32 %v4232_v54, %v3548_v56  ;;  %v3947_v54 = vor.u32 %v4346_v44, %v3946_v43  ;;  %v3572_v31 = vld [vmem:[%s4445_s20 + $0x2f8] sm:$0xf0]  ;;  %v4202_v43 = vld [vmem:[%s4445_s20 + $0x174] sm:$0xf] }
  0xb9   : > { %1835 = vmatpush.bf16.msrb.mxu0 %v3275_v61  ;;  %1848 = vmatpush.bf16.msrb.mxu1 %v3279_v1  ;;  %v3555_v1 = vor.u32 %v4249_v58, %v3554_v57  ;;  %v3818_v57 = vld [vmem:[%s4445_s20 + $0x470] sm:$0xf]  ;;  %v3575_v44 = vor.u32 %v4235_v30, %v3572_v31 }
  0xba   : > { %1861 = vmatpush.bf16.msrb.mxu2 %v3283_v2  ;;  %v3418_v2 = vld [vmem:[%s4445_s20 + $0x160] sm:$0xf]  ;;  %v4314_v58 = vld [vmem:[%s4445_s20 + $0x4ec] sm:$0xf0] }
  0xbb   : > { %1874 = vmatpush.bf16.msrb.mxu3 %v3287_v5  ;;  %v3559_v5 = vor.u32 %v4233_v59, %v3556_v60  ;;  %v3419_v11 = vor.u32 %v4216_v3, %v3418_v2  ;;  %v4298_v59 = vld [vmem:[%s4445_s20 + $0x474] sm:$0xf]  ;;  %v3819_v3 = vor.u32 %v4314_v58, %v3818_v57  ;;  %v1988_v58 = vld [vmem:[%s4960_s28 + $0x18] sm:$0xff] }
  0xbc   : > { %4108 = vmatmul.msk.bf16.vlgmr.msrb.gmra.mxu0 %vm1564_vm0, %v4854_v25  ;;  %4109 = vmatmul.msk.bf16.vlgmr.msrb.gmra.mxu1 %vm1564_vm0, %v4854_v25 }
  0xbd   : > { %1881 = vmatpush.bf16.msra.mxu0 %v4059_v6  ;;  %1894 = vmatpush.bf16.msra.mxu1 %v4063_v7  ;;  %v1618_v63 = vpop.f32.mrf.mxu3  ;;  %v3420_v6 = vld [vmem:[%s4445_s20 + $0x1e0] sm:$0xf0]  ;;  %v3426_v7 = vld [vmem:[%s4445_s20 + $0x168] sm:$0xf] }
  0xbe   : > { %1907 = vmatpush.bf16.msra.mxu2 %v4067_v8  ;;  %4111 = vmatmul.msk.bf16.vlgmr.msrb.gmra.mxu3 %vm1564_vm0, %v4854_v25  ;;  %v1605_v61 = vpop.f32.mrf.mxu2  ;;  %v4217_v8 = vld [vmem:[%s4445_s20 + $0x1e4] sm:$0xf0]  ;;  %v3423_v14 = vor.u32 %v4200_v4, %v3420_v6  ;;  %v4315_v63 = vld [vmem:[%s4445_s20 + $0x4f4] sm:$0xf0] }
  0xbf   : > { %1920 = vmatpush.bf16.msra.mxu3 %v4071_v12  ;;  %4110 = vmatmul.msk.bf16.vlgmr.msrb.gmra.mxu2 %vm1564_vm0, %v4854_v25  ;;  %v3290_v12 = vld [vmem:[%s4445_s20 + $0x60] sm:$0xf]  ;;  %v3427_v15 = vor.u32 %v4217_v8, %v3426_v7  ;;  %v3820_v61 = vld [vmem:[%s4445_s20 + $0x4f0] sm:$0xf0]  ;;  %v3690_v7 = vld [vmem:[%s4445_s20 + $0x370] sm:$0xf] }
  0xc0   : > { %v3291_v28 = vor.u32 %v4184_v13, %v3290_v12  ;;  %v4282_v8 = vld [vmem:[%s4445_s20 + $0x3ec] sm:$0xf0]  ;;  %v3698_v12 = vld [vmem:[%s4445_s20 + $0x378] sm:$0xf] }
  0xc1   : > { %1882 = vmatpush.bf16.msra.mxu0 %v3931_v19  ;;  %1895 = vmatpush.bf16.msra.mxu1 %v3935_v20  ;;  %v3298_v19 = vld [vmem:[%s4445_s20 + $0x68] sm:$0xf]  ;;  %v3431_v20 = vor.u32 %v4201_v9, %v3428_v10  ;;  %v4266_v9 = vld [vmem:[%s4445_s20 + $0x374] sm:$0xf]  ;;  %v4283_v13 = vld [vmem:[%s4445_s20 + $0x3f4] sm:$0xf0] }
  0xc2   : > { %1908 = vmatpush.bf16.msra.mxu2 %v3939_v21  ;;  %v4185_v21 = vld [vmem:[%s4445_s20 + $0xe4] sm:$0xf0] }
  0xc3   : > { %1921 = vmatpush.bf16.msra.mxu3 %v3943_v26  ;;  %v4378_v26 = vld [vmem:[%s4445_s20 + $0x6ec] sm:$0xf0] }
  0xc4   : > { %v4075_v39 = vor.u32 %v4378_v26, %v4074_v24  ;;  %v4234_v24 = vld [vmem:[%s4445_s20 + $0x274] sm:$0xf] }
  0xc5   : > { %1883 = vmatpush.bf16.msra.mxu0 %v3803_v33  ;;  %1896 = vmatpush.bf16.msra.mxu1 %v3807_v35  ;;  %v3295_v33 = vor.u32 %v4168_v17, %v3292_v18  ;;  %v3299_v35 = vor.u32 %v4185_v21, %v3298_v19  ;;  %v3700_v17 = vld [vmem:[%s4445_s20 + $0x3f8] sm:$0xf0]  ;;  %v3691_v19 = vor.u32 %v4282_v8, %v3690_v7 }
  0xc6   : > { %1909 = vmatpush.bf16.msra.mxu2 %v3811_v36  ;;  %v4363_v36 = vld [vmem:[%s4445_s20 + $0x67c] sm:$0xf]  ;;  %v3699_v21 = vor.u32 %v4283_v13, %v3698_v12 }
  0xc7   : > { %1922 = vmatpush.bf16.msra.mxu3 %v3815_v40  ;;  %v4079_v40 = vor.u32 %v4362_v27, %v4076_v29  ;;  %v4087_v46 = vor.u32 %v4363_v36, %v4084_v37  ;;  %v3564_v27 = vld [vmem:[%s4445_s20 + $0x2f0] sm:$0xf0]  ;;  %v4251_v29 = vld [vmem:[%s4445_s20 + $0x2f4] sm:$0xf0]  ;;  %v1986_v37 = vld [vmem:[%s4960_s28 + $0x8] sm:$0xff] }
  0xc8   : > { %v2020_v57 = vunpack.c.h.b16 %v1986_v37  ;;  %v4171_v7 = vld [vmem:[%s4445_s20 + $0x7c] sm:$0xf] }
  0xc9   : > { %1884 = vmatpush.bf16.msra.mxu0 %v3675_v49  ;;  %1897 = vmatpush.bf16.msra.mxu1 %v3679_v50  ;;  %v4347_v49 = vld [vmem:[%s4445_s20 + $0x5f4] sm:$0xf0]  ;;  %v4919_v50 = vpop.f32.mrf.mxu0  ;;  %v4923_v53 = vpop.f32.mrf.mxu1  ;;  %v3316_v8 = vld [vmem:[%s4445_s20 + $0xf8] sm:$0xf0] }
  0xca   : > { %1910 = vmatpush.bf16.msra.mxu2 %v3683_v51  ;;  %v4331_v51 = vld [vmem:[%s4445_s20 + $0x57c] sm:$0xf]  ;;  %v3955_v56 = vor.u32 %v4347_v49, %v3954_v48  ;;  %v2052_v12 = vpack.c.b16 %v2020_v57, %v2020_v57 }
  0xcb   : > { %1923 = vmatpush.bf16.msra.mxu3 %v3687_v55  ;;  %v3951_v55 = vor.u32 %v4330_v45, %v3948_v47  ;;  %v3959_v60 = vor.u32 %v4331_v51, %v3956_v52  ;;  %v3436_v45 = vld [vmem:[%s4445_s20 + $0x1f0] sm:$0xf0]  ;;  %v4219_v47 = vld [vmem:[%s4445_s20 + $0x1f4] sm:$0xf0]  ;;  %v4203_v48 = vld [vmem:[%s4445_s20 + $0x17c] sm:$0xf]  ;;  %v2019_v51 = vunpack.c.l.b16 %v1986_v37 }
  0xcc   : > { %v3444_v49 = vld [vmem:[%s4445_s20 + $0x1f8] sm:$0xf0]  ;;  %v1985_v52 = vld [vmem:[%s4960_s28] sm:$0xff] }
  0xcd   : > { %1885 = vmatpush.bf16.msra.mxu0 %v3547_v62  ;;  %1898 = vmatpush.bf16.msra.mxu1 %v3551_v0  ;;  %v3826_v62 = vld [vmem:[%s4445_s20 + $0x478] sm:$0xf]  ;;  %v4299_v0 = vld [vmem:[%s4445_s20 + $0x47c] sm:$0xf] }
  0xce   : > { %1911 = vmatpush.bf16.msra.mxu2 %v3555_v1  ;;  %v3828_v1 = vld [vmem:[%s4445_s20 + $0x4f8] sm:$0xf0]  ;;  %v3827_v6 = vor.u32 %v4315_v63, %v3826_v62  ;;  %v1987_v62 = vld [vmem:[%s4960_s28 + $0x10] sm:$0xff]  ;;  %v3447_v63 = vor.u32 %v4203_v48, %v3444_v49 }
  0xcf   : > { %1924 = vmatpush.bf16.msra.mxu3 %v3559_v5  ;;  %v3823_v5 = vor.u32 %v4298_v59, %v3820_v61  ;;  %v3831_v10 = vor.u32 %v4299_v0, %v3828_v1  ;;  %v3439_v59 = vor.u32 %v4202_v43, %v3436_v45  ;;  %v4170_v61 = vld [vmem:[%s4445_s20 + $0x74] sm:$0xf]  ;;  %v3314_v1 = vld [vmem:[%s4445_s20 + $0x78] sm:$0xf]  ;;  %v2021_v13 = vunpack.c.l.b16 %v1987_v62  ;;  %v1990_v43 = vld [vmem:[%s4960_s28 + $0x28] sm:$0xff] }
  0xd0   : > { %v3308_v0 = vld [vmem:[%s4445_s20 + $0xf0] sm:$0xf0]  ;;  %v1989_v45 = vld [vmem:[%s4960_s28 + $0x20] sm:$0xff]  ;;  %v2028_v48 = vunpack.c.h.b16 %v1990_v43 }
  0xd1   : > { %1886 = vmatpush.bf16.msra.mxu0 %v3419_v11  ;;  %1899 = vmatpush.bf16.msra.mxu1 %v3423_v14  ;;  %v4943_v4 = vpop.f32.mrf.mxu3  ;;  %v3692_v11 = vld [vmem:[%s4445_s20 + $0x3f0] sm:$0xf0]  ;;  %v1631_v14 = vpop.f32.mrf.mxu0 }
  0xd2   : > { %1912 = vmatpush.bf16.msra.mxu2 %v3427_v15  ;;  %v4939_v2 = vpop.f32.mrf.mxu2  ;;  %v4267_v15 = vld [vmem:[%s4445_s20 + $0x37c] sm:$0xf]  ;;  %v1644_v18 = vpop.f32.mrf.mxu1  ;;  %v2024_v14 = vunpack.c.h.b16 %v1988_v58 }
  0xd3   : > { %1925 = vmatpush.bf16.msra.mxu3 %v3431_v20  ;;  %v3695_v20 = vor.u32 %v4266_v9, %v3692_v11  ;;  %v3703_v26 = vor.u32 %v4267_v15, %v3700_v17  ;;  %v2051_v9 = vpack.c.b16 %v2019_v51, %v2019_v51  ;;  %v2023_v11 = vunpack.c.l.b16 %v1988_v58 }
  0xd4   : > { %v3311_v15 = vor.u32 %v4170_v61, %v3308_v0  ;;  %v2022_v18 = vunpack.c.h.b16 %v1987_v62  ;;  %v1992_v62 = vld [vmem:[%s4960_s28 + $0x38] sm:$0xff] }
  0xd5   : > { %1887 = vmatpush.bf16.msra.mxu0 %v3291_v28  ;;  %1900 = vmatpush.bf16.msra.mxu1 %v3295_v33  ;;  %v3570_v28 = vld [vmem:[%s4445_s20 + $0x278] sm:$0xf] }
  0xd6   : > { %1913 = vmatpush.bf16.msra.mxu2 %v3299_v35  ;;  %v3563_v35 = vor.u32 %v4250_v23, %v3562_v22  ;;  %v2093_v22 = vsel %vm2085_vm1, %v2051_v9, 0  ;;  %v2054_v30 = vpack.c.b16 %v2022_v18, %v2022_v18 }
  0xd7   : > { %1926 = vmatpush.bf16.msra.mxu3 %v3303_v38  ;;  %v3567_v38 = vor.u32 %v4234_v24, %v3564_v27  ;;  %v2055_v24 = vpack.c.b16 %v2023_v11, %v2023_v11  ;;  %v2096_v27 = vsel %vm2085_vm1, %v2052_v12, 0 }
  0xd8   : > { %4112 = vmatmul.msk.bf16.vlgmr.msra.gmra.mxu0 %vm1564_vm0, %v4854_v25  ;;  %4113 = vmatmul.msk.bf16.vlgmr.msra.gmra.mxu1 %vm1564_vm0, %v4854_v25 }
  0xd9   : > { %1933 = vmatpush.bf16.msrb.mxu0 %v4075_v39  ;;  %1946 = vmatpush.bf16.msrb.mxu1 %v4079_v40  ;;  %v1670_v36 = vpop.f32.mrf.mxu3  ;;  %v3571_v39 = vor.u32 %v4251_v29, %v3570_v28  ;;  %v3434_v40 = vld [vmem:[%s4445_s20 + $0x170] sm:$0xf]  ;;  %v2053_v28 = vpack.c.b16 %v2021_v13, %v2021_v13  ;;  %v2056_v29 = vpack.c.b16 %v2024_v14, %v2024_v14 }
  0xda   : > { %1959 = vmatpush.bf16.msrb.mxu2 %v4083_v42  ;;  %4115 = vmatmul.msk.bf16.vlgmr.msra.gmra.mxu3 %vm1564_vm0, %v4854_v25  ;;  %v1657_v33 = vpop.f32.mrf.mxu2  ;;  %v4218_v42 = vld [vmem:[%s4445_s20 + $0x1ec] sm:$0xf0] }
  0xdb   : > { %1972 = vmatpush.bf16.msrb.mxu3 %v4087_v46  ;;  %4114 = vmatmul.msk.bf16.vlgmr.msra.gmra.mxu2 %vm1564_vm0, %v4854_v25  ;;  %v3442_v46 = vld [vmem:[%s4445_s20 + $0x178] sm:$0xf]  ;;  %v2099_v36 = vsel %vm2085_vm1, %v2053_v28, 0  ;;  %v2108_v37 = vsel %vm2085_vm1, %v2056_v29, 0 }
  0xdd   : > { %1934 = vmatpush.bf16.msrb.mxu0 %v3947_v54  ;;  %1947 = vmatpush.bf16.msrb.mxu1 %v3951_v55  ;;  %v3435_v54 = vor.u32 %v4218_v42, %v3434_v40  ;;  %v3306_v55 = vld [vmem:[%s4445_s20 + $0x70] sm:$0xf] }
  0xde   : > { %1960 = vmatpush.bf16.msrb.mxu2 %v3955_v56  ;;  %v4186_v56 = vld [vmem:[%s4445_s20 + $0xec] sm:$0xf0] }
  0xdf   : > { %1973 = vmatpush.bf16.msrb.mxu3 %v3959_v60  ;;  %v3443_v60 = vor.u32 %v4219_v47, %v3442_v46  ;;  %v2027_v46 = vunpack.c.l.b16 %v1990_v43  ;;  %v2025_v47 = vunpack.c.l.b16 %v1989_v45 }
  0xe1   : > { %1935 = vmatpush.bf16.msrb.mxu0 %v3819_v3  ;;  %1948 = vmatpush.bf16.msrb.mxu1 %v3823_v5  ;;  %v4187_v3 = vld [vmem:[%s4445_s20 + $0xf4] sm:$0xf0]  ;;  %v2017_v5 = vunpack.c.l.b16 %v1985_v52  ;;  %v2059_v51 = vpack.c.b16 %v2027_v46, %v2027_v46 }
  0xe2   : > { %1961 = vmatpush.bf16.msrb.mxu2 %v3827_v6  ;;  %v3307_v6 = vor.u32 %v4186_v56, %v3306_v55  ;;  %v3315_v17 = vor.u32 %v4187_v3, %v3314_v1  ;;  %v2060_v55 = vpack.c.b16 %v2028_v48, %v2028_v48  ;;  %v5016_v56 = vld [vmem:[%s5977_s3] sm:$0xf]  ;;  %v2031_v3 = vunpack.c.l.b16 %v1992_v62 }
  0xe3   : > { %1974 = vmatpush.bf16.msrb.mxu3 %v3831_v10  ;;  %v2018_v10 = vunpack.c.h.b16 %v1985_v52  ;;  %v2117_v58 = vsel %vm2085_vm1, %v2059_v51, 0 }
  0xe5   : > { %1936 = vmatpush.bf16.msrb.mxu0 %v3691_v19  ;;  %1949 = vmatpush.bf16.msrb.mxu1 %v3695_v20  ;;  %v3319_v19 = vor.u32 %v4171_v7, %v3316_v8  ;;  %v2049_v20 = vpack.c.b16 %v2017_v5, %v2017_v5  ;;  %v2050_v23 = vpack.c.b16 %v2018_v10, %v2018_v10 }
  0xe6   : > { %1962 = vmatpush.bf16.msrb.mxu2 %v3699_v21  ;;  %v4987_v21 = vpop.f32.mrf.mxu0  ;;  %v2063_v8 = vpack.c.b16 %v2031_v3, %v2031_v3 }
  0xe7   : > { %1975 = vmatpush.bf16.msrb.mxu3 %v3703_v26  ;;  %v4990_v26 = vpop.f32.mrf.mxu1  ;;  %v2087_v31 = vsel %vm2085_vm1, %v2049_v20, 0  ;;  %v2090_v33 = vsel %vm2085_vm1, %v2050_v23, 0 }
  0xe9   : > { %1937 = vmatpush.bf16.msrb.mxu0 %v3563_v35  ;;  %1950 = vmatpush.bf16.msrb.mxu1 %v3567_v38  ;;  %v2105_v35 = vsel %vm2085_vm1, %v2055_v24, 0  ;;  %v2102_v38 = vsel %vm2085_vm1, %v2054_v30, 0  ;;  %v1993_v24 = vld [vmem:[%s4960_s28 + $0x40] sm:$0xff] }
  0xea   : > { %1963 = vmatpush.bf16.msrb.mxu2 %v3571_v39  ;;  %v2033_v29 = vunpack.c.l.b16 %v1993_v24 }
  0xeb   : > { %1976 = vmatpush.bf16.msrb.mxu3 %v3575_v44 }
  0xed   : > { %1938 = vmatpush.bf16.msrb.mxu0 %v3435_v54  ;;  %1951 = vmatpush.bf16.msrb.mxu1 %v3439_v59  ;;  %v5009_v40 = vpop.f32.mrf.mxu3  ;;  %v2057_v54 = vpack.c.b16 %v2025_v47, %v2025_v47 }
  0xee   : > { %1964 = vmatpush.bf16.msrb.mxu2 %v3443_v60  ;;  %v5007_v39 = vpop.f32.mrf.mxu2  ;;  %v1683_v42 = vpop.f32.mrf.mxu0  ;;  %v2120_v60 = vsel %vm2085_vm1, %v2060_v55, 0 }
  0xef   : > { %1977 = vmatpush.bf16.msrb.mxu3 %v3447_v63  ;;  %v1696_v44 = vpop.f32.mrf.mxu1  ;;  %v2111_v59 = vsel %vm2085_vm1, %v2057_v54, 0  ;;  %v1991_v63 = vld [vmem:[%s4960_s28 + $0x30] sm:$0xff] }
  0xf0   : > { %v2029_v5 = vunpack.c.l.b16 %v1991_v63  ;;  %v2030_v7 = vunpack.c.h.b16 %v1991_v63 }
  0xf1   : > { %1939 = vmatpush.bf16.msrb.mxu0 %v3307_v6  ;;  %1952 = vmatpush.bf16.msrb.mxu1 %v3311_v15  ;;  %v2032_v6 = vunpack.c.h.b16 %v1992_v62 }
  0xf2   : > { %1965 = vmatpush.bf16.msrb.mxu2 %v3315_v17  ;;  %v2061_v9 = vpack.c.b16 %v2029_v5, %v2029_v5  ;;  %v2062_v12 = vpack.c.b16 %v2030_v7, %v2030_v7  ;;  %v2129_v17 = vsel %vm2085_vm1, %v2063_v8, 0 }
  0xf3   : > { %1978 = vmatpush.bf16.msrb.mxu3 %v3319_v19  ;;  %v2064_v10 = vpack.c.b16 %v2032_v6, %v2032_v6 }
  0xf4   : > { %4116 = vmatmul.msk.bf16.vlgmr.msrb.gmra.mxu0 %vm1564_vm0, %v4854_v25  ;;  %4117 = vmatmul.msk.bf16.vlgmr.msrb.gmra.mxu1 %vm1564_vm0, %v4854_v25  ;;  %v2123_v18 = vsel %vm2085_vm1, %v2061_v9, 0  ;;  %v2126_v20 = vsel %vm2085_vm1, %v2062_v12, 0 }
  0xf5   : > { %4118 = vmatmul.msk.bf16.vlgmr.msrb.gmra.mxu2 %vm1564_vm0, %v4854_v25  ;;  %2189 = vmatpush.bf16.msra.mxu0 %v2087_v31  ;;  %v1722_v52 = vpop.f32.mrf.mxu3  ;;  %v2132_v19 = vsel %vm2085_vm1, %v2064_v10, 0  ;;  %v2598_v31 = vadd.f32 %v4846_v41, %v4842_v16 }
  0xf6   : > { %2215 = vmatpush.bf16.msra.mxu2 %v2093_v22  ;;  %4119 = vmatmul.msk.bf16.vlgmr.msrb.gmra.mxu3 %vm1564_vm0, %v4854_v25  ;;  %v2026_v25 = vunpack.c.h.b16 %v1989_v45  ;;  %v1709_v49 = vpop.f32.mrf.mxu2  ;;  %v1994_v22 = vld [vmem:[%s4960_s28 + $0x48] sm:$0xff]  ;;  %v1995_v52 = vld [vmem:[%s4960_s28 + $0x50] sm:$0xff] }
  0xf7   : > { %2228 = vmatpush.bf16.msra.mxu3 %v2096_v27  ;;  %2202 = vmatpush.bf16.msra.mxu1 %v2090_v33  ;;  %v2035_v28 = vunpack.c.l.b16 %v1994_v22  ;;  %v2036_v30 = vunpack.c.h.b16 %v1994_v22  ;;  %v2034_v33 = vunpack.c.h.b16 %v1993_v24  ;;  %v1996_v49 = vld [vmem:[%s4960_s28 + $0x58] sm:$0xff]  ;;  %v2038_v63 = vunpack.c.h.b16 %v1995_v52  ;;  %v1997_v22 = vld [vmem:[%s4960_s28 + $0x60] sm:$0xff] }
  0xf8   : > { %v2058_v57 = vpack.c.b16 %v2026_v25, %v2026_v25  ;;  %v2039_v55 = vunpack.c.l.b16 %v1996_v49 }
  0xf9   : > { %2241 = vmatpush.bf16.msrb.mxu0 %v2099_v36  ;;  %v2065_v36 = vpack.c.b16 %v2033_v29, %v2033_v29  ;;  %v2066_v42 = vpack.c.b16 %v2034_v33, %v2034_v33  ;;  %v2070_v8 = vpack.c.b16 %v2038_v63, %v2038_v63 }
  0xfa   : > { %2267 = vmatpush.bf16.msrb.mxu2 %v2105_v35  ;;  %v2114_v61 = vsel %vm2085_vm1, %v2058_v57, 0  ;;  %v2067_v35 = vpack.c.b16 %v2035_v28, %v2035_v28  ;;  %v2071_v3 = vpack.c.b16 %v2039_v55, %v2039_v55 }
  0xfb   : > { %2280 = vmatpush.bf16.msrb.mxu3 %v2108_v37  ;;  %2254 = vmatpush.bf16.msrb.mxu1 %v2102_v38  ;;  %v2068_v37 = vpack.c.b16 %v2036_v30, %v2036_v30  ;;  %v2599_v38 = vadd.f32 %v2598_v31, %v4867_v32  ;;  %v2135_v45 = vsel %vm2085_vm1, %v2065_v36, 0  ;;  %v2138_v25 = vsel %vm2085_vm1, %v2066_v42, 0 }
  0xfc   : > { %v2141_v43 = vsel %vm2085_vm1, %v2067_v35, 0  ;;  %v2153_v10 = vsel %vm2085_vm1, %v2071_v3, 0  ;;  %v2042_v30 = vunpack.c.h.b16 %v1997_v22 }
  0xfd   : > { %v2144_v46 = vsel %vm2085_vm1, %v2068_v37, 0  ;;  %v2600_v47 = vadd.f32 %v2599_v38, %v4871_v34 }
  0xfe   : > { %v2074_v42 = vpack.c.b16 %v2042_v30, %v2042_v30 }
  0xff   : > { %v2601_v51 = vadd.f32 %v2600_v47, %v4919_v50 }
 0x101   : > { %v5032_v0 = vpop.f32.mrf.mxu0  ;;  %v5034_v1 = vpop.f32.mrf.mxu1 }
 0x104   : > { %4120 = vmatmul.msk.bf16.vlgmr.msra.gmra.mxu0 %vm2081_vm2, %v5016_v56  ;;  %4121 = vmatmul.msk.bf16.vlgmr.msra.gmra.mxu1 %vm2081_vm2, %v5016_v56 }
 0x105   : > { %4122 = vmatmul.msk.bf16.vlgmr.msra.gmra.mxu2 %vm2081_vm2, %v5016_v56  ;;  %2293 = vmatpush.bf16.msra.mxu0 %v2111_v59  ;;  %v2037_v59 = vunpack.c.l.b16 %v1995_v52 }
 0x106   : > { %4123 = vmatmul.msk.bf16.vlgmr.msra.gmra.mxu3 %vm2081_vm2, %v5016_v56  ;;  %2319 = vmatpush.bf16.msra.mxu2 %v2117_v58 }
 0x107   : > { %2332 = vmatpush.bf16.msra.mxu3 %v2120_v60  ;;  %2306 = vmatpush.bf16.msra.mxu1 %v2114_v61  ;;  %v2040_v60 = vunpack.c.h.b16 %v1996_v49  ;;  %v2602_v61 = vadd.f32 %v2601_v51, %v4923_v53  ;;  %v2069_v5 = vpack.c.b16 %v2037_v59, %v2037_v59  ;;  %v2162_v49 = vsel %vm2085_vm1, %v2074_v42, 0  ;;  %v2000_v59 = vld [vmem:[%s4960_s28 + $0x78] sm:$0xff] }
 0x108   : > { %v2048_v3 = vunpack.c.h.b16 %v2000_v59 }
 0x109   : > { %v5038_v13 = vpop.f32.mrf.mxu3  ;;  %v1735_v14 = vpop.f32.mrf.mxu0  ;;  %v2072_v6 = vpack.c.b16 %v2040_v60, %v2040_v60  ;;  %v2603_v7 = vadd.f32 %v2602_v61, %v4939_v2  ;;  %v1999_v61 = vld [vmem:[%s4960_s28 + $0x70] sm:$0xff] }
 0x10a   : > { %v5036_v11 = vpop.f32.mrf.mxu2  ;;  %v1748_v15 = vpop.f32.mrf.mxu1  ;;  %v2147_v14 = vsel %vm2085_vm1, %v2069_v5, 0  ;;  %v2045_v63 = vunpack.c.l.b16 %v1999_v61 }
 0x10b   : > { %v2156_v15 = vsel %vm2085_vm1, %v2072_v6, 0 }
 0x111   : > { %v1774_v27 = vpop.f32.mrf.mxu3 }
 0x112   : > { %v1761_v23 = vpop.f32.mrf.mxu2  ;;  %v2041_v27 = vunpack.c.l.b16 %v1997_v22 }
 0x114   : > { %4124 = vmatmul.msk.bf16.vlgmr.msrb.gmra.mxu0 %vm2081_vm2, %v5016_v56  ;;  %4125 = vmatmul.msk.bf16.vlgmr.msrb.gmra.mxu1 %vm2081_vm2, %v5016_v56  ;;  %v2073_v36 = vpack.c.b16 %v2041_v27, %v2041_v27 }
 0x115   : > { %4126 = vmatmul.msk.bf16.vlgmr.msrb.gmra.mxu2 %vm2081_vm2, %v5016_v56  ;;  %2345 = vmatpush.bf16.msrb.mxu0 %v2123_v18  ;;  %v2150_v18 = vsel %vm2085_vm1, %v2070_v8, 0 }
 0x116   : > { %4127 = vmatmul.msk.bf16.vlgmr.msrb.gmra.mxu3 %vm2081_vm2, %v5016_v56  ;;  %2371 = vmatpush.bf16.msrb.mxu2 %v2129_v17  ;;  %v2604_v17 = vadd.f32 %v2603_v7, %v4943_v4  ;;  %v2046_v7 = vunpack.c.h.b16 %v1999_v61 }
 0x117   : > { %2384 = vmatpush.bf16.msrb.mxu3 %v2132_v19  ;;  %2358 = vmatpush.bf16.msrb.mxu1 %v2126_v20  ;;  %v1998_v20 = vld [vmem:[%s4960_s28 + $0x68] sm:$0xff] }
 0x118   : > { %v2605_v19 = vadd.f32 %v2604_v17, %v4987_v21  ;;  %v2043_v24 = vunpack.c.l.b16 %v1998_v20  ;;  %v2044_v28 = vunpack.c.h.b16 %v1998_v20 }
 0x11a   : > { %v2606_v23 = vadd.f32 %v2605_v19, %v4990_v26  ;;  %v2075_v35 = vpack.c.b16 %v2043_v24, %v2043_v24  ;;  %v2076_v37 = vpack.c.b16 %v2044_v28, %v2044_v28 }
 0x11c   : > { %v2607_v29 = vadd.f32 %v2606_v23, %v5007_v39  ;;  %v2168_v47 = vsel %vm2085_vm1, %v2076_v37, 0 }
 0x11d   : > { %v5060_v44 = vpop.f32.mrf.mxu0  ;;  %v5069_v48 = vpop.f32.mrf.mxu1 }
 0x11e   : > { %v2608_v38 = vadd.f32 %v2607_v29, %v5009_v40 }
 0x124   : > { %4128 = vmatmul.msk.bf16.vlgmr.msra.gmra.mxu0 %vm2081_vm2, %v5016_v56  ;;  %4129 = vmatmul.msk.bf16.vlgmr.msra.gmra.mxu1 %vm2081_vm2, %v5016_v56 }
 0x125   : > { %4130 = vmatmul.msk.bf16.vlgmr.msra.gmra.mxu2 %vm2081_vm2, %v5016_v56  ;;  %2397 = vmatpush.bf16.msra.mxu0 %v2135_v45  ;;  %v5079_v57 = vpop.f32.mrf.mxu3  ;;  %v1787_v58 = vpop.f32.mrf.mxu0  ;;  %v2165_v45 = vsel %vm2085_vm1, %v2075_v35, 0 }
 0x126   : > { %4131 = vmatmul.msk.bf16.vlgmr.msra.gmra.mxu3 %vm2081_vm2, %v5016_v56  ;;  %2423 = vmatpush.bf16.msra.mxu2 %v2141_v43  ;;  %v5077_v54 = vpop.f32.mrf.mxu2  ;;  %v1800_v62 = vpop.f32.mrf.mxu1  ;;  %v2609_v43 = vadd.f32 %v2608_v38, %v5032_v0 }
 0x127   : > { %2436 = vmatpush.bf16.msra.mxu3 %v2144_v46  ;;  %2410 = vmatpush.bf16.msra.mxu1 %v2138_v25  ;;  %v2159_v46 = vsel %vm2085_vm1, %v2073_v36, 0  ;;  %v2047_v62 = vunpack.c.l.b16 %v2000_v59 }
 0x128   : > { %v2610_v55 = vadd.f32 %v2609_v43, %v5034_v1 }
 0x12a   : > { %v2611_v60 = vadd.f32 %v2610_v55, %v5036_v11 }
 0x12c   : > { %v2612_v5 = vadd.f32 %v2611_v60, %v5038_v13 }
 0x12d   : > { %v1826_v12 = vpop.f32.mrf.mxu3 }
 0x12e   : > { %v1813_v9 = vpop.f32.mrf.mxu2  ;;  %v2077_v12 = vpack.c.b16 %v2045_v63, %v2045_v63 }
 0x12f   : > { %v2613_v9 = vadd.f32 %v2612_v5, %v5060_v44 }
 0x130   : > { %v2171_v19 = vsel %vm2085_vm1, %v2077_v12, 0 }
 0x131   : > { %v2614_v17 = vadd.f32 %v2613_v9, %v5069_v48 }
 0x133   : > { %v2615_v22 = vadd.f32 %v2614_v17, %v5077_v54 }
 0x134   : > { %4132 = vmatmul.msk.bf16.vlgmr.msrb.gmra.mxu0 %vm2081_vm2, %v5016_v56  ;;  %4133 = vmatmul.msk.bf16.vlgmr.msrb.gmra.mxu1 %vm2081_vm2, %v5016_v56 }
 0x135   : > { %4134 = vmatmul.msk.bf16.vlgmr.msrb.gmra.mxu2 %vm2081_vm2, %v5016_v56  ;;  %2449 = vmatpush.bf16.msrb.mxu0 %v2147_v14  ;;  %v2080_v14 = vpack.c.b16 %v2048_v3, %v2048_v3  ;;  %v2616_v27 = vadd.f32 %v2615_v22, %v5079_v57 }
 0x136   : > { %4135 = vmatmul.msk.bf16.vlgmr.msrb.gmra.mxu3 %vm2081_vm2, %v5016_v56  ;;  %2475 = vmatpush.bf16.msrb.mxu2 %v2153_v10  ;;  %v2079_v10 = vpack.c.b16 %v2047_v62, %v2047_v62 }
 0x137   : > { %2488 = vmatpush.bf16.msrb.mxu3 %v2156_v15  ;;  %2462 = vmatpush.bf16.msrb.mxu1 %v2150_v18  ;;  %v2078_v15 = vpack.c.b16 %v2046_v7, %v2046_v7  ;;  %v2180_v20 = vsel %vm2085_vm1, %v2080_v14, 0 }
 0x138   : > { %v2177_v18 = vsel %vm2085_vm1, %v2079_v10, 0 }
 0x139   : > { %v5101_v31 = vpop.f32.mrf.mxu0  ;;  %v5103_v33 = vpop.f32.mrf.mxu1  ;;  %v2174_v23 = vsel %vm2085_vm1, %v2078_v15, 0 }
 0x13a   : > { %v2617_v29 = vadd.f32 %v2616_v27, %v5101_v31 }
 0x13c   : > { %v2618_v30 = vadd.f32 %v2617_v29, %v5103_v33 }
 0x141   : > { %v5121_v51 = vpop.f32.mrf.mxu3  ;;  %v1839_v52 = vpop.f32.mrf.mxu0 }
 0x142   : > { %v5116_v25 = vpop.f32.mrf.mxu2  ;;  %v1852_v58 = vpop.f32.mrf.mxu1 }
 0x143   : > { %v2619_v38 = vadd.f32 %v2618_v30, %v5116_v25 }
 0x144   : > { %4136 = vmatmul.msk.bf16.vlgmr.msra.gmra.mxu0 %vm2081_vm2, %v5016_v56  ;;  %4137 = vmatmul.msk.bf16.vlgmr.msra.gmra.mxu1 %vm2081_vm2, %v5016_v56 }
 0x145   : > { %4138 = vmatmul.msk.bf16.vlgmr.msra.gmra.mxu2 %vm2081_vm2, %v5016_v56  ;;  %2501 = vmatpush.bf16.msra.mxu0 %v2159_v46  ;;  %v2620_v43 = vadd.f32 %v2619_v38, %v5121_v51 }
 0x146   : > { %4139 = vmatmul.msk.bf16.vlgmr.msra.gmra.mxu3 %vm2081_vm2, %v5016_v56  ;;  %2527 = vmatpush.bf16.msra.mxu2 %v2165_v45 }
 0x147   : > { %2540 = vmatpush.bf16.msra.mxu3 %v2168_v47  ;;  %2514 = vmatpush.bf16.msra.mxu1 %v2162_v49 }
 0x149   : > { %v1878_v8 = vpop.f32.mrf.mxu3 }
 0x14a   : > { %v1865_v6 = vpop.f32.mrf.mxu2 }
 0x154   : > { %4140 = vmatmul.msk.bf16.vlgmr.msrb.gmra.mxu0 %vm2081_vm2, %v5016_v56  ;;  %4141 = vmatmul.msk.bf16.vlgmr.msrb.gmra.mxu1 %vm2081_vm2, %v5016_v56 }
 0x155   : > { %4142 = vmatmul.msk.bf16.vlgmr.msrb.gmra.mxu2 %vm2081_vm2, %v5016_v56  ;;  %2553 = vmatpush.bf16.msrb.mxu0 %v2171_v19  ;;  %v5143_v24 = vpop.f32.mrf.mxu0  ;;  %v5146_v28 = vpop.f32.mrf.mxu1 }
 0x156   : > { %4143 = vmatmul.msk.bf16.vlgmr.msrb.gmra.mxu3 %vm2081_vm2, %v5016_v56  ;;  %2579 = vmatpush.bf16.msrb.mxu2 %v2177_v18  ;;  %v2621_v45 = vadd.f32 %v2620_v43, %v5143_v24 }
 0x157   : > { %2592 = vmatpush.bf16.msrb.mxu3 %v2180_v20  ;;  %2566 = vmatpush.bf16.msrb.mxu1 %v2174_v23 }
 0x158   : > { %v2622_v49 = vadd.f32 %v2621_v45, %v5146_v28 }
 0x15d   : > { %v5152_v36 = vpop.f32.mrf.mxu3  ;;  %v1891_v37 = vpop.f32.mrf.mxu0 }
 0x15e   : > { %v5150_v35 = vpop.f32.mrf.mxu2  ;;  %v1904_v42 = vpop.f32.mrf.mxu1 }
 0x15f   : > { %v2623_v52 = vadd.f32 %v2622_v49, %v5150_v35 }
 0x161   : > { %v2624_v55 = vadd.f32 %v2623_v52, %v5152_v36 }
 0x164   : > { %4144 = vmatmul.msk.bf16.vlgmr.msra.gmra.mxu0 %vm2081_vm2, %v5016_v56  ;;  %4145 = vmatmul.msk.bf16.vlgmr.msra.gmra.mxu1 %vm2081_vm2, %v5016_v56 }
 0x165   : > { %4146 = vmatmul.msk.bf16.vlgmr.msra.gmra.mxu2 %vm2081_vm2, %v5016_v56  ;;  %v1930_v47 = vpop.f32.mrf.mxu3 }
 0x166   : > { %4147 = vmatmul.msk.bf16.vlgmr.msra.gmra.mxu3 %vm2081_vm2, %v5016_v56  ;;  %v1917_v46 = vpop.f32.mrf.mxu2 }
 0x171   : > { %v5168_v58 = vpop.f32.mrf.mxu0  ;;  %v5170_v59 = vpop.f32.mrf.mxu1 }
 0x172   : > { %v2625_v60 = vadd.f32 %v2624_v55, %v5168_v58 }
 0x174   : > { %4148 = vmatmul.msk.bf16.vlgmr.msrb.gmra.mxu0 %vm2081_vm2, %v5016_v56  ;;  %4149 = vmatmul.msk.bf16.vlgmr.msrb.gmra.mxu1 %vm2081_vm2, %v5016_v56  ;;  %v2626_v61 = vadd.f32 %v2625_v60, %v5170_v59 }
 0x175   : > { %4150 = vmatmul.msk.bf16.vlgmr.msrb.gmra.mxu2 %vm2081_vm2, %v5016_v56 }
 0x176   : > { %4151 = vmatmul.msk.bf16.vlgmr.msrb.gmra.mxu3 %vm2081_vm2, %v5016_v56 }
 0x178   : > { %v5182_v62 = vpop.f32.mrf.mxu2 }
 0x179   : > { %v2627_v63 = vadd.f32 %v2626_v61, %v5182_v62  ;;  %v5185_v3 = vpop.f32.mrf.mxu3  ;;  %v1943_v5 = vpop.f32.mrf.mxu0 }
 0x17a   : > { %v1956_v6 = vpop.f32.mrf.mxu1 }
 0x17b   : > { %v2628_v7 = vadd.f32 %v2627_v63, %v5185_v3 }
 0x17d   : > { %2629 = vadd.xlane.f32.xlu0 %v2628_v7 }
 0x180   : > { %v1969_v8 = vpop.f32.mrf.mxu2 }
 0x181   : > { %v1982_v9 = vpop.f32.mrf.mxu3  ;;  %v5188_v10 = vpop.f32.mrf.mxu0 }
 0x182   : > { %v5190_v12 = vpop.f32.mrf.mxu1 }
 0x183   : > { %v2780_v52 = vadd.f32 %v5190_v12, %v5188_v10 }
 0x188   : > { %v5192_v56 = vpop.f32.mrf.mxu2 }
 0x189   : > { %v5194_v14 = vpop.f32.mrf.mxu3  ;;  %v2193_v15 = vpop.f32.mrf.mxu0  ;;  %v2781_v55 = vadd.f32 %v2780_v52, %v5192_v56 }
 0x18a   : > { %v2206_v17 = vpop.f32.mrf.mxu1 }
 0x18b   : > { %v2782_v6 = vadd.f32 %v2781_v55, %v5194_v14 }
 0x190   : > { %v2219_v18 = vpop.f32.mrf.mxu2 }
 0x191   : > { %v2232_v19 = vpop.f32.mrf.mxu3  ;;  %v5196_v20 = vpop.f32.mrf.mxu0 }
 0x192   : > { %v5198_v22 = vpop.f32.mrf.mxu1  ;;  %v2783_v7 = vadd.f32 %v2782_v6, %v5196_v20 }
 0x194   : > { %v2784_v17 = vadd.f32 %v2783_v7, %v5198_v22 }
 0x198   : > { %v5200_v23 = vpop.f32.mrf.mxu2 }
 0x199   : > { %v5202_v27 = vpop.f32.mrf.mxu3  ;;  %v2245_v29 = vpop.f32.mrf.mxu0  ;;  %v2785_v19 = vadd.f32 %v2784_v17, %v5200_v23 }
 0x19a   : > { %v2258_v30 = vpop.f32.mrf.mxu1 }
 0x19b   : > { %v2786_v29 = vadd.f32 %v2785_v19, %v5202_v27 }
 0x1a0   : > { %v2271_v37 = vpop.f32.mrf.mxu2 }
 0x1a1   : > { %v2284_v38 = vpop.f32.mrf.mxu3  ;;  %v5204_v42 = vpop.f32.mrf.mxu0 }
 0x1a2   : > { %v5206_v43 = vpop.f32.mrf.mxu1 }
 0x1a3   : > { %6011 = vst [vmem:[#allocation2_spill] sm:$0xff] %v5206_v43 }
 0x1a8   : > { %v5208_v45 = vpop.f32.mrf.mxu2 }
 0x1a9   : > { %6012 = vst [vmem:[#allocation3_spill] sm:$0xff] %v5208_v45  ;;  %v5210_v46 = vpop.f32.mrf.mxu3  ;;  %v2297_v47 = vpop.f32.mrf.mxu0 }
 0x1aa   : > { %6013 = vst [vmem:[#allocation4_spill] sm:$0xff] %v5210_v46  ;;  %v2310_v49 = vpop.f32.mrf.mxu1  ;;  %v2787_v47 = vadd.f32 %v2786_v29, %v5204_v42 }
 0x1ac   : > { %v2788_v52 = vadd.f32 %v2787_v47, %v5206_v43 }
 0x1ae   : > { %v2789_v55 = vadd.f32 %v2788_v52, %v5208_v45 }
 0x1b0   : > { %v2323_v60 = vpop.f32.mrf.mxu2 }
 0x1b1   : > { %v2336_v61 = vpop.f32.mrf.mxu3  ;;  %v5215_v63 = vpop.f32.mrf.mxu0 }
 0x1b2   : > { %6014 = vst [vmem:[#allocation5_spill] sm:$0xff] %v5215_v63  ;;  %v5217_v5 = vpop.f32.mrf.mxu1 }
 0x1b3   : > { %6015 = vst [vmem:[#allocation6_spill] sm:$0xff] %v5217_v5 }
 0x1b8   : > { %v5221_v8 = vpop.f32.mrf.mxu2 }
 0x1b9   : > { %6016 = vst [vmem:[#allocation7_spill] sm:$0xff] %v5221_v8  ;;  %v5223_v9 = vpop.f32.mrf.mxu3  ;;  %v2349_v15 = vpop.f32.mrf.mxu0 }
 0x1ba   : > { %6017 = vst [vmem:[#allocation8_spill] sm:$0xff] %v5223_v9  ;;  %v2362_v18 = vpop.f32.mrf.mxu1  ;;  %v2790_v15 = vadd.f32 %v2789_v55, %v5210_v46 }
 0x1bc   : > { %v2791_v17 = vadd.f32 %v2790_v15, %v5215_v63 }
 0x1be   : > { %v2792_v29 = vadd.f32 %v2791_v17, %v5217_v5 }
 0x1c0   : > { %v2375_v30 = vpop.f32.mrf.mxu2  ;;  %v2793_v47 = vadd.f32 %v2792_v29, %v5221_v8 }
 0x1c1   : > { %v2388_v37 = vpop.f32.mrf.mxu3  ;;  %v5228_v38 = vpop.f32.mrf.mxu0 }
 0x1c2   : > { %6018 = vst [vmem:[#allocation9_spill] sm:$0xff] %v5228_v38  ;;  %v5231_v49 = vpop.f32.mrf.mxu1  ;;  %v2794_v52 = vadd.f32 %v2793_v47, %v5223_v9 }
 0x1c3   : > { %6019 = vst [vmem:[#allocation10_spill] sm:$0xff] %v5231_v49 }
 0x1c4   : > { %v2795_v55 = vadd.f32 %v2794_v52, %v5228_v38 }
 0x1c8   : > { %v5235_v60 = vpop.f32.mrf.mxu2 }
 0x1c9   : > { %6020 = vst [vmem:[#allocation11_spill] sm:$0xff] %v5235_v60  ;;  %v5237_v61 = vpop.f32.mrf.mxu3  ;;  %v2401_v6 = vpop.f32.mrf.mxu0 }
 0x1ca   : > { %6021 = vst [vmem:[#allocation12_spill] sm:$0xff] %v5237_v61  ;;  %v2414_v7 = vpop.f32.mrf.mxu1 }
 0x1d0   : > { %v2427_v18 = vpop.f32.mrf.mxu2 }
 0x1d1   : > { %v2440_v19 = vpop.f32.mrf.mxu3  ;;  %v5241_v30 = vpop.f32.mrf.mxu0  ;;  %v4405_v18 = vmov 4096.0  }
 0x1d2   : > { %6022 = vst [vmem:[#allocation13_spill] sm:$0xff] %v5241_v30  ;;  %v5244_v37 = vpop.f32.mrf.mxu1  ;;  %4390 = vrcp.f32 %v4405_v18  ;;  %v2796_v19 = vadd.f32 %v2795_v55, %v5231_v49 }
 0x1d4   : > { %v2797_v17 = vadd.f32 %v2796_v19, %v5235_v60 }
 0x1d6   : > { %v2798_v9 = vadd.f32 %v2797_v17, %v5237_v61 }
 0x1d8   : > { %v5248_v45 = vpop.f32.mrf.mxu2  ;;  %v4391_v63 = vpop.eup %4390 }
 0x1d9   : > { %v5250_v6 = vpop.f32.mrf.mxu3  ;;  %v2453_v7 = vpop.f32.mrf.mxu0  ;;  %v2632_v8 = vmul.f32 4096.0, %v4391_v63  ;;  %vm2636_vm3 = vweird.f32 %v4391_v63 }
 0x1da   : > { %v2466_v15 = vpop.f32.mrf.mxu1  ;;  %v2799_v7 = vadd.f32 %v2798_v9, %v5241_v30 }
 0x1db   : > { %v2633_v15 = vsub.f32 1.0, %v2632_v8 }
 0x1dc   : > { %v2800_v19 = vadd.f32 %v2799_v7, %v5244_v37 }
 0x1dd   : > { %v2634_v60 = vmul.f32 %v4391_v63, %v2633_v15 }
 0x1df   : > { %v2635_v43 = vadd.f32 %v4391_v63, %v2634_v60 }
 0x1e0   : > { %v2479_v5 = vpop.f32.mrf.mxu2 }
 0x1e1   : > { %v2492_v46 = vpop.f32.mrf.mxu3  ;;  %v5255_v29 = vpop.f32.mrf.mxu0  ;;  %v5273_v30 = vsel %vm2636_vm3, %v4391_v63, %v2635_v43 }
 0x1e2   : > { %v5257_v47 = vpop.f32.mrf.mxu1  ;;  %v2801_v46 = vadd.f32 %v2800_v19, %v5248_v45 }
 0x1e4   : > { %v2802_v49 = vadd.f32 %v2801_v46, %v5250_v6 }
 0x1e6   : > { %v2803_v9 = vadd.f32 %v2802_v49, %v5255_v29 }
 0x1e8   : > { %v5261_v52 = vpop.f32.mrf.mxu2  ;;  %v2804_v7 = vadd.f32 %v2803_v9, %v5257_v47 }
 0x1e9   : > { %v5263_v18 = vpop.f32.mrf.mxu3  ;;  %v2505_v55 = vpop.f32.mrf.mxu0 }
 0x1ea   : > { %v2518_v5 = vpop.f32.mrf.mxu1  ;;  %v2805_v15 = vadd.f32 %v2804_v7, %v5261_v52 }
 0x1ec   : > { %v2806_v63 = vadd.f32 %v2805_v15, %v5263_v18 }
 0x1f0   : > { %v2531_v38 = vpop.f32.mrf.mxu2  ;;  %v2630_v55 = vpop.xlane.xlu0 %2629 }
 0x1f1   : > { %v2544_v17 = vpop.f32.mrf.mxu3  ;;  %v5268_v61 = vpop.f32.mrf.mxu0  ;;  %v5277_v19 = vmul.f32 %v5273_v30, %v2630_v55 }
 0x1f2   : > { %v5271_v8 = vpop.f32.mrf.mxu1  ;;  %v2807_v17 = vadd.f32 %v2806_v63, %v5268_v61 }
 0x1f3   : > { %v5286_v49 = vsub.f32 %v4842_v16, %v5277_v19  ;;  %v5290_v43 = vsub.f32 %v4846_v41, %v5277_v19  ;;  %v5296_v9 = vsub.f32 %v4867_v32, %v5277_v19 }
 0x1f4   : > { %v2808_v15 = vadd.f32 %v2807_v17, %v5271_v8 }
 0x1f5   : > { %6023 = vst [vmem:[#allocation14_spill] sm:$0xff] %v5286_v49  ;;  %v2671_v55 = vmul.f32 %v5286_v49, %v5286_v49  ;;  %v2672_v7 = vmul.f32 %v5290_v43, %v5290_v43  ;;  %v2673_v32 = vmul.f32 %v5296_v9, %v5296_v9 }
 0x1f6   : > { %6024 = vst [vmem:[#allocation15_spill] sm:$0xff] %v5296_v9 }
 0x1f7   : > { %v2703_v63 = vadd.f32 %v2672_v7, %v2671_v55  ;;  %v5329_v7 = vsub.f32 %v4943_v4, %v5277_v19 }
 0x1f8   : > { %v5280_v38 = vpop.f32.mrf.mxu2 }
 0x1f9   : > { %v5282_v60 = vpop.f32.mrf.mxu3  ;;  %v2557_v5 = vpop.f32.mrf.mxu0  ;;  %v2809_v49 = vadd.f32 %v2808_v15, %v5280_v38  ;;  %v2678_v4 = vmul.f32 %v5329_v7, %v5329_v7 }
 0x1fa   : > { %v2570_v46 = vpop.f32.mrf.mxu1  ;;  %v5304_v5 = vsub.f32 %v4871_v34, %v5277_v19 }
 0x1fb   : > { %v5309_v46 = vsub.f32 %v4919_v50, %v5277_v19  ;;  %v2810_v17 = vadd.f32 %v2809_v49, %v5282_v60  ;;  %v5323_v50 = vsub.f32 %v4939_v2, %v5277_v19  ;;  %v5335_v49 = vsub.f32 %v4987_v21, %v5277_v19 }
 0x1fc   : > { %v2674_v34 = vmul.f32 %v5304_v5, %v5304_v5 }
 0x1fd   : > { %v2675_v9 = vmul.f32 %v5309_v46, %v5309_v46  ;;  %2811 = vadd.xlane.f32.xlu0 %v2810_v17  ;;  %v2677_v2 = vmul.f32 %v5323_v50, %v5323_v50  ;;  %v2679_v21 = vmul.f32 %v5335_v49, %v5335_v49  ;;  %v5353_v17 = vsub.f32 %v5009_v40, %v5277_v19 }
 0x1ff   : > { %v2682_v40 = vmul.f32 %v5353_v17, %v5353_v17 }
 0x200   : > { %v2583_v16 = vpop.f32.mrf.mxu2 }
 0x201   : > { %v2596_v41 = vpop.f32.mrf.mxu3  ;;  %v5316_v16 = vsub.f32 %v4923_v53, %v5277_v19 }
 0x202   : > { %v2704_v41 = vadd.f32 %v2703_v63, %v2673_v32  ;;  %v5341_v63 = vsub.f32 %v4990_v26, %v5277_v19 }
 0x203   : > { %v2676_v53 = vmul.f32 %v5316_v16, %v5316_v16 }
 0x204   : > { %v2705_v55 = vadd.f32 %v2704_v41, %v2674_v34  ;;  %v5347_v41 = vsub.f32 %v5007_v39, %v5277_v19  ;;  %v2680_v26 = vmul.f32 %v5341_v63, %v5341_v63 }
 0x206   : > { %v2706_v15 = vadd.f32 %v2705_v55, %v2675_v9  ;;  %v2681_v39 = vmul.f32 %v5347_v41, %v5347_v41 }
 0x208   : > { %v2707_v32 = vadd.f32 %v2706_v15, %v2676_v53  ;;  %v5359_v53 = vsub.f32 %v5032_v0, %v5277_v19 }
 0x20a   : > { %v2708_v34 = vadd.f32 %v2707_v32, %v2677_v2  ;;  %v5365_v2 = vsub.f32 %v5034_v1, %v5277_v19  ;;  %v2683_v0 = vmul.f32 %v5359_v53, %v5359_v53 }
 0x20c   : > { %v2709_v9 = vadd.f32 %v2708_v34, %v2678_v4  ;;  %v5371_v4 = vsub.f32 %v5036_v11, %v5277_v19  ;;  %v2684_v1 = vmul.f32 %v5365_v2, %v5365_v2 }
 0x20e   : > { %v2710_v55 = vadd.f32 %v2709_v9, %v2679_v21  ;;  %v5377_v21 = vsub.f32 %v5038_v13, %v5277_v19  ;;  %v2685_v11 = vmul.f32 %v5371_v4, %v5371_v4 }
 0x210   : > { %v2711_v15 = vadd.f32 %v2710_v55, %v2680_v26  ;;  %v5383_v26 = vsub.f32 %v5060_v44, %v5277_v19  ;;  %v2686_v13 = vmul.f32 %v5377_v21, %v5377_v21 }
 0x212   : > { %v2712_v32 = vadd.f32 %v2711_v15, %v2681_v39  ;;  %v5389_v39 = vsub.f32 %v5069_v48, %v5277_v19  ;;  %v2687_v44 = vmul.f32 %v5383_v26, %v5383_v26 }
 0x214   : > { %v2713_v34 = vadd.f32 %v2712_v32, %v2682_v40  ;;  %v5395_v40 = vsub.f32 %v5077_v54, %v5277_v19  ;;  %v2688_v48 = vmul.f32 %v5389_v39, %v5389_v39 }
 0x216   : > { %v2714_v9 = vadd.f32 %v2713_v34, %v2683_v0  ;;  %v5401_v0 = vsub.f32 %v5079_v57, %v5277_v19  ;;  %v2689_v54 = vmul.f32 %v5395_v40, %v5395_v40 }
 0x218   : > { %v2715_v55 = vadd.f32 %v2714_v9, %v2684_v1  ;;  %v5407_v1 = vsub.f32 %v5101_v31, %v5277_v19  ;;  %v2690_v57 = vmul.f32 %v5401_v0, %v5401_v0 }
 0x21a   : > { %v2716_v15 = vadd.f32 %v2715_v55, %v2685_v11  ;;  %v5413_v11 = vsub.f32 %v5103_v33, %v5277_v19  ;;  %v2691_v31 = vmul.f32 %v5407_v1, %v5407_v1 }
 0x21c   : > { %v2717_v32 = vadd.f32 %v2716_v15, %v2686_v13  ;;  %v5419_v13 = vsub.f32 %v5116_v25, %v5277_v19  ;;  %v2692_v33 = vmul.f32 %v5413_v11, %v5413_v11 }
 0x21e   : > { %v2718_v34 = vadd.f32 %v2717_v32, %v2687_v44  ;;  %v5425_v44 = vsub.f32 %v5121_v51, %v5277_v19  ;;  %v2693_v25 = vmul.f32 %v5419_v13, %v5419_v13 }
 0x220   : > { %v2719_v9 = vadd.f32 %v2718_v34, %v2688_v48  ;;  %v5431_v48 = vsub.f32 %v5143_v24, %v5277_v19  ;;  %v2694_v51 = vmul.f32 %v5425_v44, %v5425_v44 }
 0x222   : > { %v2720_v55 = vadd.f32 %v2719_v9, %v2689_v54  ;;  %v5437_v54 = vsub.f32 %v5146_v28, %v5277_v19  ;;  %v2695_v24 = vmul.f32 %v5431_v48, %v5431_v48 }
 0x224   : > { %v2721_v15 = vadd.f32 %v2720_v55, %v2690_v57  ;;  %v5443_v57 = vsub.f32 %v5150_v35, %v5277_v19  ;;  %v2696_v28 = vmul.f32 %v5437_v54, %v5437_v54 }
 0x226   : > { %v2722_v32 = vadd.f32 %v2721_v15, %v2691_v31  ;;  %v5449_v31 = vsub.f32 %v5152_v36, %v5277_v19  ;;  %v2697_v35 = vmul.f32 %v5443_v57, %v5443_v57 }
 0x228   : > { %v2723_v34 = vadd.f32 %v2722_v32, %v2692_v33  ;;  %v5455_v33 = vsub.f32 %v5168_v58, %v5277_v19  ;;  %v2698_v36 = vmul.f32 %v5449_v31, %v5449_v31 }
 0x22a   : > { %v2724_v9 = vadd.f32 %v2723_v34, %v2693_v25  ;;  %6025 = vst [vmem:[#allocation16_spill] sm:$0xff] %v5455_v33  ;;  %v5461_v25 = vsub.f32 %v5170_v59, %v5277_v19  ;;  %v2699_v58 = vmul.f32 %v5455_v33, %v5455_v33 }
 0x22c   : > { %v2725_v55 = vadd.f32 %v2724_v9, %v2694_v51  ;;  %v5467_v51 = vsub.f32 %v5182_v62, %v5277_v19  ;;  %v2700_v59 = vmul.f32 %v5461_v25, %v5461_v25 }
 0x22e   : > { %v2726_v15 = vadd.f32 %v2725_v55, %v2695_v24  ;;  %v5473_v24 = vsub.f32 %v5185_v3, %v5277_v19 }
 0x230   : > { %v2727_v32 = vadd.f32 %v2726_v15, %v2696_v28  ;;  %v2701_v28 = vmul.f32 %v5467_v51, %v5467_v51  ;;  %v2702_v62 = vmul.f32 %v5473_v24, %v5473_v24 }
 0x232   : > { %v2728_v34 = vadd.f32 %v2727_v32, %v2697_v35 }
 0x234   : > { %v2729_v9 = vadd.f32 %v2728_v34, %v2698_v36 }
 0x236   : > { %v2730_v55 = vadd.f32 %v2729_v9, %v2699_v58 }
 0x238   : > { %v2731_v15 = vadd.f32 %v2730_v55, %v2700_v59 }
 0x23a   : > { %v2732_v35 = vadd.f32 %v2731_v15, %v2701_v28 }
 0x23c   : > { %v2733_v32 = vadd.f32 %v2732_v35, %v2702_v62 }
 0x23e   : > { %2734 = vadd.xlane.f32.xlu1 %v2733_v32 }
 0x270   : > { %v2812_v33 = vpop.xlane.xlu0 %2811 }
 0x271   : > { %v5482_v36 = vmul.f32 %v2812_v33, %v5273_v30 }
 0x273   : > { %v5486_v3 = vsub.f32 %v5188_v10, %v5482_v36  ;;  %v5490_v19 = vsub.f32 %v5190_v12, %v5482_v36  ;;  %v5494_v34 = vsub.f32 %v5192_v56, %v5482_v36  ;;  %v5502_v33 = vsub.f32 %v5194_v14, %v5482_v36 }
 0x274   : > { %v5506_v10 = vsub.f32 %v5196_v20, %v5482_v36  ;;  %v5512_v56 = vsub.f32 %v5198_v22, %v5482_v36  ;;  %v5518_v14 = vsub.f32 %v5200_v23, %v5482_v36  ;;  %v5524_v62 = vsub.f32 %v5202_v27, %v5482_v36 }
 0x275   : > { %v2846_v58 = vmul.f32 %v5486_v3, %v5486_v3  ;;  %v2847_v9 = vmul.f32 %v5490_v19, %v5490_v19  ;;  %v2848_v12 = vmul.f32 %v5494_v34, %v5494_v34  ;;  %v2849_v55 = vmul.f32 %v5502_v33, %v5502_v33 }
 0x276   : > { %6026 = vst [vmem:[#allocation17_spill] sm:$0xff] %v5518_v14  ;;  %v2850_v20 = vmul.f32 %v5506_v10, %v5506_v10  ;;  %v2851_v22 = vmul.f32 %v5512_v56, %v5512_v56  ;;  %v5530_v32 = vsub.f32 %v5204_v42, %v5482_v36  ;;  %v2852_v23 = vmul.f32 %v5518_v14, %v5518_v14 }
 0x277   : > { %v2878_v59 = vadd.f32 %v2847_v9, %v2846_v58  ;;  %6027 = vst [vmem:[#allocation18_spill] sm:$0xff] %v5524_v62  ;;  %v6029_v9 = vld [vmem:[#allocation2_spill] sm:$0xff]  ;;  %v2853_v27 = vmul.f32 %v5524_v62, %v5524_v62 }
 0x278   : > { %6028 = vst [vmem:[#allocation19_spill] sm:$0xff] %v5530_v32  ;;  %v2854_v42 = vmul.f32 %v5530_v32, %v5530_v32 }
 0x279   : > { %v2879_v28 = vadd.f32 %v2878_v59, %v2848_v12  ;;  %v5536_v12 = vsub.f32 %v6029_v9, %v5482_v36  ;;  %v6035_v9 = vld [vmem:[#allocation5_spill] sm:$0xff] }
 0x27a   : > { %v5554_v62 = vsub.f32 %v6035_v9, %v5482_v36  ;;  %v6041_v9 = vld [vmem:[#allocation8_spill] sm:$0xff] }
 0x27b   : > { %v2880_v15 = vadd.f32 %v2879_v28, %v2849_v55  ;;  %6030 = vst [vmem:[#allocation2_spill] sm:$0xff] %v5536_v12  ;;  %v6031_v55 = vld [vmem:[#allocation3_spill] sm:$0xff] }
 0x27c   : > { %v5542_v28 = vsub.f32 %v6031_v55, %v5482_v36  ;;  %6036 = vst [vmem:[#allocation5_spill] sm:$0xff] %v5554_v62  ;;  %v6037_v55 = vld [vmem:[#allocation6_spill] sm:$0xff] }
 0x27d   : > { %v2881_v35 = vadd.f32 %v2880_v15, %v2850_v20  ;;  %v6033_v15 = vld [vmem:[#allocation4_spill] sm:$0xff]  ;;  %v5560_v32 = vsub.f32 %v6037_v55, %v5482_v36  ;;  %v6043_v55 = vld [vmem:[#allocation9_spill] sm:$0xff] }
 0x27e   : > { %6032 = vst [vmem:[#allocation3_spill] sm:$0xff] %v5542_v28  ;;  %v5548_v14 = vsub.f32 %v6033_v15, %v5482_v36  ;;  %v6039_v15 = vld [vmem:[#allocation7_spill] sm:$0xff] }
 0x27f   : > { %v2882_v58 = vadd.f32 %v2881_v35, %v2851_v22  ;;  %v2855_v22 = vmul.f32 %v5536_v12, %v5536_v12  ;;  %6038 = vst [vmem:[#allocation6_spill] sm:$0xff] %v5560_v32  ;;  %v5566_v12 = vsub.f32 %v6039_v15, %v5482_v36  ;;  %v6044_v15 = vld [vmem:[#allocation10_spill] sm:$0xff] }
 0x280   : > { %6034 = vst [vmem:[#allocation4_spill] sm:$0xff] %v5548_v14 }
 0x281   : > { %v2883_v59 = vadd.f32 %v2882_v58, %v2852_v23  ;;  %v2856_v23 = vmul.f32 %v5542_v28, %v5542_v28  ;;  %6040 = vst [vmem:[#allocation7_spill] sm:$0xff] %v5566_v12  ;;  %v5572_v28 = vsub.f32 %v6041_v9, %v5482_v36  ;;  %v6045_v9 = vld [vmem:[#allocation11_spill] sm:$0xff] }
 0x283   : > { %v2884_v20 = vadd.f32 %v2883_v59, %v2853_v27  ;;  %v2857_v27 = vmul.f32 %v5548_v14, %v5548_v14  ;;  %6042 = vst [vmem:[#allocation8_spill] sm:$0xff] %v5572_v28  ;;  %v5578_v14 = vsub.f32 %v6043_v55, %v5482_v36  ;;  %v6046_v55 = vld [vmem:[#allocation12_spill] sm:$0xff] }
 0x285   : > { %v2885_v35 = vadd.f32 %v2884_v20, %v2854_v42  ;;  %v2858_v42 = vmul.f32 %v5554_v62, %v5554_v62  ;;  %v5584_v62 = vsub.f32 %v6044_v15, %v5482_v36  ;;  %v6047_v15 = vld [vmem:[#allocation13_spill] sm:$0xff] }
 0x287   : > { %v2886_v58 = vadd.f32 %v2885_v35, %v2855_v22  ;;  %v2859_v22 = vmul.f32 %v5560_v32, %v5560_v32  ;;  %v5590_v32 = vsub.f32 %v6045_v9, %v5482_v36  ;;  %v5608_v9 = vsub.f32 %v5244_v37, %v5482_v36 }
 0x289   : > { %v2887_v59 = vadd.f32 %v2886_v58, %v2856_v23  ;;  %v2860_v23 = vmul.f32 %v5566_v12, %v5566_v12  ;;  %v5596_v12 = vsub.f32 %v6046_v55, %v5482_v36  ;;  %v5614_v55 = vsub.f32 %v5248_v45, %v5482_v36 }
 0x28a   : > { %v2867_v37 = vmul.f32 %v5608_v9, %v5608_v9 }
 0x28b   : > { %v2888_v20 = vadd.f32 %v2887_v59, %v2857_v27  ;;  %v2861_v27 = vmul.f32 %v5572_v28, %v5572_v28  ;;  %v5602_v28 = vsub.f32 %v6047_v15, %v5482_v36  ;;  %v5620_v15 = vsub.f32 %v5250_v6, %v5482_v36 }
 0x28c   : > { %v2868_v45 = vmul.f32 %v5614_v55, %v5614_v55 }
 0x28d   : > { %v2889_v35 = vadd.f32 %v2888_v20, %v2858_v42  ;;  %v2862_v42 = vmul.f32 %v5578_v14, %v5578_v14  ;;  %v2869_v6 = vmul.f32 %v5620_v15, %v5620_v15 }
 0x28f   : > { %v2890_v58 = vadd.f32 %v2889_v35, %v2859_v22  ;;  %v2863_v22 = vmul.f32 %v5584_v62, %v5584_v62 }
 0x291   : > { %v2891_v59 = vadd.f32 %v2890_v58, %v2860_v23  ;;  %v2864_v23 = vmul.f32 %v5590_v32, %v5590_v32 }
 0x293   : > { %v2892_v20 = vadd.f32 %v2891_v59, %v2861_v27  ;;  %v2865_v27 = vmul.f32 %v5596_v12, %v5596_v12 }
 0x295   : > { %v2893_v35 = vadd.f32 %v2892_v20, %v2862_v42  ;;  %v2866_v42 = vmul.f32 %v5602_v28, %v5602_v28 }
 0x297   : > { %v2894_v58 = vadd.f32 %v2893_v35, %v2863_v22  ;;  %v5626_v35 = vsub.f32 %v5255_v29, %v5482_v36 }
 0x299   : > { %v2895_v59 = vadd.f32 %v2894_v58, %v2864_v23  ;;  %v5632_v58 = vsub.f32 %v5257_v47, %v5482_v36  ;;  %v2870_v29 = vmul.f32 %v5626_v35, %v5626_v35 }
 0x29b   : > { %v2896_v20 = vadd.f32 %v2895_v59, %v2865_v27  ;;  %6048 = vst [vmem:[#allocation9_spill] sm:$0xff] %v5632_v58  ;;  %v5638_v59 = vsub.f32 %v5261_v52, %v5482_v36  ;;  %v2871_v47 = vmul.f32 %v5632_v58, %v5632_v58 }
 0x29d   : > { %v2897_v22 = vadd.f32 %v2896_v20, %v2866_v42  ;;  %6049 = vst [vmem:[#allocation10_spill] sm:$0xff] %v5638_v59  ;;  %v5644_v20 = vsub.f32 %v5263_v18, %v5482_v36  ;;  %v2872_v52 = vmul.f32 %v5638_v59, %v5638_v59 }
 0x29f   : > { %v2898_v23 = vadd.f32 %v2897_v22, %v2867_v37  ;;  %6050 = vst [vmem:[#allocation11_spill] sm:$0xff] %v5644_v20  ;;  %v5650_v22 = vsub.f32 %v5268_v61, %v5482_v36  ;;  %v2873_v18 = vmul.f32 %v5644_v20, %v5644_v20 }
 0x2a1   : > { %v2899_v27 = vadd.f32 %v2898_v23, %v2868_v45  ;;  %6051 = vst [vmem:[#allocation12_spill] sm:$0xff] %v5650_v22  ;;  %v5656_v23 = vsub.f32 %v5271_v8, %v5482_v36  ;;  %v2874_v61 = vmul.f32 %v5650_v22, %v5650_v22 }
 0x2a3   : > { %v2900_v42 = vadd.f32 %v2899_v27, %v2869_v6  ;;  %6052 = vst [vmem:[#allocation13_spill] sm:$0xff] %v5656_v23  ;;  %v5662_v27 = vsub.f32 %v5280_v38, %v5482_v36  ;;  %v2875_v8 = vmul.f32 %v5656_v23, %v5656_v23 }
 0x2a5   : > { %v2901_v37 = vadd.f32 %v2900_v42, %v2870_v29  ;;  %6053 = vst [vmem:[#allocation20_spill] sm:$0xff] %v5662_v27  ;;  %v5668_v42 = vsub.f32 %v5282_v60, %v5482_v36 }
 0x2a7   : > { %v2902_v45 = vadd.f32 %v2901_v37, %v2871_v47  ;;  %6054 = vst [vmem:[#allocation21_spill] sm:$0xff] %v5668_v42  ;;  %v2876_v37 = vmul.f32 %v5662_v27, %v5662_v27  ;;  %v2877_v38 = vmul.f32 %v5668_v42, %v5668_v42 }
 0x2a9   : > { %v2903_v6 = vadd.f32 %v2902_v45, %v2872_v52 }
 0x2ab   : > { %v2904_v29 = vadd.f32 %v2903_v6, %v2873_v18 }
 0x2ad   : > { %v2905_v47 = vadd.f32 %v2904_v29, %v2874_v61 }
 0x2af   : > { %v2906_v52 = vadd.f32 %v2905_v47, %v2875_v8 }
 0x2b1   : > { %v2907_v45 = vadd.f32 %v2906_v52, %v2876_v37  ;;  %v2735_v22 = vpop.xlane.xlu1 %2734 }
 0x2b2   : > { %v2736_v18 = vmul.f32 %v2735_v22, %v5273_v30 }
 0x2b3   : > { %v2908_v20 = vadd.f32 %v2907_v45, %v2877_v38 }
 0x2b4   : > { %v2737_v6 = vadd.f32 1e-05, %v2736_v18 }
 0x2b5   : > { %2909 = vadd.xlane.f32.xlu1 %v2908_v20 }
 0x2b6   : > { %4392 = vrsqrt.f32 %v2737_v6  ;;  %vm2744_vm5 = vweird.f32 %v2737_v6 }
 0x2bc   : > { %v4393_v61 = vpop.eup %4392 }
 0x2bd   : > { %v2739_v29 = vmul.f32 %v4393_v61, %v2737_v6  ;;  %vm2745_vm4 = vweird.f32 %v4393_v61 }
 0x2be   : > { %vm2746_vm6 = vmor %vm2744_vm5, %vm2745_vm4 }
 0x2bf   : > { %v2740_v8 = vmul.f32 %v4393_v61, %v2739_v29 }
 0x2c1   : > { %v2741_v59 = vmul.f32 0.5, %v2740_v8 }
 0x2c3   : > { %v2742_v37 = vsub.f32 1.5, %v2741_v59 }
 0x2c5   : > { %v2743_v20 = vmul.f32 %v4393_v61, %v2742_v37  ;;  %v6062_v37 = vld [vmem:[#allocation17_spill] sm:$0xff] }
 0x2c7   : > { %v2747_v38 = vsel %vm2746_vm6, %v4393_v61, %v2743_v20 }
 0x2c8   : > { %v5682_v29 = vmul.f32 %v2747_v38, %v5304_v5  ;;  %v5685_v59 = vmul.f32 %v2747_v38, %v5309_v46  ;;  %v5691_v6 = vmul.f32 %v2747_v38, %v5323_v50  ;;  %v5694_v61 = vmul.f32 %v2747_v38, %v5329_v7 }
 0x2c9   : > { %v5700_v5 = vmul.f32 %v2747_v38, %v5341_v63  ;;  %v5711_v50 = vmul.f32 %v2747_v38, %v5359_v53  ;;  %v5714_v7 = vmul.f32 %v2747_v38, %v5365_v2  ;;  %v5720_v63 = vmul.f32 %v2747_v38, %v5377_v21 }
 0x2ca   : > { %v5732_v53 = vmul.f32 %v2747_v38, %v5401_v0  ;;  %v5735_v2 = vmul.f32 %v2747_v38, %v5407_v1  ;;  %v5752_v0 = vmul.f32 %v2747_v38, %v5437_v54  ;;  %v5755_v1 = vmul.f32 %v2747_v38, %v5443_v57 }
 0x328   : > { %v2910_v60 = vpop.xlane.xlu1 %2909 }
 0x329   : > { %v2911_v36 = vmul.f32 %v2910_v60, %v5273_v30  ;;  %v6055_v30 = vld [vmem:[#allocation14_spill] sm:$0xff]  ;;  %v2749_v60 = vmul.f32 %v2747_v38, %v5290_v43  ;;  %v5697_v43 = vmul.f32 %v2747_v38, %v5335_v49  ;;  %v5717_v49 = vmul.f32 %v2747_v38, %v5371_v4 }
 0x32a   : > { %v2748_v18 = vmul.f32 %v2747_v38, %v6055_v30  ;;  %v5738_v4 = vmul.f32 %v2747_v38, %v5413_v11  ;;  %v5758_v11 = vmul.f32 %v2747_v38, %v5449_v31  ;;  %v6068_v30 = vld [vmem:[#allocation5_spill] sm:$0xff] }
 0x32b   : > { %v2912_v23 = vadd.f32 1e-05, %v2911_v36  ;;  %v6056_v36 = vld [vmem:[#allocation15_spill] sm:$0xff] }
 0x32c   : > { %v2750_v58 = vmul.f32 %v2747_v38, %v6056_v36  ;;  %v6069_v36 = vld [vmem:[#allocation6_spill] sm:$0xff] }
 0x32d   : > { %4394 = vrsqrt.f32 %v2912_v23  ;;  %vm2919_vm8 = vweird.f32 %v2912_v23 }
 0x333   : > { %v4395_v27 = vpop.eup %4394 }
 0x334   : > { %v2914_v47 = vmul.f32 %v4395_v27, %v2912_v23  ;;  %vm2920_vm7 = vweird.f32 %v4395_v27  ;;  %v5703_v23 = vmul.f32 %v2747_v38, %v5347_v41  ;;  %v5723_v41 = vmul.f32 %v2747_v38, %v5383_v26 }
 0x335   : > { %vm2921_vm9 = vmor %vm2919_vm8, %vm2920_vm7  ;;  %v5743_v26 = vmul.f32 %v2747_v38, %v5419_v13  ;;  %v5764_v13 = vmul.f32 %v2747_v38, %v5461_v25 }
 0x336   : > { %v2915_v42 = vmul.f32 %v4395_v27, %v2914_v47 }
 0x337   : > { %6059 = vst [vmem:[#allocation15_spill] sm:$0xff] %v5764_v13  ;;  %v6075_v13 = vld [vmem:[#allocation12_spill] sm:$0xff] }
 0x338   : > { %v2916_v52 = vmul.f32 0.5, %v2915_v42  ;;  %v5688_v42 = vmul.f32 %v2747_v38, %v5316_v16  ;;  %v5708_v16 = vmul.f32 %v2747_v38, %v5353_v17  ;;  %v5729_v17 = vmul.f32 %v2747_v38, %v5395_v40 }
 0x339   : > { %v5749_v40 = vmul.f32 %v2747_v38, %v5431_v48  ;;  %v5770_v48 = vmul.f32 %v2747_v38, %v5473_v24 }
 0x33a   : > { %v2917_v22 = vsub.f32 1.5, %v2916_v52  ;;  %v6063_v52 = vld [vmem:[#allocation18_spill] sm:$0xff] }
 0x33b   : > { %6061 = vst [vmem:[#allocation22_spill] sm:$0xff] %v5770_v48 }
 0x33c   : > { %v2918_v45 = vmul.f32 %v4395_v27, %v2917_v22 }
 0x33e   : > { %v5705_v46 = vsel %vm2921_vm9, %v4395_v27, %v2918_v45  ;;  %v5726_v27 = vmul.f32 %v2747_v38, %v5389_v39  ;;  %v5746_v39 = vmul.f32 %v2747_v38, %v5425_v44  ;;  %v5767_v44 = vmul.f32 %v2747_v38, %v5467_v51  ;;  %v6067_v45 = vld [vmem:[#allocation4_spill] sm:$0xff] }
 0x33f   : > { %v2923_v21 = vmul.f32 %v5705_v46, %v5486_v3  ;;  %v6057_v3 = vld [vmem:[#allocation16_spill] sm:$0xff]  ;;  %v2924_v54 = vmul.f32 %v5705_v46, %v5490_v19  ;;  %v2925_v57 = vmul.f32 %v5705_v46, %v5494_v34  ;;  %v2926_v31 = vmul.f32 %v5705_v46, %v5502_v33  ;;  %v6064_v19 = vld [vmem:[#allocation19_spill] sm:$0xff]  ;;  %v6065_v34 = vld [vmem:[#allocation2_spill] sm:$0xff] }
 0x340   : > { %v5761_v8 = vmul.f32 %v2747_v38, %v6057_v3  ;;  %6060 = vst [vmem:[#allocation16_spill] sm:$0xff] %v5767_v44  ;;  %v2927_v47 = vmul.f32 %v5705_v46, %v5506_v10  ;;  %v2928_v25 = vmul.f32 %v5705_v46, %v5512_v56  ;;  %v2929_v24 = vmul.f32 %v5705_v46, %v6062_v37  ;;  %v6066_v33 = vld [vmem:[#allocation3_spill] sm:$0xff] }
 0x341   : > { %v2955_v51 = vadd.f32 %v2923_v21, %v2748_v18  ;;  %v2930_v20 = vmul.f32 %v5705_v46, %v6063_v52  ;;  %v2931_v22 = vmul.f32 %v5705_v46, %v6064_v19  ;;  %v2932_v38 = vmul.f32 %v5705_v46, %v6065_v34  ;;  %v6070_v3 = vld [vmem:[#allocation7_spill] sm:$0xff]  ;;  %v6071_v52 = vld [vmem:[#allocation8_spill] sm:$0xff] }
 0x342   : > { %6058 = vst [vmem:[#allocation14_spill] sm:$0xff] %v5761_v8  ;;  %v2933_v10 = vmul.f32 %v5705_v46, %v6066_v33  ;;  %v2934_v56 = vmul.f32 %v5705_v46, %v6067_v45  ;;  %v2935_v18 = vmul.f32 %v5705_v46, %v6068_v30  ;;  %v2936_v21 = vmul.f32 %v5705_v46, %v6069_v36  ;;  %v6074_v44 = vld [vmem:[#allocation11_spill] sm:$0xff] }
 0x343   : > { %v2937_v37 = vmul.f32 %v5705_v46, %v6070_v3  ;;  %v5803_v19 = vmul.f32 %v5705_v46, %v6071_v52  ;;  %v5807_v34 = vmul.f32 %v5705_v46, %v5578_v14  ;;  %v5811_v33 = vmul.f32 %v5705_v46, %v5584_v62  ;;  %v6072_v52 = vld [vmem:[#allocation9_spill] sm:$0xff] }
 0x344   : > { %v5815_v45 = vmul.f32 %v5705_v46, %v5590_v32  ;;  %v5819_v30 = vmul.f32 %v5705_v46, %v5596_v12  ;;  %v2956_v36 = vadd.f32 %v2924_v54, %v2749_v60  ;;  %vm2987_vm10 = vcmp.ge.f32.partialorder %v2955_v51, 0.0 }
 0x345   : > { %v5828_v14 = vmul.f32 %v5705_v46, %v5602_v28  ;;  %v5832_v62 = vmul.f32 %v5705_v46, %v5608_v9  ;;  %v2957_v32 = vadd.f32 %v2925_v57, %v2750_v58  ;;  %v3019_v3 = vmul.f32 0.01, %v2955_v51  ;;  %v6073_v58 = vld [vmem:[#allocation10_spill] sm:$0xff] }
 0x346   : > { %v5836_v12 = vmul.f32 %v5705_v46, %v5614_v55  ;;  %v5840_v60 = vmul.f32 %v5705_v46, %v5620_v15  ;;  %v5844_v54 = vmul.f32 %v5705_v46, %v5626_v35  ;;  %v2958_v28 = vadd.f32 %v2926_v31, %v5682_v29 }
 0x347   : > { %v5849_v9 = vmul.f32 %v5705_v46, %v6072_v52  ;;  %v5853_v57 = vmul.f32 %v5705_v46, %v6073_v58  ;;  %v2959_v55 = vadd.f32 %v2927_v47, %v5685_v59  ;;  %v3051_v48 = vsel %vm2987_vm10, %v2955_v51, %v3019_v3  ;;  %v6076_v52 = vld [vmem:[#allocation13_spill] sm:$0xff]  ;;  %v6077_v47 = vld [vmem:[#allocation20_spill] sm:$0xff] }
 0x348   : > { %v5858_v15 = vmul.f32 %v5705_v46, %v6074_v44  ;;  %v5862_v35 = vmul.f32 %v5705_v46, %v6075_v13  ;;  %v2960_v29 = vadd.f32 %v2928_v25, %v5688_v42  ;;  %v3020_v31 = vmul.f32 0.01, %v2956_v36  ;;  %3083 = vst [vmem:[%s5824_s8] sm:$0xff] %v3051_v48  ;;  %v6079_v3 = vld [vmem:[#allocation21_spill] sm:$0xff] }
 0x349   : > { %v5868_v8 = vmul.f32 %v5705_v46, %v6076_v52  ;;  %v2961_v58 = vadd.f32 %v2929_v24, %v5691_v6  ;;  %vm2988_vm11 = vcmp.ge.f32.partialorder %v2956_v36, 0.0  ;;  %v3021_v59 = vmul.f32 0.01, %v2957_v32 }
 0x34a   : > { %v5873_v44 = vmul.f32 %v5705_v46, %v6077_v47  ;;  %v2962_v51 = vadd.f32 %v2930_v20, %v5694_v61  ;;  %vm2989_vm12 = vcmp.ge.f32.partialorder %v2957_v32, 0.0  ;;  %v3022_v13 = vmul.f32 0.01, %v2958_v28 }
 0x34b   : > { %v5878_v42 = vmul.f32 %v5705_v46, %v6079_v3  ;;  %v2963_v48 = vadd.f32 %v2931_v22, %v5697_v43  ;;  %vm2990_vm13 = vcmp.ge.f32.partialorder %v2958_v28, 0.0  ;;  %v3023_v25 = vmul.f32 0.01, %v2959_v55 }
 0x34c   : > { %6078 = vst [vmem:[#allocation17_spill] sm:$0xff] %v5873_v44  ;;  %v2964_v6 = vadd.f32 %v2932_v38, %v5700_v5  ;;  %vm2991_vm14 = vcmp.ge.f32.partialorder %v2959_v55, 0.0  ;;  %v3024_v24 = vmul.f32 0.01, %v2960_v29  ;;  %v3052_v52 = vsel %vm2988_vm11, %v2956_v36, %v3020_v31 }
 0x34d   : > { %v2965_v47 = vadd.f32 %v2933_v10, %v5703_v23  ;;  %vm2992_vm15 = vcmp.ge.f32.partialorder %v2960_v29, 0.0  ;;  %v3025_v61 = vmul.f32 0.01, %v2961_v58  ;;  %v3053_v20 = vsel %vm2989_vm12, %v2957_v32, %v3021_v59  ;;  %3084 = vst [vmem:[%s5824_s8 + $0x8] sm:$0xff] %v3052_v52 }
 0x34e   : > { %v2966_v44 = vadd.f32 %v2934_v56, %v5708_v16  ;;  %vm2993_vm0 = vcmp.ge.f32.partialorder %v2961_v58, 0.0  ;;  %v3026_v46 = vmul.f32 0.01, %v2962_v51  ;;  %v3054_v43 = vsel %vm2990_vm13, %v2958_v28, %v3022_v13  ;;  %3085 = vst [vmem:[%s5824_s8 + $0x10] sm:$0xff] %v3053_v20 }
 0x34f   : > { %v2967_v22 = vadd.f32 %v2935_v18, %v5711_v50  ;;  %vm2994_vm1 = vcmp.ge.f32.partialorder %v2962_v51, 0.0  ;;  %v3027_v5 = vmul.f32 0.01, %v2963_v48  ;;  %v3055_v38 = vsel %vm2991_vm14, %v2959_v55, %v3023_v25  ;;  %3086 = vst [vmem:[%s5824_s8 + $0x18] sm:$0xff] %v3054_v43  ;;  %v6080_v25 = vld [vmem:[#allocation14_spill] sm:$0xff] }
 0x350   : > { %v2968_v36 = vadd.f32 %v2936_v21, %v5714_v7  ;;  %vm2995_vm2 = vcmp.ge.f32.partialorder %v2963_v48, 0.0  ;;  %v3028_v23 = vmul.f32 0.01, %v2964_v6  ;;  %v3056_v10 = vsel %vm2992_vm15, %v2960_v29, %v3024_v24  ;;  %3087 = vst [vmem:[%s5824_s8 + $0x20] sm:$0xff] %v3055_v38  ;;  %v6081_v24 = vld [vmem:[#allocation15_spill] sm:$0xff]  ;;  %v6084_v43 = vld [vmem:[#allocation22_spill] sm:$0xff] }
 0x351   : > { %v2969_v16 = vadd.f32 %v2937_v37, %v5717_v49  ;;  %vm2996_vm3 = vcmp.ge.f32.partialorder %v2964_v6, 0.0  ;;  %v3029_v56 = vmul.f32 0.01, %v2965_v47  ;;  %v3057_v32 = vsel %vm2993_vm0, %v2961_v58, %v3025_v61  ;;  %3088 = vst [vmem:[%s5824_s8 + $0x28] sm:$0xff] %v3056_v10 }
 0x352   : > { %v2970_v50 = vadd.f32 %v5803_v19, %v5720_v63  ;;  %vm2997_vm4 = vcmp.ge.f32.partialorder %v2965_v47, 0.0  ;;  %v3030_v18 = vmul.f32 0.01, %v2966_v44  ;;  %v3058_v7 = vsel %vm2994_vm1, %v2962_v51, %v3026_v46  ;;  %3089 = vst [vmem:[%s5824_s8 + $0x30] sm:$0xff] %v3057_v32 }
 0x353   : > { %v2971_v21 = vadd.f32 %v5807_v34, %v5723_v41  ;;  %vm2998_vm5 = vcmp.ge.f32.partialorder %v2966_v44, 0.0  ;;  %v3031_v49 = vmul.f32 0.01, %v2967_v22  ;;  %v3059_v37 = vsel %vm2995_vm2, %v2963_v48, %v3027_v5  ;;  %3090 = vst [vmem:[%s5824_s8 + $0x38] sm:$0xff] %v3058_v7  ;;  %v6083_v61 = vld [vmem:[#allocation17_spill] sm:$0xff] }
 0x354   : > { %v2972_v28 = vadd.f32 %v5811_v33, %v5726_v27  ;;  %vm2999_vm6 = vcmp.ge.f32.partialorder %v2967_v22, 0.0  ;;  %v3032_v63 = vmul.f32 0.01, %v2968_v36  ;;  %v3060_v19 = vsel %vm2996_vm3, %v2964_v6, %v3028_v23  ;;  %3091 = vst [vmem:[%s5824_s8 + $0x40] sm:$0xff] %v3059_v37 }
 0x355   : > { %v2973_v55 = vadd.f32 %v5815_v45, %v5729_v17  ;;  %vm3000_vm7 = vcmp.ge.f32.partialorder %v2968_v36, 0.0  ;;  %v3033_v41 = vmul.f32 0.01, %v2969_v16  ;;  %v3061_v34 = vsel %vm2997_vm4, %v2965_v47, %v3029_v56  ;;  %3092 = vst [vmem:[%s5824_s8 + $0x48] sm:$0xff] %v3060_v19  ;;  %v6082_v47 = vld [vmem:[#allocation16_spill] sm:$0xff] }
 0x356   : > { %v2974_v29 = vadd.f32 %v5819_v30, %v5732_v53  ;;  %vm3001_vm8 = vcmp.ge.f32.partialorder %v2969_v16, 0.0  ;;  %v3034_v27 = vmul.f32 0.01, %v2970_v50  ;;  %v3062_v33 = vsel %vm2998_vm5, %v2966_v44, %v3030_v18  ;;  %3093 = vst [vmem:[%s5824_s8 + $0x50] sm:$0xff] %v3061_v34 }
 0x357   : > { %v2975_v31 = vadd.f32 %v5828_v14, %v5735_v2  ;;  %vm3002_vm9 = vcmp.ge.f32.partialorder %v2970_v50, 0.0  ;;  %v3035_v17 = vmul.f32 0.01, %v2971_v21  ;;  %v3063_v45 = vsel %vm2999_vm6, %v2967_v22, %v3031_v49  ;;  %3094 = vst [vmem:[%s5824_s8 + $0x58] sm:$0xff] %v3062_v33 }
 0x358   : > { %v2976_v58 = vadd.f32 %v5832_v62, %v5738_v4  ;;  %vm3003_vm10 = vcmp.ge.f32.partialorder %v2971_v21, 0.0  ;;  %v3036_v53 = vmul.f32 0.01, %v2972_v28  ;;  %v3064_v30 = vsel %vm3000_vm7, %v2968_v36, %v3032_v63  ;;  %3095 = vst [vmem:[%s5824_s8 + $0x60] sm:$0xff] %v3063_v45 }
 0x359   : > { %v2977_v59 = vadd.f32 %v5836_v12, %v5743_v26  ;;  %vm3004_vm11 = vcmp.ge.f32.partialorder %v2972_v28, 0.0  ;;  %v3037_v2 = vmul.f32 0.01, %v2973_v55  ;;  %v3065_v14 = vsel %vm3001_vm8, %v2969_v16, %v3033_v41  ;;  %3096 = vst [vmem:[%s5824_s8 + $0x68] sm:$0xff] %v3064_v30 }
 0x35a   : > { %v2978_v44 = vadd.f32 %v5840_v60, %v5746_v39  ;;  %vm3005_vm12 = vcmp.ge.f32.partialorder %v2973_v55, 0.0  ;;  %v3038_v4 = vmul.f32 0.01, %v2974_v29  ;;  %v3066_v62 = vsel %vm3002_vm9, %v2970_v50, %v3034_v27  ;;  %3097 = vst [vmem:[%s5824_s8 + $0x70] sm:$0xff] %v3065_v14 }
 0x35b   : > { %v2979_v51 = vadd.f32 %v5844_v54, %v5749_v40  ;;  %vm3006_vm13 = vcmp.ge.f32.partialorder %v2974_v29, 0.0  ;;  %v3039_v26 = vmul.f32 0.01, %v2975_v31  ;;  %v3067_v12 = vsel %vm3003_vm10, %v2971_v21, %v3035_v17  ;;  %3098 = vst [vmem:[%s5824_s8 + $0x78] sm:$0xff] %v3066_v62 }
 0x35c   : > { %v2980_v13 = vadd.f32 %v5849_v9, %v5752_v0  ;;  %vm3007_vm14 = vcmp.ge.f32.partialorder %v2975_v31, 0.0  ;;  %v3040_v39 = vmul.f32 0.01, %v2976_v58  ;;  %v3068_v60 = vsel %vm3004_vm11, %v2972_v28, %v3036_v53  ;;  %3099 = vst [vmem:[%s5824_s8 + $0x80] sm:$0xff] %v3067_v12 }
 0x35d   : > { %v2981_v3 = vadd.f32 %v5853_v57, %v5755_v1  ;;  %vm3008_vm15 = vcmp.ge.f32.partialorder %v2976_v58, 0.0  ;;  %v3041_v40 = vmul.f32 0.01, %v2977_v59  ;;  %v3069_v54 = vsel %vm3005_vm12, %v2973_v55, %v3037_v2  ;;  %3100 = vst [vmem:[%s5824_s8 + $0x88] sm:$0xff] %v3068_v60 }
 0x35e   : > { %v2982_v48 = vadd.f32 %v5858_v15, %v5758_v11  ;;  %vm3009_vm0 = vcmp.ge.f32.partialorder %v2977_v59, 0.0  ;;  %v3042_v0 = vmul.f32 0.01, %v2978_v44  ;;  %v3070_v9 = vsel %vm3006_vm13, %v2974_v29, %v3038_v4  ;;  %3101 = vst [vmem:[%s5824_s8 + $0x90] sm:$0xff] %v3069_v54 }
 0x35f   : > { %v2983_v6 = vadd.f32 %v5862_v35, %v6080_v25  ;;  %vm3010_vm1 = vcmp.ge.f32.partialorder %v2978_v44, 0.0  ;;  %v3043_v1 = vmul.f32 0.01, %v2979_v51  ;;  %v3071_v57 = vsel %vm3007_vm14, %v2975_v31, %v3039_v26  ;;  %3102 = vst [vmem:[%s5824_s8 + $0x98] sm:$0xff] %v3070_v9 }
 0x360   : > { %v2984_v52 = vadd.f32 %v5868_v8, %v6081_v24  ;;  %vm3011_vm2 = vcmp.ge.f32.partialorder %v2979_v51, 0.0  ;;  %v3044_v11 = vmul.f32 0.01, %v2980_v13  ;;  %v3072_v15 = vsel %vm3008_vm15, %v2976_v58, %v3040_v39  ;;  %3103 = vst [vmem:[%s5824_s8 + $0xa0] sm:$0xff] %v3071_v57 }
 0x361   : > { %v2985_v20 = vadd.f32 %v6083_v61, %v6082_v47  ;;  %vm3012_vm3 = vcmp.ge.f32.partialorder %v2980_v13, 0.0  ;;  %v3045_v35 = vmul.f32 0.01, %v2981_v3  ;;  %v3073_v46 = vsel %vm3009_vm0, %v2977_v59, %v3041_v40  ;;  %3104 = vst [vmem:[%s5824_s8 + $0xa8] sm:$0xff] %v3072_v15 }
 0x362   : > { %v2986_v22 = vadd.f32 %v5878_v42, %v6084_v43  ;;  %vm3013_vm4 = vcmp.ge.f32.partialorder %v2981_v3, 0.0  ;;  %v3046_v8 = vmul.f32 0.01, %v2982_v48  ;;  %v3074_v5 = vsel %vm3010_vm1, %v2978_v44, %v3042_v0  ;;  %3105 = vst [vmem:[%s5824_s8 + $0xb0] sm:$0xff] %v3073_v46 }
 0x363   : > { %vm3014_vm5 = vcmp.ge.f32.partialorder %v2982_v48, 0.0  ;;  %v3047_v38 = vmul.f32 0.01, %v2983_v6  ;;  %v3075_v36 = vsel %vm3011_vm2, %v2979_v51, %v3043_v1  ;;  %vm3015_vm6 = vcmp.ge.f32.partialorder %v2983_v6, 0.0  ;;  %3106 = vst [vmem:[%s5824_s8 + $0xb8] sm:$0xff] %v3074_v5 }
 0x364   : > { %v3048_v23 = vmul.f32 0.01, %v2984_v52  ;;  %v3076_v10 = vsel %vm3012_vm3, %v2980_v13, %v3044_v11  ;;  %vm3016_vm7 = vcmp.ge.f32.partialorder %v2984_v52, 0.0  ;;  %v3049_v42 = vmul.f32 0.01, %v2985_v20  ;;  %3107 = vst [vmem:[%s5824_s8 + $0xc0] sm:$0xff] %v3075_v36 }
 0x365   : > { %v3077_v16 = vsel %vm3013_vm4, %v2981_v3, %v3045_v35  ;;  %vm3017_vm8 = vcmp.ge.f32.partialorder %v2985_v20, 0.0  ;;  %v3050_v56 = vmul.f32 0.01, %v2986_v22  ;;  %v3078_v32 = vsel %vm3014_vm5, %v2982_v48, %v3046_v8  ;;  %3108 = vst [vmem:[%s5824_s8 + $0xc8] sm:$0xff] %v3076_v10 }
 0x366   : > { %vm3018_vm9 = vcmp.ge.f32.partialorder %v2986_v22, 0.0  ;;  %v3079_v50 = vsel %vm3015_vm6, %v2983_v6, %v3047_v38  ;;  %v3080_v18 = vsel %vm3016_vm7, %v2984_v52, %v3048_v23  ;;  %3109 = vst [vmem:[%s5824_s8 + $0xd0] sm:$0xff] %v3077_v16  ;;  %v3081_v7 = vsel %vm3017_vm8, %v2985_v20, %v3049_v42 }
 0x367   : > { %3110 = vst [vmem:[%s5824_s8 + $0xd8] sm:$0xff] %v3078_v32  ;;  %v3082_v21 = vsel %vm3018_vm9, %v2986_v22, %v3050_v56 }
 0x368   : > { %3111 = vst [vmem:[%s5824_s8 + $0xe0] sm:$0xff] %v3079_v50 }
 0x369   : > { %3112 = vst [vmem:[%s5824_s8 + $0xe8] sm:$0xff] %v3080_v18 }
 0x36a   : > { %3113 = vst [vmem:[%s5824_s8 + $0xf0] sm:$0xff] %v3081_v7 }
 0x36b   : > { %3114 = vst [vmem:[%s5824_s8 + $0xf8] sm:$0xff] %v3082_v21 }
 0x36c PF: > { %s14_s15 = sadd.s32 1, %s4403_s15  }
 0x36d   : > { %p11_p4 = scmp.ge.s32.totalorder %s14_s15, 4  }
 0x36f   :  { %13 = sbr.rel (!%p11_p4) target bundleno = 1 (0x1), region = 69 }

</bundles_post_ra>
